<compile_context>
chip_gen: v7x
topology: tpu7x:2x2x1
jax: 0.10.0
libtpu: 0.0.40
codegen_flags: <defaults>
</compile_context>

<pallas_src>
import math

import jax
import jax.numpy as jnp
from jax.experimental import pallas as pl
from jax.experimental.pallas import tpu as pltpu

# ---- small synthetic config ----
B = 2
IMG_H = IMG_W = 16
BACKBONE_C = 8            # backbone.num_channels
HIDDEN = 32               # transformer.d_model
NHEAD = 4
HEAD_DIM = HIDDEN // NHEAD
FFN_DIM = 64
NUM_QUERIES = 2
N_LINES = 8
NUM_DEC_LAYERS = 2

T_ENC = (IMG_H // 2) * (IMG_W // 2)      # 64 encoder tokens after stride-2
T_DEC = NUM_QUERIES + N_LINES            # 10 decoder tokens
N_ATTN = 1 + 2 * NUM_DEC_LAYERS          # enc-self + (self, cross) per dec layer
N_FFN = 1 + NUM_DEC_LAYERS
N_LN = 2 + 3 * NUM_DEC_LAYERS
OUT_ROWS, OUT_LANES = 16, 128            # lane-dense packed head-output slab

_SCALE = 1.0 / math.sqrt(HEAD_DIM)
_NEG = jnp.float32(-1e9)


# ----------------------------------------------------------------------------
# In-kernel helpers
# ----------------------------------------------------------------------------
def _mm(a, b):
    """MXU matmul: bf16 operands, f32 accumulation (v6e/v7x native; v5e OK)."""
    return jnp.dot(a.astype(jnp.bfloat16), b.astype(jnp.bfloat16),
                   preferred_element_type=jnp.float32)


def _layer_norm(z, g, b):
    mu = jnp.mean(z, axis=-1, keepdims=True)
    var = jnp.mean((z - mu) * (z - mu), axis=-1, keepdims=True)
    return (z - mu) * jax.lax.rsqrt(var + 1e-5) * g + b


def _mha(q, k, v, w_o, b_o, bias):
    """Multi-head attention core.  q,k,v are already projected (T, E).
    Heads are static lane windows; per-head context vectors are concatenated
    once and pushed through a single (E,E) output projection."""
    outs = []
    for h in range(NHEAD):
        sl = slice(h * HEAD_DIM, (h + 1) * HEAD_DIM)
        s = jax.lax.dot_general(
            q[:, sl].astype(jnp.bfloat16), k[:, sl].astype(jnp.bfloat16),
            (((1,), (1,)), ((), ())), preferred_element_type=jnp.float32)
        s = s * _SCALE + bias                    # (1, Tk) key-padding bias
        s = s - jnp.max(s, axis=-1, keepdims=True)
        p = jnp.exp(s)
        # approx reciprocal: EUP slot, fine for inference (rows sum to ~1).
        p = p * pl.reciprocal(jnp.sum(p, axis=-1, keepdims=True), approx=True)
        outs.append(_mm(p, v[:, sl]))
    o = jnp.concatenate(outs, axis=-1)           # (Tq, E)
    return _mm(o, w_o) + b_o


# ----------------------------------------------------------------------------
# The fused GPTran kernel (one program per batch row)
# ----------------------------------------------------------------------------
def _gptran_kernel(img_ref, pos_ref, lines_ref, membias_ref, tgtbias_ref,
                   conv_w, conv_b, proj_w, proj_b, line_w, line_b, query_w,
                   wqk, bqk, wv, bv, wo, bo,
                   w1, b1, w2, b2, lng, lnb, head_w, head_b,
                   out_ref):
    # ---- blocks that close over the (VMEM-resident) weight refs ----
    def ln(z, l):
        return _layer_norm(z, lng[l:l + 1, :], lnb[l:l + 1, :])

    def self_attn(x, posq, a, l, bias):
        # identical Q/K inputs -> one merged (E, 2E) projection matmul.
        qk = _mm(x + posq, wqk[a]) + bqk[a]                  # (T, 2E)
        v_ = _mm(x, wv[a]) + bv[a]
        y = _mha(qk[:, :HIDDEN], qk[:, HIDDEN:], v_, wo[a], bo[a], bias)
        return ln(x + y, l)

    def cross_attn(x, posq, mem_k, mem_v, a, l, bias):
        wqk_a, bqk_a = wqk[a], bqk[a]
        q_ = _mm(x + posq, wqk_a[:, :HIDDEN]) + bqk_a[:, :HIDDEN]
        k_ = _mm(mem_k, wqk_a[:, HIDDEN:]) + bqk_a[:, HIDDEN:]
        v_ = _mm(mem_v, wv[a]) + bv[a]
        y = _mha(q_, k_, v_, wo[a], bo[a], bias)
        return ln(x + y, l)

    def ffn(x, f, l):
        h = jnp.maximum(_mm(x, w1[f]) + b1[f], 0.0)
        y = _mm(h, w2[f]) + b2[f]
        return ln(x + y, l)

    # ---- backbone: 1x1 conv (strided pixels only) + ReLU + input_proj ----
    img = img_ref[...]                                        # (T_ENC, 3)
    feat = jnp.maximum(
        jnp.dot(img, conv_w[...], preferred_element_type=jnp.float32)
        + conv_b[...], 0.0)
    src = (jnp.dot(feat, proj_w[...], preferred_element_type=jnp.float32)
           + proj_b[...])                                     # (T_ENC, E)
    pos = pos_ref[...]                                        # (T_ENC, E)
    mem_bias = membias_ref[...]                               # (1, T_ENC)

    # ---- structure tensor + input_line_proj (built in registers) ----
    l3 = lines_ref[...]                                       # (N_LINES, 3)
    a_, b_, c_ = l3[:, 0:1], l3[:, 1:2], l3[:, 2:3]
    feats = jnp.concatenate([a_ * a_, a_ * b_, b_ * b_,
                             b_ * c_, c_ * c_, c_ * a_], axis=-1)   # (N_LINES, 6)
    tgt = (jnp.dot(feats, line_w[...], preferred_element_type=jnp.float32)
           + line_b[...])                                     # (N_LINES, E)

    # ---- encoder (1 layer) ----
    x = self_attn(src, pos, 0, 0, mem_bias)
    memory = ffn(x, 0, 1)
    mem_k = memory + pos                                      # hoisted once

    # ---- decoder (queries prepended to line tokens) ----
    qe = query_w[...]                                         # (NQ, E)
    x = jnp.concatenate([jnp.zeros_like(qe), tgt], axis=0)    # (T_DEC, E)
    qpos = jnp.concatenate([qe, jnp.zeros_like(tgt)], axis=0)
    tgt_bias = tgtbias_ref[...]                               # (1, T_DEC)

    a_idx, l_idx, f_idx = 1, 2, 1
    for _ in range(NUM_DEC_LAYERS):
        x = self_attn(x, qpos, a_idx, l_idx, tgt_bias)
        x = cross_attn(x, qpos, mem_k, memory, a_idx + 1, l_idx + 1, mem_bias)
        x = ffn(x, f_idx, l_idx + 2)
        a_idx += 2
        l_idx += 3
        f_idx += 1

    # ---- heads: one matmul over all tokens, columns = [vp(3) | hl(1) | hline(1)]
    y = (jnp.dot(x, head_w[...], preferred_element_type=jnp.float32)
         + head_b[...])                                       # (T_DEC, 5)
    vp = y[0:1, 0:3]
    nrm = jnp.sqrt(jnp.sum(vp * vp, axis=-1, keepdims=True))
    vp = vp / jnp.maximum(nrm, 1e-12)                         # F.normalize(p=2)
    hl = (jax.nn.sigmoid(y[0:1, 3:4]) - 0.5) * math.pi

    out_ref[...] = jnp.zeros((OUT_ROWS, OUT_LANES), jnp.float32)
    out_ref[0:1, 0:3] = vp
    out_ref[0:1, 3:4] = hl
    out_ref[2:T_DEC, 4:5] = y[2:T_DEC, 4:5]                   # hline logits


# ----------------------------------------------------------------------------
# Wrapper-side glue (pure XLA, executed once per forward)
# ----------------------------------------------------------------------------
def sine_pos_embed(mask, num_pos_feats):
    not_mask = jnp.logical_not(mask).astype(jnp.float32)
    y_embed = jnp.cumsum(not_mask, axis=1)
    x_embed = jnp.cumsum(not_mask, axis=2)
    eps, scale = 1e-6, 2 * math.pi
    y_embed = y_embed / (y_embed[:, -1:, :] + eps) * scale
    x_embed = x_embed / (x_embed[:, :, -1:] + eps) * scale
    dim_t = jnp.arange(num_pos_feats)
    dim_t = 10000.0 ** (2.0 * (dim_t // 2).astype(jnp.float32) / num_pos_feats)
    pos_x = x_embed[..., None] / dim_t
    pos_y = y_embed[..., None] / dim_t
    Bn, h, w = mask.shape
    pos_x = jnp.stack([jnp.sin(pos_x[..., 0::2]), jnp.cos(pos_x[..., 1::2])],
                      axis=4).reshape(Bn, h, w, -1)
    pos_y = jnp.stack([jnp.sin(pos_y[..., 0::2]), jnp.cos(pos_y[..., 1::2])],
                      axis=4).reshape(Bn, h, w, -1)
    return jnp.concatenate([pos_y, pos_x], axis=3)            # (B, h, w, HIDDEN)


def _const_spec(shape):
    if len(shape) == 2:
        return pl.BlockSpec(tuple(shape), lambda i: (0, 0))
    return pl.BlockSpec(tuple(shape), lambda i: (0, 0, 0))


def _batch_spec(shape):
    return pl.BlockSpec((pl.Squeezed(),) + tuple(shape), lambda i: (i, 0, 0))


def gptran_forward(params, samples_tensor, samples_mask, lines, line_mask):
    Bn = samples_tensor.shape[0]

    # stride-2 pixel grid, channels-last (3/4 of the 1x1-conv work never done).
    img = samples_tensor.transpose(0, 2, 3, 1)[:, ::2, ::2, :]
    img_tok = img.reshape(Bn, T_ENC, 3)
    mask2d = samples_mask[:, ::2, ::2]
    pos_tok = sine_pos_embed(mask2d, HIDDEN // 2).reshape(Bn, T_ENC, HIDDEN)
    mask_tok = mask2d.reshape(Bn, T_ENC)

    # key-padding additive biases: built ONCE, reused by every attention layer.
    mem_bias = jnp.where(mask_tok, _NEG, 0.0).astype(jnp.float32).reshape(
        Bn, 1, T_ENC)
    lmask = jnp.logical_not(jnp.squeeze(line_mask, axis=2).astype(bool))
    kpm = jnp.concatenate(
        [jnp.zeros((Bn, NUM_QUERIES), dtype=bool), lmask], axis=1)
    tgt_bias = jnp.where(kpm, _NEG, 0.0).astype(jnp.float32).reshape(
        Bn, 1, T_DEC)

    in_specs = [
        _batch_spec((T_ENC, 3)),
        _batch_spec((T_ENC, HIDDEN)),
        _batch_spec((N_LINES, 3)),
        _batch_spec((1, T_ENC)),
        _batch_spec((1, T_DEC)),
        _const_spec((3, BACKBONE_C)), _const_spec((1, BACKBONE_C)),
        _const_spec((BACKBONE_C, HIDDEN)), _const_spec((1, HIDDEN)),
        _const_spec((6, HIDDEN)), _const_spec((1, HIDDEN)),
        _const_spec((NUM_QUERIES, HIDDEN)),
        _const_spec((N_ATTN, HIDDEN, 2 * HIDDEN)),
        _const_spec((N_ATTN, 1, 2 * HIDDEN)),
        _const_spec((N_ATTN, HIDDEN, HIDDEN)), _const_spec((N_ATTN, 1, HIDDEN)),
        _const_spec((N_ATTN, HIDDEN, HIDDEN)), _const_spec((N_ATTN, 1, HIDDEN)),
        _const_spec((N_FFN, HIDDEN, FFN_DIM)), _const_spec((N_FFN, 1, FFN_DIM)),
        _const_spec((N_FFN, FFN_DIM, HIDDEN)), _const_spec((N_FFN, 1, HIDDEN)),
        _const_spec((N_LN, HIDDEN)), _const_spec((N_LN, HIDDEN)),
        _const_spec((HIDDEN, 5)), _const_spec((1, 5)),
    ]

    out = pl.pallas_call(
        _gptran_kernel,
        out_shape=jax.ShapeDtypeStruct((Bn, OUT_ROWS, OUT_LANES), jnp.float32),
        grid=(Bn,),
        in_specs=in_specs,
        out_specs=pl.BlockSpec((pl.Squeezed(), OUT_ROWS, OUT_LANES),
                               lambda i: (i, 0, 0)),
        compiler_params=pltpu.CompilerParams(
            dimension_semantics=("parallel",)),   # v7x: one batch row per TC
    )(img_tok, pos_tok, lines, mem_bias, tgt_bias,
      params["conv_w"], params["conv_b"],
      params["proj_w"], params["proj_b"],
      params["line_w"], params["line_b"],
      params["query_embed"],
      params["attn_wqk"], params["attn_bqk"],
      params["attn_wv"], params["attn_bv"],
      params["attn_wo"], params["attn_bo"],
      params["ffn_w1"], params["ffn_b1"],
      params["ffn_w2"], params["ffn_b2"],
      params["ln_g"], params["ln_b"],
      params["head_w"], params["head_b"])

    return {
        "pred_vp": out[:, 0, 0:3],
        "pred_hl": out[:, 0, 3:4],
        "pred_hline_logits": out[:, 2:T_DEC, 4:5],
    }


# ----------------------------------------------------------------------------
# Deterministic parameter init (weights pre-packed for the fused kernel)
# ----------------------------------------------------------------------------
def _init_linear(key, fan_in, fan_out):
    kw, kb = jax.random.split(key)
    bound = 1.0 / math.sqrt(fan_in)
    w = jax.random.uniform(kw, (fan_in, fan_out), jnp.float32, -bound, bound)
    b = jax.random.uniform(kb, (fan_out,), jnp.float32, -bound, bound)
    return w, b


def init_params(key):
    keys = iter(jax.random.split(key, 64))

    def nxt():
        return next(keys)

    p = {}
    cw, cb = _init_linear(nxt(), 3, BACKBONE_C)
    p["conv_w"], p["conv_b"] = cw, cb.reshape(1, BACKBONE_C)
    pw, pb = _init_linear(nxt(), BACKBONE_C, HIDDEN)
    p["proj_w"], p["proj_b"] = pw, pb.reshape(1, HIDDEN)
    lw, lb = _init_linear(nxt(), 6, HIDDEN)
    p["line_w"], p["line_b"] = lw, lb.reshape(1, HIDDEN)
    p["query_embed"] = jax.random.normal(nxt(), (NUM_QUERIES, HIDDEN), jnp.float32)

    # attention blocks: 0 = enc-self, then (self, cross) per decoder layer.
    wqk, bqk, wv, bv, wo, bo = [], [], [], [], [], []
    for _ in range(N_ATTN):
        wq, bq_ = _init_linear(nxt(), HIDDEN, HIDDEN)
        wk, bk_ = _init_linear(nxt(), HIDDEN, HIDDEN)
        wv_, bv_ = _init_linear(nxt(), HIDDEN, HIDDEN)
        wo_, bo_ = _init_linear(nxt(), HIDDEN, HIDDEN)
        wqk.append(jnp.concatenate([wq, wk], axis=1))          # merged Q|K
        bqk.append(jnp.concatenate([bq_, bk_]).reshape(1, 2 * HIDDEN))
        wv.append(wv_); bv.append(bv_.reshape(1, HIDDEN))
        wo.append(wo_); bo.append(bo_.reshape(1, HIDDEN))
    # matmul weights stored bf16 (MXU-native on v6e/v7x); biases stay f32.
    p["attn_wqk"] = jnp.stack(wqk).astype(jnp.bfloat16)
    p["attn_bqk"] = jnp.stack(bqk)
    p["attn_wv"] = jnp.stack(wv).astype(jnp.bfloat16)
    p["attn_bv"] = jnp.stack(bv)
    p["attn_wo"] = jnp.stack(wo).astype(jnp.bfloat16)
    p["attn_bo"] = jnp.stack(bo)

    w1, b1, w2, b2 = [], [], [], []
    for _ in range(N_FFN):
        w1_, b1_ = _init_linear(nxt(), HIDDEN, FFN_DIM)
        w2_, b2_ = _init_linear(nxt(), FFN_DIM, HIDDEN)
        w1.append(w1_); b1.append(b1_.reshape(1, FFN_DIM))
        w2.append(w2_); b2.append(b2_.reshape(1, HIDDEN))
    p["ffn_w1"] = jnp.stack(w1).astype(jnp.bfloat16)
    p["ffn_b1"] = jnp.stack(b1)
    p["ffn_w2"] = jnp.stack(w2).astype(jnp.bfloat16)
    p["ffn_b2"] = jnp.stack(b2)

    p["ln_g"] = jnp.ones((N_LN, HIDDEN), jnp.float32)
    p["ln_b"] = jnp.zeros((N_LN, HIDDEN), jnp.float32)

    vp_w, vp_b = _init_linear(nxt(), HIDDEN, 3)
    hl_w, hl_b = _init_linear(nxt(), HIDDEN, 1)
    hline_w, hline_b = _init_linear(nxt(), HIDDEN, 1)
    # heads pre-concatenated at init: columns = [vp(3) | hl(1) | hline(1)].
    p["head_w"] = jnp.concatenate([vp_w, hl_w, hline_w], axis=1)
    p["head_b"] = jnp.concatenate([vp_b, hl_b, hline_b]).reshape(1, 5)
    return p


# ----------------------------------------------------------------------------
if __name__ == "__main__":
    key = jax.random.PRNGKey(0)
    pkey, k1, k2 = jax.random.split(key, 3)
    params = init_params(pkey)

    samples = jax.random.normal(k1, (B, 3, IMG_H, IMG_W), jnp.float32)
    samples_mask = jnp.zeros((B, IMG_H, IMG_W), dtype=bool)   # no padded pixels
    lines = jax.random.normal(k2, (B, N_LINES, 3), jnp.float32)
    # line_mask == 1 for valid lines (as in extra_samples['line_mask'])
    valid_counts = jnp.array([6, 7])
    line_mask = (jnp.arange(N_LINES)[None, :, None]
                 < valid_counts[:, None, None]).astype(jnp.float32)

    out = jax.jit(gptran_forward)(params, samples, samples_mask, lines, line_mask)
    out = jax.block_until_ready(out)

    assert out["pred_vp"].shape == (B, 3)
    assert out["pred_hl"].shape == (B, 1)
    assert out["pred_hline_logits"].shape == (B, NUM_QUERIES + N_LINES - 2, 1)
    assert bool(jnp.all(jnp.isfinite(out["pred_vp"])))
    assert bool(jnp.all(jnp.isfinite(out["pred_hl"])))
    assert bool(jnp.all(jnp.isfinite(out["pred_hline_logits"])))
    print("KERNEL_OK")
</pallas_src>

<mosaic_0001>
module attributes {stable_mosaic.version = 11 : i64} {
  func.func @_gptran_kernel(%arg0: i32, %arg1: memref<1x64x3xf32, #tpu.memory_space<vmem>>, %arg2: memref<1x64x32xf32, #tpu.memory_space<vmem>>, %arg3: memref<1x8x3xf32, #tpu.memory_space<vmem>>, %arg4: memref<1x1x64xf32, #tpu.memory_space<vmem>>, %arg5: memref<1x1x10xf32, #tpu.memory_space<vmem>>, %arg6: memref<3x8xf32, #tpu.memory_space<vmem>>, %arg7: memref<1x8xf32, #tpu.memory_space<vmem>>, %arg8: memref<8x32xf32, #tpu.memory_space<vmem>>, %arg9: memref<1x32xf32, #tpu.memory_space<vmem>>, %arg10: memref<6x32xf32, #tpu.memory_space<vmem>>, %arg11: memref<1x32xf32, #tpu.memory_space<vmem>>, %arg12: memref<2x32xf32, #tpu.memory_space<vmem>>, %arg13: memref<5x32x64xbf16, #tpu.memory_space<vmem>>, %arg14: memref<5x1x64xf32, #tpu.memory_space<vmem>>, %arg15: memref<5x32x32xbf16, #tpu.memory_space<vmem>>, %arg16: memref<5x1x32xf32, #tpu.memory_space<vmem>>, %arg17: memref<5x32x32xbf16, #tpu.memory_space<vmem>>, %arg18: memref<5x1x32xf32, #tpu.memory_space<vmem>>, %arg19: memref<3x32x64xbf16, #tpu.memory_space<vmem>>, %arg20: memref<3x1x64xf32, #tpu.memory_space<vmem>>, %arg21: memref<3x64x32xbf16, #tpu.memory_space<vmem>>, %arg22: memref<3x1x32xf32, #tpu.memory_space<vmem>>, %arg23: memref<8x32xf32, #tpu.memory_space<vmem>>, %arg24: memref<8x32xf32, #tpu.memory_space<vmem>>, %arg25: memref<32x5xf32, #tpu.memory_space<vmem>>, %arg26: memref<1x5xf32, #tpu.memory_space<vmem>>, %arg27: memref<1x16x128xf32, #tpu.memory_space<vmem>>) attributes {dimension_semantics = [#tpu.dimension_semantics<parallel>], iteration_bounds = array<i64: 2>, scalar_prefetch = 0 : i64, scratch_operands = 0 : i64, tpu.core_type = #tpu.core_type<tc>, window_params = [{transform_indices = @transform_0, window_bounds = array<i64: 1, 64, 3>}, {transform_indices = @transform_1, window_bounds = array<i64: 1, 64, 32>}, {transform_indices = @transform_2, window_bounds = array<i64: 1, 8, 3>}, {transform_indices = @transform_3, window_bounds = array<i64: 1, 1, 64>}, {transform_indices = @transform_4, window_bounds = array<i64: 1, 1, 10>}, {pipeline_mode = #tpu.pipeline_mode<synchronous>, transform_indices = @transform_5, window_bounds = array<i64: 3, 8>}, {pipeline_mode = #tpu.pipeline_mode<synchronous>, transform_indices = @transform_6, window_bounds = array<i64: 1, 8>}, {pipeline_mode = #tpu.pipeline_mode<synchronous>, transform_indices = @transform_7, window_bounds = array<i64: 8, 32>}, {pipeline_mode = #tpu.pipeline_mode<synchronous>, transform_indices = @transform_8, window_bounds = array<i64: 1, 32>}, {pipeline_mode = #tpu.pipeline_mode<synchronous>, transform_indices = @transform_9, window_bounds = array<i64: 6, 32>}, {pipeline_mode = #tpu.pipeline_mode<synchronous>, transform_indices = @transform_10, window_bounds = array<i64: 1, 32>}, {pipeline_mode = #tpu.pipeline_mode<synchronous>, transform_indices = @transform_11, window_bounds = array<i64: 2, 32>}, {pipeline_mode = #tpu.pipeline_mode<synchronous>, transform_indices = @transform_12, window_bounds = array<i64: 5, 32, 64>}, {pipeline_mode = #tpu.pipeline_mode<synchronous>, transform_indices = @transform_13, window_bounds = array<i64: 5, 1, 64>}, {pipeline_mode = #tpu.pipeline_mode<synchronous>, transform_indices = @transform_14, window_bounds = array<i64: 5, 32, 32>}, {pipeline_mode = #tpu.pipeline_mode<synchronous>, transform_indices = @transform_15, window_bounds = array<i64: 5, 1, 32>}, {pipeline_mode = #tpu.pipeline_mode<synchronous>, transform_indices = @transform_16, window_bounds = array<i64: 5, 32, 32>}, {pipeline_mode = #tpu.pipeline_mode<synchronous>, transform_indices = @transform_17, window_bounds = array<i64: 5, 1, 32>}, {pipeline_mode = #tpu.pipeline_mode<synchronous>, transform_indices = @transform_18, window_bounds = array<i64: 3, 32, 64>}, {pipeline_mode = #tpu.pipeline_mode<synchronous>, transform_indices = @transform_19, window_bounds = array<i64: 3, 1, 64>}, {pipeline_mode = #tpu.pipeline_mode<synchronous>, transform_indices = @transform_20, window_bounds = array<i64: 3, 64, 32>}, {pipeline_mode = #tpu.pipeline_mode<synchronous>, transform_indices = @transform_21, window_bounds = array<i64: 3, 1, 32>}, {pipeline_mode = #tpu.pipeline_mode<synchronous>, transform_indices = @transform_22, window_bounds = array<i64: 8, 32>}, {pipeline_mode = #tpu.pipeline_mode<synchronous>, transform_indices = @transform_23, window_bounds = array<i64: 8, 32>}, {pipeline_mode = #tpu.pipeline_mode<synchronous>, transform_indices = @transform_24, window_bounds = array<i64: 32, 5>}, {pipeline_mode = #tpu.pipeline_mode<synchronous>, transform_indices = @transform_25, window_bounds = array<i64: 1, 5>}, {transform_indices = @transform_26, window_bounds = array<i64: 1, 16, 128>}]} {
    %c0 = arith.constant 0 : index
    %c0_0 = arith.constant 0 : index
    %c0_1 = arith.constant 0 : index
    %0 = vector.load %arg1[%c0, %c0_0, %c0_1] : memref<1x64x3xf32, #tpu.memory_space<vmem>>, vector<1x64x3xf32>
    %1 = vector.shape_cast %0 : vector<1x64x3xf32> to vector<64x3xf32>
    %c0_2 = arith.constant 0 : index
    %c0_3 = arith.constant 0 : index
    %2 = vector.load %arg6[%c0_2, %c0_3] : memref<3x8xf32, #tpu.memory_space<vmem>>, vector<3x8xf32>
    %cst = arith.constant dense<0.000000e+00> : vector<64x8xf32>
    %3 = tpu.matmul %1, %2, %cst {dimension_numbers = #tpu.dot_dimension_numbers<[1], [0], [0], [1], [0, 0, 1, 1], [], []>} : vector<64x3xf32>, vector<3x8xf32>, vector<64x8xf32> -> vector<64x8xf32>
    %c0_4 = arith.constant 0 : index
    %c0_5 = arith.constant 0 : index
    %4 = vector.load %arg7[%c0_4, %c0_5] : memref<1x8xf32, #tpu.memory_space<vmem>>, vector<1x8xf32>
    %5 = vector.broadcast %4 : vector<1x8xf32> to vector<64x8xf32>
    %6 = arith.addf %3, %5 : vector<64x8xf32>
    %cst_6 = arith.constant 0.000000e+00 : f32
    %7 = vector.broadcast %cst_6 : f32 to vector<64x8xf32>
    %8 = arith.maximumf %6, %7 : vector<64x8xf32>
    %c0_7 = arith.constant 0 : index
    %c0_8 = arith.constant 0 : index
    %9 = vector.load %arg8[%c0_7, %c0_8] : memref<8x32xf32, #tpu.memory_space<vmem>>, vector<8x32xf32>
    %cst_9 = arith.constant dense<0.000000e+00> : vector<64x32xf32>
    %10 = tpu.matmul %8, %9, %cst_9 {dimension_numbers = #tpu.dot_dimension_numbers<[1], [0], [0], [1], [0, 0, 1, 1], [], []>} : vector<64x8xf32>, vector<8x32xf32>, vector<64x32xf32> -> vector<64x32xf32>
    %c0_10 = arith.constant 0 : index
    %c0_11 = arith.constant 0 : index
    %11 = vector.load %arg9[%c0_10, %c0_11] : memref<1x32xf32, #tpu.memory_space<vmem>>, vector<1x32xf32>
    %12 = vector.broadcast %11 : vector<1x32xf32> to vector<64x32xf32>
    %13 = arith.addf %10, %12 : vector<64x32xf32>
    %c0_12 = arith.constant 0 : index
    %c0_13 = arith.constant 0 : index
    %c0_14 = arith.constant 0 : index
    %14 = vector.load %arg2[%c0_12, %c0_13, %c0_14] : memref<1x64x32xf32, #tpu.memory_space<vmem>>, vector<1x64x32xf32>
    %15 = vector.shape_cast %14 : vector<1x64x32xf32> to vector<64x32xf32>
    %c0_15 = arith.constant 0 : index
    %c0_16 = arith.constant 0 : index
    %c0_17 = arith.constant 0 : index
    %16 = vector.load %arg4[%c0_15, %c0_16, %c0_17] : memref<1x1x64xf32, #tpu.memory_space<vmem>>, vector<1x1x64xf32>
    %17 = vector.shape_cast %16 : vector<1x1x64xf32> to vector<1x64xf32>
    %c0_18 = arith.constant 0 : index
    %c0_19 = arith.constant 0 : index
    %c0_20 = arith.constant 0 : index
    %18 = vector.load %arg3[%c0_18, %c0_19, %c0_20] : memref<1x8x3xf32, #tpu.memory_space<vmem>>, vector<1x8x3xf32>
    %19 = vector.shape_cast %18 : vector<1x8x3xf32> to vector<8x3xf32>
    %20 = vector.extract_strided_slice %19 {offsets = [0, 0], sizes = [8, 1], strides = [1, 1]} : vector<8x3xf32> to vector<8x1xf32>
    %21 = vector.extract_strided_slice %19 {offsets = [0, 1], sizes = [8, 1], strides = [1, 1]} : vector<8x3xf32> to vector<8x1xf32>
    %22 = vector.extract_strided_slice %19 {offsets = [0, 2], sizes = [8, 1], strides = [1, 1]} : vector<8x3xf32> to vector<8x1xf32>
    %23 = arith.mulf %20, %20 : vector<8x1xf32>
    %24 = arith.mulf %20, %21 : vector<8x1xf32>
    %25 = arith.mulf %21, %21 : vector<8x1xf32>
    %26 = arith.mulf %21, %22 : vector<8x1xf32>
    %27 = arith.mulf %22, %22 : vector<8x1xf32>
    %28 = arith.mulf %22, %20 : vector<8x1xf32>
    %29 = tpu.concatenate %23, %24, %25, %26, %27, %28 in 1 : vector<8x1xf32>, vector<8x1xf32>, vector<8x1xf32>, vector<8x1xf32>, vector<8x1xf32>, vector<8x1xf32> -> vector<8x6xf32>
    %c0_21 = arith.constant 0 : index
    %c0_22 = arith.constant 0 : index
    %30 = vector.load %arg10[%c0_21, %c0_22] : memref<6x32xf32, #tpu.memory_space<vmem>>, vector<6x32xf32>
    %cst_23 = arith.constant dense<0.000000e+00> : vector<8x32xf32>
    %31 = tpu.matmul %29, %30, %cst_23 {dimension_numbers = #tpu.dot_dimension_numbers<[1], [0], [0], [1], [0, 0, 1, 1], [], []>} : vector<8x6xf32>, vector<6x32xf32>, vector<8x32xf32> -> vector<8x32xf32>
    %c0_24 = arith.constant 0 : index
    %c0_25 = arith.constant 0 : index
    %32 = vector.load %arg11[%c0_24, %c0_25] : memref<1x32xf32, #tpu.memory_space<vmem>>, vector<1x32xf32>
    %33 = vector.broadcast %32 : vector<1x32xf32> to vector<8x32xf32>
    %34 = arith.addf %31, %33 : vector<8x32xf32>
    %35 = arith.addf %13, %15 : vector<64x32xf32>
    %c0_26 = arith.constant 0 : index
    %c0_27 = arith.constant 0 : index
    %c0_28 = arith.constant 0 : index
    %36 = vector.load %arg13[%c0_26, %c0_27, %c0_28] : memref<5x32x64xbf16, #tpu.memory_space<vmem>>, vector<1x32x64xbf16>
    %37 = vector.shape_cast %36 : vector<1x32x64xbf16> to vector<32x64xbf16>
    %38 = arith.truncf %35 : vector<64x32xf32> to vector<64x32xbf16>
    %cst_29 = arith.constant dense<0.000000e+00> : vector<64x64xf32>
    %39 = tpu.matmul %38, %37, %cst_29 {dimension_numbers = #tpu.dot_dimension_numbers<[1], [0], [0], [1], [0, 0, 1, 1], [], []>} : vector<64x32xbf16>, vector<32x64xbf16>, vector<64x64xf32> -> vector<64x64xf32>
    %c0_30 = arith.constant 0 : index
    %c0_31 = arith.constant 0 : index
    %c0_32 = arith.constant 0 : index
    %40 = vector.load %arg14[%c0_30, %c0_31, %c0_32] : memref<5x1x64xf32, #tpu.memory_space<vmem>>, vector<1x1x64xf32>
    %41 = vector.shape_cast %40 : vector<1x1x64xf32> to vector<1x64xf32>
    %42 = vector.broadcast %41 : vector<1x64xf32> to vector<64x64xf32>
    %43 = arith.addf %39, %42 : vector<64x64xf32>
    %c0_33 = arith.constant 0 : index
    %c0_34 = arith.constant 0 : index
    %c0_35 = arith.constant 0 : index
    %44 = vector.load %arg15[%c0_33, %c0_34, %c0_35] : memref<5x32x32xbf16, #tpu.memory_space<vmem>>, vector<1x32x32xbf16>
    %45 = vector.shape_cast %44 : vector<1x32x32xbf16> to vector<32x32xbf16>
    %46 = arith.truncf %13 : vector<64x32xf32> to vector<64x32xbf16>
    %cst_36 = arith.constant dense<0.000000e+00> : vector<64x32xf32>
    %47 = tpu.matmul %46, %45, %cst_36 {dimension_numbers = #tpu.dot_dimension_numbers<[1], [0], [0], [1], [0, 0, 1, 1], [], []>} : vector<64x32xbf16>, vector<32x32xbf16>, vector<64x32xf32> -> vector<64x32xf32>
    %c0_37 = arith.constant 0 : index
    %c0_38 = arith.constant 0 : index
    %c0_39 = arith.constant 0 : index
    %48 = vector.load %arg16[%c0_37, %c0_38, %c0_39] : memref<5x1x32xf32, #tpu.memory_space<vmem>>, vector<1x1x32xf32>
    %49 = vector.shape_cast %48 : vector<1x1x32xf32> to vector<1x32xf32>
    %50 = vector.broadcast %49 : vector<1x32xf32> to vector<64x32xf32>
    %51 = arith.addf %47, %50 : vector<64x32xf32>
    %52 = vector.extract_strided_slice %43 {offsets = [0, 0], sizes = [64, 32], strides = [1, 1]} : vector<64x64xf32> to vector<64x32xf32>
    %53 = vector.extract_strided_slice %43 {offsets = [0, 32], sizes = [64, 32], strides = [1, 1]} : vector<64x64xf32> to vector<64x32xf32>
    %c0_40 = arith.constant 0 : index
    %c0_41 = arith.constant 0 : index
    %c0_42 = arith.constant 0 : index
    %54 = vector.load %arg17[%c0_40, %c0_41, %c0_42] : memref<5x32x32xbf16, #tpu.memory_space<vmem>>, vector<1x32x32xbf16>
    %55 = vector.shape_cast %54 : vector<1x32x32xbf16> to vector<32x32xbf16>
    %c0_43 = arith.constant 0 : index
    %c0_44 = arith.constant 0 : index
    %c0_45 = arith.constant 0 : index
    %56 = vector.load %arg18[%c0_43, %c0_44, %c0_45] : memref<5x1x32xf32, #tpu.memory_space<vmem>>, vector<1x1x32xf32>
    %57 = vector.shape_cast %56 : vector<1x1x32xf32> to vector<1x32xf32>
    %58 = vector.extract_strided_slice %52 {offsets = [0, 0], sizes = [64, 8], strides = [1, 1]} : vector<64x32xf32> to vector<64x8xf32>
    %59 = arith.truncf %58 : vector<64x8xf32> to vector<64x8xbf16>
    %60 = vector.extract_strided_slice %53 {offsets = [0, 0], sizes = [64, 8], strides = [1, 1]} : vector<64x32xf32> to vector<64x8xf32>
    %61 = arith.truncf %60 : vector<64x8xf32> to vector<64x8xbf16>
    %cst_46 = arith.constant dense<0.000000e+00> : vector<64x64xf32>
    %62 = tpu.matmul %59, %61, %cst_46 {dimension_numbers = #tpu.dot_dimension_numbers<[1], [1], [0], [0], [0, 0, 1, 0], [], []>} : vector<64x8xbf16>, vector<64x8xbf16>, vector<64x64xf32> -> vector<64x64xf32>
    %cst_47 = arith.constant 0.353553385 : f32
    %63 = vector.broadcast %cst_47 : f32 to vector<64x64xf32>
    %64 = arith.mulf %62, %63 : vector<64x64xf32>
    %65 = vector.broadcast %17 : vector<1x64xf32> to vector<64x64xf32>
    %66 = arith.addf %64, %65 : vector<64x64xf32>
    %cst_48 = arith.constant dense<0xFF800000> : vector<64xf32>
    %67 = vector.multi_reduction <maximumf>, %66, %cst_48 [1] : vector<64x64xf32> to vector<64xf32>
    %68 = vector.shape_cast %67 : vector<64xf32> to vector<64x1xf32>
    %69 = vector.broadcast %68 : vector<64x1xf32> to vector<64x64xf32>
    %70 = arith.subf %66, %69 : vector<64x64xf32>
    %71 = math.exp %70 : vector<64x64xf32>
    %cst_49 = arith.constant dense<0.000000e+00> : vector<64xf32>
    %72 = vector.multi_reduction <add>, %71, %cst_49 [1] : vector<64x64xf32> to vector<64xf32>
    %73 = vector.shape_cast %72 : vector<64xf32> to vector<64x1xf32>
    %74 = tpu.reciprocal %73 {approx = true} : vector<64x1xf32> -> vector<64x1xf32>
    %75 = vector.broadcast %74 : vector<64x1xf32> to vector<64x64xf32>
    %76 = arith.mulf %71, %75 : vector<64x64xf32>
    %77 = vector.extract_strided_slice %51 {offsets = [0, 0], sizes = [64, 8], strides = [1, 1]} : vector<64x32xf32> to vector<64x8xf32>
    %78 = arith.truncf %76 : vector<64x64xf32> to vector<64x64xbf16>
    %79 = arith.truncf %77 : vector<64x8xf32> to vector<64x8xbf16>
    %cst_50 = arith.constant dense<0.000000e+00> : vector<64x8xf32>
    %80 = tpu.matmul %78, %79, %cst_50 {dimension_numbers = #tpu.dot_dimension_numbers<[1], [0], [0], [1], [0, 0, 1, 1], [], []>} : vector<64x64xbf16>, vector<64x8xbf16>, vector<64x8xf32> -> vector<64x8xf32>
    %81 = vector.extract_strided_slice %52 {offsets = [0, 8], sizes = [64, 8], strides = [1, 1]} : vector<64x32xf32> to vector<64x8xf32>
    %82 = arith.truncf %81 : vector<64x8xf32> to vector<64x8xbf16>
    %83 = vector.extract_strided_slice %53 {offsets = [0, 8], sizes = [64, 8], strides = [1, 1]} : vector<64x32xf32> to vector<64x8xf32>
    %84 = arith.truncf %83 : vector<64x8xf32> to vector<64x8xbf16>
    %cst_51 = arith.constant dense<0.000000e+00> : vector<64x64xf32>
    %85 = tpu.matmul %82, %84, %cst_51 {dimension_numbers = #tpu.dot_dimension_numbers<[1], [1], [0], [0], [0, 0, 1, 0], [], []>} : vector<64x8xbf16>, vector<64x8xbf16>, vector<64x64xf32> -> vector<64x64xf32>
    %cst_52 = arith.constant 0.353553385 : f32
    %86 = vector.broadcast %cst_52 : f32 to vector<64x64xf32>
    %87 = arith.mulf %85, %86 : vector<64x64xf32>
    %88 = vector.broadcast %17 : vector<1x64xf32> to vector<64x64xf32>
    %89 = arith.addf %87, %88 : vector<64x64xf32>
    %cst_53 = arith.constant dense<0xFF800000> : vector<64xf32>
    %90 = vector.multi_reduction <maximumf>, %89, %cst_53 [1] : vector<64x64xf32> to vector<64xf32>
    %91 = vector.shape_cast %90 : vector<64xf32> to vector<64x1xf32>
    %92 = vector.broadcast %91 : vector<64x1xf32> to vector<64x64xf32>
    %93 = arith.subf %89, %92 : vector<64x64xf32>
    %94 = math.exp %93 : vector<64x64xf32>
    %cst_54 = arith.constant dense<0.000000e+00> : vector<64xf32>
    %95 = vector.multi_reduction <add>, %94, %cst_54 [1] : vector<64x64xf32> to vector<64xf32>
    %96 = vector.shape_cast %95 : vector<64xf32> to vector<64x1xf32>
    %97 = tpu.reciprocal %96 {approx = true} : vector<64x1xf32> -> vector<64x1xf32>
    %98 = vector.broadcast %97 : vector<64x1xf32> to vector<64x64xf32>
    %99 = arith.mulf %94, %98 : vector<64x64xf32>
    %100 = vector.extract_strided_slice %51 {offsets = [0, 8], sizes = [64, 8], strides = [1, 1]} : vector<64x32xf32> to vector<64x8xf32>
    %101 = arith.truncf %99 : vector<64x64xf32> to vector<64x64xbf16>
    %102 = arith.truncf %100 : vector<64x8xf32> to vector<64x8xbf16>
    %cst_55 = arith.constant dense<0.000000e+00> : vector<64x8xf32>
    %103 = tpu.matmul %101, %102, %cst_55 {dimension_numbers = #tpu.dot_dimension_numbers<[1], [0], [0], [1], [0, 0, 1, 1], [], []>} : vector<64x64xbf16>, vector<64x8xbf16>, vector<64x8xf32> -> vector<64x8xf32>
    %104 = vector.extract_strided_slice %52 {offsets = [0, 16], sizes = [64, 8], strides = [1, 1]} : vector<64x32xf32> to vector<64x8xf32>
    %105 = arith.truncf %104 : vector<64x8xf32> to vector<64x8xbf16>
    %106 = vector.extract_strided_slice %53 {offsets = [0, 16], sizes = [64, 8], strides = [1, 1]} : vector<64x32xf32> to vector<64x8xf32>
    %107 = arith.truncf %106 : vector<64x8xf32> to vector<64x8xbf16>
    %cst_56 = arith.constant dense<0.000000e+00> : vector<64x64xf32>
    %108 = tpu.matmul %105, %107, %cst_56 {dimension_numbers = #tpu.dot_dimension_numbers<[1], [1], [0], [0], [0, 0, 1, 0], [], []>} : vector<64x8xbf16>, vector<64x8xbf16>, vector<64x64xf32> -> vector<64x64xf32>
    %cst_57 = arith.constant 0.353553385 : f32
    %109 = vector.broadcast %cst_57 : f32 to vector<64x64xf32>
    %110 = arith.mulf %108, %109 : vector<64x64xf32>
    %111 = vector.broadcast %17 : vector<1x64xf32> to vector<64x64xf32>
    %112 = arith.addf %110, %111 : vector<64x64xf32>
    %cst_58 = arith.constant dense<0xFF800000> : vector<64xf32>
    %113 = vector.multi_reduction <maximumf>, %112, %cst_58 [1] : vector<64x64xf32> to vector<64xf32>
    %114 = vector.shape_cast %113 : vector<64xf32> to vector<64x1xf32>
    %115 = vector.broadcast %114 : vector<64x1xf32> to vector<64x64xf32>
    %116 = arith.subf %112, %115 : vector<64x64xf32>
    %117 = math.exp %116 : vector<64x64xf32>
    %cst_59 = arith.constant dense<0.000000e+00> : vector<64xf32>
    %118 = vector.multi_reduction <add>, %117, %cst_59 [1] : vector<64x64xf32> to vector<64xf32>
    %119 = vector.shape_cast %118 : vector<64xf32> to vector<64x1xf32>
    %120 = tpu.reciprocal %119 {approx = true} : vector<64x1xf32> -> vector<64x1xf32>
    %121 = vector.broadcast %120 : vector<64x1xf32> to vector<64x64xf32>
    %122 = arith.mulf %117, %121 : vector<64x64xf32>
    %123 = vector.extract_strided_slice %51 {offsets = [0, 16], sizes = [64, 8], strides = [1, 1]} : vector<64x32xf32> to vector<64x8xf32>
    %124 = arith.truncf %122 : vector<64x64xf32> to vector<64x64xbf16>
    %125 = arith.truncf %123 : vector<64x8xf32> to vector<64x8xbf16>
    %cst_60 = arith.constant dense<0.000000e+00> : vector<64x8xf32>
    %126 = tpu.matmul %124, %125, %cst_60 {dimension_numbers = #tpu.dot_dimension_numbers<[1], [0], [0], [1], [0, 0, 1, 1], [], []>} : vector<64x64xbf16>, vector<64x8xbf16>, vector<64x8xf32> -> vector<64x8xf32>
    %127 = vector.extract_strided_slice %52 {offsets = [0, 24], sizes = [64, 8], strides = [1, 1]} : vector<64x32xf32> to vector<64x8xf32>
    %128 = arith.truncf %127 : vector<64x8xf32> to vector<64x8xbf16>
    %129 = vector.extract_strided_slice %53 {offsets = [0, 24], sizes = [64, 8], strides = [1, 1]} : vector<64x32xf32> to vector<64x8xf32>
    %130 = arith.truncf %129 : vector<64x8xf32> to vector<64x8xbf16>
    %cst_61 = arith.constant dense<0.000000e+00> : vector<64x64xf32>
    %131 = tpu.matmul %128, %130, %cst_61 {dimension_numbers = #tpu.dot_dimension_numbers<[1], [1], [0], [0], [0, 0, 1, 0], [], []>} : vector<64x8xbf16>, vector<64x8xbf16>, vector<64x64xf32> -> vector<64x64xf32>
    %cst_62 = arith.constant 0.353553385 : f32
    %132 = vector.broadcast %cst_62 : f32 to vector<64x64xf32>
    %133 = arith.mulf %131, %132 : vector<64x64xf32>
    %134 = vector.broadcast %17 : vector<1x64xf32> to vector<64x64xf32>
    %135 = arith.addf %133, %134 : vector<64x64xf32>
    %cst_63 = arith.constant dense<0xFF800000> : vector<64xf32>
    %136 = vector.multi_reduction <maximumf>, %135, %cst_63 [1] : vector<64x64xf32> to vector<64xf32>
    %137 = vector.shape_cast %136 : vector<64xf32> to vector<64x1xf32>
    %138 = vector.broadcast %137 : vector<64x1xf32> to vector<64x64xf32>
    %139 = arith.subf %135, %138 : vector<64x64xf32>
    %140 = math.exp %139 : vector<64x64xf32>
    %cst_64 = arith.constant dense<0.000000e+00> : vector<64xf32>
    %141 = vector.multi_reduction <add>, %140, %cst_64 [1] : vector<64x64xf32> to vector<64xf32>
    %142 = vector.shape_cast %141 : vector<64xf32> to vector<64x1xf32>
    %143 = tpu.reciprocal %142 {approx = true} : vector<64x1xf32> -> vector<64x1xf32>
    %144 = vector.broadcast %143 : vector<64x1xf32> to vector<64x64xf32>
    %145 = arith.mulf %140, %144 : vector<64x64xf32>
    %146 = vector.extract_strided_slice %51 {offsets = [0, 24], sizes = [64, 8], strides = [1, 1]} : vector<64x32xf32> to vector<64x8xf32>
    %147 = arith.truncf %145 : vector<64x64xf32> to vector<64x64xbf16>
    %148 = arith.truncf %146 : vector<64x8xf32> to vector<64x8xbf16>
    %cst_65 = arith.constant dense<0.000000e+00> : vector<64x8xf32>
    %149 = tpu.matmul %147, %148, %cst_65 {dimension_numbers = #tpu.dot_dimension_numbers<[1], [0], [0], [1], [0, 0, 1, 1], [], []>} : vector<64x64xbf16>, vector<64x8xbf16>, vector<64x8xf32> -> vector<64x8xf32>
    %150 = tpu.concatenate %80, %103, %126, %149 in 1 : vector<64x8xf32>, vector<64x8xf32>, vector<64x8xf32>, vector<64x8xf32> -> vector<64x32xf32>
    %151 = arith.truncf %150 : vector<64x32xf32> to vector<64x32xbf16>
    %cst_66 = arith.constant dense<0.000000e+00> : vector<64x32xf32>
    %152 = tpu.matmul %151, %55, %cst_66 {dimension_numbers = #tpu.dot_dimension_numbers<[1], [0], [0], [1], [0, 0, 1, 1], [], []>} : vector<64x32xbf16>, vector<32x32xbf16>, vector<64x32xf32> -> vector<64x32xf32>
    %153 = vector.broadcast %57 : vector<1x32xf32> to vector<64x32xf32>
    %154 = arith.addf %152, %153 : vector<64x32xf32>
    %155 = arith.addf %13, %154 : vector<64x32xf32>
    %c0_67 = arith.constant 0 : index
    %c0_68 = arith.constant 0 : index
    %156 = vector.load %arg23[%c0_67, %c0_68] : memref<8x32xf32, #tpu.memory_space<vmem>>, vector<1x32xf32>
    %c0_69 = arith.constant 0 : index
    %c0_70 = arith.constant 0 : index
    %157 = vector.load %arg24[%c0_69, %c0_70] : memref<8x32xf32, #tpu.memory_space<vmem>>, vector<1x32xf32>
    %cst_71 = arith.constant dense<0.000000e+00> : vector<64xf32>
    %158 = vector.multi_reduction <add>, %155, %cst_71 [1] : vector<64x32xf32> to vector<64xf32>
    %159 = vector.shape_cast %158 : vector<64xf32> to vector<64x1xf32>
    %cst_72 = arith.constant 3.200000e+01 : f32
    %160 = vector.broadcast %cst_72 : f32 to vector<64x1xf32>
    %161 = arith.divf %159, %160 : vector<64x1xf32>
    %162 = vector.broadcast %161 : vector<64x1xf32> to vector<64x32xf32>
    %163 = arith.subf %155, %162 : vector<64x32xf32>
    %164 = vector.broadcast %161 : vector<64x1xf32> to vector<64x32xf32>
    %165 = arith.subf %155, %164 : vector<64x32xf32>
    %166 = arith.mulf %163, %165 : vector<64x32xf32>
    %cst_73 = arith.constant dense<0.000000e+00> : vector<64xf32>
    %167 = vector.multi_reduction <add>, %166, %cst_73 [1] : vector<64x32xf32> to vector<64xf32>
    %168 = vector.shape_cast %167 : vector<64xf32> to vector<64x1xf32>
    %cst_74 = arith.constant 3.200000e+01 : f32
    %169 = vector.broadcast %cst_74 : f32 to vector<64x1xf32>
    %170 = arith.divf %168, %169 : vector<64x1xf32>
    %171 = vector.broadcast %161 : vector<64x1xf32> to vector<64x32xf32>
    %172 = arith.subf %155, %171 : vector<64x32xf32>
    %cst_75 = arith.constant 9.99999974E-6 : f32
    %173 = vector.broadcast %cst_75 : f32 to vector<64x1xf32>
    %174 = arith.addf %170, %173 : vector<64x1xf32>
    %175 = math.rsqrt %174 : vector<64x1xf32>
    %176 = vector.broadcast %175 : vector<64x1xf32> to vector<64x32xf32>
    %177 = arith.mulf %172, %176 : vector<64x32xf32>
    %178 = vector.broadcast %156 : vector<1x32xf32> to vector<64x32xf32>
    %179 = arith.mulf %177, %178 : vector<64x32xf32>
    %180 = vector.broadcast %157 : vector<1x32xf32> to vector<64x32xf32>
    %181 = arith.addf %179, %180 : vector<64x32xf32>
    %c0_76 = arith.constant 0 : index
    %c0_77 = arith.constant 0 : index
    %c0_78 = arith.constant 0 : index
    %182 = vector.load %arg19[%c0_76, %c0_77, %c0_78] : memref<3x32x64xbf16, #tpu.memory_space<vmem>>, vector<1x32x64xbf16>
    %183 = vector.shape_cast %182 : vector<1x32x64xbf16> to vector<32x64xbf16>
    %184 = arith.truncf %181 : vector<64x32xf32> to vector<64x32xbf16>
    %cst_79 = arith.constant dense<0.000000e+00> : vector<64x64xf32>
    %185 = tpu.matmul %184, %183, %cst_79 {dimension_numbers = #tpu.dot_dimension_numbers<[1], [0], [0], [1], [0, 0, 1, 1], [], []>} : vector<64x32xbf16>, vector<32x64xbf16>, vector<64x64xf32> -> vector<64x64xf32>
    %c0_80 = arith.constant 0 : index
    %c0_81 = arith.constant 0 : index
    %c0_82 = arith.constant 0 : index
    %186 = vector.load %arg20[%c0_80, %c0_81, %c0_82] : memref<3x1x64xf32, #tpu.memory_space<vmem>>, vector<1x1x64xf32>
    %187 = vector.shape_cast %186 : vector<1x1x64xf32> to vector<1x64xf32>
    %188 = vector.broadcast %187 : vector<1x64xf32> to vector<64x64xf32>
    %189 = arith.addf %185, %188 : vector<64x64xf32>
    %cst_83 = arith.constant 0.000000e+00 : f32
    %190 = vector.broadcast %cst_83 : f32 to vector<64x64xf32>
    %191 = arith.maximumf %189, %190 : vector<64x64xf32>
    %c0_84 = arith.constant 0 : index
    %c0_85 = arith.constant 0 : index
    %c0_86 = arith.constant 0 : index
    %192 = vector.load %arg21[%c0_84, %c0_85, %c0_86] : memref<3x64x32xbf16, #tpu.memory_space<vmem>>, vector<1x64x32xbf16>
    %193 = vector.shape_cast %192 : vector<1x64x32xbf16> to vector<64x32xbf16>
    %194 = arith.truncf %191 : vector<64x64xf32> to vector<64x64xbf16>
    %cst_87 = arith.constant dense<0.000000e+00> : vector<64x32xf32>
    %195 = tpu.matmul %194, %193, %cst_87 {dimension_numbers = #tpu.dot_dimension_numbers<[1], [0], [0], [1], [0, 0, 1, 1], [], []>} : vector<64x64xbf16>, vector<64x32xbf16>, vector<64x32xf32> -> vector<64x32xf32>
    %c0_88 = arith.constant 0 : index
    %c0_89 = arith.constant 0 : index
    %c0_90 = arith.constant 0 : index
    %196 = vector.load %arg22[%c0_88, %c0_89, %c0_90] : memref<3x1x32xf32, #tpu.memory_space<vmem>>, vector<1x1x32xf32>
    %197 = vector.shape_cast %196 : vector<1x1x32xf32> to vector<1x32xf32>
    %198 = vector.broadcast %197 : vector<1x32xf32> to vector<64x32xf32>
    %199 = arith.addf %195, %198 : vector<64x32xf32>
    %200 = arith.addf %181, %199 : vector<64x32xf32>
    %c1 = arith.constant 1 : index
    %c0_91 = arith.constant 0 : index
    %201 = vector.load %arg23[%c1, %c0_91] : memref<8x32xf32, #tpu.memory_space<vmem>>, vector<1x32xf32>
    %c1_92 = arith.constant 1 : index
    %c0_93 = arith.constant 0 : index
    %202 = vector.load %arg24[%c1_92, %c0_93] : memref<8x32xf32, #tpu.memory_space<vmem>>, vector<1x32xf32>
    %cst_94 = arith.constant dense<0.000000e+00> : vector<64xf32>
    %203 = vector.multi_reduction <add>, %200, %cst_94 [1] : vector<64x32xf32> to vector<64xf32>
    %204 = vector.shape_cast %203 : vector<64xf32> to vector<64x1xf32>
    %cst_95 = arith.constant 3.200000e+01 : f32
    %205 = vector.broadcast %cst_95 : f32 to vector<64x1xf32>
    %206 = arith.divf %204, %205 : vector<64x1xf32>
    %207 = vector.broadcast %206 : vector<64x1xf32> to vector<64x32xf32>
    %208 = arith.subf %200, %207 : vector<64x32xf32>
    %209 = vector.broadcast %206 : vector<64x1xf32> to vector<64x32xf32>
    %210 = arith.subf %200, %209 : vector<64x32xf32>
    %211 = arith.mulf %208, %210 : vector<64x32xf32>
    %cst_96 = arith.constant dense<0.000000e+00> : vector<64xf32>
    %212 = vector.multi_reduction <add>, %211, %cst_96 [1] : vector<64x32xf32> to vector<64xf32>
    %213 = vector.shape_cast %212 : vector<64xf32> to vector<64x1xf32>
    %cst_97 = arith.constant 3.200000e+01 : f32
    %214 = vector.broadcast %cst_97 : f32 to vector<64x1xf32>
    %215 = arith.divf %213, %214 : vector<64x1xf32>
    %216 = vector.broadcast %206 : vector<64x1xf32> to vector<64x32xf32>
    %217 = arith.subf %200, %216 : vector<64x32xf32>
    %cst_98 = arith.constant 9.99999974E-6 : f32
    %218 = vector.broadcast %cst_98 : f32 to vector<64x1xf32>
    %219 = arith.addf %215, %218 : vector<64x1xf32>
    %220 = math.rsqrt %219 : vector<64x1xf32>
    %221 = vector.broadcast %220 : vector<64x1xf32> to vector<64x32xf32>
    %222 = arith.mulf %217, %221 : vector<64x32xf32>
    %223 = vector.broadcast %201 : vector<1x32xf32> to vector<64x32xf32>
    %224 = arith.mulf %222, %223 : vector<64x32xf32>
    %225 = vector.broadcast %202 : vector<1x32xf32> to vector<64x32xf32>
    %226 = arith.addf %224, %225 : vector<64x32xf32>
    %227 = arith.addf %226, %15 : vector<64x32xf32>
    %c0_99 = arith.constant 0 : index
    %c0_100 = arith.constant 0 : index
    %228 = vector.load %arg12[%c0_99, %c0_100] : memref<2x32xf32, #tpu.memory_space<vmem>>, vector<2x32xf32>
    %cst_101 = arith.constant 0.000000e+00 : f32
    %229 = vector.broadcast %cst_101 : f32 to vector<2x32xf32>
    %230 = tpu.concatenate %229, %34 in 0 : vector<2x32xf32>, vector<8x32xf32> -> vector<10x32xf32>
    %cst_102 = arith.constant 0.000000e+00 : f32
    %231 = vector.broadcast %cst_102 : f32 to vector<8x32xf32>
    %232 = tpu.concatenate %228, %231 in 0 : vector<2x32xf32>, vector<8x32xf32> -> vector<10x32xf32>
    %c0_103 = arith.constant 0 : index
    %c0_104 = arith.constant 0 : index
    %c0_105 = arith.constant 0 : index
    %233 = vector.load %arg5[%c0_103, %c0_104, %c0_105] : memref<1x1x10xf32, #tpu.memory_space<vmem>>, vector<1x1x10xf32>
    %234 = vector.shape_cast %233 : vector<1x1x10xf32> to vector<1x10xf32>
    %235 = arith.addf %230, %232 : vector<10x32xf32>
    %c1_106 = arith.constant 1 : index
    %c0_107 = arith.constant 0 : index
    %c0_108 = arith.constant 0 : index
    %236 = vector.load %arg13[%c1_106, %c0_107, %c0_108] : memref<5x32x64xbf16, #tpu.memory_space<vmem>>, vector<1x32x64xbf16>
    %237 = vector.shape_cast %236 : vector<1x32x64xbf16> to vector<32x64xbf16>
    %238 = arith.truncf %235 : vector<10x32xf32> to vector<10x32xbf16>
    %cst_109 = arith.constant dense<0.000000e+00> : vector<10x64xf32>
    %239 = tpu.matmul %238, %237, %cst_109 {dimension_numbers = #tpu.dot_dimension_numbers<[1], [0], [0], [1], [0, 0, 1, 1], [], []>} : vector<10x32xbf16>, vector<32x64xbf16>, vector<10x64xf32> -> vector<10x64xf32>
    %c1_110 = arith.constant 1 : index
    %c0_111 = arith.constant 0 : index
    %c0_112 = arith.constant 0 : index
    %240 = vector.load %arg14[%c1_110, %c0_111, %c0_112] : memref<5x1x64xf32, #tpu.memory_space<vmem>>, vector<1x1x64xf32>
    %241 = vector.shape_cast %240 : vector<1x1x64xf32> to vector<1x64xf32>
    %242 = vector.broadcast %241 : vector<1x64xf32> to vector<10x64xf32>
    %243 = arith.addf %239, %242 : vector<10x64xf32>
    %c1_113 = arith.constant 1 : index
    %c0_114 = arith.constant 0 : index
    %c0_115 = arith.constant 0 : index
    %244 = vector.load %arg15[%c1_113, %c0_114, %c0_115] : memref<5x32x32xbf16, #tpu.memory_space<vmem>>, vector<1x32x32xbf16>
    %245 = vector.shape_cast %244 : vector<1x32x32xbf16> to vector<32x32xbf16>
    %246 = arith.truncf %230 : vector<10x32xf32> to vector<10x32xbf16>
    %cst_116 = arith.constant dense<0.000000e+00> : vector<10x32xf32>
    %247 = tpu.matmul %246, %245, %cst_116 {dimension_numbers = #tpu.dot_dimension_numbers<[1], [0], [0], [1], [0, 0, 1, 1], [], []>} : vector<10x32xbf16>, vector<32x32xbf16>, vector<10x32xf32> -> vector<10x32xf32>
    %c1_117 = arith.constant 1 : index
    %c0_118 = arith.constant 0 : index
    %c0_119 = arith.constant 0 : index
    %248 = vector.load %arg16[%c1_117, %c0_118, %c0_119] : memref<5x1x32xf32, #tpu.memory_space<vmem>>, vector<1x1x32xf32>
    %249 = vector.shape_cast %248 : vector<1x1x32xf32> to vector<1x32xf32>
    %250 = vector.broadcast %249 : vector<1x32xf32> to vector<10x32xf32>
    %251 = arith.addf %247, %250 : vector<10x32xf32>
    %252 = vector.extract_strided_slice %243 {offsets = [0, 0], sizes = [10, 32], strides = [1, 1]} : vector<10x64xf32> to vector<10x32xf32>
    %253 = vector.extract_strided_slice %243 {offsets = [0, 32], sizes = [10, 32], strides = [1, 1]} : vector<10x64xf32> to vector<10x32xf32>
    %c1_120 = arith.constant 1 : index
    %c0_121 = arith.constant 0 : index
    %c0_122 = arith.constant 0 : index
    %254 = vector.load %arg17[%c1_120, %c0_121, %c0_122] : memref<5x32x32xbf16, #tpu.memory_space<vmem>>, vector<1x32x32xbf16>
    %255 = vector.shape_cast %254 : vector<1x32x32xbf16> to vector<32x32xbf16>
    %c1_123 = arith.constant 1 : index
    %c0_124 = arith.constant 0 : index
    %c0_125 = arith.constant 0 : index
    %256 = vector.load %arg18[%c1_123, %c0_124, %c0_125] : memref<5x1x32xf32, #tpu.memory_space<vmem>>, vector<1x1x32xf32>
    %257 = vector.shape_cast %256 : vector<1x1x32xf32> to vector<1x32xf32>
    %258 = vector.extract_strided_slice %252 {offsets = [0, 0], sizes = [10, 8], strides = [1, 1]} : vector<10x32xf32> to vector<10x8xf32>
    %259 = arith.truncf %258 : vector<10x8xf32> to vector<10x8xbf16>
    %260 = vector.extract_strided_slice %253 {offsets = [0, 0], sizes = [10, 8], strides = [1, 1]} : vector<10x32xf32> to vector<10x8xf32>
    %261 = arith.truncf %260 : vector<10x8xf32> to vector<10x8xbf16>
    %cst_126 = arith.constant dense<0.000000e+00> : vector<10x10xf32>
    %262 = tpu.matmul %259, %261, %cst_126 {dimension_numbers = #tpu.dot_dimension_numbers<[1], [1], [0], [0], [0, 0, 1, 0], [], []>} : vector<10x8xbf16>, vector<10x8xbf16>, vector<10x10xf32> -> vector<10x10xf32>
    %cst_127 = arith.constant 0.353553385 : f32
    %263 = vector.broadcast %cst_127 : f32 to vector<10x10xf32>
    %264 = arith.mulf %262, %263 : vector<10x10xf32>
    %265 = vector.broadcast %234 : vector<1x10xf32> to vector<10x10xf32>
    %266 = arith.addf %264, %265 : vector<10x10xf32>
    %cst_128 = arith.constant dense<0xFF800000> : vector<10xf32>
    %267 = vector.multi_reduction <maximumf>, %266, %cst_128 [1] : vector<10x10xf32> to vector<10xf32>
    %268 = vector.shape_cast %267 : vector<10xf32> to vector<10x1xf32>
    %269 = vector.broadcast %268 : vector<10x1xf32> to vector<10x10xf32>
    %270 = arith.subf %266, %269 : vector<10x10xf32>
    %271 = math.exp %270 : vector<10x10xf32>
    %cst_129 = arith.constant dense<0.000000e+00> : vector<10xf32>
    %272 = vector.multi_reduction <add>, %271, %cst_129 [1] : vector<10x10xf32> to vector<10xf32>
    %273 = vector.shape_cast %272 : vector<10xf32> to vector<10x1xf32>
    %274 = tpu.reciprocal %273 {approx = true} : vector<10x1xf32> -> vector<10x1xf32>
    %275 = vector.broadcast %274 : vector<10x1xf32> to vector<10x10xf32>
    %276 = arith.mulf %271, %275 : vector<10x10xf32>
    %277 = vector.extract_strided_slice %251 {offsets = [0, 0], sizes = [10, 8], strides = [1, 1]} : vector<10x32xf32> to vector<10x8xf32>
    %278 = arith.truncf %276 : vector<10x10xf32> to vector<10x10xbf16>
    %279 = arith.truncf %277 : vector<10x8xf32> to vector<10x8xbf16>
    %cst_130 = arith.constant dense<0.000000e+00> : vector<10x8xf32>
    %280 = tpu.matmul %278, %279, %cst_130 {dimension_numbers = #tpu.dot_dimension_numbers<[1], [0], [0], [1], [0, 0, 1, 1], [], []>} : vector<10x10xbf16>, vector<10x8xbf16>, vector<10x8xf32> -> vector<10x8xf32>
    %281 = vector.extract_strided_slice %252 {offsets = [0, 8], sizes = [10, 8], strides = [1, 1]} : vector<10x32xf32> to vector<10x8xf32>
    %282 = arith.truncf %281 : vector<10x8xf32> to vector<10x8xbf16>
    %283 = vector.extract_strided_slice %253 {offsets = [0, 8], sizes = [10, 8], strides = [1, 1]} : vector<10x32xf32> to vector<10x8xf32>
    %284 = arith.truncf %283 : vector<10x8xf32> to vector<10x8xbf16>
    %cst_131 = arith.constant dense<0.000000e+00> : vector<10x10xf32>
    %285 = tpu.matmul %282, %284, %cst_131 {dimension_numbers = #tpu.dot_dimension_numbers<[1], [1], [0], [0], [0, 0, 1, 0], [], []>} : vector<10x8xbf16>, vector<10x8xbf16>, vector<10x10xf32> -> vector<10x10xf32>
    %cst_132 = arith.constant 0.353553385 : f32
    %286 = vector.broadcast %cst_132 : f32 to vector<10x10xf32>
    %287 = arith.mulf %285, %286 : vector<10x10xf32>
    %288 = vector.broadcast %234 : vector<1x10xf32> to vector<10x10xf32>
    %289 = arith.addf %287, %288 : vector<10x10xf32>
    %cst_133 = arith.constant dense<0xFF800000> : vector<10xf32>
    %290 = vector.multi_reduction <maximumf>, %289, %cst_133 [1] : vector<10x10xf32> to vector<10xf32>
    %291 = vector.shape_cast %290 : vector<10xf32> to vector<10x1xf32>
    %292 = vector.broadcast %291 : vector<10x1xf32> to vector<10x10xf32>
    %293 = arith.subf %289, %292 : vector<10x10xf32>
    %294 = math.exp %293 : vector<10x10xf32>
    %cst_134 = arith.constant dense<0.000000e+00> : vector<10xf32>
    %295 = vector.multi_reduction <add>, %294, %cst_134 [1] : vector<10x10xf32> to vector<10xf32>
    %296 = vector.shape_cast %295 : vector<10xf32> to vector<10x1xf32>
    %297 = tpu.reciprocal %296 {approx = true} : vector<10x1xf32> -> vector<10x1xf32>
    %298 = vector.broadcast %297 : vector<10x1xf32> to vector<10x10xf32>
    %299 = arith.mulf %294, %298 : vector<10x10xf32>
    %300 = vector.extract_strided_slice %251 {offsets = [0, 8], sizes = [10, 8], strides = [1, 1]} : vector<10x32xf32> to vector<10x8xf32>
    %301 = arith.truncf %299 : vector<10x10xf32> to vector<10x10xbf16>
    %302 = arith.truncf %300 : vector<10x8xf32> to vector<10x8xbf16>
    %cst_135 = arith.constant dense<0.000000e+00> : vector<10x8xf32>
    %303 = tpu.matmul %301, %302, %cst_135 {dimension_numbers = #tpu.dot_dimension_numbers<[1], [0], [0], [1], [0, 0, 1, 1], [], []>} : vector<10x10xbf16>, vector<10x8xbf16>, vector<10x8xf32> -> vector<10x8xf32>
    %304 = vector.extract_strided_slice %252 {offsets = [0, 16], sizes = [10, 8], strides = [1, 1]} : vector<10x32xf32> to vector<10x8xf32>
    %305 = arith.truncf %304 : vector<10x8xf32> to vector<10x8xbf16>
    %306 = vector.extract_strided_slice %253 {offsets = [0, 16], sizes = [10, 8], strides = [1, 1]} : vector<10x32xf32> to vector<10x8xf32>
    %307 = arith.truncf %306 : vector<10x8xf32> to vector<10x8xbf16>
    %cst_136 = arith.constant dense<0.000000e+00> : vector<10x10xf32>
    %308 = tpu.matmul %305, %307, %cst_136 {dimension_numbers = #tpu.dot_dimension_numbers<[1], [1], [0], [0], [0, 0, 1, 0], [], []>} : vector<10x8xbf16>, vector<10x8xbf16>, vector<10x10xf32> -> vector<10x10xf32>
    %cst_137 = arith.constant 0.353553385 : f32
    %309 = vector.broadcast %cst_137 : f32 to vector<10x10xf32>
    %310 = arith.mulf %308, %309 : vector<10x10xf32>
    %311 = vector.broadcast %234 : vector<1x10xf32> to vector<10x10xf32>
    %312 = arith.addf %310, %311 : vector<10x10xf32>
    %cst_138 = arith.constant dense<0xFF800000> : vector<10xf32>
    %313 = vector.multi_reduction <maximumf>, %312, %cst_138 [1] : vector<10x10xf32> to vector<10xf32>
    %314 = vector.shape_cast %313 : vector<10xf32> to vector<10x1xf32>
    %315 = vector.broadcast %314 : vector<10x1xf32> to vector<10x10xf32>
    %316 = arith.subf %312, %315 : vector<10x10xf32>
    %317 = math.exp %316 : vector<10x10xf32>
    %cst_139 = arith.constant dense<0.000000e+00> : vector<10xf32>
    %318 = vector.multi_reduction <add>, %317, %cst_139 [1] : vector<10x10xf32> to vector<10xf32>
    %319 = vector.shape_cast %318 : vector<10xf32> to vector<10x1xf32>
    %320 = tpu.reciprocal %319 {approx = true} : vector<10x1xf32> -> vector<10x1xf32>
    %321 = vector.broadcast %320 : vector<10x1xf32> to vector<10x10xf32>
    %322 = arith.mulf %317, %321 : vector<10x10xf32>
    %323 = vector.extract_strided_slice %251 {offsets = [0, 16], sizes = [10, 8], strides = [1, 1]} : vector<10x32xf32> to vector<10x8xf32>
    %324 = arith.truncf %322 : vector<10x10xf32> to vector<10x10xbf16>
    %325 = arith.truncf %323 : vector<10x8xf32> to vector<10x8xbf16>
    %cst_140 = arith.constant dense<0.000000e+00> : vector<10x8xf32>
    %326 = tpu.matmul %324, %325, %cst_140 {dimension_numbers = #tpu.dot_dimension_numbers<[1], [0], [0], [1], [0, 0, 1, 1], [], []>} : vector<10x10xbf16>, vector<10x8xbf16>, vector<10x8xf32> -> vector<10x8xf32>
    %327 = vector.extract_strided_slice %252 {offsets = [0, 24], sizes = [10, 8], strides = [1, 1]} : vector<10x32xf32> to vector<10x8xf32>
    %328 = arith.truncf %327 : vector<10x8xf32> to vector<10x8xbf16>
    %329 = vector.extract_strided_slice %253 {offsets = [0, 24], sizes = [10, 8], strides = [1, 1]} : vector<10x32xf32> to vector<10x8xf32>
    %330 = arith.truncf %329 : vector<10x8xf32> to vector<10x8xbf16>
    %cst_141 = arith.constant dense<0.000000e+00> : vector<10x10xf32>
    %331 = tpu.matmul %328, %330, %cst_141 {dimension_numbers = #tpu.dot_dimension_numbers<[1], [1], [0], [0], [0, 0, 1, 0], [], []>} : vector<10x8xbf16>, vector<10x8xbf16>, vector<10x10xf32> -> vector<10x10xf32>
    %cst_142 = arith.constant 0.353553385 : f32
    %332 = vector.broadcast %cst_142 : f32 to vector<10x10xf32>
    %333 = arith.mulf %331, %332 : vector<10x10xf32>
    %334 = vector.broadcast %234 : vector<1x10xf32> to vector<10x10xf32>
    %335 = arith.addf %333, %334 : vector<10x10xf32>
    %cst_143 = arith.constant dense<0xFF800000> : vector<10xf32>
    %336 = vector.multi_reduction <maximumf>, %335, %cst_143 [1] : vector<10x10xf32> to vector<10xf32>
    %337 = vector.shape_cast %336 : vector<10xf32> to vector<10x1xf32>
    %338 = vector.broadcast %337 : vector<10x1xf32> to vector<10x10xf32>
    %339 = arith.subf %335, %338 : vector<10x10xf32>
    %340 = math.exp %339 : vector<10x10xf32>
    %cst_144 = arith.constant dense<0.000000e+00> : vector<10xf32>
    %341 = vector.multi_reduction <add>, %340, %cst_144 [1] : vector<10x10xf32> to vector<10xf32>
    %342 = vector.shape_cast %341 : vector<10xf32> to vector<10x1xf32>
    %343 = tpu.reciprocal %342 {approx = true} : vector<10x1xf32> -> vector<10x1xf32>
    %344 = vector.broadcast %343 : vector<10x1xf32> to vector<10x10xf32>
    %345 = arith.mulf %340, %344 : vector<10x10xf32>
    %346 = vector.extract_strided_slice %251 {offsets = [0, 24], sizes = [10, 8], strides = [1, 1]} : vector<10x32xf32> to vector<10x8xf32>
    %347 = arith.truncf %345 : vector<10x10xf32> to vector<10x10xbf16>
    %348 = arith.truncf %346 : vector<10x8xf32> to vector<10x8xbf16>
    %cst_145 = arith.constant dense<0.000000e+00> : vector<10x8xf32>
    %349 = tpu.matmul %347, %348, %cst_145 {dimension_numbers = #tpu.dot_dimension_numbers<[1], [0], [0], [1], [0, 0, 1, 1], [], []>} : vector<10x10xbf16>, vector<10x8xbf16>, vector<10x8xf32> -> vector<10x8xf32>
    %350 = tpu.concatenate %280, %303, %326, %349 in 1 : vector<10x8xf32>, vector<10x8xf32>, vector<10x8xf32>, vector<10x8xf32> -> vector<10x32xf32>
    %351 = arith.truncf %350 : vector<10x32xf32> to vector<10x32xbf16>
    %cst_146 = arith.constant dense<0.000000e+00> : vector<10x32xf32>
    %352 = tpu.matmul %351, %255, %cst_146 {dimension_numbers = #tpu.dot_dimension_numbers<[1], [0], [0], [1], [0, 0, 1, 1], [], []>} : vector<10x32xbf16>, vector<32x32xbf16>, vector<10x32xf32> -> vector<10x32xf32>
    %353 = vector.broadcast %257 : vector<1x32xf32> to vector<10x32xf32>
    %354 = arith.addf %352, %353 : vector<10x32xf32>
    %355 = arith.addf %230, %354 : vector<10x32xf32>
    %c2 = arith.constant 2 : index
    %c0_147 = arith.constant 0 : index
    %356 = vector.load %arg23[%c2, %c0_147] : memref<8x32xf32, #tpu.memory_space<vmem>>, vector<1x32xf32>
    %c2_148 = arith.constant 2 : index
    %c0_149 = arith.constant 0 : index
    %357 = vector.load %arg24[%c2_148, %c0_149] : memref<8x32xf32, #tpu.memory_space<vmem>>, vector<1x32xf32>
    %cst_150 = arith.constant dense<0.000000e+00> : vector<10xf32>
    %358 = vector.multi_reduction <add>, %355, %cst_150 [1] : vector<10x32xf32> to vector<10xf32>
    %359 = vector.shape_cast %358 : vector<10xf32> to vector<10x1xf32>
    %cst_151 = arith.constant 3.200000e+01 : f32
    %360 = vector.broadcast %cst_151 : f32 to vector<10x1xf32>
    %361 = arith.divf %359, %360 : vector<10x1xf32>
    %362 = vector.broadcast %361 : vector<10x1xf32> to vector<10x32xf32>
    %363 = arith.subf %355, %362 : vector<10x32xf32>
    %364 = vector.broadcast %361 : vector<10x1xf32> to vector<10x32xf32>
    %365 = arith.subf %355, %364 : vector<10x32xf32>
    %366 = arith.mulf %363, %365 : vector<10x32xf32>
    %cst_152 = arith.constant dense<0.000000e+00> : vector<10xf32>
    %367 = vector.multi_reduction <add>, %366, %cst_152 [1] : vector<10x32xf32> to vector<10xf32>
    %368 = vector.shape_cast %367 : vector<10xf32> to vector<10x1xf32>
    %cst_153 = arith.constant 3.200000e+01 : f32
    %369 = vector.broadcast %cst_153 : f32 to vector<10x1xf32>
    %370 = arith.divf %368, %369 : vector<10x1xf32>
    %371 = vector.broadcast %361 : vector<10x1xf32> to vector<10x32xf32>
    %372 = arith.subf %355, %371 : vector<10x32xf32>
    %cst_154 = arith.constant 9.99999974E-6 : f32
    %373 = vector.broadcast %cst_154 : f32 to vector<10x1xf32>
    %374 = arith.addf %370, %373 : vector<10x1xf32>
    %375 = math.rsqrt %374 : vector<10x1xf32>
    %376 = vector.broadcast %375 : vector<10x1xf32> to vector<10x32xf32>
    %377 = arith.mulf %372, %376 : vector<10x32xf32>
    %378 = vector.broadcast %356 : vector<1x32xf32> to vector<10x32xf32>
    %379 = arith.mulf %377, %378 : vector<10x32xf32>
    %380 = vector.broadcast %357 : vector<1x32xf32> to vector<10x32xf32>
    %381 = arith.addf %379, %380 : vector<10x32xf32>
    %c2_155 = arith.constant 2 : index
    %c0_156 = arith.constant 0 : index
    %c0_157 = arith.constant 0 : index
    %382 = vector.load %arg13[%c2_155, %c0_156, %c0_157] : memref<5x32x64xbf16, #tpu.memory_space<vmem>>, vector<1x32x64xbf16>
    %383 = vector.shape_cast %382 : vector<1x32x64xbf16> to vector<32x64xbf16>
    %c2_158 = arith.constant 2 : index
    %c0_159 = arith.constant 0 : index
    %c0_160 = arith.constant 0 : index
    %384 = vector.load %arg14[%c2_158, %c0_159, %c0_160] : memref<5x1x64xf32, #tpu.memory_space<vmem>>, vector<1x1x64xf32>
    %385 = vector.shape_cast %384 : vector<1x1x64xf32> to vector<1x64xf32>
    %386 = arith.addf %381, %232 : vector<10x32xf32>
    %387 = vector.extract_strided_slice %383 {offsets = [0, 0], sizes = [32, 32], strides = [1, 1]} : vector<32x64xbf16> to vector<32x32xbf16>
    %388 = arith.truncf %386 : vector<10x32xf32> to vector<10x32xbf16>
    %cst_161 = arith.constant dense<0.000000e+00> : vector<10x32xf32>
    %389 = tpu.matmul %388, %387, %cst_161 {dimension_numbers = #tpu.dot_dimension_numbers<[1], [0], [0], [1], [0, 0, 1, 1], [], []>} : vector<10x32xbf16>, vector<32x32xbf16>, vector<10x32xf32> -> vector<10x32xf32>
    %390 = vector.extract_strided_slice %385 {offsets = [0, 0], sizes = [1, 32], strides = [1, 1]} : vector<1x64xf32> to vector<1x32xf32>
    %391 = vector.broadcast %390 : vector<1x32xf32> to vector<10x32xf32>
    %392 = arith.addf %389, %391 : vector<10x32xf32>
    %393 = vector.extract_strided_slice %383 {offsets = [0, 32], sizes = [32, 32], strides = [1, 1]} : vector<32x64xbf16> to vector<32x32xbf16>
    %394 = arith.truncf %227 : vector<64x32xf32> to vector<64x32xbf16>
    %cst_162 = arith.constant dense<0.000000e+00> : vector<64x32xf32>
    %395 = tpu.matmul %394, %393, %cst_162 {dimension_numbers = #tpu.dot_dimension_numbers<[1], [0], [0], [1], [0, 0, 1, 1], [], []>} : vector<64x32xbf16>, vector<32x32xbf16>, vector<64x32xf32> -> vector<64x32xf32>
    %396 = vector.extract_strided_slice %385 {offsets = [0, 32], sizes = [1, 32], strides = [1, 1]} : vector<1x64xf32> to vector<1x32xf32>
    %397 = vector.broadcast %396 : vector<1x32xf32> to vector<64x32xf32>
    %398 = arith.addf %395, %397 : vector<64x32xf32>
    %c2_163 = arith.constant 2 : index
    %c0_164 = arith.constant 0 : index
    %c0_165 = arith.constant 0 : index
    %399 = vector.load %arg15[%c2_163, %c0_164, %c0_165] : memref<5x32x32xbf16, #tpu.memory_space<vmem>>, vector<1x32x32xbf16>
    %400 = vector.shape_cast %399 : vector<1x32x32xbf16> to vector<32x32xbf16>
    %401 = arith.truncf %226 : vector<64x32xf32> to vector<64x32xbf16>
    %cst_166 = arith.constant dense<0.000000e+00> : vector<64x32xf32>
    %402 = tpu.matmul %401, %400, %cst_166 {dimension_numbers = #tpu.dot_dimension_numbers<[1], [0], [0], [1], [0, 0, 1, 1], [], []>} : vector<64x32xbf16>, vector<32x32xbf16>, vector<64x32xf32> -> vector<64x32xf32>
    %c2_167 = arith.constant 2 : index
    %c0_168 = arith.constant 0 : index
    %c0_169 = arith.constant 0 : index
    %403 = vector.load %arg16[%c2_167, %c0_168, %c0_169] : memref<5x1x32xf32, #tpu.memory_space<vmem>>, vector<1x1x32xf32>
    %404 = vector.shape_cast %403 : vector<1x1x32xf32> to vector<1x32xf32>
    %405 = vector.broadcast %404 : vector<1x32xf32> to vector<64x32xf32>
    %406 = arith.addf %402, %405 : vector<64x32xf32>
    %c2_170 = arith.constant 2 : index
    %c0_171 = arith.constant 0 : index
    %c0_172 = arith.constant 0 : index
    %407 = vector.load %arg17[%c2_170, %c0_171, %c0_172] : memref<5x32x32xbf16, #tpu.memory_space<vmem>>, vector<1x32x32xbf16>
    %408 = vector.shape_cast %407 : vector<1x32x32xbf16> to vector<32x32xbf16>
    %c2_173 = arith.constant 2 : index
    %c0_174 = arith.constant 0 : index
    %c0_175 = arith.constant 0 : index
    %409 = vector.load %arg18[%c2_173, %c0_174, %c0_175] : memref<5x1x32xf32, #tpu.memory_space<vmem>>, vector<1x1x32xf32>
    %410 = vector.shape_cast %409 : vector<1x1x32xf32> to vector<1x32xf32>
    %411 = vector.extract_strided_slice %392 {offsets = [0, 0], sizes = [10, 8], strides = [1, 1]} : vector<10x32xf32> to vector<10x8xf32>
    %412 = arith.truncf %411 : vector<10x8xf32> to vector<10x8xbf16>
    %413 = vector.extract_strided_slice %398 {offsets = [0, 0], sizes = [64, 8], strides = [1, 1]} : vector<64x32xf32> to vector<64x8xf32>
    %414 = arith.truncf %413 : vector<64x8xf32> to vector<64x8xbf16>
    %cst_176 = arith.constant dense<0.000000e+00> : vector<10x64xf32>
    %415 = tpu.matmul %412, %414, %cst_176 {dimension_numbers = #tpu.dot_dimension_numbers<[1], [1], [0], [0], [0, 0, 1, 0], [], []>} : vector<10x8xbf16>, vector<64x8xbf16>, vector<10x64xf32> -> vector<10x64xf32>
    %cst_177 = arith.constant 0.353553385 : f32
    %416 = vector.broadcast %cst_177 : f32 to vector<10x64xf32>
    %417 = arith.mulf %415, %416 : vector<10x64xf32>
    %418 = vector.broadcast %17 : vector<1x64xf32> to vector<10x64xf32>
    %419 = arith.addf %417, %418 : vector<10x64xf32>
    %cst_178 = arith.constant dense<0xFF800000> : vector<10xf32>
    %420 = vector.multi_reduction <maximumf>, %419, %cst_178 [1] : vector<10x64xf32> to vector<10xf32>
    %421 = vector.shape_cast %420 : vector<10xf32> to vector<10x1xf32>
    %422 = vector.broadcast %421 : vector<10x1xf32> to vector<10x64xf32>
    %423 = arith.subf %419, %422 : vector<10x64xf32>
    %424 = math.exp %423 : vector<10x64xf32>
    %cst_179 = arith.constant dense<0.000000e+00> : vector<10xf32>
    %425 = vector.multi_reduction <add>, %424, %cst_179 [1] : vector<10x64xf32> to vector<10xf32>
    %426 = vector.shape_cast %425 : vector<10xf32> to vector<10x1xf32>
    %427 = tpu.reciprocal %426 {approx = true} : vector<10x1xf32> -> vector<10x1xf32>
    %428 = vector.broadcast %427 : vector<10x1xf32> to vector<10x64xf32>
    %429 = arith.mulf %424, %428 : vector<10x64xf32>
    %430 = vector.extract_strided_slice %406 {offsets = [0, 0], sizes = [64, 8], strides = [1, 1]} : vector<64x32xf32> to vector<64x8xf32>
    %431 = arith.truncf %429 : vector<10x64xf32> to vector<10x64xbf16>
    %432 = arith.truncf %430 : vector<64x8xf32> to vector<64x8xbf16>
    %cst_180 = arith.constant dense<0.000000e+00> : vector<10x8xf32>
    %433 = tpu.matmul %431, %432, %cst_180 {dimension_numbers = #tpu.dot_dimension_numbers<[1], [0], [0], [1], [0, 0, 1, 1], [], []>} : vector<10x64xbf16>, vector<64x8xbf16>, vector<10x8xf32> -> vector<10x8xf32>
    %434 = vector.extract_strided_slice %392 {offsets = [0, 8], sizes = [10, 8], strides = [1, 1]} : vector<10x32xf32> to vector<10x8xf32>
    %435 = arith.truncf %434 : vector<10x8xf32> to vector<10x8xbf16>
    %436 = vector.extract_strided_slice %398 {offsets = [0, 8], sizes = [64, 8], strides = [1, 1]} : vector<64x32xf32> to vector<64x8xf32>
    %437 = arith.truncf %436 : vector<64x8xf32> to vector<64x8xbf16>
    %cst_181 = arith.constant dense<0.000000e+00> : vector<10x64xf32>
    %438 = tpu.matmul %435, %437, %cst_181 {dimension_numbers = #tpu.dot_dimension_numbers<[1], [1], [0], [0], [0, 0, 1, 0], [], []>} : vector<10x8xbf16>, vector<64x8xbf16>, vector<10x64xf32> -> vector<10x64xf32>
    %cst_182 = arith.constant 0.353553385 : f32
    %439 = vector.broadcast %cst_182 : f32 to vector<10x64xf32>
    %440 = arith.mulf %438, %439 : vector<10x64xf32>
    %441 = vector.broadcast %17 : vector<1x64xf32> to vector<10x64xf32>
    %442 = arith.addf %440, %441 : vector<10x64xf32>
    %cst_183 = arith.constant dense<0xFF800000> : vector<10xf32>
    %443 = vector.multi_reduction <maximumf>, %442, %cst_183 [1] : vector<10x64xf32> to vector<10xf32>
    %444 = vector.shape_cast %443 : vector<10xf32> to vector<10x1xf32>
    %445 = vector.broadcast %444 : vector<10x1xf32> to vector<10x64xf32>
    %446 = arith.subf %442, %445 : vector<10x64xf32>
    %447 = math.exp %446 : vector<10x64xf32>
    %cst_184 = arith.constant dense<0.000000e+00> : vector<10xf32>
    %448 = vector.multi_reduction <add>, %447, %cst_184 [1] : vector<10x64xf32> to vector<10xf32>
    %449 = vector.shape_cast %448 : vector<10xf32> to vector<10x1xf32>
    %450 = tpu.reciprocal %449 {approx = true} : vector<10x1xf32> -> vector<10x1xf32>
    %451 = vector.broadcast %450 : vector<10x1xf32> to vector<10x64xf32>
    %452 = arith.mulf %447, %451 : vector<10x64xf32>
    %453 = vector.extract_strided_slice %406 {offsets = [0, 8], sizes = [64, 8], strides = [1, 1]} : vector<64x32xf32> to vector<64x8xf32>
    %454 = arith.truncf %452 : vector<10x64xf32> to vector<10x64xbf16>
    %455 = arith.truncf %453 : vector<64x8xf32> to vector<64x8xbf16>
    %cst_185 = arith.constant dense<0.000000e+00> : vector<10x8xf32>
    %456 = tpu.matmul %454, %455, %cst_185 {dimension_numbers = #tpu.dot_dimension_numbers<[1], [0], [0], [1], [0, 0, 1, 1], [], []>} : vector<10x64xbf16>, vector<64x8xbf16>, vector<10x8xf32> -> vector<10x8xf32>
    %457 = vector.extract_strided_slice %392 {offsets = [0, 16], sizes = [10, 8], strides = [1, 1]} : vector<10x32xf32> to vector<10x8xf32>
    %458 = arith.truncf %457 : vector<10x8xf32> to vector<10x8xbf16>
    %459 = vector.extract_strided_slice %398 {offsets = [0, 16], sizes = [64, 8], strides = [1, 1]} : vector<64x32xf32> to vector<64x8xf32>
    %460 = arith.truncf %459 : vector<64x8xf32> to vector<64x8xbf16>
    %cst_186 = arith.constant dense<0.000000e+00> : vector<10x64xf32>
    %461 = tpu.matmul %458, %460, %cst_186 {dimension_numbers = #tpu.dot_dimension_numbers<[1], [1], [0], [0], [0, 0, 1, 0], [], []>} : vector<10x8xbf16>, vector<64x8xbf16>, vector<10x64xf32> -> vector<10x64xf32>
    %cst_187 = arith.constant 0.353553385 : f32
    %462 = vector.broadcast %cst_187 : f32 to vector<10x64xf32>
    %463 = arith.mulf %461, %462 : vector<10x64xf32>
    %464 = vector.broadcast %17 : vector<1x64xf32> to vector<10x64xf32>
    %465 = arith.addf %463, %464 : vector<10x64xf32>
    %cst_188 = arith.constant dense<0xFF800000> : vector<10xf32>
    %466 = vector.multi_reduction <maximumf>, %465, %cst_188 [1] : vector<10x64xf32> to vector<10xf32>
    %467 = vector.shape_cast %466 : vector<10xf32> to vector<10x1xf32>
    %468 = vector.broadcast %467 : vector<10x1xf32> to vector<10x64xf32>
    %469 = arith.subf %465, %468 : vector<10x64xf32>
    %470 = math.exp %469 : vector<10x64xf32>
    %cst_189 = arith.constant dense<0.000000e+00> : vector<10xf32>
    %471 = vector.multi_reduction <add>, %470, %cst_189 [1] : vector<10x64xf32> to vector<10xf32>
    %472 = vector.shape_cast %471 : vector<10xf32> to vector<10x1xf32>
    %473 = tpu.reciprocal %472 {approx = true} : vector<10x1xf32> -> vector<10x1xf32>
    %474 = vector.broadcast %473 : vector<10x1xf32> to vector<10x64xf32>
    %475 = arith.mulf %470, %474 : vector<10x64xf32>
    %476 = vector.extract_strided_slice %406 {offsets = [0, 16], sizes = [64, 8], strides = [1, 1]} : vector<64x32xf32> to vector<64x8xf32>
    %477 = arith.truncf %475 : vector<10x64xf32> to vector<10x64xbf16>
    %478 = arith.truncf %476 : vector<64x8xf32> to vector<64x8xbf16>
    %cst_190 = arith.constant dense<0.000000e+00> : vector<10x8xf32>
    %479 = tpu.matmul %477, %478, %cst_190 {dimension_numbers = #tpu.dot_dimension_numbers<[1], [0], [0], [1], [0, 0, 1, 1], [], []>} : vector<10x64xbf16>, vector<64x8xbf16>, vector<10x8xf32> -> vector<10x8xf32>
    %480 = vector.extract_strided_slice %392 {offsets = [0, 24], sizes = [10, 8], strides = [1, 1]} : vector<10x32xf32> to vector<10x8xf32>
    %481 = arith.truncf %480 : vector<10x8xf32> to vector<10x8xbf16>
    %482 = vector.extract_strided_slice %398 {offsets = [0, 24], sizes = [64, 8], strides = [1, 1]} : vector<64x32xf32> to vector<64x8xf32>
    %483 = arith.truncf %482 : vector<64x8xf32> to vector<64x8xbf16>
    %cst_191 = arith.constant dense<0.000000e+00> : vector<10x64xf32>
    %484 = tpu.matmul %481, %483, %cst_191 {dimension_numbers = #tpu.dot_dimension_numbers<[1], [1], [0], [0], [0, 0, 1, 0], [], []>} : vector<10x8xbf16>, vector<64x8xbf16>, vector<10x64xf32> -> vector<10x64xf32>
    %cst_192 = arith.constant 0.353553385 : f32
    %485 = vector.broadcast %cst_192 : f32 to vector<10x64xf32>
    %486 = arith.mulf %484, %485 : vector<10x64xf32>
    %487 = vector.broadcast %17 : vector<1x64xf32> to vector<10x64xf32>
    %488 = arith.addf %486, %487 : vector<10x64xf32>
    %cst_193 = arith.constant dense<0xFF800000> : vector<10xf32>
    %489 = vector.multi_reduction <maximumf>, %488, %cst_193 [1] : vector<10x64xf32> to vector<10xf32>
    %490 = vector.shape_cast %489 : vector<10xf32> to vector<10x1xf32>
    %491 = vector.broadcast %490 : vector<10x1xf32> to vector<10x64xf32>
    %492 = arith.subf %488, %491 : vector<10x64xf32>
    %493 = math.exp %492 : vector<10x64xf32>
    %cst_194 = arith.constant dense<0.000000e+00> : vector<10xf32>
    %494 = vector.multi_reduction <add>, %493, %cst_194 [1] : vector<10x64xf32> to vector<10xf32>
    %495 = vector.shape_cast %494 : vector<10xf32> to vector<10x1xf32>
    %496 = tpu.reciprocal %495 {approx = true} : vector<10x1xf32> -> vector<10x1xf32>
    %497 = vector.broadcast %496 : vector<10x1xf32> to vector<10x64xf32>
    %498 = arith.mulf %493, %497 : vector<10x64xf32>
    %499 = vector.extract_strided_slice %406 {offsets = [0, 24], sizes = [64, 8], strides = [1, 1]} : vector<64x32xf32> to vector<64x8xf32>
    %500 = arith.truncf %498 : vector<10x64xf32> to vector<10x64xbf16>
    %501 = arith.truncf %499 : vector<64x8xf32> to vector<64x8xbf16>
    %cst_195 = arith.constant dense<0.000000e+00> : vector<10x8xf32>
    %502 = tpu.matmul %500, %501, %cst_195 {dimension_numbers = #tpu.dot_dimension_numbers<[1], [0], [0], [1], [0, 0, 1, 1], [], []>} : vector<10x64xbf16>, vector<64x8xbf16>, vector<10x8xf32> -> vector<10x8xf32>
    %503 = tpu.concatenate %433, %456, %479, %502 in 1 : vector<10x8xf32>, vector<10x8xf32>, vector<10x8xf32>, vector<10x8xf32> -> vector<10x32xf32>
    %504 = arith.truncf %503 : vector<10x32xf32> to vector<10x32xbf16>
    %cst_196 = arith.constant dense<0.000000e+00> : vector<10x32xf32>
    %505 = tpu.matmul %504, %408, %cst_196 {dimension_numbers = #tpu.dot_dimension_numbers<[1], [0], [0], [1], [0, 0, 1, 1], [], []>} : vector<10x32xbf16>, vector<32x32xbf16>, vector<10x32xf32> -> vector<10x32xf32>
    %506 = vector.broadcast %410 : vector<1x32xf32> to vector<10x32xf32>
    %507 = arith.addf %505, %506 : vector<10x32xf32>
    %508 = arith.addf %381, %507 : vector<10x32xf32>
    %c3 = arith.constant 3 : index
    %c0_197 = arith.constant 0 : index
    %509 = vector.load %arg23[%c3, %c0_197] : memref<8x32xf32, #tpu.memory_space<vmem>>, vector<1x32xf32>
    %c3_198 = arith.constant 3 : index
    %c0_199 = arith.constant 0 : index
    %510 = vector.load %arg24[%c3_198, %c0_199] : memref<8x32xf32, #tpu.memory_space<vmem>>, vector<1x32xf32>
    %cst_200 = arith.constant dense<0.000000e+00> : vector<10xf32>
    %511 = vector.multi_reduction <add>, %508, %cst_200 [1] : vector<10x32xf32> to vector<10xf32>
    %512 = vector.shape_cast %511 : vector<10xf32> to vector<10x1xf32>
    %cst_201 = arith.constant 3.200000e+01 : f32
    %513 = vector.broadcast %cst_201 : f32 to vector<10x1xf32>
    %514 = arith.divf %512, %513 : vector<10x1xf32>
    %515 = vector.broadcast %514 : vector<10x1xf32> to vector<10x32xf32>
    %516 = arith.subf %508, %515 : vector<10x32xf32>
    %517 = vector.broadcast %514 : vector<10x1xf32> to vector<10x32xf32>
    %518 = arith.subf %508, %517 : vector<10x32xf32>
    %519 = arith.mulf %516, %518 : vector<10x32xf32>
    %cst_202 = arith.constant dense<0.000000e+00> : vector<10xf32>
    %520 = vector.multi_reduction <add>, %519, %cst_202 [1] : vector<10x32xf32> to vector<10xf32>
    %521 = vector.shape_cast %520 : vector<10xf32> to vector<10x1xf32>
    %cst_203 = arith.constant 3.200000e+01 : f32
    %522 = vector.broadcast %cst_203 : f32 to vector<10x1xf32>
    %523 = arith.divf %521, %522 : vector<10x1xf32>
    %524 = vector.broadcast %514 : vector<10x1xf32> to vector<10x32xf32>
    %525 = arith.subf %508, %524 : vector<10x32xf32>
    %cst_204 = arith.constant 9.99999974E-6 : f32
    %526 = vector.broadcast %cst_204 : f32 to vector<10x1xf32>
    %527 = arith.addf %523, %526 : vector<10x1xf32>
    %528 = math.rsqrt %527 : vector<10x1xf32>
    %529 = vector.broadcast %528 : vector<10x1xf32> to vector<10x32xf32>
    %530 = arith.mulf %525, %529 : vector<10x32xf32>
    %531 = vector.broadcast %509 : vector<1x32xf32> to vector<10x32xf32>
    %532 = arith.mulf %530, %531 : vector<10x32xf32>
    %533 = vector.broadcast %510 : vector<1x32xf32> to vector<10x32xf32>
    %534 = arith.addf %532, %533 : vector<10x32xf32>
    %c1_205 = arith.constant 1 : index
    %c0_206 = arith.constant 0 : index
    %c0_207 = arith.constant 0 : index
    %535 = vector.load %arg19[%c1_205, %c0_206, %c0_207] : memref<3x32x64xbf16, #tpu.memory_space<vmem>>, vector<1x32x64xbf16>
    %536 = vector.shape_cast %535 : vector<1x32x64xbf16> to vector<32x64xbf16>
    %537 = arith.truncf %534 : vector<10x32xf32> to vector<10x32xbf16>
    %cst_208 = arith.constant dense<0.000000e+00> : vector<10x64xf32>
    %538 = tpu.matmul %537, %536, %cst_208 {dimension_numbers = #tpu.dot_dimension_numbers<[1], [0], [0], [1], [0, 0, 1, 1], [], []>} : vector<10x32xbf16>, vector<32x64xbf16>, vector<10x64xf32> -> vector<10x64xf32>
    %c1_209 = arith.constant 1 : index
    %c0_210 = arith.constant 0 : index
    %c0_211 = arith.constant 0 : index
    %539 = vector.load %arg20[%c1_209, %c0_210, %c0_211] : memref<3x1x64xf32, #tpu.memory_space<vmem>>, vector<1x1x64xf32>
    %540 = vector.shape_cast %539 : vector<1x1x64xf32> to vector<1x64xf32>
    %541 = vector.broadcast %540 : vector<1x64xf32> to vector<10x64xf32>
    %542 = arith.addf %538, %541 : vector<10x64xf32>
    %cst_212 = arith.constant 0.000000e+00 : f32
    %543 = vector.broadcast %cst_212 : f32 to vector<10x64xf32>
    %544 = arith.maximumf %542, %543 : vector<10x64xf32>
    %c1_213 = arith.constant 1 : index
    %c0_214 = arith.constant 0 : index
    %c0_215 = arith.constant 0 : index
    %545 = vector.load %arg21[%c1_213, %c0_214, %c0_215] : memref<3x64x32xbf16, #tpu.memory_space<vmem>>, vector<1x64x32xbf16>
    %546 = vector.shape_cast %545 : vector<1x64x32xbf16> to vector<64x32xbf16>
    %547 = arith.truncf %544 : vector<10x64xf32> to vector<10x64xbf16>
    %cst_216 = arith.constant dense<0.000000e+00> : vector<10x32xf32>
    %548 = tpu.matmul %547, %546, %cst_216 {dimension_numbers = #tpu.dot_dimension_numbers<[1], [0], [0], [1], [0, 0, 1, 1], [], []>} : vector<10x64xbf16>, vector<64x32xbf16>, vector<10x32xf32> -> vector<10x32xf32>
    %c1_217 = arith.constant 1 : index
    %c0_218 = arith.constant 0 : index
    %c0_219 = arith.constant 0 : index
    %549 = vector.load %arg22[%c1_217, %c0_218, %c0_219] : memref<3x1x32xf32, #tpu.memory_space<vmem>>, vector<1x1x32xf32>
    %550 = vector.shape_cast %549 : vector<1x1x32xf32> to vector<1x32xf32>
    %551 = vector.broadcast %550 : vector<1x32xf32> to vector<10x32xf32>
    %552 = arith.addf %548, %551 : vector<10x32xf32>
    %553 = arith.addf %534, %552 : vector<10x32xf32>
    %c4 = arith.constant 4 : index
    %c0_220 = arith.constant 0 : index
    %554 = vector.load %arg23[%c4, %c0_220] : memref<8x32xf32, #tpu.memory_space<vmem>>, vector<1x32xf32>
    %c4_221 = arith.constant 4 : index
    %c0_222 = arith.constant 0 : index
    %555 = vector.load %arg24[%c4_221, %c0_222] : memref<8x32xf32, #tpu.memory_space<vmem>>, vector<1x32xf32>
    %cst_223 = arith.constant dense<0.000000e+00> : vector<10xf32>
    %556 = vector.multi_reduction <add>, %553, %cst_223 [1] : vector<10x32xf32> to vector<10xf32>
    %557 = vector.shape_cast %556 : vector<10xf32> to vector<10x1xf32>
    %cst_224 = arith.constant 3.200000e+01 : f32
    %558 = vector.broadcast %cst_224 : f32 to vector<10x1xf32>
    %559 = arith.divf %557, %558 : vector<10x1xf32>
    %560 = vector.broadcast %559 : vector<10x1xf32> to vector<10x32xf32>
    %561 = arith.subf %553, %560 : vector<10x32xf32>
    %562 = vector.broadcast %559 : vector<10x1xf32> to vector<10x32xf32>
    %563 = arith.subf %553, %562 : vector<10x32xf32>
    %564 = arith.mulf %561, %563 : vector<10x32xf32>
    %cst_225 = arith.constant dense<0.000000e+00> : vector<10xf32>
    %565 = vector.multi_reduction <add>, %564, %cst_225 [1] : vector<10x32xf32> to vector<10xf32>
    %566 = vector.shape_cast %565 : vector<10xf32> to vector<10x1xf32>
    %cst_226 = arith.constant 3.200000e+01 : f32
    %567 = vector.broadcast %cst_226 : f32 to vector<10x1xf32>
    %568 = arith.divf %566, %567 : vector<10x1xf32>
    %569 = vector.broadcast %559 : vector<10x1xf32> to vector<10x32xf32>
    %570 = arith.subf %553, %569 : vector<10x32xf32>
    %cst_227 = arith.constant 9.99999974E-6 : f32
    %571 = vector.broadcast %cst_227 : f32 to vector<10x1xf32>
    %572 = arith.addf %568, %571 : vector<10x1xf32>
    %573 = math.rsqrt %572 : vector<10x1xf32>
    %574 = vector.broadcast %573 : vector<10x1xf32> to vector<10x32xf32>
    %575 = arith.mulf %570, %574 : vector<10x32xf32>
    %576 = vector.broadcast %554 : vector<1x32xf32> to vector<10x32xf32>
    %577 = arith.mulf %575, %576 : vector<10x32xf32>
    %578 = vector.broadcast %555 : vector<1x32xf32> to vector<10x32xf32>
    %579 = arith.addf %577, %578 : vector<10x32xf32>
    %580 = arith.addf %579, %232 : vector<10x32xf32>
    %c3_228 = arith.constant 3 : index
    %c0_229 = arith.constant 0 : index
    %c0_230 = arith.constant 0 : index
    %581 = vector.load %arg13[%c3_228, %c0_229, %c0_230] : memref<5x32x64xbf16, #tpu.memory_space<vmem>>, vector<1x32x64xbf16>
    %582 = vector.shape_cast %581 : vector<1x32x64xbf16> to vector<32x64xbf16>
    %583 = arith.truncf %580 : vector<10x32xf32> to vector<10x32xbf16>
    %cst_231 = arith.constant dense<0.000000e+00> : vector<10x64xf32>
    %584 = tpu.matmul %583, %582, %cst_231 {dimension_numbers = #tpu.dot_dimension_numbers<[1], [0], [0], [1], [0, 0, 1, 1], [], []>} : vector<10x32xbf16>, vector<32x64xbf16>, vector<10x64xf32> -> vector<10x64xf32>
    %c3_232 = arith.constant 3 : index
    %c0_233 = arith.constant 0 : index
    %c0_234 = arith.constant 0 : index
    %585 = vector.load %arg14[%c3_232, %c0_233, %c0_234] : memref<5x1x64xf32, #tpu.memory_space<vmem>>, vector<1x1x64xf32>
    %586 = vector.shape_cast %585 : vector<1x1x64xf32> to vector<1x64xf32>
    %587 = vector.broadcast %586 : vector<1x64xf32> to vector<10x64xf32>
    %588 = arith.addf %584, %587 : vector<10x64xf32>
    %c3_235 = arith.constant 3 : index
    %c0_236 = arith.constant 0 : index
    %c0_237 = arith.constant 0 : index
    %589 = vector.load %arg15[%c3_235, %c0_236, %c0_237] : memref<5x32x32xbf16, #tpu.memory_space<vmem>>, vector<1x32x32xbf16>
    %590 = vector.shape_cast %589 : vector<1x32x32xbf16> to vector<32x32xbf16>
    %591 = arith.truncf %579 : vector<10x32xf32> to vector<10x32xbf16>
    %cst_238 = arith.constant dense<0.000000e+00> : vector<10x32xf32>
    %592 = tpu.matmul %591, %590, %cst_238 {dimension_numbers = #tpu.dot_dimension_numbers<[1], [0], [0], [1], [0, 0, 1, 1], [], []>} : vector<10x32xbf16>, vector<32x32xbf16>, vector<10x32xf32> -> vector<10x32xf32>
    %c3_239 = arith.constant 3 : index
    %c0_240 = arith.constant 0 : index
    %c0_241 = arith.constant 0 : index
    %593 = vector.load %arg16[%c3_239, %c0_240, %c0_241] : memref<5x1x32xf32, #tpu.memory_space<vmem>>, vector<1x1x32xf32>
    %594 = vector.shape_cast %593 : vector<1x1x32xf32> to vector<1x32xf32>
    %595 = vector.broadcast %594 : vector<1x32xf32> to vector<10x32xf32>
    %596 = arith.addf %592, %595 : vector<10x32xf32>
    %597 = vector.extract_strided_slice %588 {offsets = [0, 0], sizes = [10, 32], strides = [1, 1]} : vector<10x64xf32> to vector<10x32xf32>
    %598 = vector.extract_strided_slice %588 {offsets = [0, 32], sizes = [10, 32], strides = [1, 1]} : vector<10x64xf32> to vector<10x32xf32>
    %c3_242 = arith.constant 3 : index
    %c0_243 = arith.constant 0 : index
    %c0_244 = arith.constant 0 : index
    %599 = vector.load %arg17[%c3_242, %c0_243, %c0_244] : memref<5x32x32xbf16, #tpu.memory_space<vmem>>, vector<1x32x32xbf16>
    %600 = vector.shape_cast %599 : vector<1x32x32xbf16> to vector<32x32xbf16>
    %c3_245 = arith.constant 3 : index
    %c0_246 = arith.constant 0 : index
    %c0_247 = arith.constant 0 : index
    %601 = vector.load %arg18[%c3_245, %c0_246, %c0_247] : memref<5x1x32xf32, #tpu.memory_space<vmem>>, vector<1x1x32xf32>
    %602 = vector.shape_cast %601 : vector<1x1x32xf32> to vector<1x32xf32>
    %603 = vector.extract_strided_slice %597 {offsets = [0, 0], sizes = [10, 8], strides = [1, 1]} : vector<10x32xf32> to vector<10x8xf32>
    %604 = arith.truncf %603 : vector<10x8xf32> to vector<10x8xbf16>
    %605 = vector.extract_strided_slice %598 {offsets = [0, 0], sizes = [10, 8], strides = [1, 1]} : vector<10x32xf32> to vector<10x8xf32>
    %606 = arith.truncf %605 : vector<10x8xf32> to vector<10x8xbf16>
    %cst_248 = arith.constant dense<0.000000e+00> : vector<10x10xf32>
    %607 = tpu.matmul %604, %606, %cst_248 {dimension_numbers = #tpu.dot_dimension_numbers<[1], [1], [0], [0], [0, 0, 1, 0], [], []>} : vector<10x8xbf16>, vector<10x8xbf16>, vector<10x10xf32> -> vector<10x10xf32>
    %cst_249 = arith.constant 0.353553385 : f32
    %608 = vector.broadcast %cst_249 : f32 to vector<10x10xf32>
    %609 = arith.mulf %607, %608 : vector<10x10xf32>
    %610 = vector.broadcast %234 : vector<1x10xf32> to vector<10x10xf32>
    %611 = arith.addf %609, %610 : vector<10x10xf32>
    %cst_250 = arith.constant dense<0xFF800000> : vector<10xf32>
    %612 = vector.multi_reduction <maximumf>, %611, %cst_250 [1] : vector<10x10xf32> to vector<10xf32>
    %613 = vector.shape_cast %612 : vector<10xf32> to vector<10x1xf32>
    %614 = vector.broadcast %613 : vector<10x1xf32> to vector<10x10xf32>
    %615 = arith.subf %611, %614 : vector<10x10xf32>
    %616 = math.exp %615 : vector<10x10xf32>
    %cst_251 = arith.constant dense<0.000000e+00> : vector<10xf32>
    %617 = vector.multi_reduction <add>, %616, %cst_251 [1] : vector<10x10xf32> to vector<10xf32>
    %618 = vector.shape_cast %617 : vector<10xf32> to vector<10x1xf32>
    %619 = tpu.reciprocal %618 {approx = true} : vector<10x1xf32> -> vector<10x1xf32>
    %620 = vector.broadcast %619 : vector<10x1xf32> to vector<10x10xf32>
    %621 = arith.mulf %616, %620 : vector<10x10xf32>
    %622 = vector.extract_strided_slice %596 {offsets = [0, 0], sizes = [10, 8], strides = [1, 1]} : vector<10x32xf32> to vector<10x8xf32>
    %623 = arith.truncf %621 : vector<10x10xf32> to vector<10x10xbf16>
    %624 = arith.truncf %622 : vector<10x8xf32> to vector<10x8xbf16>
    %cst_252 = arith.constant dense<0.000000e+00> : vector<10x8xf32>
    %625 = tpu.matmul %623, %624, %cst_252 {dimension_numbers = #tpu.dot_dimension_numbers<[1], [0], [0], [1], [0, 0, 1, 1], [], []>} : vector<10x10xbf16>, vector<10x8xbf16>, vector<10x8xf32> -> vector<10x8xf32>
    %626 = vector.extract_strided_slice %597 {offsets = [0, 8], sizes = [10, 8], strides = [1, 1]} : vector<10x32xf32> to vector<10x8xf32>
    %627 = arith.truncf %626 : vector<10x8xf32> to vector<10x8xbf16>
    %628 = vector.extract_strided_slice %598 {offsets = [0, 8], sizes = [10, 8], strides = [1, 1]} : vector<10x32xf32> to vector<10x8xf32>
    %629 = arith.truncf %628 : vector<10x8xf32> to vector<10x8xbf16>
    %cst_253 = arith.constant dense<0.000000e+00> : vector<10x10xf32>
    %630 = tpu.matmul %627, %629, %cst_253 {dimension_numbers = #tpu.dot_dimension_numbers<[1], [1], [0], [0], [0, 0, 1, 0], [], []>} : vector<10x8xbf16>, vector<10x8xbf16>, vector<10x10xf32> -> vector<10x10xf32>
    %cst_254 = arith.constant 0.353553385 : f32
    %631 = vector.broadcast %cst_254 : f32 to vector<10x10xf32>
    %632 = arith.mulf %630, %631 : vector<10x10xf32>
    %633 = vector.broadcast %234 : vector<1x10xf32> to vector<10x10xf32>
    %634 = arith.addf %632, %633 : vector<10x10xf32>
    %cst_255 = arith.constant dense<0xFF800000> : vector<10xf32>
    %635 = vector.multi_reduction <maximumf>, %634, %cst_255 [1] : vector<10x10xf32> to vector<10xf32>
    %636 = vector.shape_cast %635 : vector<10xf32> to vector<10x1xf32>
    %637 = vector.broadcast %636 : vector<10x1xf32> to vector<10x10xf32>
    %638 = arith.subf %634, %637 : vector<10x10xf32>
    %639 = math.exp %638 : vector<10x10xf32>
    %cst_256 = arith.constant dense<0.000000e+00> : vector<10xf32>
    %640 = vector.multi_reduction <add>, %639, %cst_256 [1] : vector<10x10xf32> to vector<10xf32>
    %641 = vector.shape_cast %640 : vector<10xf32> to vector<10x1xf32>
    %642 = tpu.reciprocal %641 {approx = true} : vector<10x1xf32> -> vector<10x1xf32>
    %643 = vector.broadcast %642 : vector<10x1xf32> to vector<10x10xf32>
    %644 = arith.mulf %639, %643 : vector<10x10xf32>
    %645 = vector.extract_strided_slice %596 {offsets = [0, 8], sizes = [10, 8], strides = [1, 1]} : vector<10x32xf32> to vector<10x8xf32>
    %646 = arith.truncf %644 : vector<10x10xf32> to vector<10x10xbf16>
    %647 = arith.truncf %645 : vector<10x8xf32> to vector<10x8xbf16>
    %cst_257 = arith.constant dense<0.000000e+00> : vector<10x8xf32>
    %648 = tpu.matmul %646, %647, %cst_257 {dimension_numbers = #tpu.dot_dimension_numbers<[1], [0], [0], [1], [0, 0, 1, 1], [], []>} : vector<10x10xbf16>, vector<10x8xbf16>, vector<10x8xf32> -> vector<10x8xf32>
    %649 = vector.extract_strided_slice %597 {offsets = [0, 16], sizes = [10, 8], strides = [1, 1]} : vector<10x32xf32> to vector<10x8xf32>
    %650 = arith.truncf %649 : vector<10x8xf32> to vector<10x8xbf16>
    %651 = vector.extract_strided_slice %598 {offsets = [0, 16], sizes = [10, 8], strides = [1, 1]} : vector<10x32xf32> to vector<10x8xf32>
    %652 = arith.truncf %651 : vector<10x8xf32> to vector<10x8xbf16>
    %cst_258 = arith.constant dense<0.000000e+00> : vector<10x10xf32>
    %653 = tpu.matmul %650, %652, %cst_258 {dimension_numbers = #tpu.dot_dimension_numbers<[1], [1], [0], [0], [0, 0, 1, 0], [], []>} : vector<10x8xbf16>, vector<10x8xbf16>, vector<10x10xf32> -> vector<10x10xf32>
    %cst_259 = arith.constant 0.353553385 : f32
    %654 = vector.broadcast %cst_259 : f32 to vector<10x10xf32>
    %655 = arith.mulf %653, %654 : vector<10x10xf32>
    %656 = vector.broadcast %234 : vector<1x10xf32> to vector<10x10xf32>
    %657 = arith.addf %655, %656 : vector<10x10xf32>
    %cst_260 = arith.constant dense<0xFF800000> : vector<10xf32>
    %658 = vector.multi_reduction <maximumf>, %657, %cst_260 [1] : vector<10x10xf32> to vector<10xf32>
    %659 = vector.shape_cast %658 : vector<10xf32> to vector<10x1xf32>
    %660 = vector.broadcast %659 : vector<10x1xf32> to vector<10x10xf32>
    %661 = arith.subf %657, %660 : vector<10x10xf32>
    %662 = math.exp %661 : vector<10x10xf32>
    %cst_261 = arith.constant dense<0.000000e+00> : vector<10xf32>
    %663 = vector.multi_reduction <add>, %662, %cst_261 [1] : vector<10x10xf32> to vector<10xf32>
    %664 = vector.shape_cast %663 : vector<10xf32> to vector<10x1xf32>
    %665 = tpu.reciprocal %664 {approx = true} : vector<10x1xf32> -> vector<10x1xf32>
    %666 = vector.broadcast %665 : vector<10x1xf32> to vector<10x10xf32>
    %667 = arith.mulf %662, %666 : vector<10x10xf32>
    %668 = vector.extract_strided_slice %596 {offsets = [0, 16], sizes = [10, 8], strides = [1, 1]} : vector<10x32xf32> to vector<10x8xf32>
    %669 = arith.truncf %667 : vector<10x10xf32> to vector<10x10xbf16>
    %670 = arith.truncf %668 : vector<10x8xf32> to vector<10x8xbf16>
    %cst_262 = arith.constant dense<0.000000e+00> : vector<10x8xf32>
    %671 = tpu.matmul %669, %670, %cst_262 {dimension_numbers = #tpu.dot_dimension_numbers<[1], [0], [0], [1], [0, 0, 1, 1], [], []>} : vector<10x10xbf16>, vector<10x8xbf16>, vector<10x8xf32> -> vector<10x8xf32>
    %672 = vector.extract_strided_slice %597 {offsets = [0, 24], sizes = [10, 8], strides = [1, 1]} : vector<10x32xf32> to vector<10x8xf32>
    %673 = arith.truncf %672 : vector<10x8xf32> to vector<10x8xbf16>
    %674 = vector.extract_strided_slice %598 {offsets = [0, 24], sizes = [10, 8], strides = [1, 1]} : vector<10x32xf32> to vector<10x8xf32>
    %675 = arith.truncf %674 : vector<10x8xf32> to vector<10x8xbf16>
    %cst_263 = arith.constant dense<0.000000e+00> : vector<10x10xf32>
    %676 = tpu.matmul %673, %675, %cst_263 {dimension_numbers = #tpu.dot_dimension_numbers<[1], [1], [0], [0], [0, 0, 1, 0], [], []>} : vector<10x8xbf16>, vector<10x8xbf16>, vector<10x10xf32> -> vector<10x10xf32>
    %cst_264 = arith.constant 0.353553385 : f32
    %677 = vector.broadcast %cst_264 : f32 to vector<10x10xf32>
    %678 = arith.mulf %676, %677 : vector<10x10xf32>
    %679 = vector.broadcast %234 : vector<1x10xf32> to vector<10x10xf32>
    %680 = arith.addf %678, %679 : vector<10x10xf32>
    %cst_265 = arith.constant dense<0xFF800000> : vector<10xf32>
    %681 = vector.multi_reduction <maximumf>, %680, %cst_265 [1] : vector<10x10xf32> to vector<10xf32>
    %682 = vector.shape_cast %681 : vector<10xf32> to vector<10x1xf32>
    %683 = vector.broadcast %682 : vector<10x1xf32> to vector<10x10xf32>
    %684 = arith.subf %680, %683 : vector<10x10xf32>
    %685 = math.exp %684 : vector<10x10xf32>
    %cst_266 = arith.constant dense<0.000000e+00> : vector<10xf32>
    %686 = vector.multi_reduction <add>, %685, %cst_266 [1] : vector<10x10xf32> to vector<10xf32>
    %687 = vector.shape_cast %686 : vector<10xf32> to vector<10x1xf32>
    %688 = tpu.reciprocal %687 {approx = true} : vector<10x1xf32> -> vector<10x1xf32>
    %689 = vector.broadcast %688 : vector<10x1xf32> to vector<10x10xf32>
    %690 = arith.mulf %685, %689 : vector<10x10xf32>
    %691 = vector.extract_strided_slice %596 {offsets = [0, 24], sizes = [10, 8], strides = [1, 1]} : vector<10x32xf32> to vector<10x8xf32>
    %692 = arith.truncf %690 : vector<10x10xf32> to vector<10x10xbf16>
    %693 = arith.truncf %691 : vector<10x8xf32> to vector<10x8xbf16>
    %cst_267 = arith.constant dense<0.000000e+00> : vector<10x8xf32>
    %694 = tpu.matmul %692, %693, %cst_267 {dimension_numbers = #tpu.dot_dimension_numbers<[1], [0], [0], [1], [0, 0, 1, 1], [], []>} : vector<10x10xbf16>, vector<10x8xbf16>, vector<10x8xf32> -> vector<10x8xf32>
    %695 = tpu.concatenate %625, %648, %671, %694 in 1 : vector<10x8xf32>, vector<10x8xf32>, vector<10x8xf32>, vector<10x8xf32> -> vector<10x32xf32>
    %696 = arith.truncf %695 : vector<10x32xf32> to vector<10x32xbf16>
    %cst_268 = arith.constant dense<0.000000e+00> : vector<10x32xf32>
    %697 = tpu.matmul %696, %600, %cst_268 {dimension_numbers = #tpu.dot_dimension_numbers<[1], [0], [0], [1], [0, 0, 1, 1], [], []>} : vector<10x32xbf16>, vector<32x32xbf16>, vector<10x32xf32> -> vector<10x32xf32>
    %698 = vector.broadcast %602 : vector<1x32xf32> to vector<10x32xf32>
    %699 = arith.addf %697, %698 : vector<10x32xf32>
    %700 = arith.addf %579, %699 : vector<10x32xf32>
    %c5 = arith.constant 5 : index
    %c0_269 = arith.constant 0 : index
    %701 = vector.load %arg23[%c5, %c0_269] : memref<8x32xf32, #tpu.memory_space<vmem>>, vector<1x32xf32>
    %c5_270 = arith.constant 5 : index
    %c0_271 = arith.constant 0 : index
    %702 = vector.load %arg24[%c5_270, %c0_271] : memref<8x32xf32, #tpu.memory_space<vmem>>, vector<1x32xf32>
    %cst_272 = arith.constant dense<0.000000e+00> : vector<10xf32>
    %703 = vector.multi_reduction <add>, %700, %cst_272 [1] : vector<10x32xf32> to vector<10xf32>
    %704 = vector.shape_cast %703 : vector<10xf32> to vector<10x1xf32>
    %cst_273 = arith.constant 3.200000e+01 : f32
    %705 = vector.broadcast %cst_273 : f32 to vector<10x1xf32>
    %706 = arith.divf %704, %705 : vector<10x1xf32>
    %707 = vector.broadcast %706 : vector<10x1xf32> to vector<10x32xf32>
    %708 = arith.subf %700, %707 : vector<10x32xf32>
    %709 = vector.broadcast %706 : vector<10x1xf32> to vector<10x32xf32>
    %710 = arith.subf %700, %709 : vector<10x32xf32>
    %711 = arith.mulf %708, %710 : vector<10x32xf32>
    %cst_274 = arith.constant dense<0.000000e+00> : vector<10xf32>
    %712 = vector.multi_reduction <add>, %711, %cst_274 [1] : vector<10x32xf32> to vector<10xf32>
    %713 = vector.shape_cast %712 : vector<10xf32> to vector<10x1xf32>
    %cst_275 = arith.constant 3.200000e+01 : f32
    %714 = vector.broadcast %cst_275 : f32 to vector<10x1xf32>
    %715 = arith.divf %713, %714 : vector<10x1xf32>
    %716 = vector.broadcast %706 : vector<10x1xf32> to vector<10x32xf32>
    %717 = arith.subf %700, %716 : vector<10x32xf32>
    %cst_276 = arith.constant 9.99999974E-6 : f32
    %718 = vector.broadcast %cst_276 : f32 to vector<10x1xf32>
    %719 = arith.addf %715, %718 : vector<10x1xf32>
    %720 = math.rsqrt %719 : vector<10x1xf32>
    %721 = vector.broadcast %720 : vector<10x1xf32> to vector<10x32xf32>
    %722 = arith.mulf %717, %721 : vector<10x32xf32>
    %723 = vector.broadcast %701 : vector<1x32xf32> to vector<10x32xf32>
    %724 = arith.mulf %722, %723 : vector<10x32xf32>
    %725 = vector.broadcast %702 : vector<1x32xf32> to vector<10x32xf32>
    %726 = arith.addf %724, %725 : vector<10x32xf32>
    %c4_277 = arith.constant 4 : index
    %c0_278 = arith.constant 0 : index
    %c0_279 = arith.constant 0 : index
    %727 = vector.load %arg13[%c4_277, %c0_278, %c0_279] : memref<5x32x64xbf16, #tpu.memory_space<vmem>>, vector<1x32x64xbf16>
    %728 = vector.shape_cast %727 : vector<1x32x64xbf16> to vector<32x64xbf16>
    %c4_280 = arith.constant 4 : index
    %c0_281 = arith.constant 0 : index
    %c0_282 = arith.constant 0 : index
    %729 = vector.load %arg14[%c4_280, %c0_281, %c0_282] : memref<5x1x64xf32, #tpu.memory_space<vmem>>, vector<1x1x64xf32>
    %730 = vector.shape_cast %729 : vector<1x1x64xf32> to vector<1x64xf32>
    %731 = arith.addf %726, %232 : vector<10x32xf32>
    %732 = vector.extract_strided_slice %728 {offsets = [0, 0], sizes = [32, 32], strides = [1, 1]} : vector<32x64xbf16> to vector<32x32xbf16>
    %733 = arith.truncf %731 : vector<10x32xf32> to vector<10x32xbf16>
    %cst_283 = arith.constant dense<0.000000e+00> : vector<10x32xf32>
    %734 = tpu.matmul %733, %732, %cst_283 {dimension_numbers = #tpu.dot_dimension_numbers<[1], [0], [0], [1], [0, 0, 1, 1], [], []>} : vector<10x32xbf16>, vector<32x32xbf16>, vector<10x32xf32> -> vector<10x32xf32>
    %735 = vector.extract_strided_slice %730 {offsets = [0, 0], sizes = [1, 32], strides = [1, 1]} : vector<1x64xf32> to vector<1x32xf32>
    %736 = vector.broadcast %735 : vector<1x32xf32> to vector<10x32xf32>
    %737 = arith.addf %734, %736 : vector<10x32xf32>
    %738 = vector.extract_strided_slice %728 {offsets = [0, 32], sizes = [32, 32], strides = [1, 1]} : vector<32x64xbf16> to vector<32x32xbf16>
    %739 = arith.truncf %227 : vector<64x32xf32> to vector<64x32xbf16>
    %cst_284 = arith.constant dense<0.000000e+00> : vector<64x32xf32>
    %740 = tpu.matmul %739, %738, %cst_284 {dimension_numbers = #tpu.dot_dimension_numbers<[1], [0], [0], [1], [0, 0, 1, 1], [], []>} : vector<64x32xbf16>, vector<32x32xbf16>, vector<64x32xf32> -> vector<64x32xf32>
    %741 = vector.extract_strided_slice %730 {offsets = [0, 32], sizes = [1, 32], strides = [1, 1]} : vector<1x64xf32> to vector<1x32xf32>
    %742 = vector.broadcast %741 : vector<1x32xf32> to vector<64x32xf32>
    %743 = arith.addf %740, %742 : vector<64x32xf32>
    %c4_285 = arith.constant 4 : index
    %c0_286 = arith.constant 0 : index
    %c0_287 = arith.constant 0 : index
    %744 = vector.load %arg15[%c4_285, %c0_286, %c0_287] : memref<5x32x32xbf16, #tpu.memory_space<vmem>>, vector<1x32x32xbf16>
    %745 = vector.shape_cast %744 : vector<1x32x32xbf16> to vector<32x32xbf16>
    %746 = arith.truncf %226 : vector<64x32xf32> to vector<64x32xbf16>
    %cst_288 = arith.constant dense<0.000000e+00> : vector<64x32xf32>
    %747 = tpu.matmul %746, %745, %cst_288 {dimension_numbers = #tpu.dot_dimension_numbers<[1], [0], [0], [1], [0, 0, 1, 1], [], []>} : vector<64x32xbf16>, vector<32x32xbf16>, vector<64x32xf32> -> vector<64x32xf32>
    %c4_289 = arith.constant 4 : index
    %c0_290 = arith.constant 0 : index
    %c0_291 = arith.constant 0 : index
    %748 = vector.load %arg16[%c4_289, %c0_290, %c0_291] : memref<5x1x32xf32, #tpu.memory_space<vmem>>, vector<1x1x32xf32>
    %749 = vector.shape_cast %748 : vector<1x1x32xf32> to vector<1x32xf32>
    %750 = vector.broadcast %749 : vector<1x32xf32> to vector<64x32xf32>
    %751 = arith.addf %747, %750 : vector<64x32xf32>
    %c4_292 = arith.constant 4 : index
    %c0_293 = arith.constant 0 : index
    %c0_294 = arith.constant 0 : index
    %752 = vector.load %arg17[%c4_292, %c0_293, %c0_294] : memref<5x32x32xbf16, #tpu.memory_space<vmem>>, vector<1x32x32xbf16>
    %753 = vector.shape_cast %752 : vector<1x32x32xbf16> to vector<32x32xbf16>
    %c4_295 = arith.constant 4 : index
    %c0_296 = arith.constant 0 : index
    %c0_297 = arith.constant 0 : index
    %754 = vector.load %arg18[%c4_295, %c0_296, %c0_297] : memref<5x1x32xf32, #tpu.memory_space<vmem>>, vector<1x1x32xf32>
    %755 = vector.shape_cast %754 : vector<1x1x32xf32> to vector<1x32xf32>
    %756 = vector.extract_strided_slice %737 {offsets = [0, 0], sizes = [10, 8], strides = [1, 1]} : vector<10x32xf32> to vector<10x8xf32>
    %757 = arith.truncf %756 : vector<10x8xf32> to vector<10x8xbf16>
    %758 = vector.extract_strided_slice %743 {offsets = [0, 0], sizes = [64, 8], strides = [1, 1]} : vector<64x32xf32> to vector<64x8xf32>
    %759 = arith.truncf %758 : vector<64x8xf32> to vector<64x8xbf16>
    %cst_298 = arith.constant dense<0.000000e+00> : vector<10x64xf32>
    %760 = tpu.matmul %757, %759, %cst_298 {dimension_numbers = #tpu.dot_dimension_numbers<[1], [1], [0], [0], [0, 0, 1, 0], [], []>} : vector<10x8xbf16>, vector<64x8xbf16>, vector<10x64xf32> -> vector<10x64xf32>
    %cst_299 = arith.constant 0.353553385 : f32
    %761 = vector.broadcast %cst_299 : f32 to vector<10x64xf32>
    %762 = arith.mulf %760, %761 : vector<10x64xf32>
    %763 = vector.broadcast %17 : vector<1x64xf32> to vector<10x64xf32>
    %764 = arith.addf %762, %763 : vector<10x64xf32>
    %cst_300 = arith.constant dense<0xFF800000> : vector<10xf32>
    %765 = vector.multi_reduction <maximumf>, %764, %cst_300 [1] : vector<10x64xf32> to vector<10xf32>
    %766 = vector.shape_cast %765 : vector<10xf32> to vector<10x1xf32>
    %767 = vector.broadcast %766 : vector<10x1xf32> to vector<10x64xf32>
    %768 = arith.subf %764, %767 : vector<10x64xf32>
    %769 = math.exp %768 : vector<10x64xf32>
    %cst_301 = arith.constant dense<0.000000e+00> : vector<10xf32>
    %770 = vector.multi_reduction <add>, %769, %cst_301 [1] : vector<10x64xf32> to vector<10xf32>
    %771 = vector.shape_cast %770 : vector<10xf32> to vector<10x1xf32>
    %772 = tpu.reciprocal %771 {approx = true} : vector<10x1xf32> -> vector<10x1xf32>
    %773 = vector.broadcast %772 : vector<10x1xf32> to vector<10x64xf32>
    %774 = arith.mulf %769, %773 : vector<10x64xf32>
    %775 = vector.extract_strided_slice %751 {offsets = [0, 0], sizes = [64, 8], strides = [1, 1]} : vector<64x32xf32> to vector<64x8xf32>
    %776 = arith.truncf %774 : vector<10x64xf32> to vector<10x64xbf16>
    %777 = arith.truncf %775 : vector<64x8xf32> to vector<64x8xbf16>
    %cst_302 = arith.constant dense<0.000000e+00> : vector<10x8xf32>
    %778 = tpu.matmul %776, %777, %cst_302 {dimension_numbers = #tpu.dot_dimension_numbers<[1], [0], [0], [1], [0, 0, 1, 1], [], []>} : vector<10x64xbf16>, vector<64x8xbf16>, vector<10x8xf32> -> vector<10x8xf32>
    %779 = vector.extract_strided_slice %737 {offsets = [0, 8], sizes = [10, 8], strides = [1, 1]} : vector<10x32xf32> to vector<10x8xf32>
    %780 = arith.truncf %779 : vector<10x8xf32> to vector<10x8xbf16>
    %781 = vector.extract_strided_slice %743 {offsets = [0, 8], sizes = [64, 8], strides = [1, 1]} : vector<64x32xf32> to vector<64x8xf32>
    %782 = arith.truncf %781 : vector<64x8xf32> to vector<64x8xbf16>
    %cst_303 = arith.constant dense<0.000000e+00> : vector<10x64xf32>
    %783 = tpu.matmul %780, %782, %cst_303 {dimension_numbers = #tpu.dot_dimension_numbers<[1], [1], [0], [0], [0, 0, 1, 0], [], []>} : vector<10x8xbf16>, vector<64x8xbf16>, vector<10x64xf32> -> vector<10x64xf32>
    %cst_304 = arith.constant 0.353553385 : f32
    %784 = vector.broadcast %cst_304 : f32 to vector<10x64xf32>
    %785 = arith.mulf %783, %784 : vector<10x64xf32>
    %786 = vector.broadcast %17 : vector<1x64xf32> to vector<10x64xf32>
    %787 = arith.addf %785, %786 : vector<10x64xf32>
    %cst_305 = arith.constant dense<0xFF800000> : vector<10xf32>
    %788 = vector.multi_reduction <maximumf>, %787, %cst_305 [1] : vector<10x64xf32> to vector<10xf32>
    %789 = vector.shape_cast %788 : vector<10xf32> to vector<10x1xf32>
    %790 = vector.broadcast %789 : vector<10x1xf32> to vector<10x64xf32>
    %791 = arith.subf %787, %790 : vector<10x64xf32>
    %792 = math.exp %791 : vector<10x64xf32>
    %cst_306 = arith.constant dense<0.000000e+00> : vector<10xf32>
    %793 = vector.multi_reduction <add>, %792, %cst_306 [1] : vector<10x64xf32> to vector<10xf32>
    %794 = vector.shape_cast %793 : vector<10xf32> to vector<10x1xf32>
    %795 = tpu.reciprocal %794 {approx = true} : vector<10x1xf32> -> vector<10x1xf32>
    %796 = vector.broadcast %795 : vector<10x1xf32> to vector<10x64xf32>
    %797 = arith.mulf %792, %796 : vector<10x64xf32>
    %798 = vector.extract_strided_slice %751 {offsets = [0, 8], sizes = [64, 8], strides = [1, 1]} : vector<64x32xf32> to vector<64x8xf32>
    %799 = arith.truncf %797 : vector<10x64xf32> to vector<10x64xbf16>
    %800 = arith.truncf %798 : vector<64x8xf32> to vector<64x8xbf16>
    %cst_307 = arith.constant dense<0.000000e+00> : vector<10x8xf32>
    %801 = tpu.matmul %799, %800, %cst_307 {dimension_numbers = #tpu.dot_dimension_numbers<[1], [0], [0], [1], [0, 0, 1, 1], [], []>} : vector<10x64xbf16>, vector<64x8xbf16>, vector<10x8xf32> -> vector<10x8xf32>
    %802 = vector.extract_strided_slice %737 {offsets = [0, 16], sizes = [10, 8], strides = [1, 1]} : vector<10x32xf32> to vector<10x8xf32>
    %803 = arith.truncf %802 : vector<10x8xf32> to vector<10x8xbf16>
    %804 = vector.extract_strided_slice %743 {offsets = [0, 16], sizes = [64, 8], strides = [1, 1]} : vector<64x32xf32> to vector<64x8xf32>
    %805 = arith.truncf %804 : vector<64x8xf32> to vector<64x8xbf16>
    %cst_308 = arith.constant dense<0.000000e+00> : vector<10x64xf32>
    %806 = tpu.matmul %803, %805, %cst_308 {dimension_numbers = #tpu.dot_dimension_numbers<[1], [1], [0], [0], [0, 0, 1, 0], [], []>} : vector<10x8xbf16>, vector<64x8xbf16>, vector<10x64xf32> -> vector<10x64xf32>
    %cst_309 = arith.constant 0.353553385 : f32
    %807 = vector.broadcast %cst_309 : f32 to vector<10x64xf32>
    %808 = arith.mulf %806, %807 : vector<10x64xf32>
    %809 = vector.broadcast %17 : vector<1x64xf32> to vector<10x64xf32>
    %810 = arith.addf %808, %809 : vector<10x64xf32>
    %cst_310 = arith.constant dense<0xFF800000> : vector<10xf32>
    %811 = vector.multi_reduction <maximumf>, %810, %cst_310 [1] : vector<10x64xf32> to vector<10xf32>
    %812 = vector.shape_cast %811 : vector<10xf32> to vector<10x1xf32>
    %813 = vector.broadcast %812 : vector<10x1xf32> to vector<10x64xf32>
    %814 = arith.subf %810, %813 : vector<10x64xf32>
    %815 = math.exp %814 : vector<10x64xf32>
    %cst_311 = arith.constant dense<0.000000e+00> : vector<10xf32>
    %816 = vector.multi_reduction <add>, %815, %cst_311 [1] : vector<10x64xf32> to vector<10xf32>
    %817 = vector.shape_cast %816 : vector<10xf32> to vector<10x1xf32>
    %818 = tpu.reciprocal %817 {approx = true} : vector<10x1xf32> -> vector<10x1xf32>
    %819 = vector.broadcast %818 : vector<10x1xf32> to vector<10x64xf32>
    %820 = arith.mulf %815, %819 : vector<10x64xf32>
    %821 = vector.extract_strided_slice %751 {offsets = [0, 16], sizes = [64, 8], strides = [1, 1]} : vector<64x32xf32> to vector<64x8xf32>
    %822 = arith.truncf %820 : vector<10x64xf32> to vector<10x64xbf16>
    %823 = arith.truncf %821 : vector<64x8xf32> to vector<64x8xbf16>
    %cst_312 = arith.constant dense<0.000000e+00> : vector<10x8xf32>
    %824 = tpu.matmul %822, %823, %cst_312 {dimension_numbers = #tpu.dot_dimension_numbers<[1], [0], [0], [1], [0, 0, 1, 1], [], []>} : vector<10x64xbf16>, vector<64x8xbf16>, vector<10x8xf32> -> vector<10x8xf32>
    %825 = vector.extract_strided_slice %737 {offsets = [0, 24], sizes = [10, 8], strides = [1, 1]} : vector<10x32xf32> to vector<10x8xf32>
    %826 = arith.truncf %825 : vector<10x8xf32> to vector<10x8xbf16>
    %827 = vector.extract_strided_slice %743 {offsets = [0, 24], sizes = [64, 8], strides = [1, 1]} : vector<64x32xf32> to vector<64x8xf32>
    %828 = arith.truncf %827 : vector<64x8xf32> to vector<64x8xbf16>
    %cst_313 = arith.constant dense<0.000000e+00> : vector<10x64xf32>
    %829 = tpu.matmul %826, %828, %cst_313 {dimension_numbers = #tpu.dot_dimension_numbers<[1], [1], [0], [0], [0, 0, 1, 0], [], []>} : vector<10x8xbf16>, vector<64x8xbf16>, vector<10x64xf32> -> vector<10x64xf32>
    %cst_314 = arith.constant 0.353553385 : f32
    %830 = vector.broadcast %cst_314 : f32 to vector<10x64xf32>
    %831 = arith.mulf %829, %830 : vector<10x64xf32>
    %832 = vector.broadcast %17 : vector<1x64xf32> to vector<10x64xf32>
    %833 = arith.addf %831, %832 : vector<10x64xf32>
    %cst_315 = arith.constant dense<0xFF800000> : vector<10xf32>
    %834 = vector.multi_reduction <maximumf>, %833, %cst_315 [1] : vector<10x64xf32> to vector<10xf32>
    %835 = vector.shape_cast %834 : vector<10xf32> to vector<10x1xf32>
    %836 = vector.broadcast %835 : vector<10x1xf32> to vector<10x64xf32>
    %837 = arith.subf %833, %836 : vector<10x64xf32>
    %838 = math.exp %837 : vector<10x64xf32>
    %cst_316 = arith.constant dense<0.000000e+00> : vector<10xf32>
    %839 = vector.multi_reduction <add>, %838, %cst_316 [1] : vector<10x64xf32> to vector<10xf32>
    %840 = vector.shape_cast %839 : vector<10xf32> to vector<10x1xf32>
    %841 = tpu.reciprocal %840 {approx = true} : vector<10x1xf32> -> vector<10x1xf32>
    %842 = vector.broadcast %841 : vector<10x1xf32> to vector<10x64xf32>
    %843 = arith.mulf %838, %842 : vector<10x64xf32>
    %844 = vector.extract_strided_slice %751 {offsets = [0, 24], sizes = [64, 8], strides = [1, 1]} : vector<64x32xf32> to vector<64x8xf32>
    %845 = arith.truncf %843 : vector<10x64xf32> to vector<10x64xbf16>
    %846 = arith.truncf %844 : vector<64x8xf32> to vector<64x8xbf16>
    %cst_317 = arith.constant dense<0.000000e+00> : vector<10x8xf32>
    %847 = tpu.matmul %845, %846, %cst_317 {dimension_numbers = #tpu.dot_dimension_numbers<[1], [0], [0], [1], [0, 0, 1, 1], [], []>} : vector<10x64xbf16>, vector<64x8xbf16>, vector<10x8xf32> -> vector<10x8xf32>
    %848 = tpu.concatenate %778, %801, %824, %847 in 1 : vector<10x8xf32>, vector<10x8xf32>, vector<10x8xf32>, vector<10x8xf32> -> vector<10x32xf32>
    %849 = arith.truncf %848 : vector<10x32xf32> to vector<10x32xbf16>
    %cst_318 = arith.constant dense<0.000000e+00> : vector<10x32xf32>
    %850 = tpu.matmul %849, %753, %cst_318 {dimension_numbers = #tpu.dot_dimension_numbers<[1], [0], [0], [1], [0, 0, 1, 1], [], []>} : vector<10x32xbf16>, vector<32x32xbf16>, vector<10x32xf32> -> vector<10x32xf32>
    %851 = vector.broadcast %755 : vector<1x32xf32> to vector<10x32xf32>
    %852 = arith.addf %850, %851 : vector<10x32xf32>
    %853 = arith.addf %726, %852 : vector<10x32xf32>
    %c6 = arith.constant 6 : index
    %c0_319 = arith.constant 0 : index
    %854 = vector.load %arg23[%c6, %c0_319] : memref<8x32xf32, #tpu.memory_space<vmem>>, vector<1x32xf32>
    %c6_320 = arith.constant 6 : index
    %c0_321 = arith.constant 0 : index
    %855 = vector.load %arg24[%c6_320, %c0_321] : memref<8x32xf32, #tpu.memory_space<vmem>>, vector<1x32xf32>
    %cst_322 = arith.constant dense<0.000000e+00> : vector<10xf32>
    %856 = vector.multi_reduction <add>, %853, %cst_322 [1] : vector<10x32xf32> to vector<10xf32>
    %857 = vector.shape_cast %856 : vector<10xf32> to vector<10x1xf32>
    %cst_323 = arith.constant 3.200000e+01 : f32
    %858 = vector.broadcast %cst_323 : f32 to vector<10x1xf32>
    %859 = arith.divf %857, %858 : vector<10x1xf32>
    %860 = vector.broadcast %859 : vector<10x1xf32> to vector<10x32xf32>
    %861 = arith.subf %853, %860 : vector<10x32xf32>
    %862 = vector.broadcast %859 : vector<10x1xf32> to vector<10x32xf32>
    %863 = arith.subf %853, %862 : vector<10x32xf32>
    %864 = arith.mulf %861, %863 : vector<10x32xf32>
    %cst_324 = arith.constant dense<0.000000e+00> : vector<10xf32>
    %865 = vector.multi_reduction <add>, %864, %cst_324 [1] : vector<10x32xf32> to vector<10xf32>
    %866 = vector.shape_cast %865 : vector<10xf32> to vector<10x1xf32>
    %cst_325 = arith.constant 3.200000e+01 : f32
    %867 = vector.broadcast %cst_325 : f32 to vector<10x1xf32>
    %868 = arith.divf %866, %867 : vector<10x1xf32>
    %869 = vector.broadcast %859 : vector<10x1xf32> to vector<10x32xf32>
    %870 = arith.subf %853, %869 : vector<10x32xf32>
    %cst_326 = arith.constant 9.99999974E-6 : f32
    %871 = vector.broadcast %cst_326 : f32 to vector<10x1xf32>
    %872 = arith.addf %868, %871 : vector<10x1xf32>
    %873 = math.rsqrt %872 : vector<10x1xf32>
    %874 = vector.broadcast %873 : vector<10x1xf32> to vector<10x32xf32>
    %875 = arith.mulf %870, %874 : vector<10x32xf32>
    %876 = vector.broadcast %854 : vector<1x32xf32> to vector<10x32xf32>
    %877 = arith.mulf %875, %876 : vector<10x32xf32>
    %878 = vector.broadcast %855 : vector<1x32xf32> to vector<10x32xf32>
    %879 = arith.addf %877, %878 : vector<10x32xf32>
    %c2_327 = arith.constant 2 : index
    %c0_328 = arith.constant 0 : index
    %c0_329 = arith.constant 0 : index
    %880 = vector.load %arg19[%c2_327, %c0_328, %c0_329] : memref<3x32x64xbf16, #tpu.memory_space<vmem>>, vector<1x32x64xbf16>
    %881 = vector.shape_cast %880 : vector<1x32x64xbf16> to vector<32x64xbf16>
    %882 = arith.truncf %879 : vector<10x32xf32> to vector<10x32xbf16>
    %cst_330 = arith.constant dense<0.000000e+00> : vector<10x64xf32>
    %883 = tpu.matmul %882, %881, %cst_330 {dimension_numbers = #tpu.dot_dimension_numbers<[1], [0], [0], [1], [0, 0, 1, 1], [], []>} : vector<10x32xbf16>, vector<32x64xbf16>, vector<10x64xf32> -> vector<10x64xf32>
    %c2_331 = arith.constant 2 : index
    %c0_332 = arith.constant 0 : index
    %c0_333 = arith.constant 0 : index
    %884 = vector.load %arg20[%c2_331, %c0_332, %c0_333] : memref<3x1x64xf32, #tpu.memory_space<vmem>>, vector<1x1x64xf32>
    %885 = vector.shape_cast %884 : vector<1x1x64xf32> to vector<1x64xf32>
    %886 = vector.broadcast %885 : vector<1x64xf32> to vector<10x64xf32>
    %887 = arith.addf %883, %886 : vector<10x64xf32>
    %cst_334 = arith.constant 0.000000e+00 : f32
    %888 = vector.broadcast %cst_334 : f32 to vector<10x64xf32>
    %889 = arith.maximumf %887, %888 : vector<10x64xf32>
    %c2_335 = arith.constant 2 : index
    %c0_336 = arith.constant 0 : index
    %c0_337 = arith.constant 0 : index
    %890 = vector.load %arg21[%c2_335, %c0_336, %c0_337] : memref<3x64x32xbf16, #tpu.memory_space<vmem>>, vector<1x64x32xbf16>
    %891 = vector.shape_cast %890 : vector<1x64x32xbf16> to vector<64x32xbf16>
    %892 = arith.truncf %889 : vector<10x64xf32> to vector<10x64xbf16>
    %cst_338 = arith.constant dense<0.000000e+00> : vector<10x32xf32>
    %893 = tpu.matmul %892, %891, %cst_338 {dimension_numbers = #tpu.dot_dimension_numbers<[1], [0], [0], [1], [0, 0, 1, 1], [], []>} : vector<10x64xbf16>, vector<64x32xbf16>, vector<10x32xf32> -> vector<10x32xf32>
    %c2_339 = arith.constant 2 : index
    %c0_340 = arith.constant 0 : index
    %c0_341 = arith.constant 0 : index
    %894 = vector.load %arg22[%c2_339, %c0_340, %c0_341] : memref<3x1x32xf32, #tpu.memory_space<vmem>>, vector<1x1x32xf32>
    %895 = vector.shape_cast %894 : vector<1x1x32xf32> to vector<1x32xf32>
    %896 = vector.broadcast %895 : vector<1x32xf32> to vector<10x32xf32>
    %897 = arith.addf %893, %896 : vector<10x32xf32>
    %898 = arith.addf %879, %897 : vector<10x32xf32>
    %c7 = arith.constant 7 : index
    %c0_342 = arith.constant 0 : index
    %899 = vector.load %arg23[%c7, %c0_342] : memref<8x32xf32, #tpu.memory_space<vmem>>, vector<1x32xf32>
    %c7_343 = arith.constant 7 : index
    %c0_344 = arith.constant 0 : index
    %900 = vector.load %arg24[%c7_343, %c0_344] : memref<8x32xf32, #tpu.memory_space<vmem>>, vector<1x32xf32>
    %cst_345 = arith.constant dense<0.000000e+00> : vector<10xf32>
    %901 = vector.multi_reduction <add>, %898, %cst_345 [1] : vector<10x32xf32> to vector<10xf32>
    %902 = vector.shape_cast %901 : vector<10xf32> to vector<10x1xf32>
    %cst_346 = arith.constant 3.200000e+01 : f32
    %903 = vector.broadcast %cst_346 : f32 to vector<10x1xf32>
    %904 = arith.divf %902, %903 : vector<10x1xf32>
    %905 = vector.broadcast %904 : vector<10x1xf32> to vector<10x32xf32>
    %906 = arith.subf %898, %905 : vector<10x32xf32>
    %907 = vector.broadcast %904 : vector<10x1xf32> to vector<10x32xf32>
    %908 = arith.subf %898, %907 : vector<10x32xf32>
    %909 = arith.mulf %906, %908 : vector<10x32xf32>
    %cst_347 = arith.constant dense<0.000000e+00> : vector<10xf32>
    %910 = vector.multi_reduction <add>, %909, %cst_347 [1] : vector<10x32xf32> to vector<10xf32>
    %911 = vector.shape_cast %910 : vector<10xf32> to vector<10x1xf32>
    %cst_348 = arith.constant 3.200000e+01 : f32
    %912 = vector.broadcast %cst_348 : f32 to vector<10x1xf32>
    %913 = arith.divf %911, %912 : vector<10x1xf32>
    %914 = vector.broadcast %904 : vector<10x1xf32> to vector<10x32xf32>
    %915 = arith.subf %898, %914 : vector<10x32xf32>
    %cst_349 = arith.constant 9.99999974E-6 : f32
    %916 = vector.broadcast %cst_349 : f32 to vector<10x1xf32>
    %917 = arith.addf %913, %916 : vector<10x1xf32>
    %918 = math.rsqrt %917 : vector<10x1xf32>
    %919 = vector.broadcast %918 : vector<10x1xf32> to vector<10x32xf32>
    %920 = arith.mulf %915, %919 : vector<10x32xf32>
    %921 = vector.broadcast %899 : vector<1x32xf32> to vector<10x32xf32>
    %922 = arith.mulf %920, %921 : vector<10x32xf32>
    %923 = vector.broadcast %900 : vector<1x32xf32> to vector<10x32xf32>
    %924 = arith.addf %922, %923 : vector<10x32xf32>
    %c0_350 = arith.constant 0 : index
    %c0_351 = arith.constant 0 : index
    %925 = vector.load %arg25[%c0_350, %c0_351] : memref<32x5xf32, #tpu.memory_space<vmem>>, vector<32x5xf32>
    %cst_352 = arith.constant dense<0.000000e+00> : vector<10x5xf32>
    %926 = tpu.matmul %924, %925, %cst_352 {dimension_numbers = #tpu.dot_dimension_numbers<[1], [0], [0], [1], [0, 0, 1, 1], [], []>} : vector<10x32xf32>, vector<32x5xf32>, vector<10x5xf32> -> vector<10x5xf32>
    %c0_353 = arith.constant 0 : index
    %c0_354 = arith.constant 0 : index
    %927 = vector.load %arg26[%c0_353, %c0_354] : memref<1x5xf32, #tpu.memory_space<vmem>>, vector<1x5xf32>
    %928 = vector.broadcast %927 : vector<1x5xf32> to vector<10x5xf32>
    %929 = arith.addf %926, %928 : vector<10x5xf32>
    %930 = vector.extract_strided_slice %929 {offsets = [0, 0], sizes = [1, 3], strides = [1, 1]} : vector<10x5xf32> to vector<1x3xf32>
    %931 = arith.mulf %930, %930 : vector<1x3xf32>
    %cst_355 = arith.constant dense<0.000000e+00> : vector<1xf32>
    %932 = vector.multi_reduction <add>, %931, %cst_355 [1] : vector<1x3xf32> to vector<1xf32>
    %933 = vector.shape_cast %932 : vector<1xf32> to vector<1x1xf32>
    %934 = math.sqrt %933 : vector<1x1xf32>
    %cst_356 = arith.constant 9.99999996E-13 : f32
    %935 = vector.broadcast %cst_356 : f32 to vector<1x1xf32>
    %936 = arith.maximumf %934, %935 : vector<1x1xf32>
    %937 = vector.broadcast %936 : vector<1x1xf32> to vector<1x3xf32>
    %938 = arith.divf %930, %937 : vector<1x3xf32>
    %939 = vector.extract_strided_slice %929 {offsets = [0, 3], sizes = [1, 1], strides = [1, 1]} : vector<10x5xf32> to vector<1x1xf32>
    %940 = arith.negf %939 : vector<1x1xf32>
    %941 = math.exp %940 : vector<1x1xf32>
    %cst_357 = arith.constant 1.000000e+00 : f32
    %942 = vector.broadcast %cst_357 : f32 to vector<1x1xf32>
    %943 = arith.addf %942, %941 : vector<1x1xf32>
    %944 = arith.divf %942, %943 : vector<1x1xf32>
    %cst_358 = arith.constant 5.000000e-01 : f32
    %945 = vector.broadcast %cst_358 : f32 to vector<1x1xf32>
    %946 = arith.subf %944, %945 : vector<1x1xf32>
    %cst_359 = arith.constant 3.14159274 : f32
    %947 = vector.broadcast %cst_359 : f32 to vector<1x1xf32>
    %948 = arith.mulf %946, %947 : vector<1x1xf32>
    %cst_360 = arith.constant 0.000000e+00 : f32
    %949 = vector.broadcast %cst_360 : f32 to vector<16x128xf32>
    %c0_361 = arith.constant 0 : index
    %c0_362 = arith.constant 0 : index
    %c0_363 = arith.constant 0 : index
    %950 = vector.load %arg27[%c0_361, %c0_362, %c0_363] : memref<1x16x128xf32, #tpu.memory_space<vmem>>, vector<1x16x128xf32>
    %951 = vector.shape_cast %950 : vector<1x16x128xf32> to vector<16x128xf32>
    %952 = vector.shape_cast %949 : vector<16x128xf32> to vector<1x16x128xf32>
    tpu.vector_store %arg27[%c0_361, %c0_362, %c0_363], %952 {strides = array<i32>} : memref<1x16x128xf32, #tpu.memory_space<vmem>>, vector<1x16x128xf32>,
    %c0_364 = arith.constant 0 : index
    %c0_365 = arith.constant 0 : index
    %c0_366 = arith.constant 0 : index
    %953 = vector.load %arg27[%c0_364, %c0_365, %c0_366] : memref<1x16x128xf32, #tpu.memory_space<vmem>>, vector<1x1x3xf32>
    %954 = vector.shape_cast %953 : vector<1x1x3xf32> to vector<1x3xf32>
    %955 = vector.shape_cast %938 : vector<1x3xf32> to vector<1x1x3xf32>
    tpu.vector_store %arg27[%c0_364, %c0_365, %c0_366], %955 {strides = array<i32>} : memref<1x16x128xf32, #tpu.memory_space<vmem>>, vector<1x1x3xf32>,
    %c0_367 = arith.constant 0 : index
    %c0_368 = arith.constant 0 : index
    %c3_369 = arith.constant 3 : index
    %956 = vector.load %arg27[%c0_367, %c0_368, %c3_369] : memref<1x16x128xf32, #tpu.memory_space<vmem>>, vector<1x1x1xf32>
    %957 = vector.shape_cast %956 : vector<1x1x1xf32> to vector<1x1xf32>
    %958 = vector.shape_cast %948 : vector<1x1xf32> to vector<1x1x1xf32>
    tpu.vector_store %arg27[%c0_367, %c0_368, %c3_369], %958 {strides = array<i32>} : memref<1x16x128xf32, #tpu.memory_space<vmem>>, vector<1x1x1xf32>,
    %959 = vector.extract_strided_slice %929 {offsets = [2, 4], sizes = [8, 1], strides = [1, 1]} : vector<10x5xf32> to vector<8x1xf32>
    %c0_370 = arith.constant 0 : index
    %c2_371 = arith.constant 2 : index
    %c4_372 = arith.constant 4 : index
    %960 = vector.load %arg27[%c0_370, %c2_371, %c4_372] : memref<1x16x128xf32, #tpu.memory_space<vmem>>, vector<1x8x1xf32>
    %961 = vector.shape_cast %960 : vector<1x8x1xf32> to vector<8x1xf32>
    %962 = vector.shape_cast %959 : vector<8x1xf32> to vector<1x8x1xf32>
    tpu.vector_store %arg27[%c0_370, %c2_371, %c4_372], %962 {strides = array<i32>} : memref<1x16x128xf32, #tpu.memory_space<vmem>>, vector<1x8x1xf32>,
    return
  }
  func.func @transform_0(%arg0: i32) -> (i32, i32, i32) {
    %c0_i32 = arith.constant 0 : i32
    %c0_i32_0 = arith.constant 0 : i32
    %c0_i32_1 = arith.constant 0 : i32
    return %arg0, %c0_i32, %c0_i32_0 : i32, i32, i32
  }
  func.func @transform_1(%arg0: i32) -> (i32, i32, i32) {
    %c0_i32 = arith.constant 0 : i32
    %c0_i32_0 = arith.constant 0 : i32
    %c0_i32_1 = arith.constant 0 : i32
    return %arg0, %c0_i32, %c0_i32_0 : i32, i32, i32
  }
  func.func @transform_2(%arg0: i32) -> (i32, i32, i32) {
    %c0_i32 = arith.constant 0 : i32
    %c0_i32_0 = arith.constant 0 : i32
    %c0_i32_1 = arith.constant 0 : i32
    return %arg0, %c0_i32, %c0_i32_0 : i32, i32, i32
  }
  func.func @transform_3(%arg0: i32) -> (i32, i32, i32) {
    %c0_i32 = arith.constant 0 : i32
    %c0_i32_0 = arith.constant 0 : i32
    %c0_i32_1 = arith.constant 0 : i32
    return %arg0, %c0_i32, %c0_i32_0 : i32, i32, i32
  }
  func.func @transform_4(%arg0: i32) -> (i32, i32, i32) {
    %c0_i32 = arith.constant 0 : i32
    %c0_i32_0 = arith.constant 0 : i32
    %c0_i32_1 = arith.constant 0 : i32
    return %arg0, %c0_i32, %c0_i32_0 : i32, i32, i32
  }
  func.func @transform_5(%arg0: i32) -> (i32, i32) {
    %c0_i32 = arith.constant 0 : i32
    %c0_i32_0 = arith.constant 0 : i32
    %c0_i32_1 = arith.constant 0 : i32
    return %c0_i32, %c0_i32_0 : i32, i32
  }
  func.func @transform_6(%arg0: i32) -> (i32, i32) {
    %c0_i32 = arith.constant 0 : i32
    %c0_i32_0 = arith.constant 0 : i32
    %c0_i32_1 = arith.constant 0 : i32
    return %c0_i32, %c0_i32_0 : i32, i32
  }
  func.func @transform_7(%arg0: i32) -> (i32, i32) {
    %c0_i32 = arith.constant 0 : i32
    %c0_i32_0 = arith.constant 0 : i32
    %c0_i32_1 = arith.constant 0 : i32
    return %c0_i32, %c0_i32_0 : i32, i32
  }
  func.func @transform_8(%arg0: i32) -> (i32, i32) {
    %c0_i32 = arith.constant 0 : i32
    %c0_i32_0 = arith.constant 0 : i32
    %c0_i32_1 = arith.constant 0 : i32
    return %c0_i32, %c0_i32_0 : i32, i32
  }
  func.func @transform_9(%arg0: i32) -> (i32, i32) {
    %c0_i32 = arith.constant 0 : i32
    %c0_i32_0 = arith.constant 0 : i32
    %c0_i32_1 = arith.constant 0 : i32
    return %c0_i32, %c0_i32_0 : i32, i32
  }
  func.func @transform_10(%arg0: i32) -> (i32, i32) {
    %c0_i32 = arith.constant 0 : i32
    %c0_i32_0 = arith.constant 0 : i32
    %c0_i32_1 = arith.constant 0 : i32
    return %c0_i32, %c0_i32_0 : i32, i32
  }
  func.func @transform_11(%arg0: i32) -> (i32, i32) {
    %c0_i32 = arith.constant 0 : i32
    %c0_i32_0 = arith.constant 0 : i32
    %c0_i32_1 = arith.constant 0 : i32
    return %c0_i32, %c0_i32_0 : i32, i32
  }
  func.func @transform_12(%arg0: i32) -> (i32, i32, i32) {
    %c0_i32 = arith.constant 0 : i32
    %c0_i32_0 = arith.constant 0 : i32
    %c0_i32_1 = arith.constant 0 : i32
    %c0_i32_2 = arith.constant 0 : i32
    return %c0_i32, %c0_i32_0, %c0_i32_1 : i32, i32, i32
  }
  func.func @transform_13(%arg0: i32) -> (i32, i32, i32) {
    %c0_i32 = arith.constant 0 : i32
    %c0_i32_0 = arith.constant 0 : i32
    %c0_i32_1 = arith.constant 0 : i32
    %c0_i32_2 = arith.constant 0 : i32
    return %c0_i32, %c0_i32_0, %c0_i32_1 : i32, i32, i32
  }
  func.func @transform_14(%arg0: i32) -> (i32, i32, i32) {
    %c0_i32 = arith.constant 0 : i32
    %c0_i32_0 = arith.constant 0 : i32
    %c0_i32_1 = arith.constant 0 : i32
    %c0_i32_2 = arith.constant 0 : i32
    return %c0_i32, %c0_i32_0, %c0_i32_1 : i32, i32, i32
  }
  func.func @transform_15(%arg0: i32) -> (i32, i32, i32) {
    %c0_i32 = arith.constant 0 : i32
    %c0_i32_0 = arith.constant 0 : i32
    %c0_i32_1 = arith.constant 0 : i32
    %c0_i32_2 = arith.constant 0 : i32
    return %c0_i32, %c0_i32_0, %c0_i32_1 : i32, i32, i32
  }
  func.func @transform_16(%arg0: i32) -> (i32, i32, i32) {
    %c0_i32 = arith.constant 0 : i32
    %c0_i32_0 = arith.constant 0 : i32
    %c0_i32_1 = arith.constant 0 : i32
    %c0_i32_2 = arith.constant 0 : i32
    return %c0_i32, %c0_i32_0, %c0_i32_1 : i32, i32, i32
  }
  func.func @transform_17(%arg0: i32) -> (i32, i32, i32) {
    %c0_i32 = arith.constant 0 : i32
    %c0_i32_0 = arith.constant 0 : i32
    %c0_i32_1 = arith.constant 0 : i32
    %c0_i32_2 = arith.constant 0 : i32
    return %c0_i32, %c0_i32_0, %c0_i32_1 : i32, i32, i32
  }
  func.func @transform_18(%arg0: i32) -> (i32, i32, i32) {
    %c0_i32 = arith.constant 0 : i32
    %c0_i32_0 = arith.constant 0 : i32
    %c0_i32_1 = arith.constant 0 : i32
    %c0_i32_2 = arith.constant 0 : i32
    return %c0_i32, %c0_i32_0, %c0_i32_1 : i32, i32, i32
  }
  func.func @transform_19(%arg0: i32) -> (i32, i32, i32) {
    %c0_i32 = arith.constant 0 : i32
    %c0_i32_0 = arith.constant 0 : i32
    %c0_i32_1 = arith.constant 0 : i32
    %c0_i32_2 = arith.constant 0 : i32
    return %c0_i32, %c0_i32_0, %c0_i32_1 : i32, i32, i32
  }
  func.func @transform_20(%arg0: i32) -> (i32, i32, i32) {
    %c0_i32 = arith.constant 0 : i32
    %c0_i32_0 = arith.constant 0 : i32
    %c0_i32_1 = arith.constant 0 : i32
    %c0_i32_2 = arith.constant 0 : i32
    return %c0_i32, %c0_i32_0, %c0_i32_1 : i32, i32, i32
  }
  func.func @transform_21(%arg0: i32) -> (i32, i32, i32) {
    %c0_i32 = arith.constant 0 : i32
    %c0_i32_0 = arith.constant 0 : i32
    %c0_i32_1 = arith.constant 0 : i32
    %c0_i32_2 = arith.constant 0 : i32
    return %c0_i32, %c0_i32_0, %c0_i32_1 : i32, i32, i32
  }
  func.func @transform_22(%arg0: i32) -> (i32, i32) {
    %c0_i32 = arith.constant 0 : i32
    %c0_i32_0 = arith.constant 0 : i32
    %c0_i32_1 = arith.constant 0 : i32
    return %c0_i32, %c0_i32_0 : i32, i32
  }
  func.func @transform_23(%arg0: i32) -> (i32, i32) {
    %c0_i32 = arith.constant 0 : i32
    %c0_i32_0 = arith.constant 0 : i32
    %c0_i32_1 = arith.constant 0 : i32
    return %c0_i32, %c0_i32_0 : i32, i32
  }
  func.func @transform_24(%arg0: i32) -> (i32, i32) {
    %c0_i32 = arith.constant 0 : i32
    %c0_i32_0 = arith.constant 0 : i32
    %c0_i32_1 = arith.constant 0 : i32
    return %c0_i32, %c0_i32_0 : i32, i32
  }
  func.func @transform_25(%arg0: i32) -> (i32, i32) {
    %c0_i32 = arith.constant 0 : i32
    %c0_i32_0 = arith.constant 0 : i32
    %c0_i32_1 = arith.constant 0 : i32
    return %c0_i32, %c0_i32_0 : i32, i32
  }
  func.func @transform_26(%arg0: i32) -> (i32, i32, i32) {
    %c0_i32 = arith.constant 0 : i32
    %c0_i32_0 = arith.constant 0 : i32
    %c0_i32_1 = arith.constant 0 : i32
    return %arg0, %c0_i32, %c0_i32_0 : i32, i32, i32
  }
}

</mosaic_0001>

<bundles_post_ra>
// kernel: gptran_forward.1
= control target key start
LH: loop header
LB: loop body
LE: loop exit
PB: predicated region body
PF: predicated region fallthrough
CT: control target
= control target key end

     0   :  { %s9690_s27 = smov 0   ;;  %s11661_s0 = inlined_call_operand.vmem [shape: f32[2,64,3], index: 0, kind: input, shape index: {}]   ;;  %s11662_s1 = inlined_call_operand.vmem [shape: f32[2,64,32], index: 1, kind: input, shape index: {}]   ;;  %s11663_s2 = inlined_call_operand.vmem [shape: f32[2,8,3], index: 2, kind: input, shape index: {}]   ;;  %s11664_s3 = inlined_call_operand.vmem [shape: f32[2,1,64], index: 3, kind: input, shape index: {}]   ;;  %s11665_s4 = inlined_call_operand.vmem [shape: f32[2,1,10], index: 4, kind: input, shape index: {}]   ;;  %s11666_s5 = inlined_call_operand.vmem [shape: f32[3,8], index: 5, kind: input, shape index: {}]   ;;  %s11667_s6 = inlined_call_operand.vmem [shape: f32[1,8], index: 6, kind: input, shape index: {}]   ;;  %s11668_s7 = inlined_call_operand.vmem [shape: f32[8,32], index: 7, kind: input, shape index: {}]   ;;  %s11669_s8 = inlined_call_operand.vmem [shape: f32[1,32], index: 8, kind: input, shape index: {}]   ;;  %s11670_s9 = inlined_call_operand.vmem [shape: f32[6,32], index: 9, kind: input, shape index: {}]   ;;  %s11671_s10 = inlined_call_operand.vmem [shape: f32[1,32], index: 10, kind: input, shape index: {}]   ;;  %s11672_s11 = inlined_call_operand.vmem [shape: f32[2,32], index: 11, kind: input, shape index: {}]   ;;  %s11673_s12 = inlined_call_operand.vmem [shape: bf16[5,32,64], index: 12, kind: input, shape index: {}]   ;;  %s11674_s13 = inlined_call_operand.vmem [shape: f32[5,1,64], index: 13, kind: input, shape index: {}]   ;;  %s11675_s14 = inlined_call_operand.vmem [shape: bf16[5,32,32], index: 14, kind: input, shape index: {}]   ;;  %s11676_s15 = inlined_call_operand.vmem [shape: f32[5,1,32], index: 15, kind: input, shape index: {}]   ;;  %s11677_s16 = inlined_call_operand.vmem [shape: bf16[5,32,32], index: 16, kind: input, shape index: {}]   ;;  %s11678_s17 = inlined_call_operand.vmem [shape: f32[5,1,32], index: 17, kind: input, shape index: {}]   ;;  %s11679_s18 = inlined_call_operand.vmem [shape: bf16[3,32,64], index: 18, kind: input, shape index: {}]   ;;  %s11680_s19 = inlined_call_operand.vmem [shape: f32[3,1,64], index: 19, kind: input, shape index: {}]   ;;  %s11681_s20 = inlined_call_operand.vmem [shape: bf16[3,64,32], index: 20, kind: input, shape index: {}]   ;;  %s11682_s21 = inlined_call_operand.vmem [shape: f32[3,1,32], index: 21, kind: input, shape index: {}]   ;;  %s11683_s22 = inlined_call_operand.vmem [shape: f32[8,32], index: 22, kind: input, shape index: {}]   ;;  %s11684_s23 = inlined_call_operand.vmem [shape: f32[8,32], index: 23, kind: input, shape index: {}]   ;;  %s11685_s24 = inlined_call_operand.vmem [shape: f32[32,5], index: 24, kind: input, shape index: {}]   ;;  %s11686_s25 = inlined_call_operand.vmem [shape: f32[1,5], index: 25, kind: input, shape index: {}]   ;;  %s11687_s26 = inlined_call_operand.vmem [shape: f32[2,16,128], index: 26, kind: output, shape index: {}]  }
   0x1   :  { %11712 = sst [smem:[#allocation4_spill]] %s11661_s0 }
   0x2   :  { %11713 = sst [smem:[#allocation5_spill]] %s11662_s1 }
   0x3   :  { %11714 = sst [smem:[#allocation6_spill]] %s11663_s2 }
   0x4   :  { %11715 = sst [smem:[#allocation7_spill]] %s11664_s3 }
   0x5   :  { %11716 = sst [smem:[#allocation8_spill]] %s11665_s4 }
   0x6   :  { %11717 = sst [smem:[#allocation9_spill]] %s11666_s5 }
   0x7   :  { %11718 = sst [smem:[#allocation10_spill]] %s11667_s6 }
   0x8   :  { %11719 = sst [smem:[#allocation11_spill]] %s11668_s7 }
   0x9   :  { %11720 = sst [smem:[#allocation12_spill]] %s11669_s8 }
   0xa   :  { %11721 = sst [smem:[#allocation13_spill]] %s11670_s9 }
   0xb   :  { %11722 = sst [smem:[#allocation14_spill]] %s11671_s10 }
   0xc   :  { %11723 = sst [smem:[#allocation15_spill]] %s11672_s11 }
   0xd   :  { %11724 = sst [smem:[#allocation16_spill]] %s11685_s24 }
   0xe   :  { %11725 = sst [smem:[#allocation17_spill]] %s11686_s25 }
   0xf   :  { %11726 = sst [smem:[#allocation18_spill]] %s11687_s26 }
  0x10 LB: > { %11727 = sst [smem:[#allocation2_spill]] %s9537_s27  ;;  %s7654_s3 = sadd.s32 4294967295, %s9537_s27   ;;  %s9537_s27 = sphi %s9690_s27, %s36_s27  }
  0x11   : > { %p7658_p0 = scmp.ge.s32.totalorder %s9537_s27, 1  ;;  %p747_p1 = scmp.lt.s32.totalorder %s9537_s27, 3 }
  0x13   : > { %p748_p2 = pnand %p7658_p0, %p747_p1 }
  0x15   : > { %751 = sbr.rel (%p748_p2) target bundleno = 16316 (0x3fbc), region = 124 }
  0x1c   : > { %s11728_s8 = sld [smem:[#allocation9_spill]]  ;;  %vm899_vm0 = vcmask 1042432   ;;  %p832_p3 = scmp.lt.s32.totalorder %s7654_s3, 1  ;;  %vm874_vm1 = vcmask 23552   ;;  %vm1024_vm2 = vcmask 64512   ;;  %v9151_v35 = vld [vmem:[%s11673_s12] sm:$0xff]  }
  0x1d   : > { %s11730_s9 = sld [smem:[#allocation4_spill]]  ;;  %s11731_s10 = sld [smem:[#allocation11_spill]]  ;;  %v9152_v36 = vld [vmem:[%s11673_s12 + $0x8] sm:$0xff]   ;;  %vm1322_vm3 = vcmask 261120   ;;  %vm1213_vm4 = vcmask 1045504   ;;  %vm9544_vm5 = vmmov 0  }
  0x1e   : > { %s11763_s3 = smov (!%p832_p3, %s7654_s3), 1  ;;  %s11732_s7 = sld [smem:[#allocation10_spill]]  ;;  %vm1192_vm6 = vcmask 7168   ;;  %vm1194_vm7 = vcmask 15360   ;;  %vm1197_vm8 = vcmask 31744   ;;  %vm1199_vm9 = vcmask 39936  }
  0x1f   : > { %11729 = sst [smem:[#allocation3_spill]] %s11763_s3  ;;  %s7984_s4 = sshll.u32 %s11763_s3, 6  ;;  %vm1209_vm10 = vcmask 48128   ;;  %vm1636_vm11 = vcmask 523264   ;;  %vm2824_vm12 = vcmask 130048   ;;  %vm2833_vm13 = vcmask 195584  }
  0x20   : > { %s11733_s2 = sld [smem:[#allocation5_spill]]  ;;  %s11734_s1 = sld [smem:[#allocation12_spill]]  ;;  %vm3462_vm14 = vcmask 1041408   ;;  %vm3705_vm15 = vcmask 1044480  }
  0x21   : > { %s7663_s28 = sshll.u32 %s11763_s3, 3  ;;  %s9542_s6 = smov 1  }
  0x22   : > { %v866_v0 = vld [vmem:[%s11728_s8] sm:$0x7]  ;;  %s11707_s8 = smov 96   ;;  %s9545_s0 = smov 3  }
  0x23   : > { %8291 = vmatprep.subr.msk.mxu0 %vm899_vm0, %v866_v0  ;;  %s836_s30 = scalar_lea.vmem %s11730_s9, %s7984_s4  ;;  %v1016_v9 = vld [vmem:[%s11731_s10] sm:$0xff]  ;;  %s11735_s9 = sld [smem:[#allocation6_spill]] }
  0x24   : > { %8292 = vmatpush3.msk.msra.mxu0 %vm899_vm0, %v866_v0  ;;  %v858_v1 = vld [vmem:[%s836_s30] sm:$0xff]  ;;  %v859_v2 = vld [vmem:[%s836_s30 + $0x8] sm:$0xff]  ;;  %v860_v3 = vld [vmem:[%s836_s30 + $0x10] sm:$0xff]  ;;  %8305 = vmatprep.subr.mxu1 %v1016_v9  ;;  %s9541_s10 = smov 2   ;;  %s11705_s29 = smov 120   ;;  %vm3676_vm0 = vcmask 80896  }
  0x25   : > { %8293 = vmatprep.mubr.msk.f32.mxu0 %vm874_vm1, %v858_v1  ;;  %v861_v4 = vld [vmem:[%s836_s30 + $0x18] sm:$0xff]  ;;  %v862_v5 = vld [vmem:[%s836_s30 + $0x20] sm:$0xff]  ;;  %v863_v6 = vld [vmem:[%s836_s30 + $0x28] sm:$0xff]  ;;  %8306 = vmatpush3.msra.mxu1 %v1016_v9  ;;  %s11745_s11 = sld [smem:[#allocation15_spill]]  ;;  %s11756_s24 = smov 88  }
  0x26   : > { %8294 = vmatmul.mubr.msk.f32.vlgmr.msra.gmra.mrb[0].mxu0 %vm874_vm1, %v859_v2  ;;  %v864_v7 = vld [vmem:[%s836_s30 + $0x30] sm:$0xff]  ;;  %v865_v8 = vld [vmem:[%s836_s30 + $0x38] sm:$0xff]  ;;  %v7666_v10 = vld [vmem:[%s11732_s7] ss:$0 sm:$0xff]  ;;  %8324 = vmatprep.subr.bf16.mxu1 %v9151_v35  ;;  %s9742_s5 = scalar_lea.vmem %s11733_s2, %s7984_s4  ;;  %s9540_s2 = smov 127  }
  0x27   : > { %8296 = vmatprep.mubr.msk.f32.mxu0 %vm874_vm1, %v860_v3  ;;  %v7676_v37 = vld [vmem:[%s11734_s1] ss:$0 sm:$0xff]  ;;  %v1155_v39 = vld [vmem:[%s9742_s5 + $0x8] sm:$0xff]  ;;  %v1157_v47 = vld [vmem:[%s9742_s5 + $0x18] sm:$0xff]  ;;  %s11736_s7 = sld [smem:[#allocation13_spill]]  ;;  %s11747_s4 = smov 112  }
  0x28   : > { %v1154_v42 = vld [vmem:[%s9742_s5] sm:$0xff]  ;;  %v1156_v50 = vld [vmem:[%s9742_s5 + $0x10] sm:$0xff]  ;;  %v1159_v56 = vld [vmem:[%s9742_s5 + $0x28] sm:$0xff]  ;;  %s11757_s27 = sld [smem:[#allocation3_spill]] }
  0x29   : > { %v1158_v59 = vld [vmem:[%s9742_s5 + $0x20] sm:$0xff]  ;;  %v1161_v1 = vld [vmem:[%s9742_s5 + $0x38] sm:$0xff]  ;;  %s845_s30 = scalar_lea.vmem %s11735_s9, %s7663_s28  ;;  %s11704_s28 = smov 88  }
  0x2a   : > { %8297 = vmatmul.mubr.msk.f32.gmra.mrb[2].mxu0 %vm874_vm1, %v861_v4  ;;  %v1160_v4 = vld [vmem:[%s9742_s5 + $0x30] sm:$0xff]  ;;  %s11700_s9 = smov 112  }
  0x2b   : > { %8299 = vmatprep.mubr.msk.f32.mxu0 %vm874_vm1, %v862_v5 }
  0x2e   : > { %8300 = vmatmul.mubr.msk.f32.gmra.mrb[4].mxu0 %vm874_vm1, %v863_v6 }
  0x2f   : > { %8302 = vmatprep.mubr.msk.f32.mxu0 %vm874_vm1, %v864_v7 }
  0x32   : > { %8303 = vmatmul.mubr.msk.f32.gmra.mrb[6].mxu0 %vm874_vm1, %v865_v8 }
  0xf9   : > { %v8295_v11 = vpop.f32.mrb[0].mxu0 }
  0xfa   : > { %v975_v12 = vadd.f32 %v8295_v11, %v7666_v10  ;;  %v969_v13 = vpop.f32.mrb[1].mxu0  ;;  %v7688_v11 = vld [vmem:[%s11674_s13] ss:$0 sm:$0xff] }
  0xfb   : > { %v970_v14 = vadd.f32 %v7666_v10, %v969_v13 }
  0xfc   : > { %v1009_v17 = vmax.f32 %v975_v12, 0.0 }
  0xfd   : > { %v1008_v15 = vmax.f32 %v970_v14, 0.0  ;;  %v8298_v16 = vpop.f32.mrb[2].mxu0 }
  0xfe   : > { %v985_v18 = vadd.f32 %v8298_v16, %v7666_v10  ;;  %v979_v19 = vpop.f32.mrb[3].mxu0 }
  0xff   : > { %v980_v20 = vadd.f32 %v7666_v10, %v979_v19  ;;  %8307 = vmatprep.mubr.msk.f32.mxu1 %vm1024_vm2, %v1008_v15 }
 0x100   : > { %8308 = vmatmul.mubr.msk.f32.vlgmr.msra.gmra.mrb[0].mxu1 %vm1024_vm2, %v1009_v17  ;;  %v1011_v23 = vmax.f32 %v985_v18, 0.0 }
 0x101   : > { %v1010_v21 = vmax.f32 %v980_v20, 0.0  ;;  %v8301_v22 = vpop.f32.mrb[4].mxu0  ;;  %8325 = vmatpush3.bf16.msra.mxu1 %v9151_v35  ;;  %v11688_v35 = vmov 0.0  }
 0x102   : > { %v995_v24 = vadd.f32 %v8301_v22, %v7666_v10  ;;  %v989_v25 = vpop.f32.mrb[5].mxu0  ;;  %8326 = vmatprep.subr.bf16.mxu1 %v9152_v36  ;;  %8319 = vmatprep.subr.mxu0 %v11688_v35 }
 0x103   : > { %v990_v26 = vadd.f32 %v7666_v10, %v989_v25  ;;  %8310 = vmatprep.mubr.msk.f32.mxu1 %vm1024_vm2, %v1010_v21  ;;  %8321 = vmatprep.mubr.msk.f32.mxu0 %vm9544_vm5, %v11688_v35 }
 0x104   : > { %v1013_v27 = vmax.f32 %v995_v24, 0.0  ;;  %8311 = vmatmul.mubr.msk.f32.gmra.mrb[2].mxu1 %vm1024_vm2, %v1011_v23 }
 0x105   : > { %v1012_v28 = vmax.f32 %v990_v26, 0.0  ;;  %v8304_v29 = vpop.f32.mrb[6].mxu0  ;;  %8327 = vmatpush3.bf16.msra.mxu1 %v9152_v36  ;;  %v1201_v36 = vld [vmem:[%s11736_s7] sm:$0x3f]  ;;  %s11748_s7 = smov 72  }
 0x106   : > { %v1005_v30 = vadd.f32 %v8304_v29, %v7666_v10  ;;  %v999_v31 = vpop.f32.mrb[7].mxu0  ;;  %8320 = vmatpush3.msk.msra.mxu0 %vm1213_vm4, %v1201_v36  ;;  %vm4232_vm4 = vcmask 254976  }
 0x107   : > { %v1000_v32 = vadd.f32 %v7666_v10, %v999_v31  ;;  %8313 = vmatprep.mubr.msk.f32.mxu1 %vm1024_vm2, %v1012_v28 }
 0x108   : > { %v1015_v33 = vmax.f32 %v1005_v30, 0.0  ;;  %8314 = vmatmul.mubr.msk.f32.gmra.mrb[4].mxu1 %vm1024_vm2, %v1013_v27  ;;  %v1163_v30 = vld [vmem:[%s845_s30] sm:$0xff]  ;;  %s11694_s30 = smov 72  }
 0x109   : > { %v1014_v34 = vmax.f32 %v1000_v32, 0.0  ;;  %v1164_v32 = vmul.f32 %v1163_v30, %v1163_v30 }
 0x10b   : > { %8316 = vmatprep.mubr.msk.f32.mxu1 %vm1024_vm2, %v1014_v34 }
 0x10c   : > { %8317 = vmatmul.mubr.msk.f32.gmra.mrb[6].mxu1 %vm1024_vm2, %v1015_v33 }
 0x1d3   : > { %v8309_v38 = vpop.f32.mrb[0].mxu1 }
 0x1d4   : > { %v9748_v40 = vadd.f32 %v8309_v38, %v7676_v37  ;;  %v1115_v41 = vpop.f32.mrb[1].mxu1  ;;  %v9153_v38 = vld [vmem:[%s11675_s14] sm:$0xff]  }
 0x1d5   : > { %v9751_v43 = vadd.f32 %v7676_v37, %v1115_v41  ;;  %8336 = vmatprep.subr.bf16.mxu0 %v9153_v38 }
 0x1d6   : > { %v1288_v44 = vadd.f32 %v1155_v39, %v9748_v40 }
 0x1d7   : > { %v1287_v45 = vadd.f32 %v1154_v42, %v9751_v43  ;;  %v8312_v46 = vpop.f32.mrb[2].mxu1 }
 0x1d8   : > { %v9756_v48 = vadd.f32 %v8312_v46, %v7676_v37  ;;  %v1125_v49 = vpop.f32.mrb[3].mxu1 }
 0x1d9   : > { %v1299_v51 = vpack.c.bf16 %v1288_v44, %v1287_v45  ;;  %v9759_v52 = vadd.f32 %v7676_v37, %v1125_v49 }
 0x1da   : > { %v1290_v53 = vadd.f32 %v1157_v47, %v9756_v48 }
 0x1db   : > { %v1289_v54 = vadd.f32 %v1156_v50, %v9759_v52  ;;  %8328 = vmatprep.mubr.msk.bf16.mxu1 %vm1322_vm3, %v1299_v51  ;;  %v8315_v55 = vpop.f32.mrb[4].mxu1 }
 0x1dc   : > { %v9765_v57 = vadd.f32 %v8315_v55, %v7676_v37  ;;  %v1135_v58 = vpop.f32.mrb[5].mxu1 }
 0x1dd   : > { %v1300_v60 = vpack.c.bf16 %v1290_v53, %v1289_v54  ;;  %v9768_v61 = vadd.f32 %v7676_v37, %v1135_v58 }
 0x1de   : > { %v1292_v62 = vadd.f32 %v1159_v56, %v9765_v57 }
 0x1df   : > { %v1291_v63 = vadd.f32 %v1158_v59, %v9768_v61  ;;  %v8318_v0 = vpop.f32.mrb[6].mxu1  ;;  %8329 = vmatmul.mubr.msk.bf16.vlgmr.msra.gmra.mrb[8].mxu1 %vm1322_vm3, %v1300_v60 }
 0x1e0   : > { %v9774_v2 = vadd.f32 %v8318_v0, %v7676_v37  ;;  %v1145_v3 = vpop.f32.mrb[7].mxu1  ;;  %v1404_v0 = vpack.c.bf16 %v9748_v40, %v9751_v43 }
 0x1e1   : > { %v1301_v5 = vpack.c.bf16 %v1292_v62, %v1291_v63  ;;  %v9777_v6 = vadd.f32 %v7676_v37, %v1145_v3  ;;  %v9154_v63 = vld [vmem:[%s11675_s14 + $0x8] sm:$0xff]   ;;  %v1405_v3 = vpack.c.bf16 %v9756_v48, %v9759_v52 }
 0x1e2   : > { %v1294_v7 = vadd.f32 %v1161_v1, %v9774_v2 }
 0x1e3   : > { %v1293_v8 = vadd.f32 %v1160_v4, %v9777_v6  ;;  %8332 = vmatprep.mubr.msk.bf16.mxu1 %vm1322_vm3, %v1301_v5  ;;  %v1406_v4 = vpack.c.bf16 %v9765_v57, %v9768_v61  ;;  %v1407_v5 = vpack.c.bf16 %v9774_v2, %v9777_v6 }
 0x1e5   : > { %v1302_v9 = vpack.c.bf16 %v1294_v7, %v1293_v8 }
 0x1e7   : > { %8333 = vmatmul.mubr.msk.bf16.gmra.mrb[12].mxu1 %vm1322_vm3, %v1302_v9 }
 0x2b2   : > { %v8330_v10 = vpop.f32.mrb[8].mxu1 }
 0x2b3   : > { %v1369_v12 = vpop.f32.mrb[9].mxu1  ;;  %v1378_v14 = vadd.f32 %v8330_v10, %v7688_v11 }
 0x2b4   : > { %v8331_v13 = vpop.f32.mrb[10].mxu1  ;;  %v1370_v17 = vadd.f32 %v7688_v11, %v1369_v12 }
 0x2b5   : > { %v1381_v15 = vadd.f32 %v8331_v13, %v7688_v11  ;;  %v1372_v16 = vpop.f32.mrb[11].mxu1 }
 0x2b6   : > { %v1373_v18 = vadd.f32 %v7688_v11, %v1372_v16 }
 0x2b7   : > { %v9786_v19 = vpack.c.bf16 %v1381_v15, %v1378_v14 }
 0x2b8   : > { %v9788_v20 = vpack.c.bf16 %v1373_v18, %v1370_v17 }
 0x2ba   : > { %v8334_v21 = vpop.f32.mrb[12].mxu1  ;;  %1517 = vrot.lane.b32.xlu0 %v9788_v20, %s11707_s8  ;;  %8356 = vmatprep.mubr.msk.bf16.mxu1 %vm1024_vm2, %v9788_v20 }
 0x2bb   : > { %v1394_v22 = vadd.f32 %v8334_v21, %v7688_v11  ;;  %v1385_v23 = vpop.f32.mrb[13].mxu1 }
 0x2bc   : > { %v1386_v24 = vadd.f32 %v7688_v11, %v1385_v23  ;;  %v8335_v25 = vpop.f32.mrb[14].mxu1 }
 0x2bd   : > { %v1397_v26 = vadd.f32 %v8335_v25, %v7688_v11  ;;  %v1388_v27 = vpop.f32.mrb[15].mxu1 }
 0x2be   : > { %v1389_v28 = vadd.f32 %v7688_v11, %v1388_v27  ;;  %1519 = vrot.lane.b32.xlu0 %v9786_v19, %s11707_s8 }
 0x2bf   : > { %v9800_v29 = vpack.c.bf16 %v1397_v26, %v1394_v22 }
 0x2c0   : > { %v9802_v31 = vpack.c.bf16 %v1389_v28, %v1386_v24 }
 0x2c2   : > { %1521 = vrot.lane.b32.xlu1 %v9802_v31, %s11707_s8  ;;  %1166 = vrot.lane.b32.xlu0 %v1163_v30, %s9540_s2  ;;  %s11692_s2 = smov 104  }
 0x2c6   : > { %1523 = vrot.lane.b32.xlu1 %v9800_v29, %s11707_s8 }
 0x2ca   : > { %1170 = vrot.lane.b32.xlu1 %v1163_v30, %s9541_s10 }
 0x2ce   : > { %1179 = vrot.lane.b32.xlu1 %v1164_v32, %s9542_s6 }
 0x2d2   : > { %1185 = vrot.lane.b32.xlu1 %v1164_v32, %s9541_s10 }
 0x32c   : > { %v1518_v33 = vpop.permute.xlu0 %1517 }
 0x32d   : > { %8991 = vmatprep.subr.msk.bf16.mxu1 %vm1024_vm2, %v1518_v33  ;;  %v1538_v34 = vsel %vm1024_vm2, %v1518_v33, 0 }
 0x32e   : > { %8349 = vmatpush3.bf16.xpose.msra.mxu1 %v1538_v34 }
 0x330   : > { %v1520_v37 = vpop.permute.xlu0 %1519 }
 0x331   : > { %8992 = vmatprep.subr.msk.bf16.mxu1 %vm1024_vm2, %v1520_v37  ;;  %v1541_v44 = vsel %vm1024_vm2, %v1520_v37, 0 }
 0x334   : > { %v1522_v39 = vpop.permute.xlu1 %1521  ;;  %v1167_v41 = vpop.permute.xlu0 %1166 }
 0x335   : > { %v1169_v42 = vmul.f32 %v1167_v41, %v1163_v30  ;;  %v1544_v49 = vsel %vm1024_vm2, %v1522_v39, 0 }
 0x336   : > { %8351 = vmatpush3.bf16.xpose.msra.mxu1 %v1541_v44 }
 0x337   : > { %8993 = vmatprep.subr.msk.bf16.mxu1 %vm1024_vm2, %v1522_v39  ;;  %1175 = vrot.lane.b32.xlu0 %v1169_v42, %s9542_s6  ;;  %s11737_s6 = sld [smem:[#allocation7_spill]] }
 0x338   : > { %v1524_v45 = vpop.permute.xlu1 %1523 }
 0x339   : > { %v1547_v50 = vsel %vm1024_vm2, %v1524_v45, 0 }
 0x33b   : > { %1182 = vrot.lane.b32.xlu0 %v1169_v42, %s9541_s10  ;;  %s11690_s10 = smov 8  }
 0x33c   : > { %v1171_v46 = vpop.permute.xlu1 %1170 }
 0x33d   : > { %v1173_v47 = vmul.f32 %v1171_v46, %v1163_v30  ;;  %s9851_s1 = scalar_lea.vmem %s11737_s6, %s11763_s3  ;;  %s11698_s6 = smov 16  }
 0x33e   : > { %8353 = vmatpush3.bf16.xpose.msra.mxu1 %v1544_v49  ;;  %v9854_v8 = vld [vmem:[%s9851_s1] ss:$0 sm:$0xff] }
 0x33f   : > { %8994 = vmatprep.subr.msk.bf16.mxu1 %vm1024_vm2, %v1524_v45  ;;  %1189 = vrot.lane.b32.xlu0 %v1173_v47, %s9545_s0  ;;  %s11702_s0 = smov 80  }
 0x340   : > { %v1180_v51 = vpop.permute.xlu1 %1179 }
 0x344   : > { %v1186_v56 = vpop.permute.xlu1 %1185 }
 0x346   : > { %8355 = vmatpush3.bf16.xpose.msra.mxu1 %v1547_v50 }
 0x34d   : > { %8357 = vmatmul.mubr.msk.bf16.vlgmr.msra.gmra.mrb[16].mxu1 %vm1024_vm2, %v9786_v19 }
 0x34e   : > { %8360 = vmatprep.mubr.msk.bf16.mxu1 %vm1024_vm2, %v9802_v31 }
 0x355   : > { %8361 = vmatmul.mubr.msk.bf16.gmra.mrb[20].mxu1 %vm1024_vm2, %v9800_v29 }
 0x3a9   : > { %v1176_v53 = vpop.permute.xlu0 %1175 }
 0x3aa   : > { %v1193_v54 = vsel %vm1192_vm6, %v1164_v32, %v1176_v53  ;;  %vm4611_vm6 = vcmask 517120  }
 0x3ab   : > { %v1195_v55 = vsel %vm1194_vm7, %v1193_v54, %v1180_v51  ;;  %v7695_v51 = vld [vmem:[%s11676_s15] ss:$0 sm:$0xff]  ;;  %vm7526_vm7 = vcmask 16384  }
 0x3ad   : > { %v1183_v58 = vpop.permute.xlu0 %1182 }
 0x3ae   : > { %v1196_v59 = vsel %vm874_vm1, %v1195_v55, %v1183_v58  ;;  %vm3680_vm1 = vcmask 74752  }
 0x3af   : > { %v1198_v60 = vsel %vm1197_vm8, %v1196_v59, %v1186_v56 }
 0x3b1   : > { %v1190_v62 = vpop.permute.xlu0 %1189 }
 0x3b2   : > { %v1200_v1 = vsel %vm1199_vm9, %v1198_v60, %v1190_v62  ;;  %vm7551_vm9 = vcmask 24600  }
 0x3b3   : > { %8322 = vmatmul.mubr.msk.f32.vlgmr.msra.gmra.mrb[8].mxu0 %vm1209_vm10, %v1200_v1 }
 0x3b4   : > { %8337 = vmatpush3.bf16.msra.mxu0 %v9153_v38  ;;  %8340 = vmatprep.mubr.msk.bf16.mxu0 %vm1322_vm3, %v1404_v0 }
 0x3b5   : > { %8338 = vmatprep.subr.bf16.mxu0 %v9154_v63 }
 0x3b8   : > { %8339 = vmatpush3.bf16.msra.mxu0 %v9154_v63 }
 0x3bb   : > { %8341 = vmatmul.mubr.msk.bf16.vlgmr.msra.gmra.mrb[12].mxu0 %vm1322_vm3, %v1405_v3 }
 0x3bc   : > { %8344 = vmatprep.mubr.msk.bf16.mxu0 %vm1322_vm3, %v1406_v4 }
 0x3c3   : > { %8345 = vmatmul.mubr.msk.bf16.gmra.mrb[16].mxu0 %vm1322_vm3, %v1407_v5 }
 0x420   : > { %v8358_v7 = vpop.f32.mrb[16].mxu1 }
 0x421   : > { %v1583_v9 = vpop.f32.mrb[17].mxu1  ;;  %v1616_v12 = vmul.f32 0.35355338, %v8358_v7 }
 0x422   : > { %v1614_v10 = vmul.f32 0.35355338, %v1583_v9  ;;  %v8359_v11 = vpop.f32.mrb[18].mxu1 }
 0x423   : > { %v1617_v13 = vmul.f32 0.35355338, %v8359_v11  ;;  %v1586_v14 = vpop.f32.mrb[19].mxu1  ;;  %v9868_v22 = vadd.f32 %v9854_v8, %v1616_v12 }
 0x424   : > { %v1615_v15 = vmul.f32 0.35355338, %v1586_v14  ;;  %v9857_v16 = vadd.f32 %v9854_v8, %v1614_v10 }
 0x425   : > { %v9865_v21 = vadd.f32 %v9854_v8, %v1617_v13  ;;  %v1643_v32 = vsel %vm1636_vm11, %v9868_v22, -inf }
 0x426   : > { %v1637_v17 = vsel %vm1636_vm11, %v9857_v16, -inf  ;;  %v9862_v18 = vadd.f32 %v9854_v8, %v1615_v15 }
 0x427   : > { %1638 = vmax.xlane.f32.xlu1 %v1637_v17  ;;  %v1646_v28 = vsel %vm1636_vm11, %v9865_v21, -inf }
 0x428   : > { %v8362_v23 = vpop.f32.mrb[20].mxu1  ;;  %v1640_v24 = vsel %vm1636_vm11, %v9862_v18, -inf }
 0x429   : > { %1641 = vmax.xlane.f32.xlu0 %v1640_v24  ;;  %v1599_v25 = vpop.f32.mrb[21].mxu1  ;;  %v1620_v33 = vmul.f32 0.35355338, %v8362_v23 }
 0x42a   : > { %v1618_v26 = vmul.f32 0.35355338, %v1599_v25  ;;  %v8363_v27 = vpop.f32.mrb[22].mxu1 }
 0x42b   : > { %1647 = vmax.xlane.f32.xlu1 %v1646_v28  ;;  %v1602_v30 = vpop.f32.mrb[23].mxu1  ;;  %v1621_v34 = vmul.f32 0.35355338, %v8363_v27  ;;  %v9887_v42 = vadd.f32 %v9854_v8, %v1620_v33 }
 0x42c   : > { %v1619_v36 = vmul.f32 0.35355338, %v1602_v30  ;;  %v9877_v37 = vadd.f32 %v9854_v8, %v1618_v26 }
 0x42d   : > { %1644 = vmax.xlane.f32.xlu0 %v1643_v32  ;;  %v9890_v44 = vadd.f32 %v9854_v8, %v1621_v34  ;;  %v1655_v45 = vsel %vm1636_vm11, %v9887_v42, -inf }
 0x42e   : > { %v9880_v38 = vadd.f32 %v9854_v8, %v1619_v36  ;;  %v1649_v39 = vsel %vm1636_vm11, %v9877_v37, -inf }
 0x42f   : > { %v1658_v46 = vsel %vm1636_vm11, %v9890_v44, -inf }
 0x430   : > { %v1652_v41 = vsel %vm1636_vm11, %v9880_v38, -inf }
 0x431   : > { %1650 = vmax.xlane.f32.xlu0 %v1649_v39  ;;  %1653 = vmax.xlane.f32.xlu1 %v1652_v41 }
 0x435   : > { %1656 = vmax.xlane.f32.xlu0 %v1655_v45  ;;  %1659 = vmax.xlane.f32.xlu1 %v1658_v46 }
 0x486   : > { %v9896_v47 = vpop.f32.mrb[8].mxu0 }
 0x487   : > { %v8323_v49 = vpop.f32.mrb[9].mxu0 }
 0x48e   : > { %v8342_v50 = vpop.f32.mrb[12].mxu0 }
 0x48f   : > { %v1473_v53 = vpop.f32.mrb[13].mxu0  ;;  %v1482_v55 = vadd.f32 %v8342_v50, %v7695_v51 }
 0x490   : > { %v8343_v54 = vpop.f32.mrb[14].mxu0  ;;  %v1474_v59 = vadd.f32 %v7695_v51, %v1473_v53 }
 0x491   : > { %v1485_v56 = vadd.f32 %v8343_v54, %v7695_v51  ;;  %v1476_v58 = vpop.f32.mrb[15].mxu0 }
 0x492   : > { %v1477_v60 = vadd.f32 %v7695_v51, %v1476_v58 }
 0x493   : > { %v9901_v62 = vpack.c.bf16 %v1485_v56, %v1482_v55 }
 0x494   : > { %v9903_v63 = vpack.c.bf16 %v1477_v60, %v1474_v59 }
 0x496   : > { %v8346_v0 = vpop.f32.mrb[16].mxu0  ;;  %8364 = vmatprep.subr.bf16.mxu0 %v9903_v63 }
 0x497   : > { %v1489_v1 = vpop.f32.mrb[17].mxu0  ;;  %8365 = vmatpush3.bf16.msra.mxu0 %v9903_v63  ;;  %v1498_v4 = vadd.f32 %v8346_v0, %v7695_v51 }
 0x498   : > { %v8347_v3 = vpop.f32.mrb[18].mxu0  ;;  %8366 = vmatprep.subr.bf16.mxu0 %v9901_v62  ;;  %v1490_v9 = vadd.f32 %v7695_v51, %v1489_v1 }
 0x499   : > { %v1501_v5 = vadd.f32 %v8347_v3, %v7695_v51  ;;  %v1492_v7 = vpop.f32.mrb[19].mxu0 }
 0x49a   : > { %v1493_v10 = vadd.f32 %v7695_v51, %v1492_v7 }
 0x49b   : > { %v9908_v11 = vpack.c.bf16 %v1501_v5, %v1498_v4  ;;  %8367 = vmatpush3.bf16.msra.mxu0 %v9901_v62 }
 0x49c   : > { %v9911_v12 = vpack.c.bf16 %v1493_v10, %v1490_v9 }
 0x49e   : > { %8368 = vmatprep.subr.bf16.mxu0 %v9911_v12 }
 0x49f   : > { %8369 = vmatpush3.bf16.msra.mxu0 %v9911_v12 }
 0x4a0   : > { %8370 = vmatprep.subr.bf16.mxu0 %v9908_v11 }
 0x4a3   : > { %8371 = vmatpush3.bf16.msra.mxu0 %v9908_v11 }
 0x4b4   : > { %v1639_v13 = vpop.xlane.xlu1 %1638 }
 0x4b5   : > { %v1661_v23 = vsub.f32 %v9857_v16, %v1639_v13 }
 0x4b6   : > { %v1642_v14 = vpop.xlane.xlu0 %1641 }
 0x4b7   : > { %v1662_v15 = vsub.f32 %v9862_v18, %v1642_v14  ;;  %v1669_v30 = vmul.f32 1.442695, %v1661_v23 }
 0x4b8   : > { %v1648_v17 = vpop.xlane.xlu1 %1647 }
 0x4b9   : > { %v1664_v24 = vsub.f32 %v9865_v21, %v1648_v17  ;;  %v1671_v25 = vmul.f32 1.442695, %v1662_v15 }
 0x4ba   : > { %v1645_v26 = vpop.xlane.xlu0 %1644 }
 0x4bb   : > { %v1675_v27 = vmul.f32 1.442695, %v1664_v24  ;;  %v1663_v28 = vsub.f32 %v9868_v22, %v1645_v26 }
 0x4bd   : > { %9199 = vpow2.f32 %v1675_v27  ;;  %v1673_v32 = vmul.f32 1.442695, %v1663_v28 }
 0x4be   : > { %9201 = vpow2.f32 %v1671_v25  ;;  %v1654_v41 = vpop.xlane.xlu1 %1653  ;;  %v1651_v45 = vpop.xlane.xlu0 %1650 }
 0x4bf   : > { %9203 = vpow2.f32 %v1673_v32  ;;  %v1666_v53 = vsub.f32 %v9880_v38, %v1654_v41  ;;  %v1665_v55 = vsub.f32 %v9877_v37, %v1651_v45 }
 0x4c0   : > { %9205 = vpow2.f32 %v1669_v30 }
 0x4c1   : > { %v1679_v58 = vmul.f32 1.442695, %v1666_v53  ;;  %v1677_v59 = vmul.f32 1.442695, %v1665_v55 }
 0x4c2   : > { %v1660_v46 = vpop.xlane.xlu1 %1659  ;;  %v1657_v49 = vpop.xlane.xlu0 %1656 }
 0x4c3   : > { %v1668_v50 = vsub.f32 %v9890_v44, %v1660_v46  ;;  %v1667_v51 = vsub.f32 %v9887_v42, %v1657_v49 }
 0x4c5   : > { %v1683_v54 = vmul.f32 1.442695, %v1668_v50  ;;  %v1681_v56 = vmul.f32 1.442695, %v1667_v51 }
 0x4c7   : > { %v9921_v33 = vpop.eup %9199  ;;  %9207 = vpow2.f32 %v1683_v54 }
 0x4c8   : > { %v9923_v34 = vpop.eup %9201  ;;  %v1694_v16 = vsel %vm1636_vm11, %v9921_v33, 0.0  ;;  %9209 = vpow2.f32 %v1681_v56 }
 0x4c9   : > { %v9927_v18 = vpop.eup %9203  ;;  %1695 = vadd.xlane.f32.xlu1 %v1694_v16  ;;  %v1688_v36 = vsel %vm1636_vm11, %v9923_v34, 0.0  ;;  %9211 = vpow2.f32 %v1679_v58 }
 0x4ca   : > { %v1691_v21 = vsel %vm1636_vm11, %v9927_v18, 0.0  ;;  %v9206_v22 = vpop.eup %9205  ;;  %9213 = vpow2.f32 %v1677_v59 }
 0x4cb   : > { %1692 = vadd.xlane.f32.xlu0 %v1691_v21  ;;  %v1685_v39 = vsel %vm1636_vm11, %v9206_v22, 0.0 }
 0x4cd   : > { %1689 = vadd.xlane.f32.xlu1 %v1688_v36 }
 0x4cf   : > { %1686 = vadd.xlane.f32.xlu0 %v1685_v39 }
 0x4d1   : > { %v9942_v60 = vpop.eup %9207 }
 0x4d2   : > { %v9944_v0 = vpop.eup %9209  ;;  %v1706_v44 = vsel %vm1636_vm11, %v9942_v60, 0.0 }
 0x4d3   : > { %v9948_v42 = vpop.eup %9211  ;;  %v1703_v37 = vsel %vm1636_vm11, %v9944_v0, 0.0 }
 0x4d4   : > { %v9952_v38 = vpop.eup %9213  ;;  %v1700_v1 = vsel %vm1636_vm11, %v9948_v42, 0.0 }
 0x4d5   : > { %v1697_v3 = vsel %vm1636_vm11, %v9952_v38, 0.0 }
 0x4de   : > { %1820 = vrot.lane.b32.xlu1 %v9786_v19, %s11704_s28 }
 0x4e5   : > { %1818 = vrot.lane.b32.xlu0 %v9788_v20, %s11704_s28 }
 0x502   : > { %1707 = vadd.xlane.f32.xlu1 %v1706_v44 }
 0x504   : > { %1704 = vadd.xlane.f32.xlu0 %v1703_v37 }
 0x506   : > { %1701 = vadd.xlane.f32.xlu1 %v1700_v1 }
 0x508   : > { %1698 = vadd.xlane.f32.xlu0 %v1697_v3 }
 0x517   : > { %1822 = vrot.lane.b32.xlu1 %v9802_v31, %s11704_s28 }
 0x51b   : > { %1810 = vrot.lane.b32.xlu1 %v9788_v20, %s11705_s29 }
 0x51e   : > { %1824 = vrot.lane.b32.xlu0 %v9800_v29, %s11704_s28 }
 0x51f   : > { %1814 = vrot.lane.b32.xlu1 %v9802_v31, %s11705_s29 }
 0x522   : > { %1812 = vrot.lane.b32.xlu0 %v9786_v19, %s11705_s29 }
 0x523   : > { %2029 = vrot.lane.b32.xlu1 %v9901_v62, %s11705_s29 }
 0x526   : > { %1816 = vrot.lane.b32.xlu0 %v9800_v29, %s11705_s29 }
 0x527   : > { %2031 = vrot.lane.b32.xlu1 %v9911_v12, %s11705_s29 }
 0x52a   : > { %2027 = vrot.lane.b32.xlu0 %v9903_v63, %s11705_s29 }
 0x556   : > { %v1696_v4 = vpop.xlane.xlu1 %1695 }
 0x558   : > { %v1693_v5 = vpop.xlane.xlu0 %1692 }
 0x559   : > { %9215 = vrcp.f32 %v1693_v5 }
 0x55a   : > { %v1690_v7 = vpop.xlane.xlu1 %1689 }
 0x55b   : > { %9217 = vrcp.f32 %v1690_v7 }
 0x55c   : > { %9219 = vrcp.f32 %v1696_v4  ;;  %v1687_v9 = vpop.xlane.xlu0 %1686 }
 0x55d   : > { %9221 = vrcp.f32 %v1687_v9 }
 0x55e   : > { %v1821_v32 = vpop.permute.xlu1 %1820 }
 0x55f   : > { %v1842_v16 = vsel %vm1024_vm2, %v1821_v32, 0 }
 0x560   : > { %v1819_v10 = vpop.permute.xlu0 %1818 }
 0x561   : > { %8995 = vmatprep.subr.msk.bf16.mxu0 %vm1024_vm2, %v1819_v10  ;;  %v1839_v30 = vsel %vm1024_vm2, %v1819_v10, 0 }
 0x563   : > { %v9216_v13 = vpop.eup %9215 }
 0x564   : > { %v1719_v23 = vmul.f32 %v9216_v13, %v9927_v18 }
 0x565   : > { %v9218_v14 = vpop.eup %9217 }
 0x566   : > { %v9220_v15 = vpop.eup %9219  ;;  %v1718_v25 = vmul.f32 %v9218_v14, %v9923_v34 }
 0x567   : > { %v9222_v17 = vpop.eup %9221  ;;  %v1720_v26 = vmul.f32 %v9220_v15, %v9921_v33 }
 0x568   : > { %v1717_v24 = vmul.f32 %v9222_v17, %v9206_v22 }
 0x569   : > { %v1726_v28 = vpack.c.bf16 %v1720_v26, %v1719_v23 }
 0x56a   : > { %v1725_v27 = vpack.c.bf16 %v1718_v25, %v1717_v24 }
 0x56c   : > { %8372 = vmatprep.mubr.msk.bf16.mxu0 %vm1636_vm11, %v1725_v27 }
 0x56d   : > { %8373 = vmatmul.mubr.msk.bf16.vlgmr.msra.gmra.mrb[20].mxu0 %vm1636_vm11, %v1726_v28 }
 0x56e   : > { %8381 = vmatpush3.bf16.xpose.msra.mxu0 %v1839_v30 }
 0x56f   : > { %8996 = vmatprep.subr.msk.bf16.mxu0 %vm1024_vm2, %v1821_v32 }
 0x576   : > { %8383 = vmatpush3.bf16.xpose.msra.mxu0 %v1842_v16 }
 0x58f   : > { %v1708_v18 = vpop.xlane.xlu1 %1707 }
 0x591   : > { %v1705_v21 = vpop.xlane.xlu0 %1704 }
 0x592   : > { %9223 = vrcp.f32 %v1705_v21 }
 0x593   : > { %v1702_v34 = vpop.xlane.xlu1 %1701 }
 0x594   : > { %9225 = vrcp.f32 %v1702_v34 }
 0x595   : > { %9227 = vrcp.f32 %v1708_v18  ;;  %v1699_v33 = vpop.xlane.xlu0 %1698 }
 0x596   : > { %9229 = vrcp.f32 %v1699_v33 }
 0x597   : > { %v1823_v22 = vpop.permute.xlu1 %1822 }
 0x598   : > { %8997 = vmatprep.subr.msk.bf16.mxu0 %vm1024_vm2, %v1823_v22  ;;  %v1845_v36 = vsel %vm1024_vm2, %v1823_v22, 0 }
 0x599   : > { %v1825_v39 = vpop.permute.xlu0 %1824  ;;  %8385 = vmatpush3.bf16.xpose.msra.mxu0 %v1845_v36 }
 0x59a   : > { %8998 = vmatprep.subr.msk.bf16.mxu0 %vm1024_vm2, %v1825_v39  ;;  %v1848_v54 = vsel %vm1024_vm2, %v1825_v39, 0 }
 0x59b   : > { %v1811_v41 = vpop.permute.xlu1 %1810 }
 0x59c   : > { %v9224_v45 = vpop.eup %9223 }
 0x59d   : > { %v1813_v46 = vpop.permute.xlu0 %1812  ;;  %v1723_v55 = vmul.f32 %v9224_v45, %v9944_v0 }
 0x59e   : > { %v9226_v49 = vpop.eup %9225 }
 0x59f   : > { %v9228_v50 = vpop.eup %9227  ;;  %v1815_v51 = vpop.permute.xlu1 %1814  ;;  %v1722_v59 = vmul.f32 %v9226_v49, %v9948_v42 }
 0x5a0   : > { %v9230_v53 = vpop.eup %9229  ;;  %v1724_v44 = vmul.f32 %v9228_v50, %v9942_v60 }
 0x5a1   : > { %v1817_v56 = vpop.permute.xlu0 %1816  ;;  %8387 = vmatpush3.bf16.xpose.msra.mxu0 %v1848_v54  ;;  %v1721_v58 = vmul.f32 %v9230_v53, %v9952_v38 }
 0x5a2   : > { %v1728_v1 = vpack.c.bf16 %v1724_v44, %v1723_v55 }
 0x5a3   : > { %v1727_v37 = vpack.c.bf16 %v1722_v59, %v1721_v58  ;;  %v2030_v3 = vpop.permute.xlu1 %2029 }
 0x5a5   : > { %v2028_v4 = vpop.permute.xlu0 %2027  ;;  %8376 = vmatprep.mubr.msk.bf16.mxu0 %vm1636_vm11, %v1727_v37 }
 0x5a6   : > { %8377 = vmatmul.mubr.msk.bf16.gmra.mrb[24].mxu0 %vm1636_vm11, %v1728_v1  ;;  %8396 = vmatprep.subr.bf16.mxu1 %v2028_v4 }
 0x5a7   : > { %8388 = vmatprep.mubr.msk.bf16.mxu0 %vm1024_vm2, %v1811_v41  ;;  %8397 = vmatpush3.bf16.msra.mxu1 %v2028_v4  ;;  %v2032_v0 = vpop.permute.xlu1 %2031 }
 0x5a8   : > { %8398 = vmatprep.subr.bf16.mxu1 %v2030_v3 }
 0x5ab   : > { %8399 = vmatpush3.bf16.msra.mxu1 %v2030_v3 }
 0x5ac   : > { %8400 = vmatprep.subr.bf16.mxu1 %v2032_v0 }
 0x5ae   : > { %8389 = vmatmul.mubr.msk.bf16.vlgmr.msra.gmra.mrb[28].mxu0 %vm1024_vm2, %v1813_v46 }
 0x5af   : > { %8392 = vmatprep.mubr.msk.bf16.mxu0 %vm1024_vm2, %v1815_v51  ;;  %8401 = vmatpush3.bf16.msra.mxu1 %v2032_v0 }
 0x5b6   : > { %8393 = vmatmul.mubr.msk.bf16.gmra.mrb[32].mxu0 %vm1024_vm2, %v1817_v56 }
 0x640   : > { %v9999_v60 = vpop.f32.mrb[20].mxu0 }
 0x641   : > { %v10001_v42 = vpop.f32.mrb[21].mxu0 }
 0x642   : > { %v10003_v38 = vpop.f32.mrb[22].mxu0 }
 0x643   : > { %v10005_v5 = vpop.f32.mrb[23].mxu0 }
 0x679   : > { %v10007_v7 = vpop.f32.mrb[24].mxu0 }
 0x67a   : > { %v10009_v9 = vpop.f32.mrb[25].mxu0 }
 0x67b   : > { %v10011_v10 = vpop.f32.mrb[26].mxu0 }
 0x67c   : > { %v10013_v13 = vpop.f32.mrb[27].mxu0 }
 0x681   : > { %v8390_v14 = vpop.f32.mrb[28].mxu0 }
 0x682   : > { %v1917_v15 = vmul.f32 0.35355338, %v8390_v14  ;;  %v1884_v17 = vpop.f32.mrb[29].mxu0 }
 0x683   : > { %v1915_v23 = vmul.f32 0.35355338, %v1884_v17  ;;  %v8391_v24 = vpop.f32.mrb[30].mxu0 }
 0x684   : > { %v1918_v25 = vmul.f32 0.35355338, %v8391_v24  ;;  %v1887_v26 = vpop.f32.mrb[31].mxu0  ;;  %v1925_v27 = vadd.f32 %v9854_v8, %v1917_v15 }
 0x685   : > { %v1916_v28 = vmul.f32 0.35355338, %v1887_v26  ;;  %v1923_v30 = vadd.f32 %v9854_v8, %v1915_v23 }
 0x686   : > { %v1937_v32 = vsel %vm1636_vm11, %v1925_v27, -inf  ;;  %v1926_v21 = vadd.f32 %v9854_v8, %v1918_v25 }
 0x687   : > { %1938 = vmax.xlane.f32.xlu0 %v1937_v32  ;;  %v1931_v16 = vsel %vm1636_vm11, %v1923_v30, -inf  ;;  %v1924_v18 = vadd.f32 %v9854_v8, %v1916_v28 }
 0x688   : > { %1932 = vmax.xlane.f32.xlu1 %v1931_v16  ;;  %v1940_v45 = vsel %vm1636_vm11, %v1926_v21, -inf }
 0x689   : > { %v8394_v34 = vpop.f32.mrb[32].mxu0  ;;  %v1934_v33 = vsel %vm1636_vm11, %v1924_v18, -inf }
 0x68a   : > { %v1921_v22 = vmul.f32 0.35355338, %v8394_v34  ;;  %v1900_v36 = vpop.f32.mrb[33].mxu0 }
 0x68b   : > { %v1919_v39 = vmul.f32 0.35355338, %v1900_v36  ;;  %1935 = vmax.xlane.f32.xlu0 %v1934_v33  ;;  %v8395_v41 = vpop.f32.mrb[34].mxu0 }
 0x68c   : > { %v1922_v46 = vmul.f32 0.35355338, %v8395_v41  ;;  %1941 = vmax.xlane.f32.xlu1 %v1940_v45  ;;  %v1903_v49 = vpop.f32.mrb[35].mxu0  ;;  %v1929_v50 = vadd.f32 %v9854_v8, %v1921_v22 }
 0x68d   : > { %v1920_v51 = vmul.f32 0.35355338, %v1903_v49  ;;  %v1927_v55 = vadd.f32 %v9854_v8, %v1919_v39 }
 0x68e   : > { %v1949_v53 = vsel %vm1636_vm11, %v1929_v50, -inf  ;;  %v1930_v54 = vadd.f32 %v9854_v8, %v1922_v46 }
 0x68f   : > { %1950 = vmax.xlane.f32.xlu0 %v1949_v53  ;;  %v1928_v58 = vadd.f32 %v9854_v8, %v1920_v51  ;;  %v1943_v59 = vsel %vm1636_vm11, %v1927_v55, -inf }
 0x690   : > { %v1952_v56 = vsel %vm1636_vm11, %v1930_v54, -inf }
 0x691   : > { %1953 = vmax.xlane.f32.xlu1 %v1952_v56  ;;  %v1946_v44 = vsel %vm1636_vm11, %v1928_v58, -inf }
 0x693   : > { %1944 = vmax.xlane.f32.xlu0 %v1943_v59 }
 0x695   : > { %1947 = vmax.xlane.f32.xlu1 %v1946_v44 }
 0x6a6   : > { %2126 = vrot.lane.b32.xlu1 %v9786_v19, %s11702_s0 }
 0x6a9   : > { %2033 = vrot.lane.b32.xlu0 %v9908_v11, %s11705_s29 }
 0x714   : > { %v1939_v37 = vpop.xlane.xlu0 %1938 }
 0x715   : > { %v1957_v1 = vsub.f32 %v1925_v27, %v1939_v37  ;;  %v1933_v3 = vpop.xlane.xlu1 %1932 }
 0x716   : > { %v1955_v4 = vsub.f32 %v1923_v30, %v1933_v3 }
 0x717   : > { %v1967_v0 = vmul.f32 1.442695, %v1957_v1 }
 0x718   : > { %v1963_v14 = vmul.f32 1.442695, %v1955_v4  ;;  %v1936_v15 = vpop.xlane.xlu0 %1935 }
 0x719   : > { %9231 = vpow2.f32 %v1967_v0  ;;  %v1956_v17 = vsub.f32 %v1924_v18, %v1936_v15  ;;  %v1942_v23 = vpop.xlane.xlu1 %1941 }
 0x71a   : > { %v1958_v24 = vsub.f32 %v1926_v21, %v1942_v23  ;;  %9233 = vpow2.f32 %v1963_v14 }
 0x71b   : > { %v1965_v25 = vmul.f32 1.442695, %v1956_v17 }
 0x71c   : > { %v1969_v26 = vmul.f32 1.442695, %v1958_v24  ;;  %v1951_v28 = vpop.xlane.xlu0 %1950 }
 0x71d   : > { %v1961_v41 = vsub.f32 %v1929_v50, %v1951_v28 }
 0x71e   : > { %9235 = vpow2.f32 %v1969_v26  ;;  %v1954_v39 = vpop.xlane.xlu1 %1953 }
 0x71f   : > { %9237 = vpow2.f32 %v1965_v25  ;;  %v1975_v46 = vmul.f32 1.442695, %v1961_v41  ;;  %v1962_v56 = vsub.f32 %v1930_v54, %v1954_v39 }
 0x720   : > { %v1945_v32 = vpop.xlane.xlu0 %1944 }
 0x721   : > { %v1959_v51 = vsub.f32 %v1927_v55, %v1945_v32  ;;  %9239 = vpow2.f32 %v1975_v46  ;;  %v1977_v44 = vmul.f32 1.442695, %v1962_v56 }
 0x722   : > { %v1948_v45 = vpop.xlane.xlu1 %1947 }
 0x723   : > { %v10035_v16 = vpop.eup %9231  ;;  %v1960_v49 = vsub.f32 %v1928_v58, %v1948_v45  ;;  %v1971_v59 = vmul.f32 1.442695, %v1959_v51 }
 0x724   : > { %v2034_v34 = vpop.permute.xlu0 %2033  ;;  %v1985_v27 = vsel %vm1636_vm11, %v10035_v16, 0.0  ;;  %v10039_v30 = vpop.eup %9233 }
 0x725   : > { %1986 = vadd.xlane.f32.xlu0 %v1985_v27  ;;  %8402 = vmatprep.subr.bf16.mxu1 %v2034_v34  ;;  %v1979_v21 = vsel %vm1636_vm11, %v10039_v30, 0.0  ;;  %v1973_v53 = vmul.f32 1.442695, %v1960_v49 }
 0x726   : > { %8403 = vmatpush3.bf16.msra.mxu1 %v2034_v34  ;;  %v2127_v14 = vpop.permute.xlu1 %2126 }
 0x727   : > { %9241 = vpow2.f32 %v1973_v53  ;;  %v2148_v45 = vsel %vm1024_vm2, %v2127_v14, 0 }
 0x728   : > { %v9236_v18 = vpop.eup %9235  ;;  %9243 = vpow2.f32 %v1971_v59 }
 0x729   : > { %1980 = vadd.xlane.f32.xlu0 %v1979_v21  ;;  %v1988_v33 = vsel %vm1636_vm11, %v9236_v18, 0.0  ;;  %v9238_v22 = vpop.eup %9237  ;;  %9245 = vpow2.f32 %v1977_v44 }
 0x72a   : > { %1989 = vadd.xlane.f32.xlu1 %v1988_v33  ;;  %v1982_v36 = vsel %vm1636_vm11, %v9238_v22, 0.0 }
 0x72b   : > { %v10049_v37 = vpop.eup %9239 }
 0x72c   : > { %v1997_v1 = vsel %vm1636_vm11, %v10049_v37, 0.0 }
 0x72e   : > { %1983 = vadd.xlane.f32.xlu1 %v1982_v36 }
 0x731   : > { %v10053_v3 = vpop.eup %9241 }
 0x732   : > { %v10055_v50 = vpop.eup %9243  ;;  %v1994_v55 = vsel %vm1636_vm11, %v10053_v3, 0.0 }
 0x733   : > { %v1991_v54 = vsel %vm1636_vm11, %v10055_v50, 0.0  ;;  %v10061_v58 = vpop.eup %9245 }
 0x734   : > { %v2000_v4 = vsel %vm1636_vm11, %v10061_v58, 0.0 }
 0x73f   : > { %2124 = vrot.lane.b32.xlu0 %v9788_v20, %s11702_s0  ;;  %2128 = vrot.lane.b32.xlu1 %v9802_v31, %s11702_s0 }
 0x75e   : > { %1998 = vadd.xlane.f32.xlu0 %v1997_v1 }
 0x762   : > { %1995 = vadd.xlane.f32.xlu0 %v1994_v55 }
 0x763   : > { %1992 = vadd.xlane.f32.xlu1 %v1991_v54 }
 0x767   : > { %2001 = vadd.xlane.f32.xlu1 %v2000_v4 }
 0x778   : > { %2116 = vrot.lane.b32.xlu1 %v9788_v20, %s11700_s9  ;;  %2130 = vrot.lane.b32.xlu0 %v9800_v29, %s11702_s0  ;;  %s11755_s0 = smov 120  }
 0x77c   : > { %2120 = vrot.lane.b32.xlu1 %v9802_v31, %s11700_s9  ;;  %2118 = vrot.lane.b32.xlu0 %v9786_v19, %s11700_s9 }
 0x780   : > { %2331 = vrot.lane.b32.xlu1 %v9901_v62, %s11700_s9  ;;  %2122 = vrot.lane.b32.xlu0 %v9800_v29, %s11700_s9 }
 0x784   : > { %2333 = vrot.lane.b32.xlu1 %v9911_v12, %s11700_s9  ;;  %2329 = vrot.lane.b32.xlu0 %v9903_v63, %s11700_s9 }
 0x7b2   : > { %v1987_v0 = vpop.xlane.xlu0 %1986 }
 0x7b6   : > { %v1981_v15 = vpop.xlane.xlu0 %1980 }
 0x7b7   : > { %v1990_v17 = vpop.xlane.xlu1 %1989 }
 0x7b8   : > { %9247 = vrcp.f32 %v1990_v17 }
 0x7b9   : > { %9249 = vrcp.f32 %v1981_v15 }
 0x7ba   : > { %v2125_v23 = vpop.permute.xlu0 %2124  ;;  %9251 = vrcp.f32 %v1987_v0 }
 0x7bb   : > { %8999 = vmatprep.subr.msk.bf16.mxu1 %vm1024_vm2, %v2125_v23  ;;  %v1984_v24 = vpop.xlane.xlu1 %1983  ;;  %v2145_v41 = vsel %vm1024_vm2, %v2125_v23, 0 }
 0x7bc   : > { %9253 = vrcp.f32 %v1984_v24 }
 0x7bf   : > { %v2129_v46 = vpop.permute.xlu1 %2128 }
 0x7c2   : > { %v9248_v25 = vpop.eup %9247 }
 0x7c3   : > { %v9250_v26 = vpop.eup %9249  ;;  %v2014_v34 = vmul.f32 %v9248_v25, %v9236_v18 }
 0x7c4   : > { %v9252_v28 = vpop.eup %9251  ;;  %v2011_v27 = vmul.f32 %v9250_v26, %v10039_v30  ;;  %v2151_v30 = vsel %vm1024_vm2, %v2129_v46, 0 }
 0x7c5   : > { %v2013_v33 = vmul.f32 %v9252_v28, %v10035_v16 }
 0x7c6   : > { %v9254_v32 = vpop.eup %9253 }
 0x7c7   : > { %v2012_v21 = vmul.f32 %v9254_v32, %v9238_v22  ;;  %v2020_v39 = vpack.c.bf16 %v2014_v34, %v2013_v33 }
 0x7c9   : > { %v2019_v36 = vpack.c.bf16 %v2012_v21, %v2011_v27 }
 0x7cb   : > { %8404 = vmatprep.mubr.msk.bf16.mxu1 %vm1636_vm11, %v2019_v36 }
 0x7cc   : > { %8405 = vmatmul.mubr.msk.bf16.vlgmr.msra.gmra.mrb[24].mxu1 %vm1636_vm11, %v2020_v39 }
 0x7cd   : > { %8413 = vmatpush3.bf16.xpose.msra.mxu1 %v2145_v41 }
 0x7ce   : > { %9000 = vmatprep.subr.msk.bf16.mxu1 %vm1024_vm2, %v2127_v14 }
 0x7d5   : > { %8415 = vmatpush3.bf16.xpose.msra.mxu1 %v2148_v45 }
 0x7d6   : > { %9001 = vmatprep.subr.msk.bf16.mxu1 %vm1024_vm2, %v2129_v46 }
 0x7dd   : > { %8417 = vmatpush3.bf16.xpose.msra.mxu1 %v2151_v30 }
 0x7eb   : > { %v1999_v16 = vpop.xlane.xlu0 %1998 }
 0x7ef   : > { %v1996_v18 = vpop.xlane.xlu0 %1995 }
 0x7f0   : > { %9255 = vrcp.f32 %v1996_v18  ;;  %v1993_v22 = vpop.xlane.xlu1 %1992 }
 0x7f1   : > { %9257 = vrcp.f32 %v1993_v22 }
 0x7f2   : > { %9259 = vrcp.f32 %v1999_v16 }
 0x7f3   : > { %v2131_v49 = vpop.permute.xlu0 %2130 }
 0x7f4   : > { %9002 = vmatprep.subr.msk.bf16.mxu1 %vm1024_vm2, %v2131_v49  ;;  %v2002_v51 = vpop.xlane.xlu1 %2001  ;;  %v2154_v53 = vsel %vm1024_vm2, %v2131_v49, 0 }
 0x7f5   : > { %9261 = vrcp.f32 %v2002_v51  ;;  %8419 = vmatpush3.bf16.xpose.msra.mxu1 %v2154_v53 }
 0x7f7   : > { %v2119_v56 = vpop.permute.xlu0 %2118 }
 0x7f8   : > { %v2117_v59 = vpop.permute.xlu1 %2116 }
 0x7fa   : > { %v9256_v44 = vpop.eup %9255 }
 0x7fb   : > { %v9258_v1 = vpop.eup %9257  ;;  %v2123_v55 = vpop.permute.xlu0 %2122  ;;  %v2016_v54 = vmul.f32 %v9256_v44, %v10053_v3 }
 0x7fc   : > { %v2121_v4 = vpop.permute.xlu1 %2120  ;;  %v2015_v0 = vmul.f32 %v9258_v1, %v10055_v50  ;;  %v9260_v14 = vpop.eup %9259 }
 0x7fd   : > { %v2017_v25 = vmul.f32 %v9260_v14, %v10049_v37 }
 0x7fe   : > { %v2021_v15 = vpack.c.bf16 %v2016_v54, %v2015_v0 }
 0x7ff   : > { %v9262_v17 = vpop.eup %9261  ;;  %v2330_v23 = vpop.permute.xlu0 %2329 }
 0x800   : > { %8408 = vmatprep.mubr.msk.bf16.mxu1 %vm1636_vm11, %v2021_v15  ;;  %8428 = vmatprep.subr.bf16.mxu0 %v2330_v23  ;;  %v2332_v24 = vpop.permute.xlu1 %2331  ;;  %v2018_v26 = vmul.f32 %v9262_v17, %v10061_v58 }
 0x801   : > { %8429 = vmatpush3.bf16.msra.mxu0 %v2330_v23 }
 0x802   : > { %8430 = vmatprep.subr.bf16.mxu0 %v2332_v24  ;;  %v2022_v28 = vpack.c.bf16 %v2018_v26, %v2017_v25 }
 0x804   : > { %8409 = vmatmul.mubr.msk.bf16.gmra.mrb[28].mxu1 %vm1636_vm11, %v2022_v28  ;;  %v2334_v3 = vpop.permute.xlu1 %2333 }
 0x805   : > { %8420 = vmatprep.mubr.msk.bf16.mxu1 %vm1024_vm2, %v2117_v59  ;;  %8431 = vmatpush3.bf16.msra.mxu0 %v2332_v24 }
 0x806   : > { %8432 = vmatprep.subr.bf16.mxu0 %v2334_v3 }
 0x809   : > { %8433 = vmatpush3.bf16.msra.mxu0 %v2334_v3 }
 0x80c   : > { %8421 = vmatmul.mubr.msk.bf16.vlgmr.msra.gmra.mrb[32].mxu1 %vm1024_vm2, %v2119_v56 }
 0x80d   : > { %8424 = vmatprep.mubr.msk.bf16.mxu1 %vm1024_vm2, %v2121_v4 }
 0x814   : > { %8425 = vmatmul.mubr.msk.bf16.gmra.mrb[36].mxu1 %vm1024_vm2, %v2123_v55 }
 0x89f   : > { %v10103_v37 = vpop.f32.mrb[24].mxu1 }
 0x8a0   : > { %v10105_v50 = vpop.f32.mrb[25].mxu1 }
 0x8a1   : > { %v10107_v58 = vpop.f32.mrb[26].mxu1 }
 0x8a2   : > { %v9036_v32 = vpack.i.bf16 %v10107_v58, %v10103_v37  ;;  %v10111_v34 = vpop.f32.mrb[27].mxu1 }
 0x8a3   : > { %v9031_v27 = vpack.i.bf16 %v10111_v34, %v10105_v50 }
 0x8d7   : > { %v10115_v21 = vpop.f32.mrb[28].mxu1 }
 0x8d8   : > { %v10117_v33 = vpop.f32.mrb[29].mxu1 }
 0x8d9   : > { %v10119_v36 = vpop.f32.mrb[30].mxu1 }
 0x8da   : > { %v10123_v41 = vpop.f32.mrb[31].mxu1  ;;  %v11740_v50 = vpack.i.bf16 %v10119_v36, %v10115_v21 }
 0x8df   : > { %v8422_v46 = vpop.f32.mrb[32].mxu1 }
 0x8e0   : > { %v2223_v30 = vmul.f32 0.35355338, %v8422_v46  ;;  %v2190_v16 = vpop.f32.mrb[33].mxu1 }
 0x8e1   : > { %v2221_v18 = vmul.f32 0.35355338, %v2190_v16  ;;  %v8423_v22 = vpop.f32.mrb[34].mxu1 }
 0x8e2   : > { %v2224_v49 = vmul.f32 0.35355338, %v8423_v22  ;;  %v2193_v51 = vpop.f32.mrb[35].mxu1  ;;  %v2231_v53 = vadd.f32 %v9854_v8, %v2223_v30 }
 0x8e3   : > { %v2222_v56 = vmul.f32 0.35355338, %v2193_v51  ;;  %v2229_v59 = vadd.f32 %v9854_v8, %v2221_v18 }
 0x8e4   : > { %v2243_v44 = vsel %vm1636_vm11, %v2231_v53, -inf  ;;  %v2232_v54 = vadd.f32 %v9854_v8, %v2224_v49 }
 0x8e5   : > { %2244 = vmax.xlane.f32.xlu0 %v2243_v44  ;;  %v2237_v1 = vsel %vm1636_vm11, %v2229_v59, -inf  ;;  %v2230_v55 = vadd.f32 %v9854_v8, %v2222_v56 }
 0x8e6   : > { %2238 = vmax.xlane.f32.xlu1 %v2237_v1  ;;  %v2246_v24 = vsel %vm1636_vm11, %v2232_v54, -inf }
 0x8e7   : > { %v8426_v4 = vpop.f32.mrb[36].mxu1  ;;  %v2240_v0 = vsel %vm1636_vm11, %v2230_v55, -inf }
 0x8e8   : > { %v2227_v14 = vmul.f32 0.35355338, %v8426_v4  ;;  %v2206_v15 = vpop.f32.mrb[37].mxu1 }
 0x8e9   : > { %v2225_v17 = vmul.f32 0.35355338, %v2206_v15  ;;  %2241 = vmax.xlane.f32.xlu0 %v2240_v0  ;;  %v8427_v23 = vpop.f32.mrb[38].mxu1 }
 0x8ea   : > { %v2228_v25 = vmul.f32 0.35355338, %v8427_v23  ;;  %2247 = vmax.xlane.f32.xlu1 %v2246_v24  ;;  %v2209_v26 = vpop.f32.mrb[39].mxu1  ;;  %v2235_v28 = vadd.f32 %v9854_v8, %v2227_v14 }
 0x8eb   : > { %v2226_v3 = vmul.f32 0.35355338, %v2209_v26  ;;  %v2233_v16 = vadd.f32 %v9854_v8, %v2225_v17 }
 0x8ec   : > { %v2255_v46 = vsel %vm1636_vm11, %v2235_v28, -inf  ;;  %v2236_v30 = vadd.f32 %v9854_v8, %v2228_v25 }
 0x8ed   : > { %2256 = vmax.xlane.f32.xlu0 %v2255_v46  ;;  %v2234_v22 = vadd.f32 %v9854_v8, %v2226_v3  ;;  %v2249_v49 = vsel %vm1636_vm11, %v2233_v16, -inf }
 0x8ee   : > { %v2258_v18 = vsel %vm1636_vm11, %v2236_v30, -inf }
 0x8ef   : > { %2259 = vmax.xlane.f32.xlu1 %v2258_v18  ;;  %v2252_v51 = vsel %vm1636_vm11, %v2234_v22, -inf }
 0x8f1   : > { %2250 = vmax.xlane.f32.xlu0 %v2249_v49 }
 0x8f3   : > { %2253 = vmax.xlane.f32.xlu1 %v2252_v51 }
 0x904   : > { %2428 = vrot.lane.b32.xlu1 %v9786_v19, %s11694_s30 }
 0x907   : > { %2335 = vrot.lane.b32.xlu0 %v9908_v11, %s11700_s9  ;;  %s11750_s9 = sld [smem:[#allocation8_spill]] }
 0x972   : > { %v2245_v56 = vpop.xlane.xlu0 %2244 }
 0x973   : > { %v2263_v44 = vsub.f32 %v2231_v53, %v2245_v56  ;;  %v2239_v1 = vpop.xlane.xlu1 %2238 }
 0x974   : > { %v2261_v4 = vsub.f32 %v2229_v59, %v2239_v1 }
 0x975   : > { %v2273_v0 = vmul.f32 1.442695, %v2263_v44 }
 0x976   : > { %v2269_v8 = vmul.f32 1.442695, %v2261_v4  ;;  %v2242_v14 = vpop.xlane.xlu0 %2241 }
 0x977   : > { %9263 = vpow2.f32 %v2273_v0  ;;  %v2262_v15 = vsub.f32 %v2230_v55, %v2242_v14  ;;  %v2248_v17 = vpop.xlane.xlu1 %2247 }
 0x978   : > { %v2264_v23 = vsub.f32 %v2232_v54, %v2248_v17  ;;  %9265 = vpow2.f32 %v2269_v8 }
 0x979   : > { %v2271_v24 = vmul.f32 1.442695, %v2262_v15 }
 0x97a   : > { %v2275_v25 = vmul.f32 1.442695, %v2264_v23  ;;  %v2257_v26 = vpop.xlane.xlu0 %2256 }
 0x97b   : > { %v2267_v1 = vsub.f32 %v2235_v28, %v2257_v26 }
 0x97c   : > { %9267 = vpow2.f32 %v2275_v25  ;;  %v2260_v44 = vpop.xlane.xlu1 %2259 }
 0x97d   : > { %9269 = vpow2.f32 %v2271_v24  ;;  %v2281_v0 = vmul.f32 1.442695, %v2267_v1  ;;  %v2268_v17 = vsub.f32 %v2236_v30, %v2260_v44 }
 0x97e   : > { %v2251_v3 = vpop.xlane.xlu0 %2250 }
 0x97f   : > { %v2265_v14 = vsub.f32 %v2233_v16, %v2251_v3  ;;  %9271 = vpow2.f32 %v2281_v0  ;;  %v2283_v24 = vmul.f32 1.442695, %v2268_v17 }
 0x980   : > { %v2254_v4 = vpop.xlane.xlu1 %2253 }
 0x981   : > { %v10147_v46 = vpop.eup %9263  ;;  %v2266_v8 = vsub.f32 %v2234_v22, %v2254_v4  ;;  %v2277_v23 = vmul.f32 1.442695, %v2265_v14 }
 0x982   : > { %v2336_v18 = vpop.permute.xlu0 %2335  ;;  %v2291_v53 = vsel %vm1636_vm11, %v10147_v46, 0.0  ;;  %v9266_v59 = vpop.eup %9265 }
 0x983   : > { %2292 = vadd.xlane.f32.xlu0 %v2291_v53  ;;  %8434 = vmatprep.subr.bf16.mxu0 %v2336_v18  ;;  %v2285_v54 = vsel %vm1636_vm11, %v9266_v59, 0.0  ;;  %v2279_v15 = vmul.f32 1.442695, %v2266_v8 }
 0x984   : > { %8435 = vmatpush3.bf16.msra.mxu0 %v2336_v18 }
 0x985   : > { %9273 = vpow2.f32 %v2279_v15 }
 0x986   : > { %v9268_v55 = vpop.eup %9267  ;;  %9275 = vpow2.f32 %v2277_v23 }
 0x987   : > { %2286 = vadd.xlane.f32.xlu0 %v2285_v54  ;;  %v2294_v49 = vsel %vm1636_vm11, %v9268_v55, 0.0  ;;  %v9270_v51 = vpop.eup %9269  ;;  %9277 = vpow2.f32 %v2283_v24  ;;  %v2429_v54 = vpop.permute.xlu1 %2428 }
 0x988   : > { %2295 = vadd.xlane.f32.xlu1 %v2294_v49  ;;  %v2288_v56 = vsel %vm1636_vm11, %v9270_v51, 0.0  ;;  %v2450_v24 = vsel %vm1024_vm2, %v2429_v54, 0 }
 0x989   : > { %v10158_v25 = vpop.eup %9271 }
 0x98a   : > { %v2303_v18 = vsel %vm1636_vm11, %v10158_v25, 0.0 }
 0x98c   : > { %2289 = vadd.xlane.f32.xlu1 %v2288_v56 }
 0x98f   : > { %v9274_v53 = vpop.eup %9273 }
 0x990   : > { %v9276_v28 = vpop.eup %9275  ;;  %v2300_v26 = vsel %vm1636_vm11, %v9274_v53, 0.0 }
 0x991   : > { %v2297_v16 = vsel %vm1636_vm11, %v9276_v28, 0.0  ;;  %v10164_v22 = vpop.eup %9277 }
 0x992   : > { %v2306_v30 = vsel %vm1636_vm11, %v10164_v22, 0.0 }
 0x99d   : > { %2426 = vrot.lane.b32.xlu0 %v9788_v20, %s11694_s30  ;;  %2430 = vrot.lane.b32.xlu1 %v9802_v31, %s11694_s30 }
 0x9bc   : > { %2304 = vadd.xlane.f32.xlu0 %v2303_v18 }
 0x9c0   : > { %2301 = vadd.xlane.f32.xlu0 %v2300_v26 }
 0x9c1   : > { %2298 = vadd.xlane.f32.xlu1 %v2297_v16 }
 0x9c5   : > { %2307 = vadd.xlane.f32.xlu1 %v2306_v30 }
 0x9d6   : > { %2418 = vrot.lane.b32.xlu1 %v9788_v20, %s11692_s2  ;;  %2432 = vrot.lane.b32.xlu0 %v9800_v29, %s11694_s30  ;;  %s11696_s30 = smov 24  }
 0x9da   : > { %2422 = vrot.lane.b32.xlu1 %v9802_v31, %s11692_s2  ;;  %2420 = vrot.lane.b32.xlu0 %v9786_v19, %s11692_s2 }
 0x9de   : > { %2424 = vrot.lane.b32.xlu0 %v9800_v29, %s11692_s2 }
 0xa10   : > { %v2293_v3 = vpop.xlane.xlu0 %2292 }
 0xa14   : > { %v2287_v49 = vpop.xlane.xlu0 %2286 }
 0xa15   : > { %v2296_v56 = vpop.xlane.xlu1 %2295 }
 0xa16   : > { %9279 = vrcp.f32 %v2296_v56 }
 0xa17   : > { %9281 = vrcp.f32 %v2287_v49 }
 0xa18   : > { %v2427_v44 = vpop.permute.xlu0 %2426  ;;  %9283 = vrcp.f32 %v2293_v3 }
 0xa19   : > { %9003 = vmatprep.subr.msk.bf16.mxu0 %vm1024_vm2, %v2427_v44  ;;  %v2290_v20 = vpop.xlane.xlu1 %2289  ;;  %v2447_v23 = vsel %vm1024_vm2, %v2427_v44, 0 }
 0xa1a   : > { %9285 = vrcp.f32 %v2290_v20 }
 0xa1d   : > { %v2431_v18 = vpop.permute.xlu1 %2430 }
 0xa20   : > { %v9280_v1 = vpop.eup %9279 }
 0xa21   : > { %v9282_v31 = vpop.eup %9281  ;;  %v2320_v19 = vmul.f32 %v9280_v1, %v9268_v55 }
 0xa22   : > { %v9284_v4 = vpop.eup %9283  ;;  %v2317_v8 = vmul.f32 %v9282_v31, %v9266_v59  ;;  %v2453_v59 = vsel %vm1024_vm2, %v2431_v18, 0 }
 0xa23   : > { %v2319_v29 = vmul.f32 %v9284_v4, %v10147_v46 }
 0xa24   : > { %v9286_v0 = vpop.eup %9285 }
 0xa25   : > { %v2318_v14 = vmul.f32 %v9286_v0, %v9270_v51  ;;  %v2326_v17 = vpack.c.bf16 %v2320_v19, %v2319_v29 }
 0xa27   : > { %v2325_v15 = vpack.c.bf16 %v2318_v14, %v2317_v8 }
 0xa29   : > { %8436 = vmatprep.mubr.msk.bf16.mxu0 %vm1636_vm11, %v2325_v15 }
 0xa2a   : > { %8437 = vmatmul.mubr.msk.bf16.vlgmr.msra.gmra.mrb[36].mxu0 %vm1636_vm11, %v2326_v17 }
 0xa2b   : > { %8445 = vmatpush3.bf16.xpose.msra.mxu0 %v2447_v23 }
 0xa2c   : > { %9004 = vmatprep.subr.msk.bf16.mxu0 %vm1024_vm2, %v2429_v54 }
 0xa33   : > { %8447 = vmatpush3.bf16.xpose.msra.mxu0 %v2450_v24 }
 0xa34   : > { %9005 = vmatprep.subr.msk.bf16.mxu0 %vm1024_vm2, %v2431_v18 }
 0xa3b   : > { %8449 = vmatpush3.bf16.xpose.msra.mxu0 %v2453_v59 }
 0xa49   : > { %v2305_v46 = vpop.xlane.xlu0 %2304 }
 0xa4d   : > { %v2302_v55 = vpop.xlane.xlu0 %2301 }
 0xa4e   : > { %9287 = vrcp.f32 %v2302_v55  ;;  %v2299_v51 = vpop.xlane.xlu1 %2298 }
 0xa4f   : > { %9289 = vrcp.f32 %v2299_v51 }
 0xa50   : > { %9291 = vrcp.f32 %v2305_v46 }
 0xa51   : > { %v2433_v26 = vpop.permute.xlu0 %2432 }
 0xa52   : > { %9006 = vmatprep.subr.msk.bf16.mxu0 %vm1024_vm2, %v2433_v26  ;;  %v2308_v16 = vpop.xlane.xlu1 %2307  ;;  %v2456_v30 = vsel %vm1024_vm2, %v2433_v26, 0 }
 0xa53   : > { %9293 = vrcp.f32 %v2308_v16  ;;  %8451 = vmatpush3.bf16.xpose.msra.mxu0 %v2456_v30 }
 0xa55   : > { %v2421_v8 = vpop.permute.xlu0 %2420 }
 0xa56   : > { %v2419_v19 = vpop.permute.xlu1 %2418 }
 0xa58   : > { %v9288_v3 = vpop.eup %9287 }
 0xa59   : > { %v9290_v54 = vpop.eup %9289  ;;  %v2322_v49 = vmul.f32 %v9288_v3, %v9274_v53  ;;  %v2425_v53 = vpop.permute.xlu0 %2424 }
 0xa5a   : > { %v2321_v56 = vmul.f32 %v9290_v54, %v9276_v28  ;;  %v9292_v44 = vpop.eup %9291  ;;  %v2423_v14 = vpop.permute.xlu1 %2422 }
 0xa5b   : > { %v2323_v31 = vmul.f32 %v9292_v44, %v10158_v25  ;;  %v9519_v44 = vld [vmem:[%s9851_s1] ss:$0 sm:$0xff] }
 0xa5c   : > { %v2327_v20 = vpack.c.bf16 %v2322_v49, %v2321_v56 }
 0xa5d   : > { %v9294_v1 = vpop.eup %9293 }
 0xa5e   : > { %8440 = vmatprep.mubr.msk.bf16.mxu0 %vm1636_vm11, %v2327_v20  ;;  %v2324_v4 = vmul.f32 %v9294_v1, %v10164_v22 }
 0xa60   : > { %v2328_v0 = vpack.c.bf16 %v2324_v4, %v2323_v31 }
 0xa62   : > { %8441 = vmatmul.mubr.msk.bf16.gmra.mrb[40].mxu0 %vm1636_vm11, %v2328_v0 }
 0xa63   : > { %8452 = vmatprep.mubr.msk.bf16.mxu0 %vm1024_vm2, %v2419_v19 }
 0xa6a   : > { %8453 = vmatmul.mubr.msk.bf16.vlgmr.msra.gmra.mrb[44].mxu0 %vm1024_vm2, %v2421_v8 }
 0xa6b   : > { %8456 = vmatprep.mubr.msk.bf16.mxu0 %vm1024_vm2, %v2423_v14 }
 0xa72   : > { %8457 = vmatmul.mubr.msk.bf16.gmra.mrb[48].mxu0 %vm1024_vm2, %v2425_v53 }
 0xafd   : > { %v10197_v28 = vpop.f32.mrb[36].mxu0 }
 0xafe   : > { %v10199_v25 = vpop.f32.mrb[37].mxu0 }
 0xaff   : > { %v10201_v22 = vpop.f32.mrb[38].mxu0 }
 0xb00   : > { %v10205_v15 = vpop.f32.mrb[39].mxu0 }
 0xb01   : > { %v9041_v17 = vpack.i.bf16 %v10205_v15, %v10199_v25 }
 0xb35   : > { %v10209_v23 = vpop.f32.mrb[40].mxu0 }
 0xb36   : > { %v10211_v24 = vpop.f32.mrb[41].mxu0 }
 0xb37   : > { %v10213_v18 = vpop.f32.mrb[42].mxu0 }
 0xb38   : > { %v10217_v46 = vpop.f32.mrb[43].mxu0 }
 0xb3d   : > { %v8454_v51 = vpop.f32.mrb[44].mxu0 }
 0xb3e   : > { %v2492_v26 = vpop.f32.mrb[45].mxu0  ;;  %v2525_v3 = vmul.f32 0.35355338, %v8454_v51 }
 0xb3f   : > { %v2523_v16 = vmul.f32 0.35355338, %v2492_v26  ;;  %v8455_v30 = vpop.f32.mrb[46].mxu0 }
 0xb40   : > { %v2526_v54 = vmul.f32 0.35355338, %v8455_v30  ;;  %v2495_v49 = vpop.f32.mrb[47].mxu0  ;;  %v2533_v0 = vadd.f32 %v9519_v44, %v2525_v3 }
 0xb41   : > { %v2524_v56 = vmul.f32 0.35355338, %v2495_v49  ;;  %v2531_v20 = vadd.f32 %v9519_v44, %v2523_v16 }
 0xb42   : > { %v2534_v4 = vadd.f32 %v9519_v44, %v2526_v54  ;;  %v2545_v49 = vsel %vm1636_vm11, %v2533_v0, -inf }
 0xb43   : > { %v2539_v1 = vsel %vm1636_vm11, %v2531_v20, -inf  ;;  %v2532_v31 = vadd.f32 %v9519_v44, %v2524_v56 }
 0xb44   : > { %2540 = vmax.xlane.f32.xlu1 %v2539_v1  ;;  %v2548_v51 = vsel %vm1636_vm11, %v2534_v4, -inf }
 0xb45   : > { %v8458_v19 = vpop.f32.mrb[48].mxu0  ;;  %v2542_v8 = vsel %vm1636_vm11, %v2532_v31, -inf }
 0xb46   : > { %2543 = vmax.xlane.f32.xlu0 %v2542_v8  ;;  %v2508_v14 = vpop.f32.mrb[49].mxu0  ;;  %v2529_v16 = vmul.f32 0.35355338, %v8458_v19 }
 0xb47   : > { %v2527_v53 = vmul.f32 0.35355338, %v2508_v14  ;;  %v8459_v26 = vpop.f32.mrb[50].mxu0 }
 0xb48   : > { %2549 = vmax.xlane.f32.xlu1 %v2548_v51  ;;  %v2511_v30 = vpop.f32.mrb[51].mxu0  ;;  %v2530_v35 = vmul.f32 0.35355338, %v8459_v26  ;;  %v2537_v3 = vadd.f32 %v9519_v44, %v2529_v16 }
 0xb49   : > { %v2528_v55 = vmul.f32 0.35355338, %v2511_v30  ;;  %v2535_v56 = vadd.f32 %v9519_v44, %v2527_v53 }
 0xb4a   : > { %2546 = vmax.xlane.f32.xlu0 %v2545_v49  ;;  %v2538_v59 = vadd.f32 %v9519_v44, %v2530_v35  ;;  %v2557_v14 = vsel %vm1636_vm11, %v2537_v3, -inf }
 0xb4b   : > { %v2536_v54 = vadd.f32 %v9519_v44, %v2528_v55  ;;  %v2551_v1 = vsel %vm1636_vm11, %v2535_v56, -inf }
 0xb4c   : > { %v2560_v51 = vsel %vm1636_vm11, %v2538_v59, -inf }
 0xb4d   : > { %v2554_v8 = vsel %vm1636_vm11, %v2536_v54, -inf }
 0xb4e   : > { %2552 = vmax.xlane.f32.xlu0 %v2551_v1  ;;  %2555 = vmax.xlane.f32.xlu1 %v2554_v8 }
 0xb52   : > { %2558 = vmax.xlane.f32.xlu0 %v2557_v14  ;;  %2561 = vmax.xlane.f32.xlu1 %v2560_v51 }
 0xb63   : > { %2633 = vrot.lane.b32.xlu1 %v9901_v62, %s11692_s2 }
 0xb68   : > { %2631 = vrot.lane.b32.xlu0 %v9903_v63, %s11692_s2 }
 0xbd1   : > { %v2541_v55 = vpop.xlane.xlu1 %2540 }
 0xbd2   : > { %v2563_v30 = vsub.f32 %v2531_v20, %v2541_v55 }
 0xbd3   : > { %v2544_v19 = vpop.xlane.xlu0 %2543 }
 0xbd4   : > { %v2564_v53 = vsub.f32 %v2532_v31, %v2544_v19  ;;  %v2571_v8 = vmul.f32 1.442695, %v2563_v30 }
 0xbd5   : > { %v2550_v26 = vpop.xlane.xlu1 %2549 }
 0xbd6   : > { %v2566_v35 = vsub.f32 %v2534_v4, %v2550_v26  ;;  %v2573_v44 = vmul.f32 1.442695, %v2564_v53 }
 0xbd7   : > { %v2547_v49 = vpop.xlane.xlu0 %2546 }
 0xbd8   : > { %v2577_v16 = vmul.f32 1.442695, %v2566_v35  ;;  %v2565_v1 = vsub.f32 %v2533_v0, %v2547_v49 }
 0xbda   : > { %9295 = vpow2.f32 %v2577_v16  ;;  %v2575_v14 = vmul.f32 1.442695, %v2565_v1 }
 0xbdb   : > { %9297 = vpow2.f32 %v2573_v44  ;;  %v2553_v51 = vpop.xlane.xlu0 %2552  ;;  %v2556_v39 = vpop.xlane.xlu1 %2555 }
 0xbdc   : > { %9299 = vpow2.f32 %v2575_v14  ;;  %v2567_v62 = vsub.f32 %v2535_v56, %v2553_v51  ;;  %v2568_v63 = vsub.f32 %v2536_v54, %v2556_v39 }
 0xbdd   : > { %9301 = vpow2.f32 %v2571_v8 }
 0xbde   : > { %v2579_v20 = vmul.f32 1.442695, %v2567_v62  ;;  %v2581_v53 = vmul.f32 1.442695, %v2568_v63 }
 0xbdf   : > { %v2559_v29 = vpop.xlane.xlu0 %2558  ;;  %v2562_v45 = vpop.xlane.xlu1 %2561 }
 0xbe0   : > { %v2569_v31 = vsub.f32 %v2537_v3, %v2559_v29  ;;  %v2570_v19 = vsub.f32 %v2538_v59, %v2562_v45 }
 0xbe2   : > { %v2583_v4 = vmul.f32 1.442695, %v2569_v31  ;;  %v2585_v55 = vmul.f32 1.442695, %v2570_v19 }
 0xbe3   : > { %v2632_v26 = vpop.permute.xlu0 %2631  ;;  %v2634_v35 = vpop.permute.xlu1 %2633 }
 0xbe4   : > { %v10234_v0 = vpop.eup %9295  ;;  %9303 = vpow2.f32 %v2583_v4  ;;  %8460 = vmatprep.subr.bf16.mxu1 %v2632_v26 }
 0xbe5   : > { %v9298_v30 = vpop.eup %9297  ;;  %9305 = vpow2.f32 %v2585_v55  ;;  %8461 = vmatpush3.bf16.msra.mxu1 %v2632_v26  ;;  %v2596_v39 = vsel %vm1636_vm11, %v10234_v0, 0.0 }
 0xbe6   : > { %v9300_v56 = vpop.eup %9299  ;;  %9307 = vpow2.f32 %v2579_v20  ;;  %2597 = vadd.xlane.f32.xlu1 %v2596_v39  ;;  %8462 = vmatprep.subr.bf16.mxu1 %v2634_v35  ;;  %v2590_v59 = vsel %vm1636_vm11, %v9298_v30, 0.0 }
 0xbe7   : > { %9309 = vpow2.f32 %v2581_v53  ;;  %v2593_v45 = vsel %vm1636_vm11, %v9300_v56, 0.0  ;;  %v9302_v29 = vpop.eup %9301 }
 0xbe8   : > { %2594 = vadd.xlane.f32.xlu0 %v2593_v45  ;;  %v2587_v54 = vsel %vm1636_vm11, %v9302_v29, 0.0 }
 0xbe9   : > { %8463 = vmatpush3.bf16.msra.mxu1 %v2634_v35 }
 0xbea   : > { %2591 = vadd.xlane.f32.xlu1 %v2590_v59 }
 0xbec   : > { %2588 = vadd.xlane.f32.xlu0 %v2587_v54  ;;  %v9156_v54 = vld [vmem:[%s11677_s16 + $0x8] sm:$0xff]  }
 0xbee   : > { %v10241_v3 = vpop.eup %9303 }
 0xbef   : > { %v10243_v44 = vpop.eup %9305  ;;  %v2605_v49 = vsel %vm1636_vm11, %v10241_v3, 0.0 }
 0xbf0   : > { %v9308_v16 = vpop.eup %9307  ;;  %2606 = vadd.xlane.f32.xlu0 %v2605_v49  ;;  %v2608_v1 = vsel %vm1636_vm11, %v10243_v44, 0.0 }
 0xbf1   : > { %v9310_v8 = vpop.eup %9309  ;;  %2609 = vadd.xlane.f32.xlu1 %v2608_v1  ;;  %v2599_v14 = vsel %vm1636_vm11, %v9308_v16, 0.0 }
 0xbf2   : > { %v2602_v51 = vsel %vm1636_vm11, %v9310_v8, 0.0 }
 0xbf4   : > { %2600 = vadd.xlane.f32.xlu0 %v2599_v14 }
 0xbf5   : > { %2603 = vadd.xlane.f32.xlu1 %v2602_v51  ;;  %v11741_v51 = vpack.i.bf16 %v10213_v18, %v10209_v23 }
 0xc06   : > { %2635 = vrot.lane.b32.xlu1 %v9911_v12, %s11692_s2  ;;  %v11738_v12 = vpack.i.bf16 %v10123_v41, %v10117_v33 }
 0xc0a   : > { %9032 = vrot.lane.b32.xlu1 %v9031_v27, %s11690_s10  ;;  %2637 = vrot.lane.b32.xlu0 %v9908_v11, %s11692_s2  ;;  %v11739_v11 = vpack.i.bf16 %v10201_v22, %v10197_v28  ;;  %s11744_s2 = sld [smem:[#allocation14_spill]] }
 0xc0e   : > { %9042 = vrot.lane.b32.xlu1 %v9041_v17, %s11698_s6  ;;  %9037 = vrot.lane.b32.xlu0 %v9036_v32, %s11690_s10 }
 0xc12   : > { %9052 = vrot.lane.b32.xlu1 %v11738_v12, %s11690_s10  ;;  %9047 = vrot.lane.b32.xlu0 %v11739_v11, %s11698_s6  ;;  %v11742_v11 = vpack.i.bf16 %v10217_v46, %v10211_v24 }
 0xc16   : > { %9057 = vrot.lane.b32.xlu0 %v11740_v50, %s11690_s10  ;;  %s11753_s10 = smov 24  }
 0xc73   : > { %v2598_v34 = vpop.xlane.xlu1 %2597 }
 0xc75   : > { %v2595_v27 = vpop.xlane.xlu0 %2594 }
 0xc77   : > { %v2592_v25 = vpop.xlane.xlu1 %2591 }
 0xc78   : > { %9311 = vrcp.f32 %v2592_v25 }
 0xc79   : > { %v2589_v37 = vpop.xlane.xlu0 %2588 }
 0xc7a   : > { %9313 = vrcp.f32 %v2589_v37 }
 0xc7b   : > { %9315 = vrcp.f32 %v2595_v27 }
 0xc7c   : > { %9317 = vrcp.f32 %v2598_v34 }
 0xc7d   : > { %v2607_v58 = vpop.xlane.xlu0 %2606 }
 0xc7e   : > { %v2610_v32 = vpop.xlane.xlu1 %2609  ;;  %9319 = vrcp.f32 %v2607_v58 }
 0xc81   : > { %v2601_v33 = vpop.xlane.xlu0 %2600 }
 0xc82   : > { %v9312_v41 = vpop.eup %9311  ;;  %9321 = vrcp.f32 %v2601_v33  ;;  %v2604_v28 = vpop.xlane.xlu1 %2603 }
 0xc83   : > { %9323 = vrcp.f32 %v2604_v28  ;;  %v2620_v36 = vmul.f32 %v9312_v41, %v9298_v30 }
 0xc84   : > { %v9314_v22 = vpop.eup %9313  ;;  %9325 = vrcp.f32 %v2610_v32 }
 0xc85   : > { %v2619_v21 = vmul.f32 %v9314_v22, %v9302_v29  ;;  %v9316_v15 = vpop.eup %9315  ;;  %v2638_v31 = vpop.permute.xlu0 %2637 }
 0xc86   : > { %v2636_v17 = vpop.permute.xlu1 %2635  ;;  %v9318_v63 = vpop.eup %9317  ;;  %v2621_v19 = vmul.f32 %v9316_v15, %v9300_v56 }
 0xc87   : > { %8464 = vmatprep.subr.bf16.mxu1 %v2636_v17  ;;  %v2627_v62 = vpack.c.bf16 %v2620_v36, %v2619_v21  ;;  %v2622_v4 = vmul.f32 %v9318_v63, %v10234_v0  ;;  %v9155_v0 = vld [vmem:[%s11677_s16] sm:$0xff]  }
 0xc88   : > { %8465 = vmatpush3.bf16.msra.mxu1 %v2636_v17  ;;  %v9320_v20 = vpop.eup %9319 }
 0xc89   : > { %8466 = vmatprep.subr.bf16.mxu1 %v2638_v31  ;;  %8468 = vmatprep.mubr.msk.bf16.mxu1 %vm1636_vm11, %v2627_v62  ;;  %v2628_v26 = vpack.c.bf16 %v2622_v4, %v2621_v19  ;;  %v2625_v29 = vmul.f32 %v9320_v20, %v10241_v3  ;;  %v9038_v37 = vpop.permute.xlu0 %9037 }
 0xc8a   : > { %v9033_v58 = vpop.permute.xlu1 %9032  ;;  %v9040_v23 = vunpack.i.h.bf16 %v9038_v37  ;;  %v9039_v18 = vunpack.i.l.bf16 %v9038_v37 }
 0xc8b   : > { %v9035_v41 = vunpack.i.h.bf16 %v9033_v58  ;;  %v9034_v22 = vunpack.i.l.bf16 %v9033_v58 }
 0xc8c   : > { %v9322_v55 = vpop.eup %9321  ;;  %8467 = vmatpush3.bf16.msra.mxu1 %v2638_v31  ;;  %v2819_v17 = vsel %vm1024_vm2, %v10003_v38, %v9040_v23  ;;  %v2818_v62 = vsel %vm1024_vm2, %v9999_v60, %v9039_v18 }
 0xc8d   : > { %v9324_v53 = vpop.eup %9323  ;;  %v2623_v35 = vmul.f32 %v9322_v55, %v9308_v16  ;;  %8476 = vmatprep.subr.bf16.mxu1 %v9155_v0  ;;  %v9048_v32 = vpop.permute.xlu0 %9047  ;;  %v2817_v63 = vsel %vm1024_vm2, %v10005_v5, %v9035_v41  ;;  %v2816_v19 = vsel %vm1024_vm2, %v10001_v42, %v9034_v22 }
 0xc8e   : > { %v9326_v30 = vpop.eup %9325  ;;  %v2624_v39 = vmul.f32 %v9324_v53, %v9310_v8  ;;  %v9043_v33 = vpop.permute.xlu1 %9042  ;;  %v9049_v21 = vunpack.i.l.bf16 %v9048_v32  ;;  %v9050_v46 = vunpack.i.h.bf16 %v9048_v32 }
 0xc8f   : > { %8469 = vmatmul.mubr.msk.bf16.vlgmr.msra.gmra.mrb[40].mxu1 %vm1636_vm11, %v2628_v26  ;;  %v2626_v56 = vmul.f32 %v9326_v30, %v10243_v44  ;;  %v9044_v36 = vunpack.i.l.bf16 %v9043_v33  ;;  %v9045_v15 = vunpack.i.h.bf16 %v9043_v33 }
 0xc90   : > { %v2629_v45 = vpack.c.bf16 %v2624_v39, %v2623_v35  ;;  %8477 = vmatpush3.bf16.msra.mxu1 %v9155_v0  ;;  %v2827_v20 = vsel %vm2824_vm12, %v2818_v62, %v9049_v21  ;;  %v2828_v26 = vsel %vm2824_vm12, %v2819_v17, %v9050_v46  ;;  %v7735_v21 = vld [vmem:[%s11678_s17] ss:$0 sm:$0xff] }
 0xc91   : > { %v2630_v59 = vpack.c.bf16 %v2626_v56, %v2625_v29  ;;  %8478 = vmatprep.subr.bf16.mxu1 %v9156_v54  ;;  %v9058_v28 = vpop.permute.xlu0 %9057  ;;  %v2825_v38 = vsel %vm2824_vm12, %v2816_v19, %v9044_v36  ;;  %v2826_v60 = vsel %vm2824_vm12, %v2817_v63, %v9045_v15 }
 0xc92   : > { %8472 = vmatprep.mubr.msk.bf16.mxu1 %vm1636_vm11, %v2629_v45  ;;  %v9053_v24 = vpop.permute.xlu1 %9052  ;;  %v9060_v39 = vunpack.i.h.bf16 %v9058_v28  ;;  %v9059_v29 = vunpack.i.l.bf16 %v9058_v28 }
 0xc94   : > { %8479 = vmatpush3.bf16.msra.mxu1 %v9156_v54  ;;  %v9055_v54 = vunpack.i.h.bf16 %v9053_v24 }
 0xc97   : > { %8473 = vmatmul.mubr.msk.bf16.gmra.mrb[44].mxu1 %vm1636_vm11, %v2630_v59 }
 0xd62   : > { %v8470_v3 = vpop.f32.mrb[40].mxu1 }
 0xd63   : > { %v2689_v49 = vpop.f32.mrb[41].mxu1 }
 0xd64   : > { %v8471_v44 = vpop.f32.mrb[42].mxu1 }
 0xd65   : > { %v9061_v16 = vpack.i.bf16 %v8471_v44, %v8470_v3  ;;  %v2692_v1 = vpop.f32.mrb[43].mxu1  ;;  %v9054_v3 = vunpack.i.l.bf16 %v9053_v24 }
 0xd66   : > { %v9066_v8 = vpack.i.bf16 %v2692_v1, %v2689_v49 }
 0xd67   : > { %9062 = vrot.lane.b32.xlu0 %v9061_v16, %s11696_s30 }
 0xd68   : > { %9067 = vrot.lane.b32.xlu1 %v9066_v8, %s11696_s30 }
 0xd6a   : > { %v8474_v14 = vpop.f32.mrb[44].mxu1 }
 0xd6b   : > { %9077 = vrot.lane.b32.xlu0 %v11741_v51, %s11698_s6  ;;  %v2705_v12 = vpop.f32.mrb[45].mxu1  ;;  %v2823_v51 = vsel %vm1024_vm2, %v10011_v10, %v9060_v39 }
 0xd6c   : > { %9072 = vrot.lane.b32.xlu1 %v11742_v11, %s11698_s6  ;;  %v8475_v50 = vpop.f32.mrb[46].mxu1  ;;  %s11746_s6 = smov 80  }
 0xd6d   : > { %v9086_v34 = vpack.i.bf16 %v8475_v50, %v8474_v14  ;;  %v2708_v27 = vpop.f32.mrb[47].mxu1  ;;  %v2821_v50 = vsel %vm1024_vm2, %v10013_v13, %v9055_v54 }
 0xd6e   : > { %v9081_v25 = vpack.i.bf16 %v2708_v27, %v2705_v12  ;;  %v2822_v12 = vsel %vm1024_vm2, %v10007_v7, %v9059_v29 }
 0xd6f   : > { %9087 = vrot.lane.b32.xlu0 %v9086_v34, %s11696_s30  ;;  %v2820_v34 = vsel %vm1024_vm2, %v10009_v9, %v9054_v3 }
 0xd70   : > { %9082 = vrot.lane.b32.xlu1 %v9081_v25, %s11696_s30  ;;  %s10571_s30 = scalar_lea.vmem %s11750_s9, %s11763_s3  ;;  %s11751_s9 = smov 8  }
 0xdd9   : > { %v9063_v31 = vpop.permute.xlu0 %9062 }
 0xdda   : > { %v9065_v4 = vunpack.i.h.bf16 %v9063_v31  ;;  %v9064_v55 = vunpack.i.l.bf16 %v9063_v31  ;;  %v9068_v53 = vpop.permute.xlu1 %9067 }
 0xddb   : > { %v9070_v35 = vunpack.i.h.bf16 %v9068_v53  ;;  %v9069_v30 = vunpack.i.l.bf16 %v9068_v53 }
 0xddc   : > { %v2837_v5 = vsel %vm2833_vm13, %v2828_v26, %v9065_v4  ;;  %v2836_v45 = vsel %vm2833_vm13, %v2827_v20, %v9064_v55 }
 0xddd   : > { %v2843_v42 = vpack.c.bf16 %v2837_v5, %v2836_v45  ;;  %v2834_v56 = vsel %vm2833_vm13, %v2825_v38, %v9069_v30  ;;  %v2835_v59 = vsel %vm2833_vm13, %v2826_v60, %v9070_v35  ;;  %v9078_v0 = vpop.permute.xlu0 %9077 }
 0xdde   : > { %v9073_v49 = vpop.permute.xlu1 %9072  ;;  %v2842_v44 = vpack.c.bf16 %v2835_v59, %v2834_v56  ;;  %v9080_v16 = vunpack.i.h.bf16 %v9078_v0  ;;  %v9079_v1 = vunpack.i.l.bf16 %v9078_v0 }
 0xddf   : > { %v9075_v8 = vunpack.i.h.bf16 %v9073_v49  ;;  %v9074_v14 = vunpack.i.l.bf16 %v9073_v49 }
 0xde0   : > { %8480 = vmatprep.mubr.msk.bf16.mxu1 %vm1322_vm3, %v2842_v44  ;;  %v2832_v58 = vsel %vm2824_vm12, %v2823_v51, %v9080_v16  ;;  %v2831_v32 = vsel %vm2824_vm12, %v2822_v12, %v9079_v1 }
 0xde1   : > { %v9088_v11 = vpop.permute.xlu0 %9087  ;;  %8481 = vmatmul.mubr.msk.bf16.vlgmr.msra.gmra.mrb[48].mxu1 %vm1322_vm3, %v2843_v42  ;;  %v2829_v7 = vsel %vm2824_vm12, %v2820_v34, %v9074_v14  ;;  %v2830_v23 = vsel %vm2824_vm12, %v2821_v50, %v9075_v8 }
 0xde2   : > { %v9090_v27 = vunpack.i.h.bf16 %v9088_v11  ;;  %v9089_v25 = vunpack.i.l.bf16 %v9088_v11  ;;  %v9083_v37 = vpop.permute.xlu1 %9082 }
 0xde3   : > { %v9085_v10 = vunpack.i.h.bf16 %v9083_v37  ;;  %v9084_v33 = vunpack.i.l.bf16 %v9083_v37 }
 0xde4   : > { %v2841_v18 = vsel %vm2833_vm13, %v2832_v58, %v9090_v27  ;;  %v2840_v13 = vsel %vm2833_vm13, %v2831_v32, %v9089_v25 }
 0xde5   : > { %v2838_v41 = vsel %vm2833_vm13, %v2829_v7, %v9084_v33  ;;  %v2839_v9 = vsel %vm2833_vm13, %v2830_v23, %v9085_v10  ;;  %v2845_v28 = vpack.c.bf16 %v2841_v18, %v2840_v13 }
 0xde6   : > { %v2844_v22 = vpack.c.bf16 %v2839_v9, %v2838_v41 }
 0xde8   : > { %8484 = vmatprep.mubr.msk.bf16.mxu1 %vm1322_vm3, %v2844_v22 }
 0xde9   : > { %8485 = vmatmul.mubr.msk.bf16.gmra.mrb[52].mxu1 %vm1322_vm3, %v2845_v28 }
 0xeb4   : > { %v8482_v24 = vpop.f32.mrb[48].mxu1 }
 0xeb5   : > { %v2910_v46 = vpop.f32.mrb[49].mxu1  ;;  %v2919_v17 = vadd.f32 %v8482_v24, %v7735_v21 }
 0xeb6   : > { %v2911_v36 = vadd.f32 %v7735_v21, %v2910_v46  ;;  %v8483_v15 = vpop.f32.mrb[50].mxu1 }
 0xeb7   : > { %v2922_v62 = vadd.f32 %v8483_v15, %v7735_v21  ;;  %v2913_v63 = vpop.f32.mrb[51].mxu1  ;;  %v2943_v53 = vadd.f32 %v2919_v17, %v9759_v52 }
 0xeb8   : > { %v2941_v31 = vadd.f32 %v2911_v36, %v9751_v43  ;;  %v2914_v19 = vadd.f32 %v7735_v21, %v2913_v63 }
 0xeb9   : > { %v2944_v20 = vadd.f32 %v2922_v62, %v9756_v48  ;;  %v2957_v48 = vsel %vm1322_vm3, %v2943_v53, 0.0 }
 0xeba   : > { %v2942_v4 = vadd.f32 %v2914_v19, %v9748_v40  ;;  %v2951_v55 = vsel %vm1322_vm3, %v2941_v31, 0.0 }
 0xebb   : > { %2952 = vadd.xlane.f32.xlu1 %v2951_v55  ;;  %v2960_v39 = vsel %vm1322_vm3, %v2944_v20, 0.0  ;;  %v11743_v55 = vmov 0.0  }
 0xebc   : > { %v8486_v26 = vpop.f32.mrb[52].mxu1  ;;  %v2954_v38 = vsel %vm1322_vm3, %v2942_v4, 0.0 }
 0xebd   : > { %v2926_v35 = vpop.f32.mrb[53].mxu1  ;;  %2955 = vadd.xlane.f32.xlu0 %v2954_v38  ;;  %v2935_v5 = vadd.f32 %v8486_v26, %v7735_v21  ;;  %v9164_v26 = vld [vmem:[%s11681_s20 + $0x8] sm:$0xff]  }
 0xebe   : > { %v2927_v30 = vadd.f32 %v7735_v21, %v2926_v35  ;;  %v8487_v60 = vpop.f32.mrb[54].mxu1 }
 0xebf   : > { %v2929_v43 = vpop.f32.mrb[55].mxu1  ;;  %2961 = vadd.xlane.f32.xlu1 %v2960_v39  ;;  %v2938_v45 = vadd.f32 %v8487_v60, %v7735_v21  ;;  %v2947_v42 = vadd.f32 %v2935_v5, %v9777_v6 }
 0xec0   : > { %v2945_v40 = vadd.f32 %v2927_v30, %v9768_v61  ;;  %v2930_v29 = vadd.f32 %v7735_v21, %v2929_v43 }
 0xec1   : > { %2958 = vadd.xlane.f32.xlu0 %v2957_v48  ;;  %v2948_v56 = vadd.f32 %v2938_v45, %v9774_v2  ;;  %v2969_v54 = vsel %vm1322_vm3, %v2947_v42, 0.0 }
 0xec2   : > { %v2946_v52 = vadd.f32 %v2930_v29, %v9765_v57  ;;  %v2963_v59 = vsel %vm1322_vm3, %v2945_v40, 0.0 }
 0xec3   : > { %v2972_v3 = vsel %vm1322_vm3, %v2948_v56, 0.0 }
 0xec4   : > { %v2966_v0 = vsel %vm1322_vm3, %v2946_v52, 0.0 }
 0xec5   : > { %2964 = vadd.xlane.f32.xlu0 %v2963_v59  ;;  %2967 = vadd.xlane.f32.xlu1 %v2966_v0 }
 0xec9   : > { %2970 = vadd.xlane.f32.xlu0 %v2969_v54  ;;  %2973 = vadd.xlane.f32.xlu1 %v2972_v3 }
 0xf48   : > { %v2953_v61 = vpop.xlane.xlu1 %2952 }
 0xf49   : > { %v2976_v49 = vmul.f32 0.03125, %v2953_v61 }
 0xf4a   : > { %v2956_v44 = vpop.xlane.xlu0 %2955 }
 0xf4b   : > { %v10359_v57 = vsub.f32 %v2941_v31, %v2976_v49  ;;  %v2977_v6 = vmul.f32 0.03125, %v2956_v44 }
 0xf4c   : > { %v2962_v16 = vpop.xlane.xlu1 %2961 }
 0xf4d   : > { %v10361_v2 = vsub.f32 %v2942_v4, %v2977_v6  ;;  %v2979_v1 = vmul.f32 0.03125, %v2962_v16  ;;  %v2992_v8 = vmul.f32 %v10359_v57, %v10359_v57  ;;  %v9158_v4 = vld [vmem:[%s11679_s18 + $0x8] sm:$0xff]   ;;  %v7742_v6 = vld [vmem:[%s11683_s22] ss:$0 sm:$0xff] }
 0xf4e   : > { %v2959_v14 = vpop.xlane.xlu0 %2958 }
 0xf4f   : > { %v10365_v51 = vsub.f32 %v2944_v20, %v2979_v1  ;;  %v2978_v12 = vmul.f32 0.03125, %v2959_v14  ;;  %v3000_v11 = vsel %vm1322_vm3, %v2992_v8, 0.0  ;;  %v2993_v50 = vmul.f32 %v10361_v2, %v10361_v2  ;;  %v9157_v20 = vld [vmem:[%s11679_s18] sm:$0xff]  }
 0xf50   : > { %3001 = vadd.xlane.f32.xlu0 %v3000_v11  ;;  %8488 = vmatprep.subr.bf16.mxu0 %v9157_v20 }
 0xf51   : > { %v10370_v34 = vsub.f32 %v2943_v53, %v2978_v12  ;;  %v3003_v27 = vsel %vm1322_vm3, %v2993_v50, 0.0  ;;  %v2995_v25 = vmul.f32 %v10365_v51, %v10365_v51  ;;  %8489 = vmatpush3.bf16.msra.mxu0 %v9157_v20  ;;  %v9163_v53 = vld [vmem:[%s11681_s20] sm:$0xff]  }
 0xf52   : > { %v2965_v37 = vpop.xlane.xlu0 %2964  ;;  %3004 = vadd.xlane.f32.xlu1 %v3003_v27  ;;  %v2968_v58 = vpop.xlane.xlu1 %2967  ;;  %8490 = vmatprep.subr.bf16.mxu0 %v9158_v4 }
 0xf53   : > { %v2980_v32 = vmul.f32 0.03125, %v2965_v37  ;;  %v2981_v10 = vmul.f32 0.03125, %v2968_v58  ;;  %v2994_v33 = vmul.f32 %v10370_v34, %v10370_v34  ;;  %v3009_v13 = vsel %vm1322_vm3, %v2995_v25, 0.0  ;;  %8500 = vmatprep.subr.bf16.mxu1 %v9163_v53  ;;  %v7743_v25 = vld [vmem:[%s11684_s23] ss:$0 sm:$0xff] }
 0xf54   : > { %8501 = vmatpush3.bf16.msra.mxu1 %v9163_v53 }
 0xf55   : > { %v10377_v7 = vsub.f32 %v2945_v40, %v2980_v32  ;;  %v10379_v23 = vsub.f32 %v2946_v52, %v2981_v10  ;;  %v3006_v18 = vsel %vm1322_vm3, %v2994_v33, 0.0  ;;  %8491 = vmatpush3.bf16.msra.mxu0 %v9158_v4  ;;  %8502 = vmatprep.subr.bf16.mxu1 %v9164_v26 }
 0xf56   : > { %v2971_v41 = vpop.xlane.xlu0 %2970  ;;  %3007 = vadd.xlane.f32.xlu0 %v3006_v18  ;;  %3010 = vadd.xlane.f32.xlu1 %v3009_v13  ;;  %v2974_v9 = vpop.xlane.xlu1 %2973 }
 0xf57   : > { %v2982_v28 = vmul.f32 0.03125, %v2971_v41  ;;  %v2983_v22 = vmul.f32 0.03125, %v2974_v9  ;;  %v2996_v21 = vmul.f32 %v10377_v7, %v10377_v7  ;;  %v2997_v24 = vmul.f32 %v10379_v23, %v10379_v23  ;;  %8516 = vmatprep.subr.bf16.mxu0 %v11743_v55 }
 0xf58   : > { %8503 = vmatpush3.bf16.msra.mxu1 %v9164_v26 }
 0xf59   : > { %v10387_v46 = vsub.f32 %v2947_v42, %v2982_v28  ;;  %v10389_v36 = vsub.f32 %v2948_v56, %v2983_v22  ;;  %v3012_v15 = vsel %vm1322_vm3, %v2996_v21, 0.0  ;;  %v3015_v17 = vsel %vm1322_vm3, %v2997_v24, 0.0 }
 0xf5a   : > { %3013 = vadd.xlane.f32.xlu0 %v3012_v15  ;;  %3016 = vadd.xlane.f32.xlu1 %v3015_v17  ;;  %v9159_v17 = vld [vmem:[%s11673_s12 + $0x10] sm:$0xff]  }
 0xf5b   : > { %v2998_v62 = vmul.f32 %v10387_v46, %v10387_v46  ;;  %v2999_v63 = vmul.f32 %v10389_v36, %v10389_v36 }
 0xf5d   : > { %v3018_v31 = vsel %vm1322_vm3, %v2998_v62, 0.0  ;;  %v3021_v19 = vsel %vm1322_vm3, %v2999_v63, 0.0 }
 0xf5e   : > { %3019 = vadd.xlane.f32.xlu0 %v3018_v31  ;;  %3022 = vadd.xlane.f32.xlu1 %v3021_v19 }
 0xfdd   : > { %v3002_v38 = vpop.xlane.xlu0 %3001 }
 0xfde   : > { %v3024_v35 = vmul.f32 0.03125, %v3002_v38  ;;  %v9160_v38 = vld [vmem:[%s11673_s12 + $0x18] sm:$0xff]  }
 0xfdf   : > { %v3005_v30 = vpop.xlane.xlu1 %3004 }
 0xfe0   : > { %v3032_v60 = vadd.f32 1e-05, %v3024_v35  ;;  %v3025_v39 = vmul.f32 0.03125, %v3005_v30 }
 0xfe2   : > { %9327 = vrsqrt.f32 %v3032_v60  ;;  %v3033_v43 = vadd.f32 1e-05, %v3025_v39 }
 0xfe3   : > { %v3008_v48 = vpop.xlane.xlu0 %3007  ;;  %v3011_v5 = vpop.xlane.xlu1 %3010 }
 0xfe4   : > { %9329 = vrsqrt.f32 %v3033_v43  ;;  %v3026_v40 = vmul.f32 0.03125, %v3008_v48  ;;  %v3027_v45 = vmul.f32 0.03125, %v3011_v5 }
 0xfe6   : > { %v3034_v29 = vadd.f32 1e-05, %v3026_v40  ;;  %v3035_v52 = vadd.f32 1e-05, %v3027_v45  ;;  %v9161_v40 = vld [vmem:[%s11675_s14 + $0x10] sm:$0xff]  }
 0xfe7   : > { %v3014_v42 = vpop.xlane.xlu0 %3013  ;;  %v3017_v56 = vpop.xlane.xlu1 %3016 }
 0xfe8   : > { %9331 = vrsqrt.f32 %v3034_v29  ;;  %v3028_v59 = vmul.f32 0.03125, %v3014_v42  ;;  %v3029_v0 = vmul.f32 0.03125, %v3017_v56  ;;  %v9162_v29 = vld [vmem:[%s11675_s14 + $0x18] sm:$0xff]   ;;  %v9165_v42 = vld [vmem:[%s11681_s20 + $0x10] sm:$0xff]  }
 0xfe9   : > { %9333 = vrsqrt.f32 %v3035_v52  ;;  %8504 = vmatprep.subr.bf16.mxu1 %v9165_v42  ;;  %v9166_v56 = vld [vmem:[%s11681_s20 + $0x18] sm:$0xff]  }
 0xfea   : > { %v3036_v54 = vadd.f32 1e-05, %v3028_v59  ;;  %v3037_v3 = vadd.f32 1e-05, %v3029_v0  ;;  %8505 = vmatpush3.bf16.msra.mxu1 %v9165_v42  ;;  %v7744_v59 = vld [vmem:[%s11680_s19] ss:$0 sm:$0xff] }
 0xfeb   : > { %v3020_v61 = vpop.xlane.xlu0 %3019  ;;  %v3023_v49 = vpop.xlane.xlu1 %3022  ;;  %8506 = vmatprep.subr.bf16.mxu1 %v9166_v56 }
 0xfec   : > { %v9328_v44 = vpop.eup %9327  ;;  %9335 = vrsqrt.f32 %v3036_v54  ;;  %v3030_v16 = vmul.f32 0.03125, %v3020_v61  ;;  %v3031_v1 = vmul.f32 0.03125, %v3023_v49 }
 0xfed   : > { %9337 = vrsqrt.f32 %v3037_v3  ;;  %v3048_v8 = vmul.f32 %v9328_v44, %v10359_v57 }
 0xfee   : > { %v9330_v14 = vpop.eup %9329  ;;  %v3038_v12 = vadd.f32 1e-05, %v3030_v16  ;;  %v3039_v11 = vadd.f32 1e-05, %v3031_v1  ;;  %8507 = vmatpush3.bf16.msra.mxu1 %v9166_v56 }
 0xfef   : > { %v3049_v50 = vmul.f32 %v9330_v14, %v10361_v2  ;;  %v3060_v27 = vmul.f32 %v7742_v6, %v3048_v8  ;;  %8532 = vmatprep.subr.bf16.mxu1 %v11743_v55 }
 0xff0   : > { %9339 = vrsqrt.f32 %v3038_v12 }
 0xff1   : > { %9341 = vrsqrt.f32 %v3039_v11  ;;  %v3061_v37 = vmul.f32 %v7742_v6, %v3049_v50  ;;  %v10421_v33 = vadd.f32 %v7743_v25, %v3060_v27 }
 0xff2   : > { %v9332_v58 = vpop.eup %9331 }
 0xff3   : > { %v9334_v32 = vpop.eup %9333  ;;  %v3050_v10 = vmul.f32 %v9332_v58, %v10370_v34  ;;  %v10423_v57 = vadd.f32 %v7743_v25, %v3061_v37  ;;  %v7685_v34 = vld [vmem:[%s11744_s2] ss:$0 sm:$0xff]  ;;  %s11749_s2 = smov 104  }
 0xff4   : > { %v3051_v18 = vmul.f32 %v9334_v32, %v10365_v51 }
 0xff5   : > { %v3062_v13 = vmul.f32 %v7742_v6, %v3050_v10  ;;  %v3084_v2 = vpack.c.bf16 %v10423_v57, %v10421_v33 }
 0xff6   : > { %v9336_v41 = vpop.eup %9335  ;;  %v3063_v9 = vmul.f32 %v7742_v6, %v3051_v18 }
 0xff7   : > { %v9338_v28 = vpop.eup %9337  ;;  %v10428_v22 = vadd.f32 %v7743_v25, %v3062_v13  ;;  %8492 = vmatprep.mubr.msk.bf16.mxu0 %vm1322_vm3, %v3084_v2  ;;  %v3052_v21 = vmul.f32 %v9336_v41, %v10377_v7  ;;  %v1284_v7 = vadd.f32 %v7685_v34, %v9896_v47 }
 0xff8   : > { %v10435_v24 = vadd.f32 %v7743_v25, %v3063_v9  ;;  %v3053_v51 = vmul.f32 %v9338_v28, %v10379_v23 }
 0xff9   : > { %v3064_v15 = vmul.f32 %v7742_v6, %v3052_v21  ;;  %v10457_v30 = vrot.slane %v1284_v7, 6 }
 0xffa   : > { %v9340_v62 = vpop.eup %9339  ;;  %v3085_v63 = vpack.c.bf16 %v10435_v24, %v10428_v22  ;;  %v3065_v31 = vmul.f32 %v7742_v6, %v3053_v51  ;;  %v7767_v51 = vld [vmem:[%s11674_s13 + $0x1] ss:$0 sm:$0xff] }
 0xffb   : > { %v9342_v19 = vpop.eup %9341  ;;  %v10444_v20 = vadd.f32 %v7743_v25, %v3064_v15  ;;  %v3054_v4 = vmul.f32 %v9340_v62, %v10387_v46  ;;  %v10471_v43 = vsel %vm3462_vm14, 0.0, %v10457_v30 }
 0xffc   : > { %8493 = vmatmul.mubr.msk.bf16.vlgmr.msra.gmra.mrb[52].mxu0 %vm1322_vm3, %v3085_v63  ;;  %v10448_v23 = vadd.f32 %v7743_v25, %v3065_v31  ;;  %v3055_v53 = vmul.f32 %v9342_v19, %v10389_v36  ;;  %v3458_v36 = vld [vmem:[%s11745_s11] sm:$0x3]  ;;  %v3543_v52 = vpack.c.bf16 %v10457_v30, %v10471_v43  ;;  %s11754_s11 = smov 96  }
 0xffd   : > { %v3066_v26 = vmul.f32 %v7742_v6, %v3054_v4  ;;  %8517 = vmatpush3.bf16.msra.mxu0 %v9159_v17  ;;  %v10473_v48 = vsel %vm3462_vm14, %v3458_v36, 0.0  ;;  %v7776_v4 = vld [vmem:[%s11676_s15 + $0x1] ss:$0 sm:$0xff] }
 0xffe   : > { %v3086_v35 = vpack.c.bf16 %v10448_v23, %v10444_v20  ;;  %v3067_v47 = vmul.f32 %v7742_v6, %v3055_v53  ;;  %8518 = vmatprep.subr.bf16.mxu0 %v11743_v55  ;;  %v3466_v5 = vadd.f32 %v10473_v48, %v10471_v43 }
 0xfff   : > { %v10459_v46 = vadd.f32 %v7743_v25, %v3066_v26 }
0x1000   : > { %8496 = vmatprep.mubr.msk.bf16.mxu0 %vm1322_vm3, %v3086_v35  ;;  %v10465_v60 = vadd.f32 %v7743_v25, %v3067_v47  ;;  %v3473_v45 = vpack.c.bf16 %v10457_v30, %v3466_v5 }
0x1001   : > { %8519 = vmatpush3.bf16.msra.mxu0 %v9160_v38 }
0x1002   : > { %v3087_v39 = vpack.c.bf16 %v10465_v60, %v10459_v46  ;;  %8524 = vmatprep.subr.bf16.mxu0 %v11743_v55 }
0x1004   : > { %8497 = vmatmul.mubr.msk.bf16.gmra.mrb[56].mxu0 %vm1322_vm3, %v3087_v39 }
0x1005   : > { %8520 = vmatprep.mubr.msk.bf16.mxu0 %vm9544_vm5, %v11743_v55 }
0x100c   : > { %8521 = vmatmul.mubr.msk.bf16.vlgmr.msra.gmra.mrb[60].mxu0 %vm1322_vm3, %v3473_v45 }
0x100d   : > { %8525 = vmatpush3.bf16.msra.mxu0 %v9161_v40  ;;  %8528 = vmatprep.mubr.msk.bf16.mxu0 %vm9544_vm5, %v11743_v55 }
0x100e   : > { %8526 = vmatprep.subr.bf16.mxu0 %v11743_v55 }
0x1011   : > { %8527 = vmatpush3.bf16.msra.mxu0 %v9162_v29 }
0x1012   : > { %8538 = vmatprep.subr.bf16.mxu0 %v11743_v55 }
0x1014   : > { %8529 = vmatmul.mubr.msk.bf16.vlgmr.msra.gmra.mrb[64].mxu0 %vm1322_vm3, %v3543_v52 }
0x1015   : > { %8540 = vmatprep.mubr.msk.bf16.mxu0 %vm9544_vm5, %v11743_v55 }
0x10cf   : > { %v8494_v0 = vpop.f32.mrb[52].mxu0 }
0x10d0   : > { %v3162_v54 = vadd.f32 %v8494_v0, %v7744_v59  ;;  %v3153_v3 = vpop.f32.mrb[53].mxu0 }
0x10d1   : > { %v3154_v61 = vadd.f32 %v7744_v59, %v3153_v3  ;;  %v8495_v49 = vpop.f32.mrb[54].mxu0 }
0x10d2   : > { %v3165_v44 = vadd.f32 %v8495_v49, %v7744_v59  ;;  %v3156_v6 = vpop.f32.mrb[55].mxu0  ;;  %v3186_v1 = vmax.f32 %v3162_v54, 0.0 }
0x10d3   : > { %v3157_v16 = vadd.f32 %v7744_v59, %v3156_v6  ;;  %v3184_v14 = vmax.f32 %v3154_v61, 0.0 }
0x10d4   : > { %v3187_v8 = vmax.f32 %v3165_v44, 0.0 }
0x10d5   : > { %v3185_v12 = vmax.f32 %v3157_v16, 0.0 }
0x10d6   : > { %v3201_v11 = vpack.c.bf16 %v3187_v8, %v3186_v1 }
0x10d7   : > { %v3200_v50 = vpack.c.bf16 %v3185_v12, %v3184_v14  ;;  %v8498_v27 = vpop.f32.mrb[56].mxu0 }
0x10d8   : > { %v3178_v25 = vadd.f32 %v8498_v27, %v7744_v59  ;;  %v3169_v37 = vpop.f32.mrb[57].mxu0 }
0x10d9   : > { %v3170_v58 = vadd.f32 %v7744_v59, %v3169_v37  ;;  %v8499_v32 = vpop.f32.mrb[58].mxu0  ;;  %8508 = vmatprep.mubr.msk.bf16.mxu1 %vm1636_vm11, %v3200_v50 }
0x10da   : > { %v3181_v10 = vadd.f32 %v8499_v32, %v7744_v59  ;;  %v3172_v18 = vpop.f32.mrb[59].mxu0  ;;  %8509 = vmatmul.mubr.msk.bf16.vlgmr.msra.gmra.mrb[56].mxu1 %vm1636_vm11, %v3201_v11  ;;  %v3190_v2 = vmax.f32 %v3178_v25, 0.0  ;;  %v7786_v11 = vld [vmem:[%s10571_s30] ss:$0 sm:$0xff] }
0x10db   : > { %v3173_v13 = vadd.f32 %v7744_v59, %v3172_v18  ;;  %v3188_v9 = vmax.f32 %v3170_v58, 0.0 }
0x10dc   : > { %v3191_v41 = vmax.f32 %v3181_v10, 0.0 }
0x10dd   : > { %v3189_v28 = vmax.f32 %v3173_v13, 0.0 }
0x10de   : > { %v3203_v21 = vpack.c.bf16 %v3191_v41, %v3190_v2 }
0x10df   : > { %v3202_v34 = vpack.c.bf16 %v3189_v28, %v3188_v9  ;;  %v3531_v15 = vpop.f32.mrb[60].mxu0 }
0x10e0   : > { %v8522_v17 = vpop.f32.mrb[61].mxu0  ;;  %v3532_v63 = vadd.f32 %v7767_v51, %v3531_v15 }
0x10e1   : > { %8512 = vmatprep.mubr.msk.bf16.mxu1 %vm1636_vm11, %v3202_v34  ;;  %v3534_v62 = vpop.f32.mrb[62].mxu0 }
0x10e2   : > { %v3535_v31 = vadd.f32 %v7767_v51, %v3534_v62  ;;  %8513 = vmatmul.mubr.msk.bf16.gmra.mrb[60].mxu1 %vm1636_vm11, %v3203_v21  ;;  %v8523_v19 = vpop.f32.mrb[63].mxu0 }
0x10e3   : > { %8534 = vmatprep.mubr.msk.bf16.mxu1 %vm9544_vm5, %v11743_v55 }
0x10e4   : > { %v3615_v7 = vpack.c.bf16 %v3535_v31, %v3532_v63 }
0x10e6   : > { %3752 = vrot.lane.b32.xlu1 %v3615_v7, %s11704_s28  ;;  %3617 = vrot.lane.b32.xlu0 %v3615_v7, %s11707_s8  ;;  %s11752_s8 = smov 16  }
0x10e7   : > { %v3601_v53 = vpop.f32.mrb[64].mxu0 }
0x10e8   : > { %v8530_v26 = vpop.f32.mrb[65].mxu0  ;;  %v3602_v35 = vadd.f32 %v7776_v4, %v3601_v53 }
0x10e9   : > { %v3604_v38 = vpop.f32.mrb[66].mxu0 }
0x10ea   : > { %v3605_v47 = vadd.f32 %v7776_v4, %v3604_v38  ;;  %3750 = vrot.lane.b32.xlu1 %v3615_v7, %s11705_s29  ;;  %3880 = vrot.lane.b32.xlu0 %v3615_v7, %s11746_s6  ;;  %v8531_v36 = vpop.f32.mrb[67].mxu0 }
0x10ec   : > { %v10523_v39 = vpack.c.bf16 %v3605_v47, %v3602_v35 }
0x10ee   : > { %3878 = vrot.lane.b32.xlu1 %v3615_v7, %s11747_s4  ;;  %4007 = vrot.lane.b32.xlu0 %v3615_v7, %s11748_s7  ;;  %v3707_v5 = vsel %vm3705_vm15, %v10523_v39, 0 }
0x10ef   : > { %8539 = vmatpush3.bf16.msra.mxu0 %v3707_v5 }
0x10f0   : > { %8550 = vmatprep.subr.bf16.mxu0 %v11743_v55 }
0x10f2   : > { %4005 = vrot.lane.b32.xlu1 %v3615_v7, %s11749_s2 }
0x1158   : > { %v3618_v40 = vpop.permute.xlu0 %3617  ;;  %v3753_v29 = vpop.permute.xlu1 %3752 }
0x1159   : > { %v3623_v45 = vsel %vm1024_vm2, %v3618_v40, 0  ;;  %v3758_v52 = vsel %vm1024_vm2, %v3753_v29, 0 }
0x115a   : > { %8533 = vmatpush3.bf16.xpose.msra.mxu1 %v3623_v45 }
0x115b   : > { %8544 = vmatprep.subr.bf16.mxu1 %v11743_v55 }
0x115c   : > { %v3881_v42 = vpop.permute.xlu0 %3880  ;;  %v3751_v56 = vpop.permute.xlu1 %3750 }
0x115d   : > { %v3886_v59 = vsel %vm1024_vm2, %v3881_v42, 0 }
0x1160   : > { %v4008_v0 = vpop.permute.xlu0 %4007  ;;  %v3879_v54 = vpop.permute.xlu1 %3878 }
0x1161   : > { %8535 = vmatmul.mubr.msk.bf16.vlgmr.msra.gmra.mrb[64].mxu1 %vm1024_vm2, %v3615_v7  ;;  %v4013_v3 = vsel %vm1024_vm2, %v4008_v0, 0 }
0x1162   : > { %8545 = vmatpush3.bf16.xpose.msra.mxu1 %v3758_v52  ;;  %8546 = vmatprep.mubr.msk.bf16.mxu1 %vm9544_vm5, %v11743_v55 }
0x1163   : > { %8556 = vmatprep.subr.bf16.mxu1 %v11743_v55 }
0x1164   : > { %v4006_v61 = vpop.permute.xlu1 %4005 }
0x1169   : > { %8547 = vmatmul.mubr.msk.bf16.vlgmr.msra.gmra.mrb[68].mxu1 %vm1024_vm2, %v3751_v56 }
0x116a   : > { %8557 = vmatpush3.bf16.xpose.msra.mxu1 %v3886_v59  ;;  %8558 = vmatprep.mubr.msk.bf16.mxu1 %vm9544_vm5, %v11743_v55 }
0x116b   : > { %8568 = vmatprep.subr.bf16.mxu1 %v11743_v55 }
0x1171   : > { %8559 = vmatmul.mubr.msk.bf16.vlgmr.msra.gmra.mrb[72].mxu1 %vm1024_vm2, %v3879_v54 }
0x1172   : > { %8569 = vmatpush3.bf16.xpose.msra.mxu1 %v4013_v3  ;;  %8570 = vmatprep.mubr.msk.bf16.mxu1 %vm9544_vm5, %v11743_v55 }
0x1173   : > { %8580 = vmatprep.subr.bf16.mxu1 %v11743_v55 }
0x1179   : > { %8571 = vmatmul.mubr.msk.bf16.vlgmr.msra.gmra.mrb[76].mxu1 %vm1024_vm2, %v4006_v61 }
0x117a   : > { %8584 = vmatprep.mubr.msk.bf16.mxu1 %vm9544_vm5, %v11743_v55 }
0x11ad   : > { %v10551_v49 = vpop.f32.mrb[56].mxu1 }
0x11ae   : > { %v10553_v44 = vpop.f32.mrb[57].mxu1 }
0x11af   : > { %v10555_v6 = vpop.f32.mrb[58].mxu1 }
0x11b0   : > { %v10557_v16 = vpop.f32.mrb[59].mxu1 }
0x11b5   : > { %v10559_v1 = vpop.f32.mrb[60].mxu1 }
0x11b6   : > { %v10561_v8 = vpop.f32.mrb[61].mxu1 }
0x11b7   : > { %v10563_v14 = vpop.f32.mrb[62].mxu1 }
0x11b8   : > { %v10565_v12 = vpop.f32.mrb[63].mxu1 }
0x1234   : > { %v3659_v50 = vpop.f32.mrb[64].mxu1 }
0x1235   : > { %v3666_v27 = vmul.f32 0.35355338, %v3659_v50  ;;  %v8536_v25 = vpop.f32.mrb[65].mxu1 }
0x1236   : > { %v3662_v37 = vpop.f32.mrb[66].mxu1 }
0x1237   : > { %v3674_v58 = vadd.f32 %v7786_v11, %v3666_v27  ;;  %v3667_v32 = vmul.f32 0.35355338, %v3662_v37  ;;  %v8537_v10 = vpop.f32.mrb[67].mxu1 }
0x1239   : > { %v3675_v18 = vadd.f32 %v7786_v11, %v3667_v32  ;;  %v3677_v13 = vsel %vm3676_vm0, %v3674_v58, -inf }
0x123a   : > { %3678 = vmax.xlane.f32.xlu0 %v3677_v13 }
0x123b   : > { %v3681_v2 = vsel %vm3680_vm1, %v3675_v18, -inf }
0x123c   : > { %3682 = vmax.xlane.f32.xlu1 %v3681_v2  ;;  %v3794_v41 = vpop.f32.mrb[68].mxu1 }
0x123d   : > { %v3801_v9 = vmul.f32 0.35355338, %v3794_v41  ;;  %v8548_v28 = vpop.f32.mrb[69].mxu1 }
0x123e   : > { %v3797_v21 = vpop.f32.mrb[70].mxu1 }
0x123f   : > { %v10576_v34 = vadd.f32 %v7786_v11, %v3801_v9  ;;  %v3802_v51 = vmul.f32 0.35355338, %v3797_v21  ;;  %v8549_v15 = vpop.f32.mrb[71].mxu1 }
0x1241   : > { %v3804_v17 = vadd.f32 %v7786_v11, %v3802_v51  ;;  %v3805_v62 = vsel %vm3676_vm0, %v10576_v34, -inf }
0x1242   : > { %3806 = vmax.xlane.f32.xlu0 %v3805_v62 }
0x1243   : > { %v3808_v7 = vsel %vm3680_vm1, %v3804_v17, -inf }
0x1244   : > { %v3922_v63 = vpop.f32.mrb[72].mxu1 }
0x1245   : > { %v3929_v31 = vmul.f32 0.35355338, %v3922_v63  ;;  %v8560_v19 = vpop.f32.mrb[73].mxu1 }
0x1246   : > { %3809 = vmax.xlane.f32.xlu0 %v3808_v7  ;;  %v3925_v4 = vpop.f32.mrb[74].mxu1 }
0x1247   : > { %v10581_v53 = vadd.f32 %v7786_v11, %v3929_v31  ;;  %v3930_v26 = vmul.f32 0.35355338, %v3925_v4  ;;  %v8561_v38 = vpop.f32.mrb[75].mxu1 }
0x1249   : > { %v3932_v35 = vadd.f32 %v7786_v11, %v3930_v26  ;;  %v3933_v47 = vsel %vm3676_vm0, %v10581_v53, -inf }
0x124a   : > { %3934 = vmax.xlane.f32.xlu1 %v3933_v47 }
0x124b   : > { %v3936_v36 = vsel %vm3680_vm1, %v3932_v35, -inf }
0x124c   : > { %3937 = vmax.xlane.f32.xlu0 %v3936_v36  ;;  %v4049_v5 = vpop.f32.mrb[76].mxu1 }
0x124d   : > { %v4056_v40 = vmul.f32 0.35355338, %v4049_v5  ;;  %v8572_v45 = vpop.f32.mrb[77].mxu1 }
0x124e   : > { %v4052_v29 = vpop.f32.mrb[78].mxu1 }
0x124f   : > { %v4058_v52 = vadd.f32 %v7786_v11, %v4056_v40  ;;  %v4057_v42 = vmul.f32 0.35355338, %v4052_v29  ;;  %v8573_v56 = vpop.f32.mrb[79].mxu1 }
0x1251   : > { %v4059_v59 = vadd.f32 %v7786_v11, %v4057_v42  ;;  %v4060_v0 = vsel %vm3676_vm0, %v4058_v52, -inf }
0x1252   : > { %4061 = vmax.xlane.f32.xlu1 %v4060_v0 }
0x1253   : > { %v4063_v54 = vsel %vm3680_vm1, %v4059_v59, -inf }
0x1254   : > { %4064 = vmax.xlane.f32.xlu0 %v4063_v54 }
0x12c7   : > { %v3679_v3 = vpop.xlane.xlu0 %3678 }
0x12c8   : > { %v3684_v61 = vsub.f32 %v3674_v58, %v3679_v3 }
0x12c9   : > { %v3683_v50 = vpop.xlane.xlu1 %3682 }
0x12ca   : > { %v3686_v27 = vmul.f32 1.442695, %v3684_v61  ;;  %v3685_v25 = vsub.f32 %v3675_v18, %v3683_v50 }
0x12cc   : > { %9343 = vpow2.f32 %v3686_v27  ;;  %v3688_v37 = vmul.f32 1.442695, %v3685_v25 }
0x12ce   : > { %9345 = vpow2.f32 %v3688_v37 }
0x12cf   : > { %v3807_v32 = vpop.xlane.xlu0 %3806 }
0x12d0   : > { %v3811_v26 = vsub.f32 %v10576_v34, %v3807_v32 }
0x12d3   : > { %v3810_v10 = vpop.xlane.xlu0 %3809 }
0x12d4   : > { %v3812_v13 = vsub.f32 %v3804_v17, %v3810_v10 }
0x12d6   : > { %v9344_v2 = vpop.eup %9343  ;;  %v3815_v41 = vmul.f32 1.442695, %v3812_v13 }
0x12d7   : > { %v3690_v11 = vsel %vm3676_vm0, %v9344_v2, 0.0  ;;  %v3935_v38 = vpop.xlane.xlu1 %3934 }
0x12d8   : > { %v9346_v9 = vpop.eup %9345  ;;  %9347 = vpow2.f32 %v3815_v41  ;;  %3691 = vadd.xlane.f32.xlu1 %v3690_v11  ;;  %v3939_v47 = vsub.f32 %v10581_v53, %v3935_v38 }
0x12d9   : > { %v3938_v28 = vpop.xlane.xlu0 %3937  ;;  %v3693_v21 = vsel %vm3680_vm1, %v9346_v9, 0.0 }
0x12da   : > { %v3940_v58 = vsub.f32 %v3932_v35, %v3938_v28  ;;  %3694 = vadd.xlane.f32.xlu0 %v3693_v21  ;;  %v3813_v35 = vmul.f32 1.442695, %v3811_v26  ;;  %v3941_v5 = vmul.f32 1.442695, %v3939_v47 }
0x12dc   : > { %v3943_v51 = vmul.f32 1.442695, %v3940_v58 }
0x12de   : > { %9349 = vpow2.f32 %v3943_v51 }
0x12df   : > { %v4062_v36 = vpop.xlane.xlu1 %4061 }
0x12e0   : > { %v4066_v40 = vsub.f32 %v4058_v52, %v4062_v36 }
0x12e1   : > { %v4065_v18 = vpop.xlane.xlu0 %4064 }
0x12e2   : > { %v9348_v15 = vpop.eup %9347  ;;  %v4067_v62 = vsub.f32 %v4059_v59, %v4065_v18  ;;  %v4068_v45 = vmul.f32 1.442695, %v4066_v40 }
0x12e3   : > { %v3820_v63 = vsel %vm3680_vm1, %v9348_v15, 0.0 }
0x12e4   : > { %v4070_v17 = vmul.f32 1.442695, %v4067_v62  ;;  %3821 = vadd.xlane.f32.xlu0 %v3820_v63 }
0x12e6   : > { %9351 = vpow2.f32 %v4070_v17 }
0x12e7   : > { %9353 = vpow2.f32 %v3813_v35 }
0x12e8   : > { %v10591_v31 = vpop.eup %9349  ;;  %9355 = vpow2.f32 %v3941_v5 }
0x12e9   : > { %3829 = vrot.lane.b32.xlu1 %v10523_v39, %s11705_s29  ;;  %v3948_v19 = vsel %vm3680_vm1, %v10591_v31, 0.0  ;;  %9357 = vpow2.f32 %v4068_v45 }
0x12ea   : > { %3949 = vadd.xlane.f32.xlu0 %v3948_v19 }
0x12f0   : > { %v10597_v7 = vpop.eup %9351 }
0x12f1   : > { %v4075_v4 = vsel %vm3680_vm1, %v10597_v7, 0.0  ;;  %v9354_v29 = vpop.eup %9353 }
0x12f2   : > { %4076 = vadd.xlane.f32.xlu0 %v4075_v4  ;;  %v3817_v42 = vsel %vm3676_vm0, %v9354_v29, 0.0  ;;  %v9356_v56 = vpop.eup %9355 }
0x12f3   : > { %v3945_v34 = vsel %vm3676_vm0, %v9356_v56, 0.0  ;;  %v9358_v59 = vpop.eup %9357 }
0x12f4   : > { %v4072_v53 = vsel %vm3676_vm0, %v9358_v59, 0.0 }
0x1308   : > { %3956 = vrot.lane.b32.xlu0 %v10523_v39, %s11747_s4 }
0x130d   : > { %3818 = vadd.xlane.f32.xlu1 %v3817_v42 }
0x1311   : > { %3946 = vadd.xlane.f32.xlu1 %v3945_v34 }
0x1315   : > { %4073 = vadd.xlane.f32.xlu1 %v4072_v53 }
0x1326   : > { %4083 = vrot.lane.b32.xlu1 %v10523_v39, %s11749_s2 }
0x1365   : > { %v3692_v52 = vpop.xlane.xlu1 %3691 }
0x1366   : > { %9359 = vrcp.f32 %v3692_v52 }
0x1367   : > { %v3695_v0 = vpop.xlane.xlu0 %3694 }
0x1368   : > { %9361 = vrcp.f32 %v3695_v0 }
0x1369   : > { %v3830_v27 = vpop.permute.xlu1 %3829 }
0x136a   : > { %v3835_v37 = vsel %vm3705_vm15, %v3830_v27, 0 }
0x1370   : > { %v9360_v54 = vpop.eup %9359 }
0x1371   : > { %v3698_v61 = vmul.f32 %v9360_v54, %v9344_v2  ;;  %v3822_v39 = vpop.xlane.xlu0 %3821  ;;  %v9168_v54 = vld [vmem:[%s11677_s16 + $0x18] sm:$0xff]  }
0x1372   : > { %v9362_v3 = vpop.eup %9361  ;;  %9363 = vrcp.f32 %v3822_v39 }
0x1373   : > { %v3699_v50 = vmul.f32 %v9362_v3, %v9346_v9 }
0x1375   : > { %v3700_v25 = vpack.c.bf16 %v3699_v50, %v3698_v61 }
0x1377   : > { %8541 = vmatmul.mubr.msk.bf16.vlgmr.msra.gmra.mrb[68].mxu0 %vm3676_vm0, %v3700_v25  ;;  %v3950_v10 = vpop.xlane.xlu0 %3949 }
0x1378   : > { %8551 = vmatpush3.bf16.msra.mxu0 %v3835_v37  ;;  %8552 = vmatprep.mubr.msk.bf16.mxu0 %vm9544_vm5, %v11743_v55 }
0x1379   : > { %8562 = vmatprep.subr.bf16.mxu0 %v11743_v55 }
0x137c   : > { %v9364_v41 = vpop.eup %9363 }
0x137d   : > { %v3826_v28 = vmul.f32 %v9364_v41, %v9348_v15 }
0x137f   : > { %v4077_v2 = vpop.xlane.xlu0 %4076 }
0x1383   : > { %v3957_v58 = vpop.permute.xlu0 %3956 }
0x1384   : > { %v3962_v62 = vsel %vm3705_vm15, %v3957_v58, 0 }
0x139a   : > { %v3819_v32 = vpop.xlane.xlu1 %3818 }
0x139b   : > { %9365 = vrcp.f32 %v3819_v32 }
0x139e   : > { %v3947_v13 = vpop.xlane.xlu1 %3946 }
0x139f   : > { %9367 = vrcp.f32 %v3947_v13 }
0x13a0   : > { %9369 = vrcp.f32 %v3950_v10  ;;  %v7751_v10 = vld [vmem:[%s11682_s21] ss:$0 sm:$0xff] }
0x13a1   : > { %v3282_v13 = vadd.f32 %v7751_v10, %v10553_v44  ;;  %v3301_v58 = vadd.f32 %v7751_v10, %v10565_v12 }
0x13a2   : > { %v4074_v11 = vpop.xlane.xlu1 %4073 }
0x13a3   : > { %9371 = vrcp.f32 %v4074_v11  ;;  %v3312_v41 = vadd.f32 %v3282_v13, %v10421_v33  ;;  %v3309_v33 = vadd.f32 %v10563_v14, %v7751_v10 }
0x13a4   : > { %9373 = vrcp.f32 %v4077_v2  ;;  %v3290_v2 = vadd.f32 %v10551_v49, %v7751_v10  ;;  %v3285_v49 = vadd.f32 %v7751_v10, %v10557_v16 }
0x13a5   : > { %v9366_v9 = vpop.eup %9365  ;;  %v10671_v12 = vadd.f32 %v3309_v33, %v10465_v60 }
0x13a6   : > { %v3825_v21 = vmul.f32 %v9366_v9, %v9354_v29  ;;  %v4084_v19 = vpop.permute.xlu1 %4083  ;;  %v10651_v11 = vadd.f32 %v3290_v2, %v10428_v22  ;;  %v3293_v9 = vadd.f32 %v10555_v6, %v7751_v10  ;;  %v10664_v22 = vadd.f32 %v3301_v58, %v10448_v23 }
0x13a7   : > { %v4089_v38 = vsel %vm3705_vm15, %v4084_v19, 0 }
0x13a8   : > { %v3827_v51 = vpack.c.bf16 %v3826_v28, %v3825_v21  ;;  %v3322_v28 = vsel %vm1322_vm3, %v3312_v41, 0.0  ;;  %v10656_v21 = vadd.f32 %v3293_v9, %v10435_v24  ;;  %v3328_v44 = vsel %vm1322_vm3, %v10651_v11, 0.0 }
0x13a9   : > { %v9368_v18 = vpop.eup %9367  ;;  %v3298_v24 = vadd.f32 %v7751_v10, %v10561_v8  ;;  %v3337_v16 = vsel %vm1322_vm3, %v10664_v22, 0.0 }
0x13aa   : > { %8553 = vmatmul.mubr.msk.bf16.vlgmr.msra.gmra.mrb[72].mxu0 %vm3676_vm0, %v3827_v51  ;;  %v9370_v63 = vpop.eup %9369  ;;  %v3953_v17 = vmul.f32 %v9368_v18, %v9356_v56  ;;  %v3331_v6 = vsel %vm1322_vm3, %v10656_v21, 0.0  ;;  %v3313_v51 = vadd.f32 %v3285_v49, %v10423_v57  ;;  %v3306_v18 = vadd.f32 %v10559_v1, %v7751_v10 }
0x13ab   : > { %8563 = vmatpush3.bf16.msra.mxu0 %v3962_v62  ;;  %8564 = vmatprep.mubr.msk.bf16.mxu0 %vm9544_vm5, %v11743_v55  ;;  %v3954_v15 = vmul.f32 %v9370_v63, %v10591_v31  ;;  %v3316_v14 = vadd.f32 %v3298_v24, %v10444_v20  ;;  %v3343_v57 = vsel %vm1322_vm3, %v10671_v12, 0.0 }
0x13ac   : > { %8574 = vmatprep.subr.bf16.mxu0 %v11743_v55  ;;  %v3325_v23 = vsel %vm1322_vm3, %v3313_v51, 0.0  ;;  %v10681_v8 = vadd.f32 %v3306_v18, %v10459_v46 }
0x13ad   : > { %v3955_v4 = vpack.c.bf16 %v3954_v15, %v3953_v17  ;;  %v9372_v26 = vpop.eup %9371  ;;  %v3334_v60 = vsel %vm1322_vm3, %v3316_v14, 0.0 }
0x13ae   : > { %v9374_v35 = vpop.eup %9373  ;;  %v4080_v47 = vmul.f32 %v9372_v26, %v9358_v59  ;;  %v9167_v59 = vld [vmem:[%s11677_s16 + $0x10] sm:$0xff]   ;;  %v3340_v62 = vsel %vm1322_vm3, %v10681_v8, 0.0 }
0x13af   : > { %v4081_v36 = vmul.f32 %v9374_v35, %v10597_v7  ;;  %8581 = vmatpush3.bf16.msra.mxu1 %v9167_v59 }
0x13b0   : > { %8582 = vmatprep.subr.bf16.mxu1 %v11743_v55 }
0x13b1   : > { %v4082_v5 = vpack.c.bf16 %v4081_v36, %v4080_v47 }
0x13b2   : > { %8565 = vmatmul.mubr.msk.bf16.vlgmr.msra.gmra.mrb[76].mxu0 %vm3676_vm0, %v3955_v4 }
0x13b3   : > { %8575 = vmatpush3.bf16.msra.mxu0 %v4089_v38  ;;  %8576 = vmatprep.mubr.msk.bf16.mxu0 %vm9544_vm5, %v11743_v55 }
0x13b4   : > { %8588 = vmatprep.subr.bf16.mxu0 %v11743_v55  ;;  %8583 = vmatpush3.bf16.msra.mxu1 %v9168_v54 }
0x13ba   : > { %8577 = vmatmul.mubr.msk.bf16.vlgmr.msra.gmra.mrb[80].mxu0 %vm3676_vm0, %v4082_v5 }
0x13bb   : > { %8592 = vmatprep.mubr.msk.bf16.mxu0 %vm9544_vm5, %v11743_v55 }
0x144a   : > { %v10630_v31 = vpop.f32.mrb[68].mxu0 }
0x144b   : > { %v8542_v40 = vpop.f32.mrb[69].mxu0 }
0x144c   : > { %v10632_v45 = vpop.f32.mrb[70].mxu0 }
0x144d   : > { %v8543_v29 = vpop.f32.mrb[71].mxu0 }
0x147d   : > { %v3871_v42 = vpop.f32.mrb[72].mxu0 }
0x147e   : > { %v8554_v56 = vpop.f32.mrb[73].mxu0 }
0x147f   : > { %v3874_v34 = vpop.f32.mrb[74].mxu0 }
0x1480   : > { %v9091_v7 = vpack.i.bf16 %v3874_v34, %v3871_v42  ;;  %v8555_v53 = vpop.f32.mrb[75].mxu0 }
0x1482   : > { %9092 = vrot.lane.b32.xlu1 %v9091_v7, %s11751_s9 }
0x1485   : > { %v3998_v52 = vpop.f32.mrb[76].mxu0 }
0x1486   : > { %v8566_v0 = vpop.f32.mrb[77].mxu0 }
0x1487   : > { %v4001_v3 = vpop.f32.mrb[78].mxu0 }
0x1488   : > { %v9096_v61 = vpack.i.bf16 %v4001_v3, %v3998_v52  ;;  %v8567_v50 = vpop.f32.mrb[79].mxu0 }
0x148a   : > { %9097 = vrot.lane.b32.xlu0 %v9096_v61, %s11752_s8 }
0x148d   : > { %v4125_v27 = vpop.f32.mrb[80].mxu0 }
0x148e   : > { %v8578_v25 = vpop.f32.mrb[81].mxu0 }
0x148f   : > { %v4128_v37 = vpop.f32.mrb[82].mxu0 }
0x1490   : > { %v9101_v39 = vpack.i.bf16 %v4128_v37, %v4125_v27  ;;  %v8579_v32 = vpop.f32.mrb[83].mxu0 }
0x1492   : > { %9102 = vrot.lane.b32.xlu1 %v9101_v39, %s11753_s10 }
0x14a9   : > { %3323 = vadd.xlane.f32.xlu0 %v3322_v28 }
0x14ad   : > { %3329 = vadd.xlane.f32.xlu0 %v3328_v44 }
0x14b1   : > { %3332 = vadd.xlane.f32.xlu0 %v3331_v6 }
0x14b5   : > { %3338 = vadd.xlane.f32.xlu0 %v3337_v16 }
0x14b6   : > { %3326 = vadd.xlane.f32.xlu1 %v3325_v23 }
0x14b9   : > { %3344 = vadd.xlane.f32.xlu0 %v3343_v57 }
0x14ba   : > { %3335 = vadd.xlane.f32.xlu1 %v3334_v60 }
0x14be   : > { %3341 = vadd.xlane.f32.xlu1 %v3340_v62 }
0x14f4   : > { %v9093_v1 = vpop.permute.xlu1 %9092 }
0x14f5   : > { %v9095_v63 = vunpack.i.h.bf16 %v9093_v1  ;;  %v9094_v17 = vunpack.i.l.bf16 %v9093_v1 }
0x14f7   : > { %v4157_v26 = vsel %vm1024_vm2, %v10632_v45, %v9095_v63  ;;  %v4156_v46 = vsel %vm1024_vm2, %v10630_v31, %v9094_v17  ;;  %v7794_v31 = vld [vmem:[%s11678_s17 + $0x1] ss:$0 sm:$0xff] }
0x14fc   : > { %v9098_v20 = vpop.permute.xlu0 %9097 }
0x14fd   : > { %v9100_v15 = vunpack.i.h.bf16 %v9098_v20  ;;  %v9099_v19 = vunpack.i.l.bf16 %v9098_v20 }
0x14ff   : > { %v4159_v47 = vsel %vm2824_vm12, %v4157_v26, %v9100_v15  ;;  %v4158_v36 = vsel %vm2824_vm12, %v4156_v46, %v9099_v19  ;;  %v9169_v19 = vld [vmem:[%s11673_s12 + $0x20] sm:$0xff]  }
0x1500   : > { %8589 = vmatpush3.bf16.msra.mxu0 %v9169_v19 }
0x1501   : > { %8590 = vmatprep.subr.bf16.mxu0 %v11743_v55 }
0x1504   : > { %v9103_v4 = vpop.permute.xlu1 %9102 }
0x1505   : > { %v9105_v38 = vunpack.i.h.bf16 %v9103_v4  ;;  %v9104_v35 = vunpack.i.l.bf16 %v9103_v4  ;;  %v10755_v4 = vld [vmem:[%s11673_s12 + $0x28] sm:$0xff]  }
0x1506   : > { %8591 = vmatpush3.bf16.msra.mxu0 %v10755_v4 }
0x1507   : > { %v4161_v5 = vsel %vm2833_vm13, %v4159_v47, %v9105_v38  ;;  %v4160_v40 = vsel %vm2833_vm13, %v4158_v36, %v9104_v35 }
0x1508   : > { %v4162_v29 = vpack.c.bf16 %v4161_v5, %v4160_v40 }
0x150a   : > { %8585 = vmatmul.mubr.msk.bf16.vlgmr.msra.gmra.mrb[80].mxu1 %vm1322_vm3, %v4162_v29 }
0x1536   : > { %v3324_v42 = vpop.xlane.xlu0 %3323 }
0x1537   : > { %v3346_v45 = vmul.f32 0.03125, %v3324_v42 }
0x1539   : > { %v10698_v53 = vsub.f32 %v3312_v41, %v3346_v45 }
0x153a   : > { %v3330_v56 = vpop.xlane.xlu0 %3329 }
0x153b   : > { %v3348_v54 = vmul.f32 0.03125, %v3330_v56  ;;  %v3362_v13 = vmul.f32 %v10698_v53, %v10698_v53 }
0x153d   : > { %v10706_v2 = vsub.f32 %v10651_v11, %v3348_v54 }
0x153e   : > { %v3333_v59 = vpop.xlane.xlu0 %3332 }
0x153f   : > { %v3349_v25 = vmul.f32 0.03125, %v3333_v59  ;;  %v3364_v24 = vmul.f32 %v10706_v2, %v10706_v2 }
0x1541   : > { %v10711_v44 = vsub.f32 %v10656_v21, %v3349_v25  ;;  %v3376_v57 = vsel %vm1322_vm3, %v3364_v24, 0.0  ;;  %v7761_v24 = vld [vmem:[%s11684_s23 + $0x1] ss:$0 sm:$0xff] }
0x1542   : > { %v3339_v50 = vpop.xlane.xlu0 %3338 }
0x1543   : > { %v3327_v34 = vpop.xlane.xlu1 %3326  ;;  %v3365_v23 = vmul.f32 %v10711_v44, %v10711_v44 }
0x1544   : > { %v3347_v7 = vmul.f32 0.03125, %v3327_v34 }
0x1546   : > { %v10700_v37 = vsub.f32 %v3313_v51, %v3347_v7  ;;  %v3345_v6 = vpop.xlane.xlu0 %3344 }
0x1547   : > { %v3336_v52 = vpop.xlane.xlu1 %3335  ;;  %v3353_v16 = vmul.f32 0.03125, %v3345_v6 }
0x1548   : > { %v3350_v41 = vmul.f32 0.03125, %v3336_v52  ;;  %v3363_v33 = vmul.f32 %v10700_v37, %v10700_v37 }
0x1549   : > { %v10734_v62 = vsub.f32 %v10671_v12, %v3353_v16 }
0x154a   : > { %v10716_v11 = vsub.f32 %v3316_v14, %v3350_v41  ;;  %v3373_v18 = vsel %vm1322_vm3, %v3363_v33, 0.0 }
0x154b   : > { %v3342_v58 = vpop.xlane.xlu1 %3341  ;;  %v3369_v17 = vmul.f32 %v10734_v62, %v10734_v62 }
0x154c   : > { %v3352_v51 = vmul.f32 0.03125, %v3342_v58  ;;  %v3366_v60 = vmul.f32 %v10716_v11, %v10716_v11 }
0x154d   : > { %v3391_v15 = vsel %vm1322_vm3, %v3369_v17, 0.0 }
0x154e   : > { %v10728_v14 = vsub.f32 %v10681_v8, %v3352_v51  ;;  %v3382_v20 = vsel %vm1322_vm3, %v3366_v60, 0.0 }
0x1550   : > { %v3368_v8 = vmul.f32 %v10728_v14, %v10728_v14 }
0x1552   : > { %v3388_v12 = vsel %vm1322_vm3, %v3368_v8, 0.0 }
0x15dd   : > { %v4218_v0 = vpop.f32.mrb[80].mxu1 }
0x15de   : > { %v4219_v3 = vadd.f32 %v7794_v31, %v4218_v0  ;;  %v8586_v61 = vpop.f32.mrb[81].mxu1 }
0x15df   : > { %v4221_v27 = vpop.f32.mrb[82].mxu1 }
0x15e0   : > { %v4225_v39 = vadd.f32 %v4219_v3, %v10471_v43  ;;  %v4222_v32 = vadd.f32 %v7794_v31, %v4221_v27  ;;  %v8587_v10 = vpop.f32.mrb[83].mxu1  ;;  %v3351_v43 = vmul.f32 0.03125, %v3339_v50 }
0x15e2   : > { %v4226_v9 = vadd.f32 %v4222_v32, %v10457_v30  ;;  %v4229_v28 = vsel %vm1322_vm3, %v4225_v39, 0.0  ;;  %v3370_v30 = vsel %vm1322_vm3, %v3362_v13, 0.0  ;;  %v10722_v21 = vsub.f32 %v10664_v22, %v3351_v43  ;;  %v7760_v43 = vld [vmem:[%s11683_s22 + $0x1] ss:$0 sm:$0xff] }
0x15e3   : > { %4230 = vadd.xlane.f32.xlu1 %v4229_v28  ;;  %v3379_v22 = vsel %vm1322_vm3, %v3365_v23, 0.0 }
0x15e4   : > { %v4233_v49 = vsel %vm4232_vm4, %v4226_v9, 0.0  ;;  %v3367_v1 = vmul.f32 %v10722_v21, %v10722_v21 }
0x15e5   : > { %4234 = vadd.xlane.f32.xlu0 %v4233_v49 }
0x15e6   : > { %v3385_v63 = vsel %vm1322_vm3, %v3367_v1, 0.0 }
0x15e7   : > { %3371 = vadd.xlane.f32.xlu1 %v3370_v30 }
0x15e9   : > { %3374 = vadd.xlane.f32.xlu0 %v3373_v18 }
0x15eb   : > { %3377 = vadd.xlane.f32.xlu1 %v3376_v57 }
0x15ed   : > { %3380 = vadd.xlane.f32.xlu0 %v3379_v22 }
0x15ef   : > { %3383 = vadd.xlane.f32.xlu1 %v3382_v20 }
0x15f1   : > { %3386 = vadd.xlane.f32.xlu0 %v3385_v63 }
0x15f3   : > { %3389 = vadd.xlane.f32.xlu1 %v3388_v12  ;;  %v9520_v12 = vld [vmem:[%s9742_s5] sm:$0xff] }
0x15f5   : > { %3392 = vadd.xlane.f32.xlu0 %v3391_v15 }
0x1604   : > { %4344 = vrot.lane.b32.xlu1 %v9169_v19, %s11754_s11 }
0x1670   : > { %v4231_v26 = vpop.xlane.xlu1 %4230 }
0x1671   : > { %v4236_v46 = vmul.f32 0.03125, %v4231_v26  ;;  %v9521_v26 = vld [vmem:[%s9742_s5 + $0x8] sm:$0xff] }
0x1672   : > { %v4235_v38 = vpop.xlane.xlu0 %4234 }
0x1673   : > { %v10758_v35 = vsub.f32 %v4225_v39, %v4236_v46  ;;  %v4237_v47 = vmul.f32 0.03125, %v4235_v38 }
0x1674   : > { %v3372_v36 = vpop.xlane.xlu1 %3371 }
0x1675   : > { %v10760_v5 = vsub.f32 %v4226_v9, %v4237_v47  ;;  %v3394_v40 = vmul.f32 0.03125, %v3372_v36  ;;  %v4240_v29 = vmul.f32 %v10758_v35, %v10758_v35 }
0x1676   : > { %v3375_v42 = vpop.xlane.xlu0 %3374 }
0x1677   : > { %v3402_v56 = vadd.f32 1e-05, %v3394_v40  ;;  %v3395_v34 = vmul.f32 0.03125, %v3375_v42  ;;  %v4242_v45 = vsel %vm1322_vm3, %v4240_v29, 0.0  ;;  %v4241_v59 = vmul.f32 %v10760_v5, %v10760_v5  ;;  %v9522_v42 = vld [vmem:[%s9742_s5 + $0x10] sm:$0xff] }
0x1678   : > { %4243 = vadd.xlane.f32.xlu0 %v4242_v45  ;;  %v3378_v31 = vpop.xlane.xlu1 %3377 }
0x1679   : > { %9375 = vrsqrt.f32 %v3402_v56  ;;  %v3403_v7 = vadd.f32 1e-05, %v3395_v34  ;;  %v3396_v52 = vmul.f32 0.03125, %v3378_v31  ;;  %v4245_v61 = vsel %vm4232_vm4, %v4241_v59, 0.0 }
0x167a   : > { %v3381_v0 = vpop.xlane.xlu0 %3380 }
0x167b   : > { %9377 = vrsqrt.f32 %v3403_v7  ;;  %v3404_v54 = vadd.f32 1e-05, %v3396_v52  ;;  %v3397_v3 = vmul.f32 0.03125, %v3381_v0 }
0x167c   : > { %4246 = vadd.xlane.f32.xlu0 %v4245_v61  ;;  %v3384_v50 = vpop.xlane.xlu1 %3383  ;;  %v9524_v61 = vld [vmem:[%s9742_s5 + $0x20] sm:$0xff] }
0x167d   : > { %9379 = vrsqrt.f32 %v3404_v54  ;;  %v3405_v27 = vadd.f32 1e-05, %v3397_v3  ;;  %v3398_v25 = vmul.f32 0.03125, %v3384_v50 }
0x167e   : > { %v3387_v39 = vpop.xlane.xlu0 %3386 }
0x167f   : > { %9381 = vrsqrt.f32 %v3405_v27  ;;  %v3406_v32 = vadd.f32 1e-05, %v3398_v25  ;;  %v3399_v10 = vmul.f32 0.03125, %v3387_v39  ;;  %v9525_v27 = vld [vmem:[%s9742_s5 + $0x28] sm:$0xff] }
0x1680   : > { %v3390_v13 = vpop.xlane.xlu1 %3389 }
0x1681   : > { %9383 = vrsqrt.f32 %v3406_v32  ;;  %v3407_v41 = vadd.f32 1e-05, %v3399_v10  ;;  %v3400_v9 = vmul.f32 0.03125, %v3390_v13 }
0x1682   : > { %v3393_v28 = vpop.xlane.xlu0 %3392 }
0x1683   : > { %v9376_v58 = vpop.eup %9375  ;;  %9385 = vrsqrt.f32 %v3407_v41  ;;  %v3408_v49 = vadd.f32 1e-05, %v3400_v9  ;;  %v3401_v33 = vmul.f32 0.03125, %v3393_v28  ;;  %v9527_v28 = vld [vmem:[%s9742_s5 + $0x38] sm:$0xff] }
0x1684   : > { %v3418_v6 = vmul.f32 %v9376_v58, %v10698_v53  ;;  %v4345_v53 = vpop.permute.xlu1 %4344 }
0x1685   : > { %v9378_v51 = vpop.eup %9377  ;;  %9387 = vrsqrt.f32 %v3408_v49  ;;  %v3409_v30 = vadd.f32 1e-05, %v3401_v33  ;;  %8596 = vmatprep.subr.bf16.mxu1 %v4345_v53  ;;  %v9171_v33 = vld [vmem:[%s11675_s14 + $0x20] sm:$0xff]  }
0x1686   : > { %v3419_v16 = vmul.f32 %v9378_v51, %v10700_v37  ;;  %v3430_v18 = vmul.f32 %v7760_v43, %v3418_v6  ;;  %8597 = vmatpush3.bf16.msra.mxu1 %v4345_v53  ;;  %8608 = vmatprep.subr.bf16.mxu0 %v9171_v33 }
0x1687   : > { %v9380_v23 = vpop.eup %9379  ;;  %9389 = vrsqrt.f32 %v3409_v30 }
0x1688   : > { %v3420_v57 = vmul.f32 %v9380_v23, %v10706_v2  ;;  %v3431_v60 = vmul.f32 %v7760_v43, %v3419_v16  ;;  %v3442_v22 = vadd.f32 %v7761_v24, %v3430_v18 }
0x1689   : > { %v9382_v1 = vpop.eup %9381 }
0x168a   : > { %v3432_v20 = vmul.f32 %v7760_v43, %v3420_v57  ;;  %v3421_v8 = vmul.f32 %v9382_v1, %v10711_v44  ;;  %v3443_v63 = vadd.f32 %v7761_v24, %v3431_v60  ;;  %v3450_v15 = vadd.f32 %v9520_v12, %v3442_v22  ;;  %v7798_v60 = vld [vmem:[%s11683_s22 + $0x2] ss:$0 sm:$0xff] }
0x168b   : > { %v9384_v17 = vpop.eup %9383  ;;  %v7799_v1 = vld [vmem:[%s11684_s23 + $0x2] ss:$0 sm:$0xff] }
0x168c   : > { %v3433_v37 = vmul.f32 %v7760_v43, %v3421_v8  ;;  %v3422_v19 = vmul.f32 %v9384_v17, %v10716_v11  ;;  %v3451_v2 = vadd.f32 %v9521_v26, %v3443_v63  ;;  %v3444_v46 = vadd.f32 %v7761_v24, %v3432_v20  ;;  %v9523_v11 = vld [vmem:[%s9742_s5 + $0x18] sm:$0xff] }
0x168d   : > { %v9386_v38 = vpop.eup %9385  ;;  %v10781_v47 = vpack.c.bf16 %v3443_v63, %v3442_v22 }
0x168e   : > { %v3423_v36 = vmul.f32 %v9386_v38, %v10722_v21  ;;  %v10784_v44 = vpack.c.bf16 %v3451_v2, %v3450_v15  ;;  %v3445_v40 = vadd.f32 %v7761_v24, %v3433_v37  ;;  %v3452_v56 = vadd.f32 %v9522_v42, %v3444_v46 }
0x168f   : > { %v9388_v29 = vpop.eup %9387  ;;  %v3434_v34 = vmul.f32 %v7760_v43, %v3422_v19 }
0x1690   : > { %v3424_v45 = vmul.f32 %v9388_v29, %v10728_v14  ;;  %8600 = vmatprep.mubr.msk.bf16.mxu1 %vm1322_vm3, %v10784_v44  ;;  %v3453_v59 = vadd.f32 %v9523_v11, %v3445_v40  ;;  %v3435_v31 = vmul.f32 %v7760_v43, %v3423_v36  ;;  %v10791_v7 = vpack.c.bf16 %v3445_v40, %v3444_v46 }
0x1691   : > { %v9390_v21 = vpop.eup %9389  ;;  %v3446_v52 = vadd.f32 %v7761_v24, %v3434_v34 }
0x1692   : > { %v3425_v0 = vmul.f32 %v9390_v21, %v10734_v62  ;;  %4346 = vrot.lane.b32.xlu0 %v10755_v4, %s11754_s11  ;;  %v10796_v54 = vpack.c.bf16 %v3453_v59, %v3452_v56  ;;  %v3447_v14 = vadd.f32 %v7761_v24, %v3435_v31  ;;  %v3436_v3 = vmul.f32 %v7760_v43, %v3424_v45  ;;  %v9526_v62 = vld [vmem:[%s9742_s5 + $0x30] sm:$0xff] }
0x1693   : > { %v3454_v50 = vadd.f32 %v9524_v61, %v3446_v52 }
0x1694   : > { %v3455_v25 = vadd.f32 %v9525_v27, %v3447_v14  ;;  %v3437_v39 = vmul.f32 %v7760_v43, %v3425_v0  ;;  %v3448_v32 = vadd.f32 %v7761_v24, %v3436_v3  ;;  %v10800_v10 = vpack.c.bf16 %v3447_v14, %v3446_v52  ;;  %v10816_v43 = vld [vmem:[%s11674_s13 + $0x2] ss:$0 sm:$0xff] }
0x1695   : > { %4350 = vrot.lane.b32.xlu1 %v10816_v43, %s11754_s11 }
0x1696   : > { %v10802_v13 = vpack.c.bf16 %v3455_v25, %v3454_v50  ;;  %v3449_v41 = vadd.f32 %v7761_v24, %v3437_v39  ;;  %v3456_v9 = vadd.f32 %v9526_v62, %v3448_v32 }
0x1698   : > { %v3457_v58 = vadd.f32 %v9527_v28, %v3449_v41  ;;  %v10806_v4 = vpack.c.bf16 %v3449_v41, %v3448_v32 }
0x169a   : > { %v10808_v49 = vpack.c.bf16 %v3457_v58, %v3456_v9  ;;  %v7818_v58 = vld [vmem:[%s11676_s15 + $0x2] ss:$0 sm:$0xff] }
0x1705   : > { %v4244_v6 = vpop.xlane.xlu0 %4243 }
0x1706   : > { %v4248_v51 = vmul.f32 0.03125, %v4244_v6 }
0x1707   : > { %v4351_v19 = vpop.permute.xlu1 %4350 }
0x1708   : > { %v4250_v30 = vadd.f32 1e-05, %v4248_v51 }
0x1709   : > { %v4247_v24 = vpop.xlane.xlu0 %4246 }
0x170a   : > { %9391 = vrsqrt.f32 %v4250_v30  ;;  %v4249_v16 = vmul.f32 0.03125, %v4247_v24 }
0x170c   : > { %v4251_v18 = vadd.f32 1e-05, %v4249_v16 }
0x170d   : > { %v4347_v23 = vpop.permute.xlu0 %4346 }
0x170e   : > { %9393 = vrsqrt.f32 %v4251_v18  ;;  %8598 = vmatprep.subr.bf16.mxu1 %v4347_v23 }
0x170f   : > { %8599 = vmatpush3.bf16.msra.mxu1 %v4347_v23 }
0x1710   : > { %8620 = vmatprep.subr.bf16.mxu1 %v11743_v55 }
0x1712   : > { %8601 = vmatmul.mubr.msk.bf16.vlgmr.msra.gmra.mrb[84].mxu1 %vm1322_vm3, %v10796_v54 }
0x1713   : > { %8604 = vmatprep.mubr.msk.bf16.mxu1 %vm1322_vm3, %v10802_v13 }
0x1714   : > { %v9392_v57 = vpop.eup %9391 }
0x1715   : > { %v4254_v22 = vmul.f32 %v9392_v57, %v10758_v35 }
0x1717   : > { %v4260_v53 = vmul.f32 %v7798_v60, %v4254_v22 }
0x1718   : > { %v9394_v20 = vpop.eup %9393 }
0x1719   : > { %v4255_v8 = vmul.f32 %v9394_v20, %v10760_v5  ;;  %v10833_v63 = vadd.f32 %v7799_v1, %v4260_v53  ;;  %v9172_v5 = vld [vmem:[%s11675_s14 + $0x28] sm:$0xff]  }
0x171a   : > { %8605 = vmatmul.mubr.msk.bf16.gmra.mrb[88].mxu1 %vm1322_vm3, %v10808_v49 }
0x171b   : > { %v4261_v17 = vmul.f32 %v7798_v60, %v4255_v8  ;;  %8628 = vmatprep.mubr.msk.bf16.mxu1 %vm9544_vm5, %v11743_v55  ;;  %v4275_v35 = vadd.f32 %v10833_v63, %v10473_v48 }
0x171d   : > { %v10839_v12 = vadd.f32 %v7799_v1, %v4261_v17 }
0x171f   : > { %v4277_v15 = vpack.c.bf16 %v10839_v12, %v4275_v35 }
0x1721   : > { %8593 = vmatmul.mubr.msk.bf16.vlgmr.msra.gmra.mrb[84].mxu0 %vm1322_vm3, %v4277_v15 }
0x1722   : > { %8609 = vmatpush3.bf16.msra.mxu0 %v9171_v33  ;;  %8612 = vmatprep.mubr.msk.bf16.mxu0 %vm1322_vm3, %v10781_v47 }
0x1723   : > { %8610 = vmatprep.subr.bf16.mxu0 %v9172_v5 }
0x1726   : > { %8611 = vmatpush3.bf16.msra.mxu0 %v9172_v5 }
0x1727   : > { %8632 = vmatprep.subr.bf16.mxu0 %v11743_v55 }
0x1729   : > { %8613 = vmatmul.mubr.msk.bf16.vlgmr.msra.gmra.mrb[88].mxu0 %vm1322_vm3, %v10791_v7 }
0x172a   : > { %8616 = vmatprep.mubr.msk.bf16.mxu0 %vm1322_vm3, %v10800_v10 }
0x1731   : > { %8617 = vmatmul.mubr.msk.bf16.gmra.mrb[92].mxu0 %vm1322_vm3, %v10806_v4 }
0x1732   : > { %8640 = vmatprep.mubr.msk.bf16.mxu0 %vm9544_vm5, %v11743_v55 }
0x17e5   : > { %v8602_v37 = vpop.f32.mrb[84].mxu1 }
0x17e6   : > { %v4399_v26 = vpop.f32.mrb[85].mxu1  ;;  %v4408_v46 = vadd.f32 %v8602_v37, %v4351_v19 }
0x17e7   : > { %v8603_v2 = vpop.f32.mrb[86].mxu1  ;;  %v4400_v40 = vadd.f32 %v4399_v26, %v4351_v19 }
0x17e8   : > { %v4411_v38 = vadd.f32 %v8603_v2, %v4351_v19  ;;  %v4402_v36 = vpop.f32.mrb[87].mxu1 }
0x17e9   : > { %v4403_v29 = vadd.f32 %v4402_v36, %v4351_v19 }
0x17ea   : > { %v10859_v42 = vpack.c.bf16 %v4411_v38, %v4408_v46  ;;  %v10907_v38 = vld [vmem:[%s9851_s1] ss:$0 sm:$0xff] }
0x17eb   : > { %v10861_v56 = vpack.c.bf16 %v4403_v29, %v4400_v40 }
0x17ec   : > { %v4555_v25 = vsel %vm1024_vm2, %v10859_v42, 0 }
0x17ed   : > { %v8606_v34 = vpop.f32.mrb[88].mxu1  ;;  %v4552_v45 = vsel %vm1024_vm2, %v10861_v56, 0 }
0x17ee   : > { %v4415_v11 = vpop.f32.mrb[89].mxu1  ;;  %8621 = vmatpush3.bf16.xpose.msra.mxu1 %v4552_v45  ;;  %v4424_v31 = vadd.f32 %v8606_v34, %v4351_v19 }
0x17ef   : > { %v8607_v59 = vpop.f32.mrb[90].mxu1  ;;  %8622 = vmatprep.subr.bf16.mxu1 %v11743_v55  ;;  %v4416_v0 = vadd.f32 %v4415_v11, %v4351_v19 }
0x17f0   : > { %v4427_v21 = vadd.f32 %v8607_v59, %v4351_v19  ;;  %v4418_v52 = vpop.f32.mrb[91].mxu1 }
0x17f1   : > { %v4419_v14 = vadd.f32 %v4418_v52, %v4351_v19 }
0x17f2   : > { %v10866_v3 = vpack.c.bf16 %v4427_v21, %v4424_v31 }
0x17f3   : > { %v10868_v61 = vpack.c.bf16 %v4419_v14, %v4416_v0 }
0x17f4   : > { %v4333_v50 = vpop.f32.mrb[84].mxu0  ;;  %v4561_v1 = vsel %vm1024_vm2, %v10866_v3, 0 }
0x17f5   : > { %v8594_v27 = vpop.f32.mrb[85].mxu0  ;;  %v4334_v32 = vadd.f32 %v10816_v43, %v4333_v50  ;;  %v4558_v6 = vsel %vm1024_vm2, %v10868_v61, 0 }
0x17f6   : > { %v4336_v39 = vpop.f32.mrb[86].mxu0  ;;  %8623 = vmatpush3.bf16.xpose.msra.mxu1 %v4555_v25 }
0x17f7   : > { %v4337_v41 = vadd.f32 %v10816_v43, %v4336_v39  ;;  %v8595_v62 = vpop.f32.mrb[87].mxu0  ;;  %8624 = vmatprep.subr.bf16.mxu1 %v11743_v55 }
0x17f9   : > { %v10875_v9 = vpack.c.bf16 %v4337_v41, %v4334_v32 }
0x17fc   : > { %v8614_v28 = vpop.f32.mrb[88].mxu0 }
0x17fd   : > { %v4505_v33 = vpop.f32.mrb[89].mxu0  ;;  %v4514_v30 = vadd.f32 %v8614_v28, %v7818_v58 }
0x17fe   : > { %v8615_v51 = vpop.f32.mrb[90].mxu0  ;;  %8625 = vmatpush3.bf16.xpose.msra.mxu1 %v4558_v6  ;;  %v4506_v43 = vadd.f32 %v7818_v58, %v4505_v33 }
0x17ff   : > { %v4517_v24 = vadd.f32 %v8615_v51, %v7818_v58  ;;  %v4508_v16 = vpop.f32.mrb[91].mxu0  ;;  %8626 = vmatprep.subr.bf16.mxu1 %v11743_v55 }
0x1800   : > { %v4509_v18 = vadd.f32 %v7818_v58, %v4508_v16 }
0x1801   : > { %v10883_v23 = vpack.c.bf16 %v4517_v24, %v4514_v30 }
0x1802   : > { %v10885_v57 = vpack.c.bf16 %v4509_v18, %v4506_v43 }
0x1804   : > { %v8618_v60 = vpop.f32.mrb[92].mxu0  ;;  %8633 = vmatpush3.bf16.msra.mxu0 %v10885_v57 }
0x1805   : > { %v4521_v22 = vpop.f32.mrb[93].mxu0  ;;  %8634 = vmatprep.subr.bf16.mxu0 %v11743_v55  ;;  %v4530_v20 = vadd.f32 %v8618_v60, %v7818_v58 }
0x1806   : > { %v8619_v53 = vpop.f32.mrb[94].mxu0  ;;  %8627 = vmatpush3.bf16.xpose.msra.mxu1 %v4561_v1  ;;  %v4522_v35 = vadd.f32 %v7818_v58, %v4521_v22 }
0x1807   : > { %v4533_v8 = vadd.f32 %v8619_v53, %v7818_v58  ;;  %v4524_v17 = vpop.f32.mrb[95].mxu0  ;;  %8656 = vmatprep.subr.bf16.mxu1 %v11743_v55 }
0x1808   : > { %v4525_v15 = vadd.f32 %v7818_v58, %v4524_v17  ;;  %8635 = vmatpush3.bf16.msra.mxu0 %v10883_v23 }
0x1809   : > { %v10893_v5 = vpack.c.bf16 %v4533_v8, %v4530_v20  ;;  %8636 = vmatprep.subr.bf16.mxu0 %v11743_v55 }
0x180a   : > { %v10896_v37 = vpack.c.bf16 %v4525_v15, %v4522_v35 }
0x180c   : > { %8637 = vmatpush3.bf16.msra.mxu0 %v10896_v37 }
0x180d   : > { %8629 = vmatmul.mubr.msk.bf16.vlgmr.msra.gmra.mrb[92].mxu1 %vm1024_vm2, %v10875_v9  ;;  %8638 = vmatprep.subr.bf16.mxu0 %v11743_v55 }
0x180e   : > { %8664 = vmatprep.mubr.msk.bf16.mxu1 %vm9544_vm5, %v11743_v55 }
0x1810   : > { %8639 = vmatpush3.bf16.msra.mxu0 %v10893_v5 }
0x1811   : > { %8644 = vmatprep.subr.bf16.mxu0 %v11743_v55 }
0x18e0   : > { %v4597_v19 = vpop.f32.mrb[92].mxu1 }
0x18e1   : > { %v4604_v26 = vmul.f32 0.35355338, %v4597_v19  ;;  %v8630_v2 = vpop.f32.mrb[93].mxu1 }
0x18e2   : > { %v4600_v46 = vpop.f32.mrb[94].mxu1 }
0x18e3   : > { %v4606_v36 = vadd.f32 %v10907_v38, %v4604_v26  ;;  %v4605_v40 = vmul.f32 0.35355338, %v4600_v46  ;;  %v8631_v29 = vpop.f32.mrb[95].mxu1 }
0x18e5   : > { %v4607_v34 = vadd.f32 %v10907_v38, %v4605_v40  ;;  %v4608_v45 = vsel %vm1636_vm11, %v4606_v36, -inf }
0x18e6   : > { %4609 = vmax.xlane.f32.xlu1 %v4608_v45 }
0x18e7   : > { %v4612_v11 = vsel %vm4611_vm6, %v4607_v34, -inf }
0x18e8   : > { %4613 = vmax.xlane.f32.xlu0 %v4612_v11 }
0x18fe   : > { %4687 = vrot.lane.b32.xlu0 %v10861_v56, %s11755_s0 }
0x1902   : > { %4693 = vrot.lane.b32.xlu0 %v10866_v3, %s11755_s0 }
0x1973   : > { %v4610_v59 = vpop.xlane.xlu1 %4609 }
0x1974   : > { %v4615_v31 = vsub.f32 %v4606_v36, %v4610_v59 }
0x1975   : > { %v4614_v21 = vpop.xlane.xlu0 %4613 }
0x1976   : > { %v4617_v52 = vmul.f32 1.442695, %v4615_v31  ;;  %v4616_v0 = vsub.f32 %v4607_v34, %v4614_v21 }
0x1978   : > { %9395 = vpow2.f32 %v4617_v52  ;;  %v4619_v14 = vmul.f32 1.442695, %v4616_v0 }
0x1979   : > { %v4688_v6 = vpop.permute.xlu0 %4687 }
0x197a   : > { %9397 = vpow2.f32 %v4619_v14  ;;  %v4699_v30 = vsel %vm1024_vm2, %v4688_v6, 0 }
0x197d   : > { %v4694_v60 = vpop.permute.xlu0 %4693 }
0x197e   : > { %v4708_v22 = vsel %vm1024_vm2, %v4694_v60, 0 }
0x1982   : > { %v9396_v50 = vpop.eup %9395 }
0x1983   : > { %v4621_v27 = vsel %vm1636_vm11, %v9396_v50, 0.0 }
0x1984   : > { %v9398_v25 = vpop.eup %9397  ;;  %4622 = vadd.xlane.f32.xlu1 %v4621_v27 }
0x1985   : > { %v4624_v39 = vsel %vm4611_vm6, %v9398_v25, 0.0 }
0x1988   : > { %4625 = vadd.xlane.f32.xlu1 %v4624_v39 }
0x1999   : > { %4689 = vrot.lane.b32.xlu1 %v10859_v42, %s11755_s0 }
0x199d   : > { %4691 = vrot.lane.b32.xlu1 %v10868_v61, %s11755_s0 }
0x19a1   : > { %4681 = vrot.lane.b32.xlu1 %v10875_v9, %s11755_s0 }
0x1a11   : > { %v4623_v32 = vpop.xlane.xlu1 %4622 }
0x1a12   : > { %9399 = vrcp.f32 %v4623_v32 }
0x1a15   : > { %v4626_v41 = vpop.xlane.xlu1 %4625 }
0x1a16   : > { %9401 = vrcp.f32 %v4626_v41 }
0x1a19   : > { %v4690_v24 = vpop.permute.xlu1 %4689 }
0x1a1a   : > { %v4702_v16 = vsel %vm1024_vm2, %v4690_v24, 0 }
0x1a1c   : > { %v9400_v62 = vpop.eup %9399 }
0x1a1d   : > { %v4629_v58 = vmul.f32 %v9400_v62, %v9396_v50  ;;  %v4692_v43 = vpop.permute.xlu1 %4691 }
0x1a1e   : > { %v4705_v18 = vsel %vm1024_vm2, %v4692_v43, 0 }
0x1a20   : > { %v9402_v28 = vpop.eup %9401 }
0x1a21   : > { %v4630_v33 = vmul.f32 %v9402_v28, %v9398_v25  ;;  %v4682_v1 = vpop.permute.xlu1 %4681 }
0x1a23   : > { %v4631_v51 = vpack.c.bf16 %v4630_v33, %v4629_v58 }
0x1a25   : > { %8641 = vmatmul.mubr.msk.bf16.vlgmr.msra.gmra.mrb[96].mxu0 %vm1636_vm11, %v4631_v51 }
0x1a26   : > { %8645 = vmatpush3.bf16.xpose.msra.mxu0 %v4699_v30  ;;  %8652 = vmatprep.mubr.msk.bf16.mxu0 %vm9544_vm5, %v11743_v55 }
0x1a27   : > { %8646 = vmatprep.subr.bf16.mxu0 %v11743_v55 }
0x1a2e   : > { %8647 = vmatpush3.bf16.xpose.msra.mxu0 %v4702_v16 }
0x1a2f   : > { %8648 = vmatprep.subr.bf16.mxu0 %v11743_v55 }
0x1a36   : > { %8649 = vmatpush3.bf16.xpose.msra.mxu0 %v4705_v18 }
0x1a37   : > { %8650 = vmatprep.subr.bf16.mxu0 %v11743_v55 }
0x1a3e   : > { %8651 = vmatpush3.bf16.xpose.msra.mxu0 %v4708_v22 }
0x1a3f   : > { %8680 = vmatprep.subr.bf16.mxu0 %v11743_v55 }
0x1a45   : > { %8653 = vmatmul.mubr.msk.bf16.vlgmr.msra.gmra.mrb[100].mxu0 %vm1024_vm2, %v4682_v1 }
0x1a46   : > { %8688 = vmatprep.mubr.msk.bf16.mxu0 %vm9544_vm5, %v11743_v55 }
0x1af8   : > { %v10939_v53 = vpop.f32.mrb[96].mxu0 }
0x1af9   : > { %v8642_v20 = vpop.f32.mrb[97].mxu0 }
0x1afa   : > { %v10941_v8 = vpop.f32.mrb[98].mxu0 }
0x1afb   : > { %v8643_v17 = vpop.f32.mrb[99].mxu0 }
0x1b18   : > { %v4744_v35 = vpop.f32.mrb[100].mxu0 }
0x1b19   : > { %v4751_v15 = vmul.f32 0.35355338, %v4744_v35  ;;  %v8654_v19 = vpop.f32.mrb[101].mxu0 }
0x1b1a   : > { %v4747_v26 = vpop.f32.mrb[102].mxu0 }
0x1b1b   : > { %v4753_v2 = vadd.f32 %v10907_v38, %v4751_v15  ;;  %v4752_v46 = vmul.f32 0.35355338, %v4747_v26  ;;  %v8655_v36 = vpop.f32.mrb[103].mxu0 }
0x1b1d   : > { %v4754_v40 = vadd.f32 %v10907_v38, %v4752_v46  ;;  %v4755_v29 = vsel %vm1636_vm11, %v4753_v2, -inf }
0x1b1e   : > { %4756 = vmax.xlane.f32.xlu0 %v4755_v29 }
0x1b1f   : > { %v4758_v34 = vsel %vm4611_vm6, %v4754_v40, -inf }
0x1b20   : > { %4759 = vmax.xlane.f32.xlu1 %v4758_v34 }
0x1b31   : > { %4782 = vrot.lane.b32.xlu1 %v10885_v57, %s11755_s0 }
0x1b34   : > { %4784 = vrot.lane.b32.xlu0 %v10883_v23, %s11755_s0 }
0x1b35   : > { %4786 = vrot.lane.b32.xlu1 %v10896_v37, %s11755_s0 }
0x1b39   : > { %4788 = vrot.lane.b32.xlu1 %v10893_v5, %s11755_s0 }
0x1b3d   : > { %4842 = vrot.lane.b32.xlu1 %v10859_v42, %s11747_s4 }
0x1b41   : > { %4846 = vrot.lane.b32.xlu1 %v10866_v3, %s11747_s4 }
0x1bab   : > { %v4757_v45 = vpop.xlane.xlu0 %4756 }
0x1bac   : > { %v4761_v11 = vsub.f32 %v4753_v2, %v4757_v45 }
0x1bad   : > { %v4760_v59 = vpop.xlane.xlu1 %4759 }
0x1bae   : > { %v4763_v31 = vmul.f32 1.442695, %v4761_v11  ;;  %v4762_v21 = vsub.f32 %v4754_v40, %v4760_v59 }
0x1baf   : > { %v4785_v14 = vpop.permute.xlu0 %4784 }
0x1bb0   : > { %9403 = vpow2.f32 %v4763_v31  ;;  %v4765_v52 = vmul.f32 1.442695, %v4762_v21 }
0x1bb1   : > { %v4783_v0 = vpop.permute.xlu1 %4782 }
0x1bb2   : > { %9405 = vpow2.f32 %v4765_v52  ;;  %8657 = vmatpush3.bf16.msra.mxu1 %v4783_v0 }
0x1bb3   : > { %8658 = vmatprep.subr.bf16.mxu1 %v11743_v55 }
0x1bb5   : > { %v4787_v50 = vpop.permute.xlu1 %4786 }
0x1bb6   : > { %8659 = vmatpush3.bf16.msra.mxu1 %v4785_v14 }
0x1bb7   : > { %8660 = vmatprep.subr.bf16.mxu1 %v11743_v55 }
0x1bb9   : > { %v4789_v32 = vpop.permute.xlu1 %4788 }
0x1bba   : > { %v9404_v27 = vpop.eup %9403  ;;  %8661 = vmatpush3.bf16.msra.mxu1 %v4787_v50 }
0x1bbb   : > { %v4767_v25 = vsel %vm1636_vm11, %v9404_v27, 0.0  ;;  %8662 = vmatprep.subr.bf16.mxu1 %v11743_v55 }
0x1bbc   : > { %v9406_v39 = vpop.eup %9405  ;;  %4768 = vadd.xlane.f32.xlu0 %v4767_v25 }
0x1bbd   : > { %v4770_v41 = vsel %vm4611_vm6, %v9406_v39, 0.0  ;;  %v4843_v43 = vpop.permute.xlu1 %4842 }
0x1bbe   : > { %8663 = vmatpush3.bf16.msra.mxu1 %v4789_v32  ;;  %v4855_v18 = vsel %vm1024_vm2, %v4843_v43, 0 }
0x1bbf   : > { %8668 = vmatprep.subr.bf16.mxu1 %v11743_v55 }
0x1bc0   : > { %4771 = vadd.xlane.f32.xlu0 %v4770_v41 }
0x1bc1   : > { %v4847_v1 = vpop.permute.xlu1 %4846 }
0x1bc2   : > { %v4861_v20 = vsel %vm1024_vm2, %v4847_v1, 0 }
0x1bd6   : > { %4840 = vrot.lane.b32.xlu0 %v10861_v56, %s11747_s4 }
0x1bda   : > { %4844 = vrot.lane.b32.xlu0 %v10868_v61, %s11747_s4 }
0x1bde   : > { %4838 = vrot.lane.b32.xlu0 %v10875_v9, %s11747_s4 }
0x1c49   : > { %v4769_v62 = vpop.xlane.xlu0 %4768 }
0x1c4a   : > { %9407 = vrcp.f32 %v4769_v62 }
0x1c4d   : > { %v4772_v28 = vpop.xlane.xlu0 %4771 }
0x1c4e   : > { %9409 = vrcp.f32 %v4772_v28 }
0x1c51   : > { %v4841_v30 = vpop.permute.xlu0 %4840 }
0x1c52   : > { %v4852_v16 = vsel %vm1024_vm2, %v4841_v30, 0 }
0x1c54   : > { %v9408_v58 = vpop.eup %9407 }
0x1c55   : > { %v4775_v6 = vmul.f32 %v9408_v58, %v9404_v27  ;;  %v4845_v60 = vpop.permute.xlu0 %4844 }
0x1c56   : > { %v4858_v22 = vsel %vm1024_vm2, %v4845_v60, 0 }
0x1c58   : > { %v9410_v33 = vpop.eup %9409 }
0x1c59   : > { %v4776_v51 = vmul.f32 %v9410_v33, %v9406_v39  ;;  %v4839_v17 = vpop.permute.xlu0 %4838 }
0x1c5b   : > { %v4777_v24 = vpack.c.bf16 %v4776_v51, %v4775_v6 }
0x1c5d   : > { %8665 = vmatmul.mubr.msk.bf16.vlgmr.msra.gmra.mrb[96].mxu1 %vm1636_vm11, %v4777_v24 }
0x1c5e   : > { %8669 = vmatpush3.bf16.xpose.msra.mxu1 %v4852_v16  ;;  %8676 = vmatprep.mubr.msk.bf16.mxu1 %vm9544_vm5, %v11743_v55 }
0x1c5f   : > { %8670 = vmatprep.subr.bf16.mxu1 %v11743_v55 }
0x1c66   : > { %8671 = vmatpush3.bf16.xpose.msra.mxu1 %v4855_v18 }
0x1c67   : > { %8672 = vmatprep.subr.bf16.mxu1 %v11743_v55 }
0x1c6e   : > { %8673 = vmatpush3.bf16.xpose.msra.mxu1 %v4858_v22 }
0x1c6f   : > { %8674 = vmatprep.subr.bf16.mxu1 %v11743_v55 }
0x1c76   : > { %8675 = vmatpush3.bf16.xpose.msra.mxu1 %v4861_v20 }
0x1c77   : > { %8704 = vmatprep.subr.bf16.mxu1 %v11743_v55 }
0x1c7d   : > { %8677 = vmatmul.mubr.msk.bf16.vlgmr.msra.gmra.mrb[100].mxu1 %vm1024_vm2, %v4839_v17 }
0x1c7e   : > { %8712 = vmatprep.mubr.msk.bf16.mxu1 %vm9544_vm5, %v11743_v55 }
0x1d30   : > { %v10985_v35 = vpop.f32.mrb[96].mxu1 }
0x1d31   : > { %v8666_v15 = vpop.f32.mrb[97].mxu1 }
0x1d32   : > { %v10987_v19 = vpop.f32.mrb[98].mxu1 }
0x1d33   : > { %v9106_v26 = vpack.i.bf16 %v10987_v19, %v10985_v35  ;;  %v8667_v2 = vpop.f32.mrb[99].mxu1  ;;  %v9173_v19 = vld [vmem:[%s11677_s16 + $0x20] sm:$0xff]  }
0x1d50   : > { %v4897_v46 = vpop.f32.mrb[100].mxu1 }
0x1d51   : > { %v4904_v36 = vmul.f32 0.35355338, %v4897_v46  ;;  %v8678_v40 = vpop.f32.mrb[101].mxu1 }
0x1d52   : > { %v4900_v29 = vpop.f32.mrb[102].mxu1 }
0x1d53   : > { %v4906_v34 = vadd.f32 %v10907_v38, %v4904_v36  ;;  %v4905_v45 = vmul.f32 0.35355338, %v4900_v29  ;;  %v8679_v11 = vpop.f32.mrb[103].mxu1 }
0x1d55   : > { %v4907_v59 = vadd.f32 %v10907_v38, %v4905_v45  ;;  %v4908_v31 = vsel %vm1636_vm11, %v4906_v34, -inf }
0x1d56   : > { %4909 = vmax.xlane.f32.xlu1 %v4908_v31 }
0x1d57   : > { %v4911_v21 = vsel %vm4611_vm6, %v4907_v59, -inf }
0x1d58   : > { %4912 = vmax.xlane.f32.xlu0 %v4911_v21 }
0x1d67   : > { %4933 = vrot.lane.b32.xlu1 %v10883_v23, %s11747_s4 }
0x1d6b   : > { %4935 = vrot.lane.b32.xlu1 %v10896_v37, %s11747_s4 }
0x1d6e   : > { %4931 = vrot.lane.b32.xlu0 %v10885_v57, %s11747_s4 }
0x1de3   : > { %v4910_v52 = vpop.xlane.xlu1 %4909 }
0x1de4   : > { %v4914_v0 = vsub.f32 %v4906_v34, %v4910_v52 }
0x1de5   : > { %v4913_v14 = vpop.xlane.xlu0 %4912 }
0x1de6   : > { %v4916_v50 = vmul.f32 1.442695, %v4914_v0  ;;  %v4915_v27 = vsub.f32 %v4907_v59, %v4913_v14 }
0x1de7   : > { %v4934_v32 = vpop.permute.xlu1 %4933 }
0x1de8   : > { %9411 = vpow2.f32 %v4916_v50  ;;  %v4918_v25 = vmul.f32 1.442695, %v4915_v27 }
0x1de9   : > { %v4932_v39 = vpop.permute.xlu0 %4931 }
0x1dea   : > { %9413 = vpow2.f32 %v4918_v25  ;;  %8681 = vmatpush3.bf16.msra.mxu0 %v4932_v39 }
0x1deb   : > { %8682 = vmatprep.subr.bf16.mxu0 %v11743_v55  ;;  %v4936_v41 = vpop.permute.xlu1 %4935 }
0x1dee   : > { %8683 = vmatpush3.bf16.msra.mxu0 %v4934_v32 }
0x1def   : > { %8684 = vmatprep.subr.bf16.mxu0 %v11743_v55 }
0x1df2   : > { %v9412_v62 = vpop.eup %9411  ;;  %8685 = vmatpush3.bf16.msra.mxu0 %v4936_v41 }
0x1df3   : > { %v4920_v28 = vsel %vm1636_vm11, %v9412_v62, 0.0  ;;  %8686 = vmatprep.subr.bf16.mxu0 %v11743_v55 }
0x1df4   : > { %v9414_v58 = vpop.eup %9413  ;;  %4921 = vadd.xlane.f32.xlu0 %v4920_v28 }
0x1df5   : > { %v4923_v33 = vsel %vm4611_vm6, %v9414_v58, 0.0 }
0x1df6   : > { %4924 = vadd.xlane.f32.xlu1 %v4923_v33 }
0x1e07   : > { %4989 = vrot.lane.b32.xlu1 %v10861_v56, %s11749_s2 }
0x1e0a   : > { %4937 = vrot.lane.b32.xlu0 %v10893_v5, %s11747_s4 }
0x1e0b   : > { %4993 = vrot.lane.b32.xlu1 %v10868_v61, %s11749_s2 }
0x1e0e   : > { %4991 = vrot.lane.b32.xlu0 %v10859_v42, %s11749_s2 }
0x1e0f   : > { %4987 = vrot.lane.b32.xlu1 %v10875_v9, %s11749_s2 }
0x1e12   : > { %4995 = vrot.lane.b32.xlu0 %v10866_v3, %s11749_s2 }
0x1e81   : > { %v4922_v6 = vpop.xlane.xlu0 %4921 }
0x1e82   : > { %9415 = vrcp.f32 %v4922_v6 }
0x1e83   : > { %v4925_v51 = vpop.xlane.xlu1 %4924 }
0x1e84   : > { %9417 = vrcp.f32 %v4925_v51 }
0x1e85   : > { %v4938_v56 = vpop.permute.xlu0 %4937 }
0x1e86   : > { %8687 = vmatpush3.bf16.msra.mxu0 %v4938_v56 }
0x1e87   : > { %8692 = vmatprep.subr.bf16.mxu0 %v11743_v55  ;;  %v4990_v43 = vpop.permute.xlu1 %4989 }
0x1e88   : > { %v5001_v18 = vsel %vm1024_vm2, %v4990_v43, 0 }
0x1e89   : > { %v4992_v3 = vpop.permute.xlu0 %4991 }
0x1e8a   : > { %v5004_v9 = vsel %vm1024_vm2, %v4992_v3, 0 }
0x1e8b   : > { %v4994_v60 = vpop.permute.xlu1 %4993 }
0x1e8c   : > { %v9416_v30 = vpop.eup %9415  ;;  %v5007_v22 = vsel %vm1024_vm2, %v4994_v60, 0 }
0x1e8d   : > { %v4928_v61 = vmul.f32 %v9416_v30, %v9412_v62  ;;  %v4996_v1 = vpop.permute.xlu0 %4995 }
0x1e8e   : > { %v9418_v24 = vpop.eup %9417  ;;  %v5010_v20 = vsel %vm1024_vm2, %v4996_v1, 0 }
0x1e8f   : > { %v4929_v16 = vmul.f32 %v9418_v24, %v9414_v58  ;;  %v4988_v17 = vpop.permute.xlu1 %4987 }
0x1e91   : > { %v4930_v42 = vpack.c.bf16 %v4929_v16, %v4928_v61 }
0x1e93   : > { %8689 = vmatmul.mubr.msk.bf16.vlgmr.msra.gmra.mrb[104].mxu0 %vm1636_vm11, %v4930_v42 }
0x1e94   : > { %8693 = vmatpush3.bf16.xpose.msra.mxu0 %v5001_v18  ;;  %8700 = vmatprep.mubr.msk.bf16.mxu0 %vm9544_vm5, %v11743_v55 }
0x1e95   : > { %8694 = vmatprep.subr.bf16.mxu0 %v11743_v55 }
0x1e9c   : > { %8695 = vmatpush3.bf16.xpose.msra.mxu0 %v5004_v9 }
0x1e9d   : > { %8696 = vmatprep.subr.bf16.mxu0 %v11743_v55 }
0x1ea4   : > { %8697 = vmatpush3.bf16.xpose.msra.mxu0 %v5007_v22 }
0x1ea5   : > { %8698 = vmatprep.subr.bf16.mxu0 %v11743_v55 }
0x1eac   : > { %8699 = vmatpush3.bf16.xpose.msra.mxu0 %v5010_v20 }
0x1ead   : > { %8724 = vmatprep.subr.bf16.mxu0 %v11743_v55 }
0x1eb3   : > { %8701 = vmatmul.mubr.msk.bf16.vlgmr.msra.gmra.mrb[108].mxu0 %vm1024_vm2, %v4988_v17 }
0x1eb4   : > { %8728 = vmatprep.mubr.msk.bf16.mxu0 %vm9544_vm5, %v11743_v55 }
0x1f66   : > { %v4980_v15 = vpop.f32.mrb[104].mxu0 }
0x1f67   : > { %v8690_v2 = vpop.f32.mrb[105].mxu0 }
0x1f68   : > { %v4983_v46 = vpop.f32.mrb[106].mxu0 }
0x1f69   : > { %v9111_v36 = vpack.i.bf16 %v4983_v46, %v4980_v15  ;;  %v8691_v40 = vpop.f32.mrb[107].mxu0 }
0x1f86   : > { %v5046_v29 = vpop.f32.mrb[108].mxu0 }
0x1f87   : > { %v5053_v34 = vmul.f32 0.35355338, %v5046_v29  ;;  %v8702_v45 = vpop.f32.mrb[109].mxu0 }
0x1f88   : > { %v5049_v11 = vpop.f32.mrb[110].mxu0 }
0x1f89   : > { %v5055_v59 = vadd.f32 %v10907_v38, %v5053_v34  ;;  %v5054_v31 = vmul.f32 0.35355338, %v5049_v11  ;;  %v8703_v21 = vpop.f32.mrb[111].mxu0 }
0x1f8b   : > { %v5056_v52 = vadd.f32 %v10907_v38, %v5054_v31  ;;  %v5057_v0 = vsel %vm1636_vm11, %v5055_v59, -inf }
0x1f8c   : > { %5058 = vmax.xlane.f32.xlu0 %v5057_v0 }
0x1f8d   : > { %v5060_v14 = vsel %vm4611_vm6, %v5056_v52, -inf }
0x1f8e   : > { %5061 = vmax.xlane.f32.xlu1 %v5060_v14 }
0x1f9f   : > { %5080 = vrot.lane.b32.xlu1 %v10885_v57, %s11749_s2 }
0x1fa3   : > { %5084 = vrot.lane.b32.xlu1 %v10896_v37, %s11749_s2 }
0x1fa7   : > { %5086 = vrot.lane.b32.xlu1 %v10893_v5, %s11749_s2 }
0x1fab   : > { %9112 = vrot.lane.b32.xlu1 %v9111_v36, %s11752_s8 }
0x2019   : > { %v5059_v50 = vpop.xlane.xlu0 %5058 }
0x201a   : > { %v5063_v27 = vsub.f32 %v5055_v59, %v5059_v50 }
0x201b   : > { %v5062_v38 = vpop.xlane.xlu1 %5061 }
0x201c   : > { %v5065_v25 = vmul.f32 1.442695, %v5063_v27  ;;  %v5064_v39 = vsub.f32 %v5056_v52, %v5062_v38 }
0x201e   : > { %9419 = vpow2.f32 %v5065_v25  ;;  %v5067_v32 = vmul.f32 1.442695, %v5064_v39 }
0x201f   : > { %v5081_v41 = vpop.permute.xlu1 %5080 }
0x2020   : > { %9421 = vpow2.f32 %v5067_v32  ;;  %8705 = vmatpush3.bf16.msra.mxu1 %v5081_v41 }
0x2021   : > { %8706 = vmatprep.subr.bf16.mxu1 %v11743_v55 }
0x2023   : > { %v5085_v6 = vpop.permute.xlu1 %5084 }
0x2028   : > { %v9420_v57 = vpop.eup %9419 }
0x2029   : > { %v5069_v37 = vsel %vm1636_vm11, %v9420_v57, 0.0 }
0x202a   : > { %v9422_v62 = vpop.eup %9421  ;;  %5070 = vadd.xlane.f32.xlu0 %v5069_v37 }
0x202b   : > { %v5072_v5 = vsel %vm4611_vm6, %v9422_v62, 0.0 }
0x202e   : > { %5073 = vadd.xlane.f32.xlu0 %v5072_v5 }
0x2044   : > { %5082 = vrot.lane.b32.xlu0 %v10883_v23, %s11749_s2  ;;  %v5087_v23 = vpop.permute.xlu1 %5086 }
0x2048   : > { %9107 = vrot.lane.b32.xlu0 %v9106_v26, %s11751_s9  ;;  %v9174_v26 = vld [vmem:[%s11677_s16 + $0x28] sm:$0xff]   ;;  %v9113_v22 = vpop.permute.xlu1 %9112 }
0x2049   : > { %v9115_v17 = vunpack.i.h.bf16 %v9113_v22  ;;  %v9114_v15 = vunpack.i.l.bf16 %v9113_v22 }
0x20b7   : > { %v5071_v28 = vpop.xlane.xlu0 %5070 }
0x20b8   : > { %9423 = vrcp.f32 %v5071_v28 }
0x20bb   : > { %v5074_v58 = vpop.xlane.xlu0 %5073 }
0x20bc   : > { %9425 = vrcp.f32 %v5074_v58  ;;  %v9176_v58 = vld [vmem:[%s11679_s18 + $0x18] sm:$0xff]  }
0x20bf   : > { %v5083_v33 = vpop.permute.xlu0 %5082 }
0x20c0   : > { %8707 = vmatpush3.bf16.msra.mxu1 %v5083_v33  ;;  %v9177_v33 = vld [vmem:[%s11681_s20 + $0x20] sm:$0xff]  }
0x20c1   : > { %8708 = vmatprep.subr.bf16.mxu1 %v11743_v55 }
0x20c2   : > { %v9424_v51 = vpop.eup %9423 }
0x20c3   : > { %v5077_v30 = vmul.f32 %v9424_v51, %v9420_v57  ;;  %v9108_v3 = vpop.permute.xlu0 %9107 }
0x20c4   : > { %8709 = vmatpush3.bf16.msra.mxu1 %v5085_v6  ;;  %v9110_v9 = vunpack.i.h.bf16 %v9108_v3  ;;  %v9109_v60 = vunpack.i.l.bf16 %v9108_v3  ;;  %v9178_v6 = vld [vmem:[%s11681_s20 + $0x28] sm:$0xff]  }
0x20c5   : > { %8710 = vmatprep.subr.bf16.mxu1 %v11743_v55 }
0x20c6   : > { %v9426_v56 = vpop.eup %9425  ;;  %v5161_v1 = vsel %vm1024_vm2, %v10941_v8, %v9110_v9  ;;  %v5160_v20 = vsel %vm1024_vm2, %v10939_v53, %v9109_v60  ;;  %v7838_v53 = vld [vmem:[%s11678_s17 + $0x2] ss:$0 sm:$0xff] }
0x20c7   : > { %v5078_v24 = vmul.f32 %v9426_v56, %v9422_v62  ;;  %v5162_v40 = vsel %vm2824_vm12, %v5160_v20, %v9114_v15  ;;  %v5163_v29 = vsel %vm2824_vm12, %v5161_v1, %v9115_v17  ;;  %v9179_v1 = vld [vmem:[%s11681_s20 + $0x30] sm:$0xff]   ;;  %v9180_v20 = vld [vmem:[%s11681_s20 + $0x38] sm:$0xff]   ;;  %v7849_v17 = vld [vmem:[%s11680_s19 + $0x1] ss:$0 sm:$0xff] }
0x20c8   : > { %8711 = vmatpush3.bf16.msra.mxu1 %v5087_v23 }
0x20c9   : > { %v5079_v35 = vpack.c.bf16 %v5078_v24, %v5077_v30  ;;  %8716 = vmatprep.subr.bf16.mxu1 %v11743_v55 }
0x20cb   : > { %8713 = vmatmul.mubr.msk.bf16.vlgmr.msra.gmra.mrb[104].mxu1 %vm1636_vm11, %v5079_v35 }
0x20cc   : > { %8720 = vmatprep.mubr.msk.bf16.mxu1 %vm9544_vm5, %v11743_v55  ;;  %8717 = vmatpush3.bf16.msra.mxu1 %v9173_v19 }
0x20cd   : > { %8718 = vmatprep.subr.bf16.mxu1 %v11743_v55 }
0x20d0   : > { %8719 = vmatpush3.bf16.msra.mxu1 %v9174_v26  ;;  %v7842_v26 = vld [vmem:[%s11683_s22 + $0x3] ss:$0 sm:$0xff] }
0x20d1   : > { %8732 = vmatprep.subr.bf16.mxu1 %v11743_v55 }
0x219e   : > { %v5129_v61 = vpop.f32.mrb[104].mxu1 }
0x219f   : > { %v8714_v16 = vpop.f32.mrb[105].mxu1 }
0x21a0   : > { %v5132_v43 = vpop.f32.mrb[106].mxu1 }
0x21a1   : > { %v9116_v42 = vpack.i.bf16 %v5132_v43, %v5129_v61  ;;  %v8715_v18 = vpop.f32.mrb[107].mxu1 }
0x21a2   : > { %v7843_v18 = vld [vmem:[%s11684_s23 + $0x3] ss:$0 sm:$0xff] }
0x21a3   : > { %9117 = vrot.lane.b32.xlu0 %v9116_v42, %s11753_s10 }
0x2215   : > { %v9118_v2 = vpop.permute.xlu0 %9117 }
0x2216   : > { %v9120_v46 = vunpack.i.h.bf16 %v9118_v2  ;;  %v9119_v36 = vunpack.i.l.bf16 %v9118_v2 }
0x2218   : > { %v5165_v34 = vsel %vm2833_vm13, %v5163_v29, %v9120_v46  ;;  %v5164_v45 = vsel %vm2833_vm13, %v5162_v40, %v9119_v36 }
0x2219   : > { %v5166_v11 = vpack.c.bf16 %v5165_v34, %v5164_v45 }
0x221b   : > { %8721 = vmatmul.mubr.msk.bf16.vlgmr.msra.gmra.mrb[108].mxu1 %vm1322_vm3, %v5166_v11 }
0x221c   : > { %8740 = vmatprep.mubr.msk.bf16.mxu1 %vm9544_vm5, %v11743_v55  ;;  %8733 = vmatpush3.bf16.msra.mxu1 %v9177_v33 }
0x221d   : > { %8734 = vmatprep.subr.bf16.mxu1 %v11743_v55 }
0x2220   : > { %8735 = vmatpush3.bf16.msra.mxu1 %v9178_v6 }
0x2221   : > { %8736 = vmatprep.subr.bf16.mxu1 %v11743_v55 }
0x2224   : > { %8737 = vmatpush3.bf16.msra.mxu1 %v9179_v1  ;;  %v9184_v1 = vld [vmem:[%s11675_s14 + $0x38] sm:$0xff]  }
0x2225   : > { %8738 = vmatprep.subr.bf16.mxu1 %v11743_v55 }
0x2228   : > { %8739 = vmatpush3.bf16.msra.mxu1 %v9180_v20 }
0x2229   : > { %8760 = vmatprep.subr.bf16.mxu1 %v11743_v55 }
0x22ee   : > { %v5222_v8 = vpop.f32.mrb[108].mxu1 }
0x22ef   : > { %v5223_v59 = vadd.f32 %v7838_v53, %v5222_v8  ;;  %v8722_v31 = vpop.f32.mrb[109].mxu1 }
0x22f0   : > { %v5225_v21 = vpop.f32.mrb[110].mxu1 }
0x22f1   : > { %v5229_v52 = vadd.f32 %v5223_v59, %v10833_v63  ;;  %v5226_v0 = vadd.f32 %v7838_v53, %v5225_v21  ;;  %v8723_v14 = vpop.f32.mrb[111].mxu1  ;;  %v7862_v53 = vld [vmem:[%s11682_s21 + $0x1] ss:$0 sm:$0xff] }
0x22f3   : > { %v5230_v50 = vadd.f32 %v5226_v0, %v10839_v12  ;;  %v5233_v27 = vsel %vm1322_vm3, %v5229_v52, 0.0  ;;  %v9175_v12 = vld [vmem:[%s11679_s18 + $0x10] sm:$0xff]  }
0x22f4   : > { %5234 = vadd.xlane.f32.xlu1 %v5233_v27  ;;  %8725 = vmatpush3.bf16.msra.mxu0 %v9175_v12  ;;  %v9181_v12 = vld [vmem:[%s11673_s12 + $0x30] sm:$0xff]  }
0x22f5   : > { %v5236_v38 = vsel %vm4232_vm4, %v5230_v50, 0.0  ;;  %8726 = vmatprep.subr.bf16.mxu0 %v11743_v55 }
0x22f6   : > { %5237 = vadd.xlane.f32.xlu0 %v5236_v38 }
0x22f8   : > { %8727 = vmatpush3.bf16.msra.mxu0 %v9176_v58  ;;  %v9182_v58 = vld [vmem:[%s11673_s12 + $0x38] sm:$0xff]  }
0x22f9   : > { %8744 = vmatprep.subr.bf16.mxu0 %v11743_v55 }
0x2381   : > { %v5235_v25 = vpop.xlane.xlu1 %5234 }
0x2382   : > { %v5239_v39 = vmul.f32 0.03125, %v5235_v25 }
0x2383   : > { %v5238_v32 = vpop.xlane.xlu0 %5237 }
0x2384   : > { %v5241_v41 = vsub.f32 %v5229_v52, %v5239_v39  ;;  %v5240_v57 = vmul.f32 0.03125, %v5238_v32 }
0x2386   : > { %v5242_v37 = vsub.f32 %v5230_v50, %v5240_v57  ;;  %v5243_v62 = vmul.f32 %v5241_v41, %v5241_v41 }
0x2388   : > { %v5245_v5 = vsel %vm1322_vm3, %v5243_v62, 0.0  ;;  %v5244_v63 = vmul.f32 %v5242_v37, %v5242_v37 }
0x2389   : > { %5246 = vadd.xlane.f32.xlu0 %v5245_v5 }
0x238a   : > { %v5248_v28 = vsel %vm4232_vm4, %v5244_v63, 0.0 }
0x238b   : > { %5249 = vadd.xlane.f32.xlu1 %v5248_v28 }
0x2416   : > { %v5247_v51 = vpop.xlane.xlu0 %5246 }
0x2417   : > { %v5251_v56 = vmul.f32 0.03125, %v5247_v51 }
0x2418   : > { %v5250_v23 = vpop.xlane.xlu1 %5249 }
0x2419   : > { %v5253_v30 = vadd.f32 1e-05, %v5251_v56  ;;  %v5252_v24 = vmul.f32 0.03125, %v5250_v23 }
0x241b   : > { %9427 = vrsqrt.f32 %v5253_v30  ;;  %v5254_v35 = vadd.f32 1e-05, %v5252_v24 }
0x241d   : > { %9429 = vrsqrt.f32 %v5254_v35  ;;  %v7868_v35 = vld [vmem:[%s11683_s22 + $0x4] ss:$0 sm:$0xff] }
0x2425   : > { %v9428_v19 = vpop.eup %9427 }
0x2426   : > { %v5257_v61 = vmul.f32 %v9428_v19, %v5241_v41 }
0x2427   : > { %v9430_v16 = vpop.eup %9429 }
0x2428   : > { %v5263_v43 = vmul.f32 %v7842_v26, %v5257_v61  ;;  %v5258_v42 = vmul.f32 %v9430_v16, %v5242_v37  ;;  %v7869_v61 = vld [vmem:[%s11684_s23 + $0x4] ss:$0 sm:$0xff] }
0x242a   : > { %v5264_v3 = vmul.f32 %v7842_v26, %v5258_v42  ;;  %v5269_v9 = vadd.f32 %v7843_v18, %v5263_v43 }
0x242c   : > { %v5270_v60 = vadd.f32 %v7843_v18, %v5264_v3 }
0x242e   : > { %v5276_v22 = vpack.c.bf16 %v5270_v60, %v5269_v9 }
0x2430   : > { %8729 = vmatmul.mubr.msk.bf16.vlgmr.msra.gmra.mrb[112].mxu0 %vm1322_vm3, %v5276_v22 }
0x2431   : > { %8748 = vmatprep.mubr.msk.bf16.mxu0 %vm9544_vm5, %v11743_v55  ;;  %8745 = vmatpush3.bf16.msra.mxu0 %v9181_v12 }
0x2432   : > { %8746 = vmatprep.subr.bf16.mxu0 %v11743_v55 }
0x2435   : > { %8747 = vmatpush3.bf16.msra.mxu0 %v9182_v58  ;;  %v9529_v58 = vld [vmem:[%s10571_s30] ss:$0 sm:$0xff]  ;;  %s11758_s30 = sld [smem:[#allocation16_spill]] }
0x2436   : > { %8752 = vmatprep.subr.bf16.mxu0 %v11743_v55 }
0x2503   : > { %v5334_v15 = vpop.f32.mrb[112].mxu0 }
0x2504   : > { %v5335_v2 = vadd.f32 %v7849_v17, %v5334_v15  ;;  %v8730_v46 = vpop.f32.mrb[113].mxu0 }
0x2505   : > { %v5337_v36 = vpop.f32.mrb[114].mxu0 }
0x2506   : > { %v5338_v40 = vadd.f32 %v7849_v17, %v5337_v36  ;;  %v8731_v29 = vpop.f32.mrb[115].mxu0  ;;  %v5341_v34 = vmax.f32 %v5335_v2, 0.0  ;;  %v7875_v17 = vld [vmem:[%s11674_s13 + $0x3] ss:$0 sm:$0xff] }
0x2508   : > { %v5342_v45 = vmax.f32 %v5338_v40, 0.0 }
0x250a   : > { %v5352_v11 = vpack.c.bf16 %v5342_v45, %v5341_v34  ;;  %v7884_v45 = vld [vmem:[%s11676_s15 + $0x3] ss:$0 sm:$0xff] }
0x250c   : > { %8741 = vmatmul.mubr.msk.bf16.vlgmr.msra.gmra.mrb[112].mxu1 %vm1636_vm11, %v5352_v11 }
0x250d   : > { %8762 = vmatprep.mubr.msk.bf16.mxu1 %vm9544_vm5, %v11743_v55 }
0x25df   : > { %v5422_v8 = vpop.f32.mrb[112].mxu1 }
0x25e0   : > { %v5423_v59 = vadd.f32 %v7862_v53, %v5422_v8  ;;  %v8742_v31 = vpop.f32.mrb[113].mxu1 }
0x25e1   : > { %v5425_v21 = vpop.f32.mrb[114].mxu1 }
0x25e2   : > { %v5429_v52 = vadd.f32 %v5423_v59, %v5269_v9  ;;  %v5426_v0 = vadd.f32 %v7862_v53, %v5425_v21  ;;  %v8743_v14 = vpop.f32.mrb[115].mxu1 }
0x25e4   : > { %v5430_v50 = vadd.f32 %v5426_v0, %v5270_v60  ;;  %v5433_v27 = vsel %vm1322_vm3, %v5429_v52, 0.0  ;;  %v9183_v60 = vld [vmem:[%s11675_s14 + $0x30] sm:$0xff]  }
0x25e5   : > { %5434 = vadd.xlane.f32.xlu0 %v5433_v27 }
0x25e6   : > { %v5436_v38 = vsel %vm4232_vm4, %v5430_v50, 0.0 }
0x25e7   : > { %5437 = vadd.xlane.f32.xlu1 %v5436_v38 }
0x2672   : > { %v5435_v25 = vpop.xlane.xlu0 %5434 }
0x2673   : > { %v5439_v39 = vmul.f32 0.03125, %v5435_v25 }
0x2674   : > { %v5438_v32 = vpop.xlane.xlu1 %5437 }
0x2675   : > { %v5441_v41 = vsub.f32 %v5429_v52, %v5439_v39  ;;  %v5440_v57 = vmul.f32 0.03125, %v5438_v32 }
0x2677   : > { %v5442_v37 = vsub.f32 %v5430_v50, %v5440_v57  ;;  %v5443_v62 = vmul.f32 %v5441_v41, %v5441_v41 }
0x2679   : > { %v5445_v5 = vsel %vm1322_vm3, %v5443_v62, 0.0  ;;  %v5444_v63 = vmul.f32 %v5442_v37, %v5442_v37 }
0x267a   : > { %5446 = vadd.xlane.f32.xlu0 %v5445_v5 }
0x267b   : > { %v5448_v28 = vsel %vm4232_vm4, %v5444_v63, 0.0 }
0x267c   : > { %5449 = vadd.xlane.f32.xlu1 %v5448_v28 }
0x2707   : > { %v5447_v33 = vpop.xlane.xlu0 %5446 }
0x2708   : > { %v5451_v6 = vmul.f32 0.03125, %v5447_v33 }
0x2709   : > { %v5450_v51 = vpop.xlane.xlu1 %5449 }
0x270a   : > { %v5453_v56 = vadd.f32 1e-05, %v5451_v6  ;;  %v5452_v23 = vmul.f32 0.03125, %v5450_v51 }
0x270c   : > { %9431 = vrsqrt.f32 %v5453_v56  ;;  %v5454_v30 = vadd.f32 1e-05, %v5452_v23 }
0x270e   : > { %9433 = vrsqrt.f32 %v5454_v30 }
0x2716   : > { %v9432_v24 = vpop.eup %9431 }
0x2717   : > { %v5457_v19 = vmul.f32 %v9432_v24, %v5441_v41 }
0x2718   : > { %v9434_v26 = vpop.eup %9433 }
0x2719   : > { %v5463_v16 = vmul.f32 %v7868_v35, %v5457_v19  ;;  %v5458_v43 = vmul.f32 %v9434_v26, %v5442_v37 }
0x271b   : > { %v11148_v42 = vadd.f32 %v7869_v61, %v5463_v16  ;;  %v5464_v18 = vmul.f32 %v7868_v35, %v5458_v43 }
0x271d   : > { %v11150_v3 = vadd.f32 %v7869_v61, %v5464_v18  ;;  %v5471_v9 = vadd.f32 %v11148_v42, %v10473_v48 }
0x271f   : > { %v5478_v22 = vpack.c.bf16 %v11150_v3, %v5471_v9  ;;  %v5548_v20 = vpack.c.bf16 %v11150_v3, %v11148_v42 }
0x2721   : > { %8749 = vmatmul.mubr.msk.bf16.vlgmr.msra.gmra.mrb[116].mxu0 %vm1322_vm3, %v5478_v22 }
0x2722   : > { %8753 = vmatpush3.bf16.msra.mxu0 %v9183_v60  ;;  %8756 = vmatprep.mubr.msk.bf16.mxu0 %vm9544_vm5, %v11743_v55 }
0x2723   : > { %8754 = vmatprep.subr.bf16.mxu0 %v11743_v55 }
0x2726   : > { %8755 = vmatpush3.bf16.msra.mxu0 %v9184_v1 }
0x2727   : > { %8766 = vmatprep.subr.bf16.mxu0 %v11743_v55 }
0x2729   : > { %8757 = vmatmul.mubr.msk.bf16.vlgmr.msra.gmra.mrb[120].mxu0 %vm1322_vm3, %v5548_v20 }
0x272a   : > { %8768 = vmatprep.mubr.msk.bf16.mxu0 %vm9544_vm5, %v11743_v55 }
0x27f4   : > { %v5536_v15 = vpop.f32.mrb[116].mxu0 }
0x27f5   : > { %v8750_v2 = vpop.f32.mrb[117].mxu0  ;;  %v5537_v36 = vadd.f32 %v7875_v17, %v5536_v15 }
0x27f6   : > { %v5539_v46 = vpop.f32.mrb[118].mxu0 }
0x27f7   : > { %v5540_v40 = vadd.f32 %v7875_v17, %v5539_v46  ;;  %v8751_v29 = vpop.f32.mrb[119].mxu0 }
0x27f9   : > { %v5620_v34 = vpack.c.bf16 %v5540_v40, %v5537_v36 }
0x27fb   : > { %5748 = vrot.lane.b32.xlu1 %v5620_v34, %s11756_s24  ;;  %5622 = vrot.lane.b32.xlu0 %v5620_v34, %s11754_s11  ;;  %s7986_s24 = sshll.u32 %s11757_s27, 4 }
0x27fc   : > { %v5606_v11 = vpop.f32.mrb[120].mxu0 }
0x27fd   : > { %v8758_v53 = vpop.f32.mrb[121].mxu0  ;;  %v5607_v59 = vadd.f32 %v7884_v45, %v5606_v11 }
0x27fe   : > { %v5609_v8 = vpop.f32.mrb[122].mxu0 }
0x27ff   : > { %v5610_v31 = vadd.f32 %v7884_v45, %v5609_v8  ;;  %5746 = vrot.lane.b32.xlu1 %v5620_v34, %s11755_s0  ;;  %5876 = vrot.lane.b32.xlu0 %v5620_v34, %s11746_s6  ;;  %v8759_v21 = vpop.f32.mrb[123].mxu0 }
0x2801   : > { %v11181_v52 = vpack.c.bf16 %v5610_v31, %v5607_v59 }
0x2803   : > { %5874 = vrot.lane.b32.xlu1 %v5620_v34, %s11747_s4  ;;  %6003 = vrot.lane.b32.xlu0 %v5620_v34, %s11748_s7  ;;  %v5703_v0 = vsel %vm3705_vm15, %v11181_v52, 0  ;;  %s11760_s7 = sld [smem:[#allocation17_spill]] }
0x2804   : > { %8767 = vmatpush3.bf16.msra.mxu0 %v5703_v0 }
0x2805   : > { %8778 = vmatprep.subr.bf16.mxu0 %v11743_v55 }
0x2807   : > { %6001 = vrot.lane.b32.xlu1 %v5620_v34, %s11749_s2 }
0x286d   : > { %v5623_v14 = vpop.permute.xlu0 %5622  ;;  %v5749_v27 = vpop.permute.xlu1 %5748 }
0x286e   : > { %v5628_v50 = vsel %vm1024_vm2, %v5623_v14, 0  ;;  %v5754_v38 = vsel %vm1024_vm2, %v5749_v27, 0 }
0x286f   : > { %8761 = vmatpush3.bf16.xpose.msra.mxu1 %v5628_v50 }
0x2870   : > { %8772 = vmatprep.subr.bf16.mxu1 %v11743_v55 }
0x2871   : > { %v5877_v25 = vpop.permute.xlu0 %5876  ;;  %v5747_v39 = vpop.permute.xlu1 %5746 }
0x2872   : > { %v5882_v32 = vsel %vm1024_vm2, %v5877_v25, 0 }
0x2875   : > { %v6004_v41 = vpop.permute.xlu0 %6003  ;;  %v5875_v57 = vpop.permute.xlu1 %5874 }
0x2876   : > { %8763 = vmatmul.mubr.msk.bf16.vlgmr.msra.gmra.mrb[116].mxu1 %vm1024_vm2, %v5620_v34  ;;  %v6009_v37 = vsel %vm1024_vm2, %v6004_v41, 0 }
0x2877   : > { %8773 = vmatpush3.bf16.xpose.msra.mxu1 %v5754_v38  ;;  %8774 = vmatprep.mubr.msk.bf16.mxu1 %vm9544_vm5, %v11743_v55 }
0x2878   : > { %8784 = vmatprep.subr.bf16.mxu1 %v11743_v55 }
0x2879   : > { %v6002_v62 = vpop.permute.xlu1 %6001 }
0x287e   : > { %8775 = vmatmul.mubr.msk.bf16.vlgmr.msra.gmra.mrb[120].mxu1 %vm1024_vm2, %v5747_v39 }
0x287f   : > { %8785 = vmatpush3.bf16.xpose.msra.mxu1 %v5882_v32  ;;  %8786 = vmatprep.mubr.msk.bf16.mxu1 %vm9544_vm5, %v11743_v55 }
0x2880   : > { %8796 = vmatprep.subr.bf16.mxu1 %v11743_v55 }
0x2886   : > { %8787 = vmatmul.mubr.msk.bf16.vlgmr.msra.gmra.mrb[124].mxu1 %vm1024_vm2, %v5875_v57 }
0x2887   : > { %8797 = vmatpush3.bf16.xpose.msra.mxu1 %v6009_v37  ;;  %8798 = vmatprep.mubr.msk.bf16.mxu1 %vm9544_vm5, %v11743_v55 }
0x2888   : > { %8808 = vmatprep.subr.bf16.mxu1 %v11743_v55 }
0x288e   : > { %8799 = vmatmul.mubr.msk.bf16.vlgmr.msra.gmra.mrb[128].mxu1 %vm1024_vm2, %v6002_v62 }
0x288f   : > { %8812 = vmatprep.mubr.msk.bf16.mxu1 %vm9544_vm5, %v11743_v55 }
0x2949   : > { %v5664_v5 = vpop.f32.mrb[116].mxu1 }
0x294a   : > { %v5671_v63 = vmul.f32 0.35355338, %v5664_v5  ;;  %v8764_v28 = vpop.f32.mrb[117].mxu1 }
0x294b   : > { %v5667_v12 = vpop.f32.mrb[118].mxu1 }
0x294c   : > { %v5673_v33 = vadd.f32 %v9529_v58, %v5671_v63  ;;  %v5672_v6 = vmul.f32 0.35355338, %v5667_v12  ;;  %v8765_v51 = vpop.f32.mrb[119].mxu1 }
0x294e   : > { %v5674_v56 = vadd.f32 %v9529_v58, %v5672_v6  ;;  %v5675_v23 = vsel %vm3676_vm0, %v5673_v33, -inf }
0x294f   : > { %5676 = vmax.xlane.f32.xlu0 %v5675_v23 }
0x2950   : > { %v5678_v30 = vsel %vm3680_vm1, %v5674_v56, -inf }
0x2951   : > { %5679 = vmax.xlane.f32.xlu1 %v5678_v30  ;;  %v5790_v24 = vpop.f32.mrb[120].mxu1 }
0x2952   : > { %v5797_v35 = vmul.f32 0.35355338, %v5790_v24  ;;  %v8776_v19 = vpop.f32.mrb[121].mxu1 }
0x2953   : > { %v5793_v26 = vpop.f32.mrb[122].mxu1 }
0x2954   : > { %v11212_v61 = vadd.f32 %v9529_v58, %v5797_v35  ;;  %v5798_v16 = vmul.f32 0.35355338, %v5793_v26  ;;  %v8777_v43 = vpop.f32.mrb[123].mxu1 }
0x2956   : > { %v5800_v18 = vadd.f32 %v9529_v58, %v5798_v16  ;;  %v5801_v9 = vsel %vm3676_vm0, %v11212_v61, -inf }
0x2957   : > { %5802 = vmax.xlane.f32.xlu0 %v5801_v9 }
0x2958   : > { %v5804_v20 = vsel %vm3680_vm1, %v5800_v18, -inf }
0x2959   : > { %v5918_v60 = vpop.f32.mrb[124].mxu1 }
0x295a   : > { %v5925_v22 = vmul.f32 0.35355338, %v5918_v60  ;;  %v8788_v1 = vpop.f32.mrb[125].mxu1 }
0x295b   : > { %5805 = vmax.xlane.f32.xlu0 %v5804_v20  ;;  %v5921_v17 = vpop.f32.mrb[126].mxu1 }
0x295c   : > { %v11217_v15 = vadd.f32 %v9529_v58, %v5925_v22  ;;  %v5926_v2 = vmul.f32 0.35355338, %v5921_v17  ;;  %v8789_v46 = vpop.f32.mrb[127].mxu1 }
0x295e   : > { %v5928_v36 = vadd.f32 %v9529_v58, %v5926_v2  ;;  %v5929_v40 = vsel %vm3676_vm0, %v11217_v15, -inf }
0x295f   : > { %5930 = vmax.xlane.f32.xlu1 %v5929_v40 }
0x2960   : > { %v5932_v29 = vsel %vm3680_vm1, %v5928_v36, -inf }
0x2961   : > { %5933 = vmax.xlane.f32.xlu0 %v5932_v29  ;;  %v6045_v34 = vpop.f32.mrb[128].mxu1 }
0x2962   : > { %v6052_v45 = vmul.f32 0.35355338, %v6045_v34  ;;  %v8800_v11 = vpop.f32.mrb[129].mxu1 }
0x2963   : > { %v6048_v53 = vpop.f32.mrb[130].mxu1 }
0x2964   : > { %v6054_v8 = vadd.f32 %v9529_v58, %v6052_v45  ;;  %v6053_v59 = vmul.f32 0.35355338, %v6048_v53  ;;  %v8801_v31 = vpop.f32.mrb[131].mxu1 }
0x2966   : > { %v6055_v21 = vadd.f32 %v9529_v58, %v6053_v59  ;;  %v6056_v0 = vsel %vm3676_vm0, %v6054_v8, -inf }
0x2967   : > { %6057 = vmax.xlane.f32.xlu1 %v6056_v0 }
0x2968   : > { %v6059_v14 = vsel %vm3680_vm1, %v6055_v21, -inf }
0x2969   : > { %6060 = vmax.xlane.f32.xlu0 %v6059_v14 }
0x29dc   : > { %v5677_v50 = vpop.xlane.xlu0 %5676 }
0x29dd   : > { %v5681_v27 = vsub.f32 %v5673_v33, %v5677_v50 }
0x29de   : > { %v5680_v38 = vpop.xlane.xlu1 %5679 }
0x29df   : > { %v5683_v25 = vmul.f32 1.442695, %v5681_v27  ;;  %v5682_v39 = vsub.f32 %v5674_v56, %v5680_v38 }
0x29e1   : > { %9435 = vpow2.f32 %v5683_v25  ;;  %v5685_v32 = vmul.f32 1.442695, %v5682_v39 }
0x29e3   : > { %9437 = vpow2.f32 %v5685_v32 }
0x29e4   : > { %v5803_v41 = vpop.xlane.xlu0 %5802 }
0x29e5   : > { %v5807_v43 = vsub.f32 %v11212_v61, %v5803_v41 }
0x29e7   : > { %v5809_v9 = vmul.f32 1.442695, %v5807_v43 }
0x29e8   : > { %v5806_v57 = vpop.xlane.xlu0 %5805 }
0x29e9   : > { %v5808_v37 = vsub.f32 %v5800_v18, %v5806_v57 }
0x29eb   : > { %v9436_v62 = vpop.eup %9435  ;;  %v5811_v5 = vmul.f32 1.442695, %v5808_v37 }
0x29ec   : > { %v5687_v63 = vsel %vm3676_vm0, %v9436_v62, 0.0  ;;  %v5931_v18 = vpop.xlane.xlu1 %5930 }
0x29ed   : > { %v9438_v28 = vpop.eup %9437  ;;  %9439 = vpow2.f32 %v5811_v5  ;;  %5688 = vadd.xlane.f32.xlu1 %v5687_v63  ;;  %v5935_v60 = vsub.f32 %v11217_v15, %v5931_v18 }
0x29ee   : > { %v5934_v12 = vpop.xlane.xlu0 %5933  ;;  %v5690_v58 = vsel %vm3680_vm1, %v9438_v28, 0.0 }
0x29ef   : > { %v5936_v33 = vsub.f32 %v5928_v36, %v5934_v12  ;;  %5691 = vadd.xlane.f32.xlu0 %v5690_v58  ;;  %v5937_v1 = vmul.f32 1.442695, %v5935_v60 }
0x29f1   : > { %v5939_v6 = vmul.f32 1.442695, %v5936_v33 }
0x29f3   : > { %9441 = vpow2.f32 %v5939_v6 }
0x29f4   : > { %v6058_v22 = vpop.xlane.xlu1 %6057 }
0x29f5   : > { %v6062_v20 = vsub.f32 %v6054_v8, %v6058_v22  ;;  %v9185_v22 = vld [vmem:[%s11677_s16 + $0x30] sm:$0xff]  }
0x29f6   : > { %v6061_v51 = vpop.xlane.xlu0 %6060  ;;  %8809 = vmatpush3.bf16.msra.mxu1 %v9185_v22  ;;  %v11309_v22 = vld [vmem:[%s11674_s13 + $0x4] ss:$0 sm:$0xff] }
0x29f7   : > { %v9440_v56 = vpop.eup %9439  ;;  %v6063_v23 = vsub.f32 %v6055_v21, %v6061_v51  ;;  %v6064_v17 = vmul.f32 1.442695, %v6062_v20  ;;  %8810 = vmatprep.subr.bf16.mxu1 %v11743_v55 }
0x29f8   : > { %v5816_v30 = vsel %vm3680_vm1, %v9440_v56, 0.0 }
0x29f9   : > { %v6066_v24 = vmul.f32 1.442695, %v6063_v23  ;;  %5817 = vadd.xlane.f32.xlu0 %v5816_v30 }
0x29fb   : > { %9443 = vpow2.f32 %v6066_v24 }
0x29fc   : > { %9445 = vpow2.f32 %v5809_v9 }
0x29fd   : > { %v11227_v35 = vpop.eup %9441  ;;  %9447 = vpow2.f32 %v5937_v1 }
0x29fe   : > { %5825 = vrot.lane.b32.xlu1 %v11181_v52, %s11755_s0  ;;  %v5944_v19 = vsel %vm3680_vm1, %v11227_v35, 0.0  ;;  %9449 = vpow2.f32 %v6064_v17 }
0x29ff   : > { %5945 = vadd.xlane.f32.xlu0 %v5944_v19 }
0x2a05   : > { %v11233_v26 = vpop.eup %9443 }
0x2a06   : > { %v6071_v16 = vsel %vm3680_vm1, %v11233_v26, 0.0  ;;  %v9446_v2 = vpop.eup %9445 }
0x2a07   : > { %6072 = vadd.xlane.f32.xlu0 %v6071_v16  ;;  %v5813_v46 = vsel %vm3676_vm0, %v9446_v2, 0.0  ;;  %v9448_v36 = vpop.eup %9447 }
0x2a08   : > { %v5941_v61 = vsel %vm3676_vm0, %v9448_v36, 0.0  ;;  %v9450_v40 = vpop.eup %9449 }
0x2a09   : > { %v6068_v15 = vsel %vm3676_vm0, %v9450_v40, 0.0 }
0x2a1d   : > { %5952 = vrot.lane.b32.xlu0 %v11181_v52, %s11747_s4 }
0x2a22   : > { %5814 = vadd.xlane.f32.xlu1 %v5813_v46 }
0x2a26   : > { %5942 = vadd.xlane.f32.xlu1 %v5941_v61 }
0x2a2a   : > { %6069 = vadd.xlane.f32.xlu1 %v6068_v15 }
0x2a3b   : > { %6079 = vrot.lane.b32.xlu1 %v11181_v52, %s11749_s2 }
0x2a7a   : > { %v5689_v29 = vpop.xlane.xlu1 %5688 }
0x2a7b   : > { %9451 = vrcp.f32 %v5689_v29 }
0x2a7c   : > { %v5692_v34 = vpop.xlane.xlu0 %5691 }
0x2a7d   : > { %9453 = vrcp.f32 %v5692_v34 }
0x2a7e   : > { %v5826_v59 = vpop.permute.xlu1 %5825 }
0x2a7f   : > { %v5831_v21 = vsel %vm3705_vm15, %v5826_v59, 0 }
0x2a85   : > { %v9452_v45 = vpop.eup %9451 }
0x2a86   : > { %v5695_v53 = vmul.f32 %v9452_v45, %v9436_v62  ;;  %v5818_v52 = vpop.xlane.xlu0 %5817 }
0x2a87   : > { %v9454_v11 = vpop.eup %9453  ;;  %9455 = vrcp.f32 %v5818_v52 }
0x2a88   : > { %v5696_v8 = vmul.f32 %v9454_v11, %v9438_v28 }
0x2a8a   : > { %v5697_v31 = vpack.c.bf16 %v5696_v8, %v5695_v53 }
0x2a8c   : > { %8769 = vmatmul.mubr.msk.bf16.vlgmr.msra.gmra.mrb[124].mxu0 %vm3676_vm0, %v5697_v31  ;;  %v5946_v14 = vpop.xlane.xlu0 %5945 }
0x2a8d   : > { %8779 = vmatpush3.bf16.msra.mxu0 %v5831_v21  ;;  %8780 = vmatprep.mubr.msk.bf16.mxu0 %vm9544_vm5, %v11743_v55 }
0x2a8e   : > { %8790 = vmatprep.subr.bf16.mxu0 %v11743_v55 }
0x2a91   : > { %v9456_v38 = vpop.eup %9455 }
0x2a92   : > { %v5822_v32 = vmul.f32 %v9456_v38, %v9440_v56 }
0x2a94   : > { %v6073_v27 = vpop.xlane.xlu0 %6072 }
0x2a98   : > { %v5953_v57 = vpop.permute.xlu0 %5952 }
0x2a99   : > { %v5958_v5 = vsel %vm3705_vm15, %v5953_v57, 0  ;;  %v7901_v57 = vld [vmem:[%s11678_s17 + $0x3] ss:$0 sm:$0xff] }
0x2aaf   : > { %v5815_v0 = vpop.xlane.xlu1 %5814 }
0x2ab0   : > { %9457 = vrcp.f32 %v5815_v0 }
0x2ab3   : > { %v5943_v50 = vpop.xlane.xlu1 %5942 }
0x2ab4   : > { %9459 = vrcp.f32 %v5943_v50 }
0x2ab5   : > { %9461 = vrcp.f32 %v5946_v14 }
0x2ab7   : > { %v6070_v25 = vpop.xlane.xlu1 %6069 }
0x2ab8   : > { %9463 = vrcp.f32 %v6070_v25 }
0x2ab9   : > { %9465 = vrcp.f32 %v6073_v27 }
0x2aba   : > { %v9458_v39 = vpop.eup %9457 }
0x2abb   : > { %v5821_v41 = vmul.f32 %v9458_v39, %v9446_v2  ;;  %v6080_v58 = vpop.permute.xlu1 %6079  ;;  %v9186_v2 = vld [vmem:[%s11677_s16 + $0x38] sm:$0xff]  }
0x2abc   : > { %v6085_v51 = vsel %vm3705_vm15, %v6080_v58, 0  ;;  %8811 = vmatpush3.bf16.msra.mxu1 %v9186_v2 }
0x2abd   : > { %v5823_v37 = vpack.c.bf16 %v5822_v32, %v5821_v41 }
0x2abe   : > { %v9460_v62 = vpop.eup %9459 }
0x2abf   : > { %8781 = vmatmul.mubr.msk.bf16.vlgmr.msra.gmra.mrb[128].mxu0 %vm3676_vm0, %v5823_v37  ;;  %v9462_v63 = vpop.eup %9461  ;;  %v5949_v28 = vmul.f32 %v9460_v62, %v9448_v36 }
0x2ac0   : > { %8791 = vmatpush3.bf16.msra.mxu0 %v5958_v5  ;;  %8792 = vmatprep.mubr.msk.bf16.mxu0 %vm9544_vm5, %v11743_v55  ;;  %v5950_v12 = vmul.f32 %v9462_v63, %v11227_v35 }
0x2ac1   : > { %8802 = vmatprep.subr.bf16.mxu0 %v11743_v55 }
0x2ac2   : > { %v5951_v33 = vpack.c.bf16 %v5950_v12, %v5949_v28  ;;  %v9464_v6 = vpop.eup %9463 }
0x2ac3   : > { %v9466_v56 = vpop.eup %9465  ;;  %v6076_v23 = vmul.f32 %v9464_v6, %v9450_v40 }
0x2ac4   : > { %v6077_v30 = vmul.f32 %v9466_v56, %v11233_v26 }
0x2ac6   : > { %v6078_v24 = vpack.c.bf16 %v6077_v30, %v6076_v23 }
0x2ac7   : > { %8793 = vmatmul.mubr.msk.bf16.vlgmr.msra.gmra.mrb[132].mxu0 %vm3676_vm0, %v5951_v33 }
0x2ac8   : > { %8803 = vmatpush3.bf16.msra.mxu0 %v6085_v51  ;;  %8804 = vmatprep.mubr.msk.bf16.mxu0 %vm9544_vm5, %v11743_v55 }
0x2ac9   : > { %8816 = vmatprep.subr.bf16.mxu0 %v11743_v55 }
0x2acf   : > { %8805 = vmatmul.mubr.msk.bf16.vlgmr.msra.gmra.mrb[136].mxu0 %vm3676_vm0, %v6078_v24 }
0x2ad0   : > { %8820 = vmatprep.mubr.msk.bf16.mxu0 %vm9544_vm5, %v11743_v55 }
0x2b5f   : > { %v5739_v35 = vpop.f32.mrb[124].mxu0 }
0x2b60   : > { %v8770_v19 = vpop.f32.mrb[125].mxu0 }
0x2b61   : > { %v5742_v16 = vpop.f32.mrb[126].mxu0 }
0x2b62   : > { %v8771_v43 = vpop.f32.mrb[127].mxu0 }
0x2b92   : > { %v5867_v18 = vpop.f32.mrb[128].mxu0 }
0x2b93   : > { %v8782_v9 = vpop.f32.mrb[129].mxu0 }
0x2b94   : > { %v5870_v60 = vpop.f32.mrb[130].mxu0 }
0x2b95   : > { %v9121_v1 = vpack.i.bf16 %v5870_v60, %v5867_v18  ;;  %v8783_v20 = vpop.f32.mrb[131].mxu0  ;;  %v9189_v60 = vld [vmem:[%s11675_s14 + $0x40] sm:$0xff]  }
0x2b97   : > { %9122 = vrot.lane.b32.xlu1 %v9121_v1, %s11751_s9 }
0x2b9a   : > { %v5994_v26 = vpop.f32.mrb[132].mxu0 }
0x2b9b   : > { %v8794_v17 = vpop.f32.mrb[133].mxu0 }
0x2b9c   : > { %v5997_v46 = vpop.f32.mrb[134].mxu0 }
0x2b9d   : > { %v9126_v36 = vpack.i.bf16 %v5997_v46, %v5994_v26  ;;  %v8795_v61 = vpop.f32.mrb[135].mxu0 }
0x2b9f   : > { %9127 = vrot.lane.b32.xlu0 %v9126_v36, %s11752_s8 }
0x2ba2   : > { %v6121_v40 = vpop.f32.mrb[136].mxu0 }
0x2ba3   : > { %v8806_v15 = vpop.f32.mrb[137].mxu0 }
0x2ba4   : > { %v6124_v29 = vpop.f32.mrb[138].mxu0 }
0x2ba5   : > { %v9131_v34 = vpack.i.bf16 %v6124_v29, %v6121_v40  ;;  %v8807_v45 = vpop.f32.mrb[139].mxu0  ;;  %v7905_v40 = vld [vmem:[%s11683_s22 + $0x5] ss:$0 sm:$0xff] }
0x2ba6   : > { %v7906_v29 = vld [vmem:[%s11684_s23 + $0x5] ss:$0 sm:$0xff] }
0x2ba7   : > { %9132 = vrot.lane.b32.xlu1 %v9131_v34, %s11753_s10 }
0x2c09   : > { %v9123_v11 = vpop.permute.xlu1 %9122 }
0x2c0a   : > { %v9125_v8 = vunpack.i.h.bf16 %v9123_v11  ;;  %v9124_v59 = vunpack.i.l.bf16 %v9123_v11 }
0x2c0c   : > { %v6153_v0 = vsel %vm1024_vm2, %v5742_v16, %v9125_v8  ;;  %v6152_v14 = vsel %vm1024_vm2, %v5739_v35, %v9124_v59 }
0x2c11   : > { %v9128_v53 = vpop.permute.xlu0 %9127 }
0x2c12   : > { %v9130_v31 = vunpack.i.h.bf16 %v9128_v53  ;;  %v9129_v21 = vunpack.i.l.bf16 %v9128_v53 }
0x2c14   : > { %v6155_v38 = vsel %vm2824_vm12, %v6153_v0, %v9130_v31  ;;  %v6154_v25 = vsel %vm2824_vm12, %v6152_v14, %v9129_v21  ;;  %v9190_v31 = vld [vmem:[%s11675_s14 + $0x48] sm:$0xff]  }
0x2c19   : > { %v9133_v52 = vpop.permute.xlu1 %9132 }
0x2c1a   : > { %v9135_v50 = vunpack.i.h.bf16 %v9133_v52  ;;  %v9134_v27 = vunpack.i.l.bf16 %v9133_v52 }
0x2c1c   : > { %v6157_v39 = vsel %vm2833_vm13, %v6155_v38, %v9135_v50  ;;  %v6156_v32 = vsel %vm2833_vm13, %v6154_v25, %v9134_v27 }
0x2c1d   : > { %v6158_v41 = vpack.c.bf16 %v6157_v39, %v6156_v32 }
0x2c1f   : > { %8813 = vmatmul.mubr.msk.bf16.vlgmr.msra.gmra.mrb[132].mxu1 %vm1322_vm3, %v6158_v41 }
0x2c20   : > { %8828 = vmatprep.mubr.msk.bf16.mxu1 %vm1322_vm3, %v10784_v44  ;;  %v9187_v44 = vld [vmem:[%s11673_s12 + $0x40] sm:$0xff]  }
0x2c21   : > { %8817 = vmatpush3.bf16.msra.mxu0 %v9187_v44 }
0x2c22   : > { %8818 = vmatprep.subr.bf16.mxu0 %v11743_v55 }
0x2cf2   : > { %v6214_v37 = vpop.f32.mrb[132].mxu1 }
0x2cf3   : > { %v6215_v62 = vadd.f32 %v7901_v57, %v6214_v37  ;;  %v8814_v5 = vpop.f32.mrb[133].mxu1 }
0x2cf4   : > { %v6217_v63 = vpop.f32.mrb[134].mxu1 }
0x2cf5   : > { %v6221_v28 = vadd.f32 %v6215_v62, %v11148_v42  ;;  %v6218_v12 = vadd.f32 %v7901_v57, %v6217_v63  ;;  %v8815_v58 = vpop.f32.mrb[135].mxu1  ;;  %v9188_v42 = vld [vmem:[%s11673_s12 + $0x48] sm:$0xff]  }
0x2cf6   : > { %8819 = vmatpush3.bf16.msra.mxu0 %v9188_v42 }
0x2cf7   : > { %v6222_v33 = vadd.f32 %v6218_v12, %v11150_v3  ;;  %v6225_v6 = vsel %vm1322_vm3, %v6221_v28, 0.0  ;;  %8836 = vmatprep.subr.bf16.mxu0 %v9189_v60 }
0x2cf8   : > { %6226 = vadd.xlane.f32.xlu0 %v6225_v6 }
0x2cf9   : > { %v6228_v51 = vsel %vm4232_vm4, %v6222_v33, 0.0 }
0x2cfa   : > { %6229 = vadd.xlane.f32.xlu1 %v6228_v51 }
0x2d0e   : > { %6335 = vrot.lane.b32.xlu0 %v9187_v44, %s11754_s11 }
0x2d12   : > { %6341 = vrot.lane.b32.xlu0 %v11309_v22, %s11754_s11 }
0x2d85   : > { %v6227_v3 = vpop.xlane.xlu0 %6226 }
0x2d86   : > { %v6231_v56 = vmul.f32 0.03125, %v6227_v3 }
0x2d87   : > { %v6230_v23 = vpop.xlane.xlu1 %6229 }
0x2d88   : > { %v6233_v30 = vsub.f32 %v6221_v28, %v6231_v56  ;;  %v6232_v24 = vmul.f32 0.03125, %v6230_v23  ;;  %v7925_v56 = vld [vmem:[%s11676_s15 + $0x4] ss:$0 sm:$0xff] }
0x2d89   : > { %v6336_v9 = vpop.permute.xlu0 %6335 }
0x2d8a   : > { %v6234_v35 = vsub.f32 %v6222_v33, %v6232_v24  ;;  %v6235_v19 = vmul.f32 %v6233_v30, %v6233_v30  ;;  %8824 = vmatprep.subr.bf16.mxu1 %v6336_v9 }
0x2d8b   : > { %8825 = vmatpush3.bf16.msra.mxu1 %v6336_v9 }
0x2d8c   : > { %v6237_v16 = vsel %vm1322_vm3, %v6235_v19, 0.0  ;;  %v6236_v43 = vmul.f32 %v6234_v35, %v6234_v35 }
0x2d8d   : > { %6238 = vadd.xlane.f32.xlu1 %v6237_v16 }
0x2d8e   : > { %v6240_v18 = vsel %vm4232_vm4, %v6236_v43, 0.0 }
0x2d91   : > { %6241 = vadd.xlane.f32.xlu1 %v6240_v18 }
0x2da2   : > { %6337 = vrot.lane.b32.xlu1 %v9188_v42, %s11754_s11 }
0x2e1a   : > { %v6239_v1 = vpop.xlane.xlu1 %6238 }
0x2e1b   : > { %v6243_v20 = vmul.f32 0.03125, %v6239_v1 }
0x2e1d   : > { %v6245_v26 = vadd.f32 1e-05, %v6243_v20 }
0x2e1e   : > { %v6242_v17 = vpop.xlane.xlu1 %6241 }
0x2e1f   : > { %9467 = vrsqrt.f32 %v6245_v26  ;;  %v6244_v2 = vmul.f32 0.03125, %v6242_v17 }
0x2e21   : > { %v6246_v46 = vadd.f32 1e-05, %v6244_v2 }
0x2e22   : > { %v6338_v36 = vpop.permute.xlu1 %6337 }
0x2e23   : > { %9469 = vrsqrt.f32 %v6246_v46  ;;  %8826 = vmatprep.subr.bf16.mxu1 %v6338_v36 }
0x2e24   : > { %8827 = vmatpush3.bf16.msra.mxu1 %v6338_v36 }
0x2e25   : > { %8848 = vmatprep.subr.bf16.mxu1 %v11743_v55 }
0x2e27   : > { %8829 = vmatmul.mubr.msk.bf16.vlgmr.msra.gmra.mrb[136].mxu1 %vm1322_vm3, %v10796_v54 }
0x2e28   : > { %8832 = vmatprep.mubr.msk.bf16.mxu1 %vm1322_vm3, %v10802_v13 }
0x2e29   : > { %v9468_v61 = vpop.eup %9467 }
0x2e2a   : > { %v6249_v15 = vmul.f32 %v9468_v61, %v6233_v30 }
0x2e2c   : > { %v6255_v34 = vmul.f32 %v7905_v40, %v6249_v15 }
0x2e2d   : > { %v9470_v45 = vpop.eup %9469 }
0x2e2e   : > { %v6250_v11 = vmul.f32 %v9470_v45, %v6234_v35  ;;  %v11324_v53 = vadd.f32 %v7906_v29, %v6255_v34 }
0x2e2f   : > { %8833 = vmatmul.mubr.msk.bf16.gmra.mrb[140].mxu1 %vm1322_vm3, %v10808_v49 }
0x2e30   : > { %v6256_v54 = vmul.f32 %v7905_v40, %v6250_v11  ;;  %8856 = vmatprep.mubr.msk.bf16.mxu1 %vm9544_vm5, %v11743_v55  ;;  %v6270_v8 = vadd.f32 %v11324_v53, %v10473_v48  ;;  %v6342_v48 = vpop.permute.xlu0 %6341 }
0x2e32   : > { %v11330_v13 = vadd.f32 %v7906_v29, %v6256_v54  ;;  %v11398_v54 = vld [vmem:[%s9851_s1] ss:$0 sm:$0xff]  ;;  %s11759_s1 = sld [smem:[#allocation18_spill]] }
0x2e34   : > { %v6272_v59 = vpack.c.bf16 %v11330_v13, %v6270_v8 }
0x2e36   : > { %8821 = vmatmul.mubr.msk.bf16.vlgmr.msra.gmra.mrb[140].mxu0 %vm1322_vm3, %v6272_v59 }
0x2e37   : > { %8837 = vmatpush3.bf16.msra.mxu0 %v9189_v60  ;;  %8840 = vmatprep.mubr.msk.bf16.mxu0 %vm1322_vm3, %v10781_v47 }
0x2e38   : > { %8838 = vmatprep.subr.bf16.mxu0 %v9190_v31 }
0x2e3b   : > { %8839 = vmatpush3.bf16.msra.mxu0 %v9190_v31 }
0x2e3c   : > { %8860 = vmatprep.subr.bf16.mxu0 %v11743_v55 }
0x2e3e   : > { %8841 = vmatmul.mubr.msk.bf16.vlgmr.msra.gmra.mrb[144].mxu0 %vm1322_vm3, %v10791_v7 }
0x2e3f   : > { %8844 = vmatprep.mubr.msk.bf16.mxu0 %vm1322_vm3, %v10800_v10 }
0x2e46   : > { %8845 = vmatmul.mubr.msk.bf16.gmra.mrb[148].mxu0 %vm1322_vm3, %v10806_v4 }
0x2e47   : > { %8868 = vmatprep.mubr.msk.bf16.mxu0 %vm9544_vm5, %v11743_v55 }
0x2efa   : > { %v8830_v49 = vpop.f32.mrb[136].mxu1 }
0x2efb   : > { %v6378_v21 = vpop.f32.mrb[137].mxu1  ;;  %v6387_v52 = vadd.f32 %v8830_v49, %v6342_v48 }
0x2efc   : > { %v8831_v47 = vpop.f32.mrb[138].mxu1  ;;  %v6379_v50 = vadd.f32 %v6378_v21, %v6342_v48 }
0x2efd   : > { %v6390_v0 = vadd.f32 %v8831_v47, %v6342_v48  ;;  %v6381_v14 = vpop.f32.mrb[139].mxu1 }
0x2efe   : > { %v6382_v27 = vadd.f32 %v6381_v14, %v6342_v48 }
0x2eff   : > { %v11350_v38 = vpack.c.bf16 %v6390_v0, %v6387_v52 }
0x2f00   : > { %v11352_v7 = vpack.c.bf16 %v6382_v27, %v6379_v50 }
0x2f01   : > { %v6518_v58 = vsel %vm1024_vm2, %v11350_v38, 0 }
0x2f02   : > { %v8834_v10 = vpop.f32.mrb[140].mxu1  ;;  %v6515_v4 = vsel %vm1024_vm2, %v11352_v7, 0 }
0x2f03   : > { %v6394_v25 = vpop.f32.mrb[141].mxu1  ;;  %8849 = vmatpush3.bf16.xpose.msra.mxu1 %v6515_v4  ;;  %v6403_v32 = vadd.f32 %v8834_v10, %v6342_v48 }
0x2f04   : > { %v8835_v39 = vpop.f32.mrb[142].mxu1  ;;  %8850 = vmatprep.subr.bf16.mxu1 %v11743_v55  ;;  %v6395_v37 = vadd.f32 %v6394_v25, %v6342_v48 }
0x2f05   : > { %v6406_v41 = vadd.f32 %v8835_v39, %v6342_v48  ;;  %v6397_v57 = vpop.f32.mrb[143].mxu1 }
0x2f06   : > { %v6398_v62 = vadd.f32 %v6397_v57, %v6342_v48 }
0x2f07   : > { %v11357_v5 = vpack.c.bf16 %v6406_v41, %v6403_v32 }
0x2f08   : > { %v11359_v63 = vpack.c.bf16 %v6398_v62, %v6395_v37 }
0x2f09   : > { %v6328_v28 = vpop.f32.mrb[140].mxu0  ;;  %v6524_v20 = vsel %vm1024_vm2, %v11357_v5, 0 }
0x2f0a   : > { %v8822_v12 = vpop.f32.mrb[141].mxu0  ;;  %v6329_v6 = vadd.f32 %v11309_v22, %v6328_v28  ;;  %v6521_v30 = vsel %vm1024_vm2, %v11359_v63, 0 }
0x2f0b   : > { %v6331_v33 = vpop.f32.mrb[142].mxu0  ;;  %8851 = vmatpush3.bf16.xpose.msra.mxu1 %v6518_v58 }
0x2f0c   : > { %v6332_v51 = vadd.f32 %v11309_v22, %v6331_v33  ;;  %v8823_v44 = vpop.f32.mrb[143].mxu0  ;;  %8852 = vmatprep.subr.bf16.mxu1 %v11743_v55 }
0x2f0e   : > { %v11366_v42 = vpack.c.bf16 %v6332_v51, %v6329_v6 }
0x2f11   : > { %v8842_v3 = vpop.f32.mrb[144].mxu0 }
0x2f12   : > { %v6468_v23 = vpop.f32.mrb[145].mxu0  ;;  %v6477_v35 = vadd.f32 %v8842_v3, %v7925_v56 }
0x2f13   : > { %v8843_v24 = vpop.f32.mrb[146].mxu0  ;;  %8853 = vmatpush3.bf16.xpose.msra.mxu1 %v6521_v30  ;;  %v6469_v43 = vadd.f32 %v7925_v56, %v6468_v23 }
0x2f14   : > { %v6480_v19 = vadd.f32 %v8843_v24, %v7925_v56  ;;  %v6471_v16 = vpop.f32.mrb[147].mxu0  ;;  %8854 = vmatprep.subr.bf16.mxu1 %v11743_v55 }
0x2f15   : > { %v6472_v18 = vadd.f32 %v7925_v56, %v6471_v16 }
0x2f16   : > { %v11374_v9 = vpack.c.bf16 %v6480_v19, %v6477_v35 }
0x2f17   : > { %v11376_v60 = vpack.c.bf16 %v6472_v18, %v6469_v43 }
0x2f19   : > { %v8846_v22 = vpop.f32.mrb[148].mxu0  ;;  %8861 = vmatpush3.bf16.msra.mxu0 %v11376_v60 }
0x2f1a   : > { %v6484_v1 = vpop.f32.mrb[149].mxu0  ;;  %8862 = vmatprep.subr.bf16.mxu0 %v11743_v55  ;;  %v6493_v17 = vadd.f32 %v8846_v22, %v7925_v56 }
0x2f1b   : > { %v8847_v26 = vpop.f32.mrb[150].mxu0  ;;  %8855 = vmatpush3.bf16.xpose.msra.mxu1 %v6524_v20  ;;  %v6485_v36 = vadd.f32 %v7925_v56, %v6484_v1 }
0x2f1c   : > { %v6496_v2 = vadd.f32 %v8847_v26, %v7925_v56  ;;  %v6487_v46 = vpop.f32.mrb[151].mxu0  ;;  %8884 = vmatprep.subr.bf16.mxu1 %v11743_v55 }
0x2f1d   : > { %v6488_v61 = vadd.f32 %v7925_v56, %v6487_v46  ;;  %8863 = vmatpush3.bf16.msra.mxu0 %v11374_v9 }
0x2f1e   : > { %v11384_v40 = vpack.c.bf16 %v6496_v2, %v6493_v17  ;;  %8864 = vmatprep.subr.bf16.mxu0 %v11743_v55 }
0x2f1f   : > { %v11387_v15 = vpack.c.bf16 %v6488_v61, %v6485_v36 }
0x2f21   : > { %8865 = vmatpush3.bf16.msra.mxu0 %v11387_v15 }
0x2f22   : > { %8857 = vmatmul.mubr.msk.bf16.vlgmr.msra.gmra.mrb[144].mxu1 %vm1024_vm2, %v11366_v42  ;;  %8866 = vmatprep.subr.bf16.mxu0 %v11743_v55 }
0x2f23   : > { %8892 = vmatprep.mubr.msk.bf16.mxu1 %vm9544_vm5, %v11743_v55 }
0x2f25   : > { %8867 = vmatpush3.bf16.msra.mxu0 %v11384_v40 }
0x2f26   : > { %8872 = vmatprep.subr.bf16.mxu0 %v11743_v55 }
0x2ff5   : > { %v6560_v29 = vpop.f32.mrb[144].mxu1 }
0x2ff6   : > { %v6567_v34 = vmul.f32 0.35355338, %v6560_v29  ;;  %v8858_v45 = vpop.f32.mrb[145].mxu1 }
0x2ff7   : > { %v6563_v11 = vpop.f32.mrb[146].mxu1 }
0x2ff8   : > { %v6569_v8 = vadd.f32 %v11398_v54, %v6567_v34  ;;  %v6568_v59 = vmul.f32 0.35355338, %v6563_v11  ;;  %v8859_v31 = vpop.f32.mrb[147].mxu1 }
0x2ffa   : > { %v6570_v48 = vadd.f32 %v11398_v54, %v6568_v59  ;;  %v6571_v49 = vsel %vm1636_vm11, %v6569_v8, -inf }
0x2ffb   : > { %6572 = vmax.xlane.f32.xlu0 %v6571_v49 }
0x2ffc   : > { %v6574_v21 = vsel %vm4611_vm6, %v6570_v48, -inf }
0x2ffd   : > { %6575 = vmax.xlane.f32.xlu1 %v6574_v21 }
0x300e   : > { %6651 = vrot.lane.b32.xlu1 %v11350_v38, %s11755_s0 }
0x3012   : > { %6653 = vrot.lane.b32.xlu1 %v11359_v63, %s11755_s0 }
0x3016   : > { %6643 = vrot.lane.b32.xlu1 %v11366_v42, %s11755_s0 }
0x3088   : > { %v6573_v47 = vpop.xlane.xlu0 %6572 }
0x3089   : > { %v6577_v52 = vsub.f32 %v6569_v8, %v6573_v47 }
0x308a   : > { %v6576_v0 = vpop.xlane.xlu1 %6575 }
0x308b   : > { %v6579_v14 = vmul.f32 1.442695, %v6577_v52  ;;  %v6578_v50 = vsub.f32 %v6570_v48, %v6576_v0 }
0x308d   : > { %9471 = vpow2.f32 %v6579_v14  ;;  %v6581_v27 = vmul.f32 1.442695, %v6578_v50 }
0x308e   : > { %v6652_v6 = vpop.permute.xlu1 %6651 }
0x308f   : > { %9473 = vpow2.f32 %v6581_v27  ;;  %v6664_v51 = vsel %vm1024_vm2, %v6652_v6, 0 }
0x3092   : > { %v6654_v44 = vpop.permute.xlu1 %6653 }
0x3093   : > { %v6667_v3 = vsel %vm1024_vm2, %v6654_v44, 0 }
0x3096   : > { %v6644_v30 = vpop.permute.xlu1 %6643 }
0x3097   : > { %v9472_v10 = vpop.eup %9471 }
0x3098   : > { %v6583_v4 = vsel %vm1636_vm11, %v9472_v10, 0.0 }
0x3099   : > { %v9474_v25 = vpop.eup %9473  ;;  %6584 = vadd.xlane.f32.xlu0 %v6583_v4 }
0x309a   : > { %v6586_v39 = vsel %vm4611_vm6, %v9474_v25, 0.0 }
0x309d   : > { %6587 = vadd.xlane.f32.xlu0 %v6586_v39 }
0x30b3   : > { %6649 = vrot.lane.b32.xlu0 %v11352_v7, %s11755_s0 }
0x30b7   : > { %6655 = vrot.lane.b32.xlu0 %v11357_v5, %s11755_s0 }
0x3126   : > { %v6585_v32 = vpop.xlane.xlu0 %6584 }
0x3127   : > { %9475 = vrcp.f32 %v6585_v32 }
0x312a   : > { %v6588_v41 = vpop.xlane.xlu0 %6587 }
0x312b   : > { %9477 = vrcp.f32 %v6588_v41 }
0x312e   : > { %v6650_v12 = vpop.permute.xlu0 %6649 }
0x312f   : > { %v6661_v33 = vsel %vm1024_vm2, %v6650_v12, 0 }
0x3131   : > { %v9476_v57 = vpop.eup %9475 }
0x3132   : > { %v6591_v62 = vmul.f32 %v9476_v57, %v9472_v10  ;;  %v6656_v56 = vpop.permute.xlu0 %6655 }
0x3133   : > { %v6670_v23 = vsel %vm1024_vm2, %v6656_v56, 0 }
0x3135   : > { %v9478_v37 = vpop.eup %9477 }
0x3136   : > { %v6592_v28 = vmul.f32 %v9478_v37, %v9474_v25 }
0x3138   : > { %v6593_v58 = vpack.c.bf16 %v6592_v28, %v6591_v62 }
0x313a   : > { %8869 = vmatmul.mubr.msk.bf16.vlgmr.msra.gmra.mrb[152].mxu0 %vm1636_vm11, %v6593_v58 }
0x313b   : > { %8873 = vmatpush3.bf16.xpose.msra.mxu0 %v6661_v33  ;;  %8880 = vmatprep.mubr.msk.bf16.mxu0 %vm9544_vm5, %v11743_v55 }
0x313c   : > { %8874 = vmatprep.subr.bf16.mxu0 %v11743_v55 }
0x3143   : > { %8875 = vmatpush3.bf16.xpose.msra.mxu0 %v6664_v51 }
0x3144   : > { %8876 = vmatprep.subr.bf16.mxu0 %v11743_v55 }
0x314b   : > { %8877 = vmatpush3.bf16.xpose.msra.mxu0 %v6667_v3 }
0x314c   : > { %8878 = vmatprep.subr.bf16.mxu0 %v11743_v55 }
0x3153   : > { %8879 = vmatpush3.bf16.xpose.msra.mxu0 %v6670_v23 }
0x3154   : > { %8908 = vmatprep.subr.bf16.mxu0 %v11743_v55 }
0x315a   : > { %8881 = vmatmul.mubr.msk.bf16.vlgmr.msra.gmra.mrb[156].mxu0 %vm1024_vm2, %v6644_v30 }
0x315b   : > { %8916 = vmatprep.mubr.msk.bf16.mxu0 %vm9544_vm5, %v11743_v55 }
0x320d   : > { %v11430_v24 = vpop.f32.mrb[152].mxu0 }
0x320e   : > { %v8870_v35 = vpop.f32.mrb[153].mxu0 }
0x320f   : > { %v11432_v19 = vpop.f32.mrb[154].mxu0 }
0x3210   : > { %v8871_v16 = vpop.f32.mrb[155].mxu0 }
0x322d   : > { %v6706_v43 = vpop.f32.mrb[156].mxu0 }
0x322e   : > { %v6713_v18 = vmul.f32 0.35355338, %v6706_v43  ;;  %v8882_v22 = vpop.f32.mrb[157].mxu0 }
0x322f   : > { %v6709_v1 = vpop.f32.mrb[158].mxu0 }
0x3230   : > { %v6715_v20 = vadd.f32 %v11398_v54, %v6713_v18  ;;  %v6714_v26 = vmul.f32 0.35355338, %v6709_v1  ;;  %v8883_v17 = vpop.f32.mrb[159].mxu0 }
0x3232   : > { %v6716_v2 = vadd.f32 %v11398_v54, %v6714_v26  ;;  %v6717_v46 = vsel %vm1636_vm11, %v6715_v20, -inf }
0x3233   : > { %6718 = vmax.xlane.f32.xlu0 %v6717_v46 }
0x3234   : > { %v6720_v36 = vsel %vm4611_vm6, %v6716_v2, -inf }
0x3235   : > { %6721 = vmax.xlane.f32.xlu1 %v6720_v36 }
0x3246   : > { %6744 = vrot.lane.b32.xlu1 %v11376_v60, %s11755_s0 }
0x3249   : > { %6746 = vrot.lane.b32.xlu0 %v11374_v9, %s11755_s0 }
0x324a   : > { %6748 = vrot.lane.b32.xlu1 %v11387_v15, %s11755_s0 }
0x324e   : > { %6750 = vrot.lane.b32.xlu1 %v11384_v40, %s11755_s0 }
0x3252   : > { %6804 = vrot.lane.b32.xlu1 %v11350_v38, %s11747_s4 }
0x3256   : > { %6808 = vrot.lane.b32.xlu1 %v11357_v5, %s11747_s4 }
0x32c0   : > { %v6719_v61 = vpop.xlane.xlu0 %6718 }
0x32c1   : > { %v6723_v29 = vsub.f32 %v6715_v20, %v6719_v61 }
0x32c2   : > { %v6722_v34 = vpop.xlane.xlu1 %6721 }
0x32c3   : > { %v6725_v45 = vmul.f32 1.442695, %v6723_v29  ;;  %v6724_v11 = vsub.f32 %v6716_v2, %v6722_v34 }
0x32c4   : > { %v6747_v31 = vpop.permute.xlu0 %6746 }
0x32c5   : > { %9479 = vpow2.f32 %v6725_v45  ;;  %v6727_v8 = vmul.f32 1.442695, %v6724_v11 }
0x32c6   : > { %v6745_v59 = vpop.permute.xlu1 %6744 }
0x32c7   : > { %9481 = vpow2.f32 %v6727_v8  ;;  %8885 = vmatpush3.bf16.msra.mxu1 %v6745_v59 }
0x32c8   : > { %8886 = vmatprep.subr.bf16.mxu1 %v11743_v55 }
0x32ca   : > { %v6749_v48 = vpop.permute.xlu1 %6748 }
0x32cb   : > { %8887 = vmatpush3.bf16.msra.mxu1 %v6747_v31 }
0x32cc   : > { %8888 = vmatprep.subr.bf16.mxu1 %v11743_v55 }
0x32ce   : > { %v6751_v52 = vpop.permute.xlu1 %6750 }
0x32cf   : > { %v9480_v49 = vpop.eup %9479  ;;  %8889 = vmatpush3.bf16.msra.mxu1 %v6749_v48 }
0x32d0   : > { %v6729_v21 = vsel %vm1636_vm11, %v9480_v49, 0.0  ;;  %8890 = vmatprep.subr.bf16.mxu1 %v11743_v55 }
0x32d1   : > { %v9482_v47 = vpop.eup %9481  ;;  %6730 = vadd.xlane.f32.xlu0 %v6729_v21 }
0x32d2   : > { %v6732_v0 = vsel %vm4611_vm6, %v9482_v47, 0.0  ;;  %v6805_v57 = vpop.permute.xlu1 %6804 }
0x32d3   : > { %8891 = vmatpush3.bf16.msra.mxu1 %v6751_v52  ;;  %v6817_v37 = vsel %vm1024_vm2, %v6805_v57, 0 }
0x32d4   : > { %8896 = vmatprep.subr.bf16.mxu1 %v11743_v55 }
0x32d5   : > { %6733 = vadd.xlane.f32.xlu0 %v6732_v0 }
0x32d6   : > { %v6809_v12 = vpop.permute.xlu1 %6808 }
0x32d7   : > { %v6823_v58 = vsel %vm1024_vm2, %v6809_v12, 0 }
0x32eb   : > { %6802 = vrot.lane.b32.xlu0 %v11352_v7, %s11747_s4 }
0x32ef   : > { %6806 = vrot.lane.b32.xlu0 %v11359_v63, %s11747_s4 }
0x32f3   : > { %6800 = vrot.lane.b32.xlu0 %v11366_v42, %s11747_s4 }
0x335e   : > { %v6731_v14 = vpop.xlane.xlu0 %6730 }
0x335f   : > { %9483 = vrcp.f32 %v6731_v14 }
0x3362   : > { %v6734_v50 = vpop.xlane.xlu0 %6733 }
0x3363   : > { %9485 = vrcp.f32 %v6734_v50 }
0x3366   : > { %v6803_v39 = vpop.permute.xlu0 %6802 }
0x3367   : > { %v6814_v41 = vsel %vm1024_vm2, %v6803_v39, 0 }
0x3369   : > { %v9484_v27 = vpop.eup %9483 }
0x336a   : > { %v6737_v4 = vmul.f32 %v9484_v27, %v9480_v49  ;;  %v6807_v62 = vpop.permute.xlu0 %6806 }
0x336b   : > { %v6820_v28 = vsel %vm1024_vm2, %v6807_v62, 0 }
0x336d   : > { %v9486_v10 = vpop.eup %9485 }
0x336e   : > { %v6738_v25 = vmul.f32 %v9486_v10, %v9482_v47  ;;  %v6801_v33 = vpop.permute.xlu0 %6800 }
0x3370   : > { %v6739_v32 = vpack.c.bf16 %v6738_v25, %v6737_v4 }
0x3372   : > { %8893 = vmatmul.mubr.msk.bf16.vlgmr.msra.gmra.mrb[148].mxu1 %vm1636_vm11, %v6739_v32 }
0x3373   : > { %8897 = vmatpush3.bf16.xpose.msra.mxu1 %v6814_v41  ;;  %8904 = vmatprep.mubr.msk.bf16.mxu1 %vm9544_vm5, %v11743_v55 }
0x3374   : > { %8898 = vmatprep.subr.bf16.mxu1 %v11743_v55 }
0x337b   : > { %8899 = vmatpush3.bf16.xpose.msra.mxu1 %v6817_v37 }
0x337c   : > { %8900 = vmatprep.subr.bf16.mxu1 %v11743_v55 }
0x3383   : > { %8901 = vmatpush3.bf16.xpose.msra.mxu1 %v6820_v28 }
0x3384   : > { %8902 = vmatprep.subr.bf16.mxu1 %v11743_v55 }
0x338b   : > { %8903 = vmatpush3.bf16.xpose.msra.mxu1 %v6823_v58 }
0x338c   : > { %8932 = vmatprep.subr.bf16.mxu1 %v11743_v55 }
0x3392   : > { %8905 = vmatmul.mubr.msk.bf16.vlgmr.msra.gmra.mrb[152].mxu1 %vm1024_vm2, %v6801_v33 }
0x3393   : > { %8940 = vmatprep.mubr.msk.bf16.mxu1 %vm9544_vm5, %v11743_v55 }
0x3445   : > { %v11476_v6 = vpop.f32.mrb[148].mxu1 }
0x3446   : > { %v8894_v51 = vpop.f32.mrb[149].mxu1 }
0x3447   : > { %v11478_v44 = vpop.f32.mrb[150].mxu1 }
0x3448   : > { %v9136_v3 = vpack.i.bf16 %v11478_v44, %v11476_v6  ;;  %v8895_v56 = vpop.f32.mrb[151].mxu1  ;;  %v9191_v44 = vld [vmem:[%s11677_s16 + $0x40] sm:$0xff]  }
0x3465   : > { %v6859_v23 = vpop.f32.mrb[152].mxu1 }
0x3466   : > { %v6866_v30 = vmul.f32 0.35355338, %v6859_v23  ;;  %v8906_v35 = vpop.f32.mrb[153].mxu1 }
0x3467   : > { %v6862_v16 = vpop.f32.mrb[154].mxu1 }
0x3468   : > { %v6868_v43 = vadd.f32 %v11398_v54, %v6866_v30  ;;  %v6867_v18 = vmul.f32 0.35355338, %v6862_v16  ;;  %v8907_v22 = vpop.f32.mrb[155].mxu1 }
0x346a   : > { %v6869_v1 = vadd.f32 %v11398_v54, %v6867_v18  ;;  %v6870_v20 = vsel %vm1636_vm11, %v6868_v43, -inf }
0x346b   : > { %6871 = vmax.xlane.f32.xlu1 %v6870_v20 }
0x346c   : > { %v6873_v26 = vsel %vm4611_vm6, %v6869_v1, -inf }
0x346d   : > { %6874 = vmax.xlane.f32.xlu0 %v6873_v26 }
0x347c   : > { %6895 = vrot.lane.b32.xlu1 %v11374_v9, %s11747_s4 }
0x3480   : > { %6897 = vrot.lane.b32.xlu1 %v11387_v15, %s11747_s4 }
0x3483   : > { %6893 = vrot.lane.b32.xlu0 %v11376_v60, %s11747_s4 }
0x34f8   : > { %v6872_v17 = vpop.xlane.xlu1 %6871 }
0x34f9   : > { %v6876_v2 = vsub.f32 %v6868_v43, %v6872_v17 }
0x34fa   : > { %v6875_v46 = vpop.xlane.xlu0 %6874 }
0x34fb   : > { %v6878_v36 = vmul.f32 1.442695, %v6876_v2  ;;  %v6877_v61 = vsub.f32 %v6869_v1, %v6875_v46 }
0x34fc   : > { %v6896_v45 = vpop.permute.xlu1 %6895 }
0x34fd   : > { %9487 = vpow2.f32 %v6878_v36  ;;  %v6880_v29 = vmul.f32 1.442695, %v6877_v61 }
0x34fe   : > { %v6894_v34 = vpop.permute.xlu0 %6893 }
0x34ff   : > { %9489 = vpow2.f32 %v6880_v29  ;;  %8909 = vmatpush3.bf16.msra.mxu0 %v6894_v34 }
0x3500   : > { %8910 = vmatprep.subr.bf16.mxu0 %v11743_v55  ;;  %v6898_v11 = vpop.permute.xlu1 %6897 }
0x3503   : > { %8911 = vmatpush3.bf16.msra.mxu0 %v6896_v45 }
0x3504   : > { %8912 = vmatprep.subr.bf16.mxu0 %v11743_v55 }
0x3507   : > { %v9488_v8 = vpop.eup %9487  ;;  %8913 = vmatpush3.bf16.msra.mxu0 %v6898_v11 }
0x3508   : > { %v6882_v59 = vsel %vm1636_vm11, %v9488_v8, 0.0  ;;  %8914 = vmatprep.subr.bf16.mxu0 %v11743_v55 }
0x3509   : > { %v9490_v31 = vpop.eup %9489  ;;  %6883 = vadd.xlane.f32.xlu0 %v6882_v59 }
0x350a   : > { %v6885_v48 = vsel %vm4611_vm6, %v9490_v31, 0.0 }
0x350b   : > { %6886 = vadd.xlane.f32.xlu1 %v6885_v48 }
0x351c   : > { %6951 = vrot.lane.b32.xlu1 %v11352_v7, %s11749_s2 }
0x351f   : > { %6899 = vrot.lane.b32.xlu0 %v11384_v40, %s11747_s4  ;;  %s11635_s4 = scalar_lea.vmem %s11759_s1, %s7986_s24 }
0x3520   : > { %6955 = vrot.lane.b32.xlu1 %v11359_v63, %s11749_s2  ;;  %7549 = vst [vmem:[%s11635_s4 + $0x8] sm:$0xff] %v11743_v55  ;;  %7548 = vst [vmem:[%s11635_s4] sm:$0xff] %v11743_v55 }
0x3523   : > { %6953 = vrot.lane.b32.xlu0 %v11350_v38, %s11749_s2 }
0x3524   : > { %6949 = vrot.lane.b32.xlu1 %v11366_v42, %s11749_s2 }
0x3527   : > { %6957 = vrot.lane.b32.xlu0 %v11357_v5, %s11749_s2 }
0x3596   : > { %v6884_v49 = vpop.xlane.xlu0 %6883 }
0x3597   : > { %9491 = vrcp.f32 %v6884_v49 }
0x3598   : > { %v6887_v21 = vpop.xlane.xlu1 %6886 }
0x3599   : > { %9493 = vrcp.f32 %v6887_v21 }
0x359a   : > { %v6900_v7 = vpop.permute.xlu0 %6899 }
0x359b   : > { %8915 = vmatpush3.bf16.msra.mxu0 %v6900_v7 }
0x359c   : > { %8920 = vmatprep.subr.bf16.mxu0 %v11743_v55  ;;  %v6952_v14 = vpop.permute.xlu1 %6951 }
0x359d   : > { %v6963_v50 = vsel %vm1024_vm2, %v6952_v14, 0 }
0x359e   : > { %v6954_v5 = vpop.permute.xlu0 %6953 }
0x359f   : > { %v6966_v42 = vsel %vm1024_vm2, %v6954_v5, 0 }
0x35a0   : > { %v6956_v27 = vpop.permute.xlu1 %6955 }
0x35a1   : > { %v9492_v47 = vpop.eup %9491  ;;  %v6969_v10 = vsel %vm1024_vm2, %v6956_v27, 0 }
0x35a2   : > { %v6890_v63 = vmul.f32 %v9492_v47, %v9488_v8  ;;  %v6958_v4 = vpop.permute.xlu0 %6957 }
0x35a3   : > { %v9494_v52 = vpop.eup %9493  ;;  %v6972_v25 = vsel %vm1024_vm2, %v6958_v4, 0 }
0x35a4   : > { %v6891_v0 = vmul.f32 %v9494_v52, %v9490_v31  ;;  %v6950_v39 = vpop.permute.xlu1 %6949 }
0x35a6   : > { %v6892_v38 = vpack.c.bf16 %v6891_v0, %v6890_v63 }
0x35a8   : > { %8917 = vmatmul.mubr.msk.bf16.vlgmr.msra.gmra.mrb[160].mxu0 %vm1636_vm11, %v6892_v38 }
0x35a9   : > { %8921 = vmatpush3.bf16.xpose.msra.mxu0 %v6963_v50  ;;  %8928 = vmatprep.mubr.msk.bf16.mxu0 %vm9544_vm5, %v11743_v55 }
0x35aa   : > { %8922 = vmatprep.subr.bf16.mxu0 %v11743_v55 }
0x35b1   : > { %8923 = vmatpush3.bf16.xpose.msra.mxu0 %v6966_v42 }
0x35b2   : > { %8924 = vmatprep.subr.bf16.mxu0 %v11743_v55 }
0x35b9   : > { %8925 = vmatpush3.bf16.xpose.msra.mxu0 %v6969_v10 }
0x35ba   : > { %8926 = vmatprep.subr.bf16.mxu0 %v11743_v55 }
0x35c1   : > { %8927 = vmatpush3.bf16.xpose.msra.mxu0 %v6972_v25 }
0x35c2   : > { %8952 = vmatprep.subr.bf16.mxu0 %v11743_v55 }
0x35c8   : > { %8929 = vmatmul.mubr.msk.bf16.vlgmr.msra.gmra.mrb[164].mxu0 %vm1024_vm2, %v6950_v39 }
0x35c9   : > { %8956 = vmatprep.mubr.msk.bf16.mxu0 %vm9544_vm5, %v11743_v55 }
0x367b   : > { %v6942_v32 = vpop.f32.mrb[160].mxu0 }
0x367c   : > { %v8918_v41 = vpop.f32.mrb[161].mxu0 }
0x367d   : > { %v6945_v57 = vpop.f32.mrb[162].mxu0 }
0x367e   : > { %v9141_v37 = vpack.i.bf16 %v6945_v57, %v6942_v32  ;;  %v8919_v62 = vpop.f32.mrb[163].mxu0 }
0x369b   : > { %v7008_v28 = vpop.f32.mrb[164].mxu0 }
0x369c   : > { %v7015_v12 = vmul.f32 0.35355338, %v7008_v28  ;;  %v8930_v58 = vpop.f32.mrb[165].mxu0 }
0x369d   : > { %v7011_v33 = vpop.f32.mrb[166].mxu0 }
0x369e   : > { %v7017_v51 = vadd.f32 %v11398_v54, %v7015_v12  ;;  %v7016_v56 = vmul.f32 0.35355338, %v7011_v33  ;;  %v8931_v23 = vpop.f32.mrb[167].mxu0 }
0x36a0   : > { %v7018_v30 = vadd.f32 %v11398_v54, %v7016_v56  ;;  %v7019_v35 = vsel %vm1636_vm11, %v7017_v51, -inf }
0x36a1   : > { %7020 = vmax.xlane.f32.xlu0 %v7019_v35 }
0x36a2   : > { %v7022_v16 = vsel %vm4611_vm6, %v7018_v30, -inf }
0x36a3   : > { %7023 = vmax.xlane.f32.xlu1 %v7022_v16 }
0x36b4   : > { %7042 = vrot.lane.b32.xlu1 %v11376_v60, %s11749_s2 }
0x36b8   : > { %7046 = vrot.lane.b32.xlu1 %v11387_v15, %s11749_s2 }
0x36bc   : > { %7048 = vrot.lane.b32.xlu1 %v11384_v40, %s11749_s2 }
0x36c0   : > { %9142 = vrot.lane.b32.xlu1 %v9141_v37, %s11752_s8 }
0x372e   : > { %v7021_v43 = vpop.xlane.xlu0 %7020 }
0x372f   : > { %v7025_v18 = vsub.f32 %v7017_v51, %v7021_v43 }
0x3730   : > { %v7024_v54 = vpop.xlane.xlu1 %7023 }
0x3731   : > { %v7027_v22 = vmul.f32 1.442695, %v7025_v18  ;;  %v7026_v1 = vsub.f32 %v7018_v30, %v7024_v54 }
0x3733   : > { %9495 = vpow2.f32 %v7027_v22  ;;  %v7029_v20 = vmul.f32 1.442695, %v7026_v1  ;;  %v9194_v22 = vld [vmem:[%s11679_s18 + $0x28] sm:$0xff]   ;;  %v9195_v1 = vld [vmem:[%s11681_s20 + $0x40] sm:$0xff]  }
0x3734   : > { %v7043_v26 = vpop.permute.xlu1 %7042 }
0x3735   : > { %9497 = vpow2.f32 %v7029_v20  ;;  %8933 = vmatpush3.bf16.msra.mxu1 %v7043_v26  ;;  %v9196_v20 = vld [vmem:[%s11681_s20 + $0x48] sm:$0xff]  }
0x3736   : > { %8934 = vmatprep.subr.bf16.mxu1 %v11743_v55 }
0x3738   : > { %v7047_v61 = vpop.permute.xlu1 %7046 }
0x373d   : > { %v9496_v60 = vpop.eup %9495 }
0x373e   : > { %v7031_v15 = vsel %vm1636_vm11, %v9496_v60, 0.0 }
0x373f   : > { %v9498_v17 = vpop.eup %9497  ;;  %7032 = vadd.xlane.f32.xlu0 %v7031_v15 }
0x3740   : > { %v7034_v40 = vsel %vm4611_vm6, %v9498_v17, 0.0 }
0x3743   : > { %7035 = vadd.xlane.f32.xlu0 %v7034_v40 }
0x3759   : > { %7044 = vrot.lane.b32.xlu0 %v11374_v9, %s11749_s2  ;;  %v7049_v9 = vpop.permute.xlu1 %7048 }
0x375d   : > { %9137 = vrot.lane.b32.xlu0 %v9136_v3, %s11751_s9  ;;  %v9192_v3 = vld [vmem:[%s11677_s16 + $0x48] sm:$0xff]   ;;  %v9143_v52 = vpop.permute.xlu1 %9142 }
0x375e   : > { %v9145_v14 = vunpack.i.h.bf16 %v9143_v52  ;;  %v9144_v38 = vunpack.i.l.bf16 %v9143_v52 }
0x37cc   : > { %v7033_v2 = vpop.xlane.xlu0 %7032 }
0x37cd   : > { %9499 = vrcp.f32 %v7033_v2 }
0x37d0   : > { %v7036_v46 = vpop.xlane.xlu0 %7035 }
0x37d1   : > { %9501 = vrcp.f32 %v7036_v46 }
0x37d4   : > { %v7045_v36 = vpop.permute.xlu0 %7044 }
0x37d5   : > { %8935 = vmatpush3.bf16.msra.mxu1 %v7045_v36  ;;  %v7949_v36 = vld [vmem:[%s11683_s22 + $0x6] ss:$0 sm:$0xff] }
0x37d6   : > { %8936 = vmatprep.subr.bf16.mxu1 %v11743_v55 }
0x37d7   : > { %v9500_v29 = vpop.eup %9499 }
0x37d8   : > { %v7039_v45 = vmul.f32 %v9500_v29, %v9496_v60  ;;  %v9138_v21 = vpop.permute.xlu0 %9137 }
0x37d9   : > { %8937 = vmatpush3.bf16.msra.mxu1 %v7047_v61  ;;  %v9140_v7 = vunpack.i.h.bf16 %v9138_v21  ;;  %v9139_v47 = vunpack.i.l.bf16 %v9138_v21 }
0x37da   : > { %8938 = vmatprep.subr.bf16.mxu1 %v11743_v55 }
0x37db   : > { %v9502_v34 = vpop.eup %9501  ;;  %v7123_v63 = vsel %vm1024_vm2, %v11432_v19, %v9140_v7  ;;  %v7122_v0 = vsel %vm1024_vm2, %v11430_v24, %v9139_v47  ;;  %v7945_v24 = vld [vmem:[%s11678_s17 + $0x4] ss:$0 sm:$0xff]  ;;  %vm7555_vm2 = vcmask 33824  }
0x37dc   : > { %v7040_v11 = vmul.f32 %v9502_v34, %v9498_v17  ;;  %v7124_v27 = vsel %vm2824_vm12, %v7122_v0, %v9144_v38  ;;  %v7125_v10 = vsel %vm2824_vm12, %v7123_v63, %v9145_v14  ;;  %v7969_v38 = vld [vmem:[%s11682_s21 + $0x2] ss:$0 sm:$0xff] }
0x37dd   : > { %8939 = vmatpush3.bf16.msra.mxu1 %v7049_v9 }
0x37de   : > { %v7041_v6 = vpack.c.bf16 %v7040_v11, %v7039_v45  ;;  %8944 = vmatprep.subr.bf16.mxu1 %v11743_v55  ;;  %v7950_v45 = vld [vmem:[%s11684_s23 + $0x6] ss:$0 sm:$0xff] }
0x37e0   : > { %8941 = vmatmul.mubr.msk.bf16.vlgmr.msra.gmra.mrb[156].mxu1 %vm1636_vm11, %v7041_v6 }
0x37e1   : > { %8948 = vmatprep.mubr.msk.bf16.mxu1 %vm9544_vm5, %v11743_v55  ;;  %8945 = vmatpush3.bf16.msra.mxu1 %v9191_v44 }
0x37e2   : > { %8946 = vmatprep.subr.bf16.mxu1 %v11743_v55 }
0x37e5   : > { %8947 = vmatpush3.bf16.msra.mxu1 %v9192_v3 }
0x37e6   : > { %8960 = vmatprep.subr.bf16.mxu1 %v11743_v55 }
0x38b3   : > { %v7091_v8 = vpop.f32.mrb[156].mxu1 }
0x38b4   : > { %v8942_v59 = vpop.f32.mrb[157].mxu1 }
0x38b5   : > { %v7094_v31 = vpop.f32.mrb[158].mxu1  ;;  %v9198_v59 = vld [vmem:[%s11681_s20 + $0x58] sm:$0xff]  }
0x38b6   : > { %v9146_v48 = vpack.i.bf16 %v7094_v31, %v7091_v8  ;;  %v8943_v49 = vpop.f32.mrb[159].mxu1  ;;  %v9197_v8 = vld [vmem:[%s11681_s20 + $0x50] sm:$0xff]   ;;  %v7956_v31 = vld [vmem:[%s11680_s19 + $0x2] ss:$0 sm:$0xff] }
0x38b8   : > { %9147 = vrot.lane.b32.xlu0 %v9146_v48, %s11753_s10 }
0x392a   : > { %v9148_v50 = vpop.permute.xlu0 %9147 }
0x392b   : > { %v9150_v5 = vunpack.i.h.bf16 %v9148_v50  ;;  %v9149_v42 = vunpack.i.l.bf16 %v9148_v50 }
0x392d   : > { %v7127_v4 = vsel %vm2833_vm13, %v7125_v10, %v9150_v5  ;;  %v7126_v25 = vsel %vm2833_vm13, %v7124_v27, %v9149_v42 }
0x392e   : > { %v7128_v39 = vpack.c.bf16 %v7127_v4, %v7126_v25 }
0x3930   : > { %8949 = vmatmul.mubr.msk.bf16.vlgmr.msra.gmra.mrb[160].mxu1 %vm1322_vm3, %v7128_v39 }
0x3931   : > { %8968 = vmatprep.mubr.msk.bf16.mxu1 %vm9544_vm5, %v11743_v55  ;;  %8961 = vmatpush3.bf16.msra.mxu1 %v9195_v1  ;;  %vm7553_vm5 = vcmask 39970  }
0x3932   : > { %8962 = vmatprep.subr.bf16.mxu1 %v11743_v55 }
0x3935   : > { %8963 = vmatpush3.bf16.msra.mxu1 %v9196_v20 }
0x3936   : > { %8964 = vmatprep.subr.bf16.mxu1 %v11743_v55 }
0x3939   : > { %8965 = vmatpush3.bf16.msra.mxu1 %v9197_v8 }
0x393a   : > { %8966 = vmatprep.subr.bf16.mxu1 %v11743_v55 }
0x393d   : > { %8967 = vmatpush3.bf16.msra.mxu1 %v9198_v59 }
0x3a03   : > { %v7184_v19 = vpop.f32.mrb[160].mxu1 }
0x3a04   : > { %v7185_v32 = vadd.f32 %v7945_v24, %v7184_v19  ;;  %v8950_v41 = vpop.f32.mrb[161].mxu1 }
0x3a05   : > { %v7187_v57 = vpop.f32.mrb[162].mxu1 }
0x3a06   : > { %v7191_v37 = vadd.f32 %v7185_v32, %v11324_v53  ;;  %v7188_v62 = vadd.f32 %v7945_v24, %v7187_v57  ;;  %v8951_v28 = vpop.f32.mrb[163].mxu1 }
0x3a08   : > { %v7192_v12 = vadd.f32 %v7188_v62, %v11330_v13  ;;  %v7195_v58 = vsel %vm1322_vm3, %v7191_v37, 0.0  ;;  %v9193_v13 = vld [vmem:[%s11679_s18 + $0x20] sm:$0xff]  }
0x3a09   : > { %7196 = vadd.xlane.f32.xlu1 %v7195_v58  ;;  %8953 = vmatpush3.bf16.msra.mxu0 %v9193_v13 }
0x3a0a   : > { %v7198_v33 = vsel %vm4232_vm4, %v7192_v12, 0.0  ;;  %8954 = vmatprep.subr.bf16.mxu0 %v11743_v55  ;;  %v7976_v55 = vld [vmem:[%s11684_s23 + $0x7] ss:$0 sm:$0xff] }
0x3a0b   : > { %7199 = vadd.xlane.f32.xlu0 %v7198_v33 }
0x3a0d   : > { %8955 = vmatpush3.bf16.msra.mxu0 %v9194_v22 }
0x3a96   : > { %v7197_v51 = vpop.xlane.xlu1 %7196 }
0x3a97   : > { %v7201_v56 = vmul.f32 0.03125, %v7197_v51 }
0x3a98   : > { %v7200_v23 = vpop.xlane.xlu0 %7199 }
0x3a99   : > { %v7203_v30 = vsub.f32 %v7191_v37, %v7201_v56  ;;  %v7202_v35 = vmul.f32 0.03125, %v7200_v23  ;;  %v7433_v56 = vld [vmem:[%s11758_s30] sm:$0xff]  ;;  %v7434_v23 = vld [vmem:[%s11758_s30 + $0x8] sm:$0xff] }
0x3a9b   : > { %v7204_v16 = vsub.f32 %v7192_v12, %v7202_v35  ;;  %v7205_v43 = vmul.f32 %v7203_v30, %v7203_v30  ;;  %v7435_v35 = vld [vmem:[%s11758_s30 + $0x10] sm:$0xff] }
0x3a9d   : > { %v7207_v18 = vsel %vm1322_vm3, %v7205_v43, 0.0  ;;  %v7206_v53 = vmul.f32 %v7204_v16, %v7204_v16 }
0x3a9e   : > { %7208 = vadd.xlane.f32.xlu0 %v7207_v18 }
0x3a9f   : > { %v7210_v54 = vsel %vm4232_vm4, %v7206_v53, 0.0 }
0x3aa0   : > { %7211 = vadd.xlane.f32.xlu1 %v7210_v54 }
0x3b2b   : > { %v7209_v26 = vpop.xlane.xlu0 %7208 }
0x3b2c   : > { %v7213_v60 = vmul.f32 0.03125, %v7209_v26  ;;  %v7975_v26 = vld [vmem:[%s11683_s22 + $0x7] ss:$0 sm:$0xff] }
0x3b2d   : > { %v7212_v15 = vpop.xlane.xlu1 %7211 }
0x3b2e   : > { %v7215_v17 = vadd.f32 1e-05, %v7213_v60  ;;  %v7214_v40 = vmul.f32 0.03125, %v7212_v15 }
0x3b30   : > { %9503 = vrsqrt.f32 %v7215_v17  ;;  %v7216_v2 = vadd.f32 1e-05, %v7214_v40 }
0x3b32   : > { %9505 = vrsqrt.f32 %v7216_v2 }
0x3b3a   : > { %v9504_v46 = vpop.eup %9503 }
0x3b3b   : > { %v7219_v61 = vmul.f32 %v9504_v46, %v7203_v30  ;;  %v8983_v30 = vpack.c.bf16 %v7434_v23, %v7433_v56 }
0x3b3c   : > { %v9506_v29 = vpop.eup %9505 }
0x3b3d   : > { %v7225_v34 = vmul.f32 %v7949_v36, %v7219_v61  ;;  %v7220_v9 = vmul.f32 %v9506_v29, %v7204_v16  ;;  %8984 = vmatprep.subr.bf16.mxu0 %v8983_v30  ;;  %v7436_v16 = vld [vmem:[%s11758_s30 + $0x18] sm:$0xff]  ;;  %v7977_v61 = vld [vmem:[%s11760_s7] ss:$0 sm:$0xff] }
0x3b3e   : > { %v8987_v43 = vpack.c.bf16 %v7436_v16, %v7435_v35 }
0x3b3f   : > { %v7226_v11 = vmul.f32 %v7949_v36, %v7220_v9  ;;  %v7231_v6 = vadd.f32 %v7950_v45, %v7225_v34 }
0x3b41   : > { %v7232_v44 = vadd.f32 %v7950_v45, %v7226_v11 }
0x3b43   : > { %v7238_v3 = vpack.c.bf16 %v7232_v44, %v7231_v6 }
0x3b45   : > { %8957 = vmatmul.mubr.msk.bf16.vlgmr.msra.gmra.mrb[168].mxu0 %vm1322_vm3, %v7238_v3 }
0x3b46   : > { %8986 = vmatpush3.bf16.msra.mxu0 %v8983_v30 }
0x3b47   : > { %8988 = vmatprep.subr.bf16.mxu0 %v8987_v43 }
0x3b4a   : > { %8990 = vmatpush3.bf16.msra.mxu0 %v8987_v43 }
0x3c18   : > { %v7296_v48 = vpop.f32.mrb[168].mxu0 }
0x3c19   : > { %v7297_v49 = vadd.f32 %v7956_v31, %v7296_v48  ;;  %v8958_v21 = vpop.f32.mrb[169].mxu0 }
0x3c1a   : > { %v7299_v7 = vpop.f32.mrb[170].mxu0 }
0x3c1b   : > { %v7300_v47 = vadd.f32 %v7956_v31, %v7299_v7  ;;  %v8959_v52 = vpop.f32.mrb[171].mxu0  ;;  %v7303_v63 = vmax.f32 %v7297_v49, 0.0 }
0x3c1d   : > { %v7304_v0 = vmax.f32 %v7300_v47, 0.0 }
0x3c1f   : > { %v7314_v14 = vpack.c.bf16 %v7304_v0, %v7303_v63 }
0x3c21   : > { %8969 = vmatmul.mubr.msk.bf16.vlgmr.msra.gmra.mrb[164].mxu1 %vm1636_vm11, %v7314_v14 }
0x3cf4   : > { %v7384_v50 = vpop.f32.mrb[164].mxu1 }
0x3cf5   : > { %v7385_v5 = vadd.f32 %v7969_v38, %v7384_v50  ;;  %v8970_v42 = vpop.f32.mrb[165].mxu1 }
0x3cf6   : > { %v7387_v27 = vpop.f32.mrb[166].mxu1 }
0x3cf7   : > { %v7391_v10 = vadd.f32 %v7385_v5, %v7231_v6  ;;  %v7388_v4 = vadd.f32 %v7969_v38, %v7387_v27  ;;  %v8971_v25 = vpop.f32.mrb[167].mxu1 }
0x3cf9   : > { %v7392_v39 = vadd.f32 %v7388_v4, %v7232_v44  ;;  %v7395_v24 = vsel %vm1322_vm3, %v7391_v10, 0.0 }
0x3cfa   : > { %7396 = vadd.xlane.f32.xlu0 %v7395_v24 }
0x3cfb   : > { %v7398_v19 = vsel %vm4232_vm4, %v7392_v39, 0.0 }
0x3cfc   : > { %7399 = vadd.xlane.f32.xlu1 %v7398_v19 }
0x3d87   : > { %v7397_v32 = vpop.xlane.xlu0 %7396 }
0x3d88   : > { %v7401_v41 = vmul.f32 0.03125, %v7397_v32 }
0x3d89   : > { %v7400_v57 = vpop.xlane.xlu1 %7399 }
0x3d8a   : > { %v7403_v37 = vsub.f32 %v7391_v10, %v7401_v41  ;;  %v7402_v62 = vmul.f32 0.03125, %v7400_v57 }
0x3d8c   : > { %v7404_v28 = vsub.f32 %v7392_v39, %v7402_v62  ;;  %v7405_v12 = vmul.f32 %v7403_v37, %v7403_v37 }
0x3d8e   : > { %v7407_v58 = vsel %vm1322_vm3, %v7405_v12, 0.0  ;;  %v7406_v33 = vmul.f32 %v7404_v28, %v7404_v28 }
0x3d8f   : > { %7408 = vadd.xlane.f32.xlu0 %v7407_v58 }
0x3d90   : > { %v7410_v51 = vsel %vm4232_vm4, %v7406_v33, 0.0 }
0x3d91   : > { %7411 = vadd.xlane.f32.xlu1 %v7410_v51 }
0x3e1c   : > { %v7409_v18 = vpop.xlane.xlu0 %7408 }
0x3e1d   : > { %v7413_v53 = vmul.f32 0.03125, %v7409_v18 }
0x3e1e   : > { %v7412_v54 = vpop.xlane.xlu1 %7411 }
0x3e1f   : > { %v7415_v13 = vadd.f32 1e-05, %v7413_v53  ;;  %v7414_v22 = vmul.f32 0.03125, %v7412_v54 }
0x3e21   : > { %9507 = vrsqrt.f32 %v7415_v13  ;;  %v7416_v1 = vadd.f32 1e-05, %v7414_v22 }
0x3e23   : > { %9509 = vrsqrt.f32 %v7416_v1 }
0x3e2b   : > { %v9508_v20 = vpop.eup %9507 }
0x3e2c   : > { %v7419_v60 = vmul.f32 %v9508_v20, %v7403_v37 }
0x3e2d   : > { %v9510_v15 = vpop.eup %9509 }
0x3e2e   : > { %v7420_v17 = vmul.f32 %v9510_v15, %v7404_v28  ;;  %v7425_v40 = vmul.f32 %v7975_v26, %v7419_v60 }
0x3e30   : > { %v7426_v2 = vmul.f32 %v7975_v26, %v7420_v17  ;;  %v7431_v46 = vadd.f32 %v7976_v55, %v7425_v40 }
0x3e32   : > { %v7432_v36 = vadd.f32 %v7976_v55, %v7426_v2  ;;  %8980 = vmatprep.mubr.msk.f32.mxu0 %vm1322_vm3, %v7431_v46 }
0x3e34   : > { %8981 = vmatmul.mubr.msk.f32.vlgmr.msra.gmra.mrb[10].mxu0 %vm1322_vm3, %v7432_v36 }
0x3f07   : > { %v8982_v29 = vpop.f32.mrb[10].mxu0 }
0x3f08   : > { %v7522_v34 = vadd.f32 %v8982_v29, %v7977_v61  ;;  %v7516_v9 = vpop.f32.mrb[11].mxu0 }
0x3f09   : > { %v7517_v45 = vadd.f32 %v7977_v61, %v7516_v9 }
0x3f0a   : > { %7556 = vst.msk [vmem:[%s11635_s4 + $0x8] sm:$0x3] %vm7555_vm2, %v7522_v34 }
0x3f0b   : > { %7554 = vst.msk [vmem:[%s11635_s4] sm:$0xfc] %vm7553_vm5, %v7517_v45  ;;  %v7525_v11 = vmul.f32 %v7517_v45, %v7517_v45  ;;  %v7980_v44 = vmul.f32 -1.442695, %v7517_v45 }
0x3f0d   : > { %v7527_v6 = vsel %vm7526_vm7, %v7525_v11, 0.0  ;;  %9511 = vpow2.f32 %v7980_v44 }
0x3f0e   : > { %7528 = vadd.xlane.f32.xlu0 %v7527_v6 }
0x3f17   : > { %v9512_v8 = vpop.eup %9511 }
0x3f18   : > { %v7543_v59 = vadd.f32 1.0, %v9512_v8 }
0x3f9b   : > { %v7529_v3 = vpop.xlane.xlu0 %7528 }
0x3f9c   : > { %9513 = vrsqrt.f32 %v7529_v3  ;;  %vm7532_vm3 = vcmp.eq.f32.partialorder %v7529_v3, inf  ;;  %v7535_v49 = vand.u32 2147483648, %v7529_v3  ;;  %vm7534_vm8 = vcmp.eq.f32.partialorder %v7529_v3, 0.0 }
0x3f9d   : > { %9515 = vrcp.f32 %v7543_v59 }
0x3fa6   : > { %v9514_v31 = vpop.eup %9513 }
0x3fa7   : > { %v7531_v48 = vmul.f32 %v9514_v31, %v7529_v3  ;;  %v9516_v52 = vpop.eup %9515 }
0x3fa8   : > { %v7981_v63 = vadd.f32 -0.5, %v9516_v52 }
0x3fa9   : > { %v7533_v21 = vsel %vm7532_vm3, %v7529_v3, %v7531_v48 }
0x3faa   : > { %v7536_v7 = vsel %vm7534_vm8, %v7535_v49, %v7533_v21  ;;  %v7547_v38 = vmul.f32 3.1415927, %v7981_v63 }
0x3fab   : > { %v7537_v47 = vmax.f32 %v7536_v7, 1e-12 }
0x3fad   : > { %9517 = vrcp.f32 %v7537_v47 }
0x3fb7   : > { %v9518_v0 = vpop.eup %9517 }
0x3fb8   : > { %v7539_v14 = vmul.f32 %v9518_v0, %v7517_v45 }
0x3fba   : > { %7550 = vst.msk [vmem:[%s11635_s4] sm:$0x1] %vm7526_vm7, %v7539_v14 }
0x3fbb   : > { %7552 = vst.msk [vmem:[%s11635_s4] sm:$0x1] %vm7551_vm9, %v7547_v38 }
0x3fbc PF: > { %s11761_s11 = sld [smem:[#allocation2_spill]] }
0x3fc2   : > { %s36_s27 = sadd.s32 1, %s11761_s11  }
0x3fc3   : > { %p33_p4 = scmp.ge.s32.totalorder %s36_s27, 4  }
0x3fc5   :  { %35 = sbr.rel (!%p33_p4) target bundleno = 16 (0x10), region = 198 }

</bundles_post_ra>
